<compile_context>
chip_gen: v6e
topology: v6e:2x2x1
jax: 0.10.0
libtpu: 0.0.40
codegen_flags: <defaults>
</compile_context>

<pallas_src>
import jax
import jax.numpy as jnp
from jax.experimental import pallas as pl
from jax.experimental.pallas import tpu as pltpu

# Module hyperparameters (PyTorch defaults).
D = 8
W = 256
INPUT_CH = 3
INPUT_CH_VIEWS = 3
OUTPUT_CH = 4
SKIPS = (4,)
OUT_PAD = 128        # lane-dense output width; wrapper slices back to OUTPUT_CH


def _round_up(a, b):
    return ((a + b - 1) // b) * b


def nerf_kernel(pts_ref,
                w0, b0,
                w1, b1, w2, b2, w3, b3, w4, b4,
                w5p, w5h, b5,
                w6, b6, w7, b7,
                wo, bo,
                out_ref):
    # pts in bf16 for the MXU; kept live (tiny) for the layer-5 skip dot.
    pts = pts_ref[...].astype(jnp.bfloat16)        # (TN, 3)

    def dense(h_bf16, w_ref, b_ref, extra=None):
        # MXU in bf16, f32 accumulation; bias+ReLU epilogue in f32 (safe on
        # v5e's f32-only VPU); single cast to bf16 for the next layer.
        acc = jnp.dot(h_bf16, w_ref[...], preferred_element_type=jnp.float32)
        if extra is not None:
            acc = acc + extra
        return jnp.maximum(acc + b_ref[...], 0.0).astype(jnp.bfloat16)

    # Layer 0: K=3 matmul on the MXU (low-K pass ~ one result-pop pass).
    h = dense(pts, w0, b0)

    # Layers 1..4 (256 -> 256).
    h = dense(h, w1, b1)
    h = dense(h, w2, b2)
    h = dense(h, w3, b3)
    h = dense(h, w4, b4)

    # Layer 5 (input is the skip concat [pts, h] in PyTorch):
    #   relu([pts, h] @ W5 + b5) == relu(pts @ W5[:3] + h @ W5[3:] + b5)
    # Both dots accumulate into one f32 accumulator (fuses in-place on v7x).
    skip = jnp.dot(pts, w5p[...], preferred_element_type=jnp.float32)
    h = dense(h, w5h, b5, extra=skip)

    # Layers 6, 7.
    h = dense(h, w6, b6)
    h = dense(h, w7, b7)

    # output_linear, padded to OUT_PAD lanes for unmasked stores; emit bf16.
    out = jnp.dot(h, wo[...], preferred_element_type=jnp.float32) + bo[...]
    out_ref[...] = out.astype(out_ref.dtype)


def prepare_params(params):
    """One-time weight preprocessing (hoisted out of the forward path).

    params: D+1 pairs (W, b) with W stored as (in_features, out_features).
    Returns the flat tuple of kernel operands: bf16 weights, f32 biases, the
    skip layer split into (3, W) / (W, W), and the output layer zero-padded to
    OUT_PAD lanes.
    """
    f32, bf16 = jnp.float32, jnp.bfloat16
    flat = []

    w0, b0 = params[0]
    flat += [w0.astype(bf16), b0.astype(f32)]

    for i in range(1, D):
        wi, bi = params[i]
        if i == SKIPS[0] + 1:
            flat += [wi[:INPUT_CH].astype(bf16),      # (3, 256)  skip part
                     wi[INPUT_CH:].astype(bf16),      # (256, 256) main part
                     bi.astype(f32)]
        else:
            flat += [wi.astype(bf16), bi.astype(f32)]

    wo, bo = params[D]
    wo_p = jnp.zeros((W, OUT_PAD), bf16).at[:, :OUTPUT_CH].set(wo.astype(bf16))
    bo_p = jnp.zeros((1, OUT_PAD), f32).at[:, :OUTPUT_CH].set(bo.astype(f32))
    flat += [wo_p, bo_p]
    return tuple(flat)


def nerf_forward(x, flat_params, *, tile_n=None):
    """x: (N, input_ch + input_ch_views). flat_params: output of
    prepare_params(). Returns (N, OUTPUT_CH) in x.dtype."""
    N = x.shape[0]
    if tile_n is None:
        # Big tiles to amortize per-step overhead, but keep >= 2 tiles when N
        # allows so v7x's two TensorCores both get work.
        tile_n = min(2048, max(256, _round_up(pl.cdiv(N, 2), 256)))
    n_tiles = pl.cdiv(N, tile_n)
    n_pad = n_tiles * tile_n

    pts = x[:, :INPUT_CH]                       # views unused (use_viewdirs=False)
    if n_pad != N:
        pts = jnp.pad(pts, ((0, n_pad - N), (0, 0)))

    in_specs = [pl.BlockSpec((tile_n, INPUT_CH), lambda i: (i, 0))]
    # Weights/biases: full-array blocks, constant index map -> resident in VMEM.
    in_specs += [pl.BlockSpec(a.shape, lambda i: (0, 0)) for a in flat_params]
    out_spec = pl.BlockSpec((tile_n, OUT_PAD), lambda i: (i, 0))

    macs = (INPUT_CH * W                     # layer 0
            + 6 * W * W                      # layers 1-4, 6, 7
            + (W * W + INPUT_CH * W)         # layer 5 (split skip)
            + W * OUT_PAD)                   # padded output layer
    weight_bytes = sum(int(a.size) * a.dtype.itemsize for a in flat_params)
    cost = pl.CostEstimate(
        flops=2 * macs * n_pad,
        transcendentals=0,
        bytes_accessed=n_pad * (INPUT_CH * 4 + OUT_PAD * 2) + weight_bytes,
    )

    out = pl.pallas_call(
        nerf_kernel,
        out_shape=jax.ShapeDtypeStruct((n_pad, OUT_PAD), jnp.bfloat16),
        grid_spec=pltpu.PrefetchScalarGridSpec(
            num_scalar_prefetch=0,
            grid=(n_tiles,),
            in_specs=in_specs,
            out_specs=out_spec,
        ),
        compiler_params=pltpu.CompilerParams(
            dimension_semantics=("parallel",),
            vmem_limit_bytes=32 * 1024 * 1024,   # raise v5e's 16 MiB default
        ),
        cost_estimate=cost,
    )(pts, *flat_params)

    return out[:N, :OUTPUT_CH].astype(x.dtype)


def init_params(key):
    """Deterministic synthetic weights, shapes match the PyTorch module.

    pts_linears: Linear(3, 256), then 7 x Linear(256, 256) except layer
    skips[0]+1 which is Linear(259, 256). output_linear: Linear(256, 4).
    Weights stored as (in_features, out_features), biases as (1, out_features).
    """
    in_dims = [INPUT_CH]
    for i in range(D - 1):
        in_dims.append(W + INPUT_CH if i in SKIPS else W)
    out_dims = [W] * D
    in_dims.append(W)            # output_linear
    out_dims.append(OUTPUT_CH)

    params = []
    for li, (din, dout) in enumerate(zip(in_dims, out_dims)):
        kw, kb = jax.random.split(jax.random.fold_in(key, li))
        scale = 1.0 / jnp.sqrt(jnp.float32(din))
        w = jax.random.uniform(kw, (din, dout), jnp.float32, -scale, scale)
        b = jax.random.uniform(kb, (1, dout), jnp.float32, -scale, scale)
        params.append((w, b))
    return params


def nerf_reference(x, params):
    """Pure-JAX reference mirroring the PyTorch forward (use_viewdirs=False).

    Matmuls use bf16 operands with f32 accumulation (including layer 0) to
    mirror the kernel's numerics; the skip is done with the original
    concatenation so it also validates the kernel's weight split.  The kernel
    additionally emits its output through a bf16 store; the test tolerance
    absorbs that last-step rounding.
    """
    pts = x[:, :INPUT_CH]

    def bf16_dot(a, w):
        return jnp.dot(a.astype(jnp.bfloat16), w.astype(jnp.bfloat16),
                       preferred_element_type=jnp.float32)

    w0, b0 = params[0]
    h = jnp.maximum(bf16_dot(pts, w0) + b0, 0.0)
    for i in range(1, D):
        w, b = params[i]
        if i == SKIPS[0] + 1:
            h = jnp.concatenate([pts, h], axis=-1)
        h = jnp.maximum(bf16_dot(h, w) + b, 0.0)
    w, b = params[D]
    return bf16_dot(h, w) + b


if __name__ == "__main__":
    key = jax.random.PRNGKey(0)
    kx, kp = jax.random.split(key)

    N = 1000    # non-multiple of the tile to exercise the padded-tail path
    x = jax.random.normal(kx, (N, INPUT_CH + INPUT_CH_VIEWS), jnp.float32)
    params = init_params(kp)

    flat = prepare_params(params)        # one-time weight preprocessing
    out = nerf_forward(x, flat)
    out = jax.block_until_ready(out)

    ref = nerf_reference(x, params)
    assert out.shape == (N, OUTPUT_CH)
    assert jnp.allclose(out, ref, atol=2e-2, rtol=2e-2), \
        float(jnp.max(jnp.abs(out - ref)))

    print("KERNEL_OK")
</pallas_src>

<mosaic_0001>
module attributes {stable_mosaic.version = 11 : i64} {
  func.func @nerf_kernel(%arg0: i32, %arg1: memref<512x3xf32, #tpu.memory_space<vmem>>, %arg2: memref<3x256xbf16, #tpu.memory_space<vmem>>, %arg3: memref<1x256xf32, #tpu.memory_space<vmem>>, %arg4: memref<256x256xbf16, #tpu.memory_space<vmem>>, %arg5: memref<1x256xf32, #tpu.memory_space<vmem>>, %arg6: memref<256x256xbf16, #tpu.memory_space<vmem>>, %arg7: memref<1x256xf32, #tpu.memory_space<vmem>>, %arg8: memref<256x256xbf16, #tpu.memory_space<vmem>>, %arg9: memref<1x256xf32, #tpu.memory_space<vmem>>, %arg10: memref<256x256xbf16, #tpu.memory_space<vmem>>, %arg11: memref<1x256xf32, #tpu.memory_space<vmem>>, %arg12: memref<3x256xbf16, #tpu.memory_space<vmem>>, %arg13: memref<256x256xbf16, #tpu.memory_space<vmem>>, %arg14: memref<1x256xf32, #tpu.memory_space<vmem>>, %arg15: memref<256x256xbf16, #tpu.memory_space<vmem>>, %arg16: memref<1x256xf32, #tpu.memory_space<vmem>>, %arg17: memref<256x256xbf16, #tpu.memory_space<vmem>>, %arg18: memref<1x256xf32, #tpu.memory_space<vmem>>, %arg19: memref<256x128xbf16, #tpu.memory_space<vmem>>, %arg20: memref<1x128xf32, #tpu.memory_space<vmem>>, %arg21: memref<512x128xbf16, #tpu.memory_space<vmem>>) attributes {dimension_semantics = [#tpu.dimension_semantics<parallel>], iteration_bounds = array<i64: 2>, scalar_prefetch = 0 : i64, scratch_operands = 0 : i64, tpu.core_type = #tpu.core_type<tc>, window_params = [{transform_indices = @transform_0, window_bounds = array<i64: 512, 3>}, {pipeline_mode = #tpu.pipeline_mode<synchronous>, transform_indices = @transform_1, window_bounds = array<i64: 3, 256>}, {pipeline_mode = #tpu.pipeline_mode<synchronous>, transform_indices = @transform_2, window_bounds = array<i64: 1, 256>}, {pipeline_mode = #tpu.pipeline_mode<synchronous>, transform_indices = @transform_3, window_bounds = array<i64: 256, 256>}, {pipeline_mode = #tpu.pipeline_mode<synchronous>, transform_indices = @transform_4, window_bounds = array<i64: 1, 256>}, {pipeline_mode = #tpu.pipeline_mode<synchronous>, transform_indices = @transform_5, window_bounds = array<i64: 256, 256>}, {pipeline_mode = #tpu.pipeline_mode<synchronous>, transform_indices = @transform_6, window_bounds = array<i64: 1, 256>}, {pipeline_mode = #tpu.pipeline_mode<synchronous>, transform_indices = @transform_7, window_bounds = array<i64: 256, 256>}, {pipeline_mode = #tpu.pipeline_mode<synchronous>, transform_indices = @transform_8, window_bounds = array<i64: 1, 256>}, {pipeline_mode = #tpu.pipeline_mode<synchronous>, transform_indices = @transform_9, window_bounds = array<i64: 256, 256>}, {pipeline_mode = #tpu.pipeline_mode<synchronous>, transform_indices = @transform_10, window_bounds = array<i64: 1, 256>}, {pipeline_mode = #tpu.pipeline_mode<synchronous>, transform_indices = @transform_11, window_bounds = array<i64: 3, 256>}, {pipeline_mode = #tpu.pipeline_mode<synchronous>, transform_indices = @transform_12, window_bounds = array<i64: 256, 256>}, {pipeline_mode = #tpu.pipeline_mode<synchronous>, transform_indices = @transform_13, window_bounds = array<i64: 1, 256>}, {pipeline_mode = #tpu.pipeline_mode<synchronous>, transform_indices = @transform_14, window_bounds = array<i64: 256, 256>}, {pipeline_mode = #tpu.pipeline_mode<synchronous>, transform_indices = @transform_15, window_bounds = array<i64: 1, 256>}, {pipeline_mode = #tpu.pipeline_mode<synchronous>, transform_indices = @transform_16, window_bounds = array<i64: 256, 256>}, {pipeline_mode = #tpu.pipeline_mode<synchronous>, transform_indices = @transform_17, window_bounds = array<i64: 1, 256>}, {pipeline_mode = #tpu.pipeline_mode<synchronous>, transform_indices = @transform_18, window_bounds = array<i64: 256, 128>}, {pipeline_mode = #tpu.pipeline_mode<synchronous>, transform_indices = @transform_19, window_bounds = array<i64: 1, 128>}, {transform_indices = @transform_20, window_bounds = array<i64: 512, 128>}]} {
    %c0 = arith.constant 0 : index
    %c0_0 = arith.constant 0 : index
    %0 = vector.load %arg1[%c0, %c0_0] : memref<512x3xf32, #tpu.memory_space<vmem>>, vector<512x3xf32>
    %1 = arith.truncf %0 : vector<512x3xf32> to vector<512x3xbf16>
    %c0_1 = arith.constant 0 : index
    %c0_2 = arith.constant 0 : index
    %2 = vector.load %arg2[%c0_1, %c0_2] : memref<3x256xbf16, #tpu.memory_space<vmem>>, vector<3x256xbf16>
    %cst = arith.constant dense<0.000000e+00> : vector<512x256xf32>
    %3 = tpu.matmul %1, %2, %cst {dimension_numbers = #tpu.dot_dimension_numbers<[1], [0], [0], [1], [0, 0, 1, 1], [], []>} : vector<512x3xbf16>, vector<3x256xbf16>, vector<512x256xf32> -> vector<512x256xf32>
    %c0_3 = arith.constant 0 : index
    %c0_4 = arith.constant 0 : index
    %4 = vector.load %arg3[%c0_3, %c0_4] : memref<1x256xf32, #tpu.memory_space<vmem>>, vector<1x256xf32>
    %5 = vector.broadcast %4 : vector<1x256xf32> to vector<512x256xf32>
    %6 = arith.addf %3, %5 : vector<512x256xf32>
    %cst_5 = arith.constant 0.000000e+00 : f32
    %7 = vector.broadcast %cst_5 : f32 to vector<512x256xf32>
    %8 = arith.maximumf %6, %7 : vector<512x256xf32>
    %9 = arith.truncf %8 : vector<512x256xf32> to vector<512x256xbf16>
    %c0_6 = arith.constant 0 : index
    %c0_7 = arith.constant 0 : index
    %10 = vector.load %arg4[%c0_6, %c0_7] : memref<256x256xbf16, #tpu.memory_space<vmem>>, vector<256x256xbf16>
    %cst_8 = arith.constant dense<0.000000e+00> : vector<512x256xf32>
    %11 = tpu.matmul %9, %10, %cst_8 {dimension_numbers = #tpu.dot_dimension_numbers<[1], [0], [0], [1], [0, 0, 1, 1], [], []>} : vector<512x256xbf16>, vector<256x256xbf16>, vector<512x256xf32> -> vector<512x256xf32>
    %c0_9 = arith.constant 0 : index
    %c0_10 = arith.constant 0 : index
    %12 = vector.load %arg5[%c0_9, %c0_10] : memref<1x256xf32, #tpu.memory_space<vmem>>, vector<1x256xf32>
    %13 = vector.broadcast %12 : vector<1x256xf32> to vector<512x256xf32>
    %14 = arith.addf %11, %13 : vector<512x256xf32>
    %cst_11 = arith.constant 0.000000e+00 : f32
    %15 = vector.broadcast %cst_11 : f32 to vector<512x256xf32>
    %16 = arith.maximumf %14, %15 : vector<512x256xf32>
    %17 = arith.truncf %16 : vector<512x256xf32> to vector<512x256xbf16>
    %c0_12 = arith.constant 0 : index
    %c0_13 = arith.constant 0 : index
    %18 = vector.load %arg6[%c0_12, %c0_13] : memref<256x256xbf16, #tpu.memory_space<vmem>>, vector<256x256xbf16>
    %cst_14 = arith.constant dense<0.000000e+00> : vector<512x256xf32>
    %19 = tpu.matmul %17, %18, %cst_14 {dimension_numbers = #tpu.dot_dimension_numbers<[1], [0], [0], [1], [0, 0, 1, 1], [], []>} : vector<512x256xbf16>, vector<256x256xbf16>, vector<512x256xf32> -> vector<512x256xf32>
    %c0_15 = arith.constant 0 : index
    %c0_16 = arith.constant 0 : index
    %20 = vector.load %arg7[%c0_15, %c0_16] : memref<1x256xf32, #tpu.memory_space<vmem>>, vector<1x256xf32>
    %21 = vector.broadcast %20 : vector<1x256xf32> to vector<512x256xf32>
    %22 = arith.addf %19, %21 : vector<512x256xf32>
    %cst_17 = arith.constant 0.000000e+00 : f32
    %23 = vector.broadcast %cst_17 : f32 to vector<512x256xf32>
    %24 = arith.maximumf %22, %23 : vector<512x256xf32>
    %25 = arith.truncf %24 : vector<512x256xf32> to vector<512x256xbf16>
    %c0_18 = arith.constant 0 : index
    %c0_19 = arith.constant 0 : index
    %26 = vector.load %arg8[%c0_18, %c0_19] : memref<256x256xbf16, #tpu.memory_space<vmem>>, vector<256x256xbf16>
    %cst_20 = arith.constant dense<0.000000e+00> : vector<512x256xf32>
    %27 = tpu.matmul %25, %26, %cst_20 {dimension_numbers = #tpu.dot_dimension_numbers<[1], [0], [0], [1], [0, 0, 1, 1], [], []>} : vector<512x256xbf16>, vector<256x256xbf16>, vector<512x256xf32> -> vector<512x256xf32>
    %c0_21 = arith.constant 0 : index
    %c0_22 = arith.constant 0 : index
    %28 = vector.load %arg9[%c0_21, %c0_22] : memref<1x256xf32, #tpu.memory_space<vmem>>, vector<1x256xf32>
    %29 = vector.broadcast %28 : vector<1x256xf32> to vector<512x256xf32>
    %30 = arith.addf %27, %29 : vector<512x256xf32>
    %cst_23 = arith.constant 0.000000e+00 : f32
    %31 = vector.broadcast %cst_23 : f32 to vector<512x256xf32>
    %32 = arith.maximumf %30, %31 : vector<512x256xf32>
    %33 = arith.truncf %32 : vector<512x256xf32> to vector<512x256xbf16>
    %c0_24 = arith.constant 0 : index
    %c0_25 = arith.constant 0 : index
    %34 = vector.load %arg10[%c0_24, %c0_25] : memref<256x256xbf16, #tpu.memory_space<vmem>>, vector<256x256xbf16>
    %cst_26 = arith.constant dense<0.000000e+00> : vector<512x256xf32>
    %35 = tpu.matmul %33, %34, %cst_26 {dimension_numbers = #tpu.dot_dimension_numbers<[1], [0], [0], [1], [0, 0, 1, 1], [], []>} : vector<512x256xbf16>, vector<256x256xbf16>, vector<512x256xf32> -> vector<512x256xf32>
    %c0_27 = arith.constant 0 : index
    %c0_28 = arith.constant 0 : index
    %36 = vector.load %arg11[%c0_27, %c0_28] : memref<1x256xf32, #tpu.memory_space<vmem>>, vector<1x256xf32>
    %37 = vector.broadcast %36 : vector<1x256xf32> to vector<512x256xf32>
    %38 = arith.addf %35, %37 : vector<512x256xf32>
    %cst_29 = arith.constant 0.000000e+00 : f32
    %39 = vector.broadcast %cst_29 : f32 to vector<512x256xf32>
    %40 = arith.maximumf %38, %39 : vector<512x256xf32>
    %41 = arith.truncf %40 : vector<512x256xf32> to vector<512x256xbf16>
    %c0_30 = arith.constant 0 : index
    %c0_31 = arith.constant 0 : index
    %42 = vector.load %arg12[%c0_30, %c0_31] : memref<3x256xbf16, #tpu.memory_space<vmem>>, vector<3x256xbf16>
    %cst_32 = arith.constant dense<0.000000e+00> : vector<512x256xf32>
    %43 = tpu.matmul %1, %42, %cst_32 {dimension_numbers = #tpu.dot_dimension_numbers<[1], [0], [0], [1], [0, 0, 1, 1], [], []>} : vector<512x3xbf16>, vector<3x256xbf16>, vector<512x256xf32> -> vector<512x256xf32>
    %c0_33 = arith.constant 0 : index
    %c0_34 = arith.constant 0 : index
    %44 = vector.load %arg13[%c0_33, %c0_34] : memref<256x256xbf16, #tpu.memory_space<vmem>>, vector<256x256xbf16>
    %cst_35 = arith.constant dense<0.000000e+00> : vector<512x256xf32>
    %45 = tpu.matmul %41, %44, %cst_35 {dimension_numbers = #tpu.dot_dimension_numbers<[1], [0], [0], [1], [0, 0, 1, 1], [], []>} : vector<512x256xbf16>, vector<256x256xbf16>, vector<512x256xf32> -> vector<512x256xf32>
    %46 = arith.addf %45, %43 : vector<512x256xf32>
    %c0_36 = arith.constant 0 : index
    %c0_37 = arith.constant 0 : index
    %47 = vector.load %arg14[%c0_36, %c0_37] : memref<1x256xf32, #tpu.memory_space<vmem>>, vector<1x256xf32>
    %48 = vector.broadcast %47 : vector<1x256xf32> to vector<512x256xf32>
    %49 = arith.addf %46, %48 : vector<512x256xf32>
    %cst_38 = arith.constant 0.000000e+00 : f32
    %50 = vector.broadcast %cst_38 : f32 to vector<512x256xf32>
    %51 = arith.maximumf %49, %50 : vector<512x256xf32>
    %52 = arith.truncf %51 : vector<512x256xf32> to vector<512x256xbf16>
    %c0_39 = arith.constant 0 : index
    %c0_40 = arith.constant 0 : index
    %53 = vector.load %arg15[%c0_39, %c0_40] : memref<256x256xbf16, #tpu.memory_space<vmem>>, vector<256x256xbf16>
    %cst_41 = arith.constant dense<0.000000e+00> : vector<512x256xf32>
    %54 = tpu.matmul %52, %53, %cst_41 {dimension_numbers = #tpu.dot_dimension_numbers<[1], [0], [0], [1], [0, 0, 1, 1], [], []>} : vector<512x256xbf16>, vector<256x256xbf16>, vector<512x256xf32> -> vector<512x256xf32>
    %c0_42 = arith.constant 0 : index
    %c0_43 = arith.constant 0 : index
    %55 = vector.load %arg16[%c0_42, %c0_43] : memref<1x256xf32, #tpu.memory_space<vmem>>, vector<1x256xf32>
    %56 = vector.broadcast %55 : vector<1x256xf32> to vector<512x256xf32>
    %57 = arith.addf %54, %56 : vector<512x256xf32>
    %cst_44 = arith.constant 0.000000e+00 : f32
    %58 = vector.broadcast %cst_44 : f32 to vector<512x256xf32>
    %59 = arith.maximumf %57, %58 : vector<512x256xf32>
    %60 = arith.truncf %59 : vector<512x256xf32> to vector<512x256xbf16>
    %c0_45 = arith.constant 0 : index
    %c0_46 = arith.constant 0 : index
    %61 = vector.load %arg17[%c0_45, %c0_46] : memref<256x256xbf16, #tpu.memory_space<vmem>>, vector<256x256xbf16>
    %cst_47 = arith.constant dense<0.000000e+00> : vector<512x256xf32>
    %62 = tpu.matmul %60, %61, %cst_47 {dimension_numbers = #tpu.dot_dimension_numbers<[1], [0], [0], [1], [0, 0, 1, 1], [], []>} : vector<512x256xbf16>, vector<256x256xbf16>, vector<512x256xf32> -> vector<512x256xf32>
    %c0_48 = arith.constant 0 : index
    %c0_49 = arith.constant 0 : index
    %63 = vector.load %arg18[%c0_48, %c0_49] : memref<1x256xf32, #tpu.memory_space<vmem>>, vector<1x256xf32>
    %64 = vector.broadcast %63 : vector<1x256xf32> to vector<512x256xf32>
    %65 = arith.addf %62, %64 : vector<512x256xf32>
    %cst_50 = arith.constant 0.000000e+00 : f32
    %66 = vector.broadcast %cst_50 : f32 to vector<512x256xf32>
    %67 = arith.maximumf %65, %66 : vector<512x256xf32>
    %68 = arith.truncf %67 : vector<512x256xf32> to vector<512x256xbf16>
    %c0_51 = arith.constant 0 : index
    %c0_52 = arith.constant 0 : index
    %69 = vector.load %arg19[%c0_51, %c0_52] : memref<256x128xbf16, #tpu.memory_space<vmem>>, vector<256x128xbf16>
    %cst_53 = arith.constant dense<0.000000e+00> : vector<512x128xf32>
    %70 = tpu.matmul %68, %69, %cst_53 {dimension_numbers = #tpu.dot_dimension_numbers<[1], [0], [0], [1], [0, 0, 1, 1], [], []>} : vector<512x256xbf16>, vector<256x128xbf16>, vector<512x128xf32> -> vector<512x128xf32>
    %c0_54 = arith.constant 0 : index
    %c0_55 = arith.constant 0 : index
    %71 = vector.load %arg20[%c0_54, %c0_55] : memref<1x128xf32, #tpu.memory_space<vmem>>, vector<1x128xf32>
    %72 = vector.broadcast %71 : vector<1x128xf32> to vector<512x128xf32>
    %73 = arith.addf %70, %72 : vector<512x128xf32>
    %74 = arith.truncf %73 : vector<512x128xf32> to vector<512x128xbf16>
    %c0_56 = arith.constant 0 : index
    %c0_57 = arith.constant 0 : index
    %75 = vector.load %arg21[%c0_56, %c0_57] : memref<512x128xbf16, #tpu.memory_space<vmem>>, vector<512x128xbf16>
    tpu.vector_store %arg21[%c0_56, %c0_57], %74 {strides = array<i32>} : memref<512x128xbf16, #tpu.memory_space<vmem>>, vector<512x128xbf16>,
    return
  }
  func.func @transform_0(%arg0: i32) -> (i32, i32) {
    %c0_i32 = arith.constant 0 : i32
    %c0_i32_0 = arith.constant 0 : i32
    return %arg0, %c0_i32 : i32, i32
  }
  func.func @transform_1(%arg0: i32) -> (i32, i32) {
    %c0_i32 = arith.constant 0 : i32
    %c0_i32_0 = arith.constant 0 : i32
    %c0_i32_1 = arith.constant 0 : i32
    return %c0_i32, %c0_i32_0 : i32, i32
  }
  func.func @transform_2(%arg0: i32) -> (i32, i32) {
    %c0_i32 = arith.constant 0 : i32
    %c0_i32_0 = arith.constant 0 : i32
    %c0_i32_1 = arith.constant 0 : i32
    return %c0_i32, %c0_i32_0 : i32, i32
  }
  func.func @transform_3(%arg0: i32) -> (i32, i32) {
    %c0_i32 = arith.constant 0 : i32
    %c0_i32_0 = arith.constant 0 : i32
    %c0_i32_1 = arith.constant 0 : i32
    return %c0_i32, %c0_i32_0 : i32, i32
  }
  func.func @transform_4(%arg0: i32) -> (i32, i32) {
    %c0_i32 = arith.constant 0 : i32
    %c0_i32_0 = arith.constant 0 : i32
    %c0_i32_1 = arith.constant 0 : i32
    return %c0_i32, %c0_i32_0 : i32, i32
  }
  func.func @transform_5(%arg0: i32) -> (i32, i32) {
    %c0_i32 = arith.constant 0 : i32
    %c0_i32_0 = arith.constant 0 : i32
    %c0_i32_1 = arith.constant 0 : i32
    return %c0_i32, %c0_i32_0 : i32, i32
  }
  func.func @transform_6(%arg0: i32) -> (i32, i32) {
    %c0_i32 = arith.constant 0 : i32
    %c0_i32_0 = arith.constant 0 : i32
    %c0_i32_1 = arith.constant 0 : i32
    return %c0_i32, %c0_i32_0 : i32, i32
  }
  func.func @transform_7(%arg0: i32) -> (i32, i32) {
    %c0_i32 = arith.constant 0 : i32
    %c0_i32_0 = arith.constant 0 : i32
    %c0_i32_1 = arith.constant 0 : i32
    return %c0_i32, %c0_i32_0 : i32, i32
  }
  func.func @transform_8(%arg0: i32) -> (i32, i32) {
    %c0_i32 = arith.constant 0 : i32
    %c0_i32_0 = arith.constant 0 : i32
    %c0_i32_1 = arith.constant 0 : i32
    return %c0_i32, %c0_i32_0 : i32, i32
  }
  func.func @transform_9(%arg0: i32) -> (i32, i32) {
    %c0_i32 = arith.constant 0 : i32
    %c0_i32_0 = arith.constant 0 : i32
    %c0_i32_1 = arith.constant 0 : i32
    return %c0_i32, %c0_i32_0 : i32, i32
  }
  func.func @transform_10(%arg0: i32) -> (i32, i32) {
    %c0_i32 = arith.constant 0 : i32
    %c0_i32_0 = arith.constant 0 : i32
    %c0_i32_1 = arith.constant 0 : i32
    return %c0_i32, %c0_i32_0 : i32, i32
  }
  func.func @transform_11(%arg0: i32) -> (i32, i32) {
    %c0_i32 = arith.constant 0 : i32
    %c0_i32_0 = arith.constant 0 : i32
    %c0_i32_1 = arith.constant 0 : i32
    return %c0_i32, %c0_i32_0 : i32, i32
  }
  func.func @transform_12(%arg0: i32) -> (i32, i32) {
    %c0_i32 = arith.constant 0 : i32
    %c0_i32_0 = arith.constant 0 : i32
    %c0_i32_1 = arith.constant 0 : i32
    return %c0_i32, %c0_i32_0 : i32, i32
  }
  func.func @transform_13(%arg0: i32) -> (i32, i32) {
    %c0_i32 = arith.constant 0 : i32
    %c0_i32_0 = arith.constant 0 : i32
    %c0_i32_1 = arith.constant 0 : i32
    return %c0_i32, %c0_i32_0 : i32, i32
  }
  func.func @transform_14(%arg0: i32) -> (i32, i32) {
    %c0_i32 = arith.constant 0 : i32
    %c0_i32_0 = arith.constant 0 : i32
    %c0_i32_1 = arith.constant 0 : i32
    return %c0_i32, %c0_i32_0 : i32, i32
  }
  func.func @transform_15(%arg0: i32) -> (i32, i32) {
    %c0_i32 = arith.constant 0 : i32
    %c0_i32_0 = arith.constant 0 : i32
    %c0_i32_1 = arith.constant 0 : i32
    return %c0_i32, %c0_i32_0 : i32, i32
  }
  func.func @transform_16(%arg0: i32) -> (i32, i32) {
    %c0_i32 = arith.constant 0 : i32
    %c0_i32_0 = arith.constant 0 : i32
    %c0_i32_1 = arith.constant 0 : i32
    return %c0_i32, %c0_i32_0 : i32, i32
  }
  func.func @transform_17(%arg0: i32) -> (i32, i32) {
    %c0_i32 = arith.constant 0 : i32
    %c0_i32_0 = arith.constant 0 : i32
    %c0_i32_1 = arith.constant 0 : i32
    return %c0_i32, %c0_i32_0 : i32, i32
  }
  func.func @transform_18(%arg0: i32) -> (i32, i32) {
    %c0_i32 = arith.constant 0 : i32
    %c0_i32_0 = arith.constant 0 : i32
    %c0_i32_1 = arith.constant 0 : i32
    return %c0_i32, %c0_i32_0 : i32, i32
  }
  func.func @transform_19(%arg0: i32) -> (i32, i32) {
    %c0_i32 = arith.constant 0 : i32
    %c0_i32_0 = arith.constant 0 : i32
    %c0_i32_1 = arith.constant 0 : i32
    return %c0_i32, %c0_i32_0 : i32, i32
  }
  func.func @transform_20(%arg0: i32) -> (i32, i32) {
    %c0_i32 = arith.constant 0 : i32
    %c0_i32_0 = arith.constant 0 : i32
    return %arg0, %c0_i32 : i32, i32
  }
}

</mosaic_0001>

<bundles_post_ra>
// kernel: tpu_custom_call.1
= control target key start
LH: loop header
LB: loop body
LE: loop exit
PB: predicated region body
PF: predicated region fallthrough
CT: control target
= control target key end

     0   :  { %s12449_s0 = inlined_call_operand.vmem [shape: f32[1024,3], index: 0, kind: input, shape index: {}]   ;;  %s12450_s1 = inlined_call_operand.vmem [shape: bf16[3,256], index: 1, kind: input, shape index: {}]   ;;  %s12451_s2 = inlined_call_operand.vmem [shape: f32[1,256], index: 2, kind: input, shape index: {}]   ;;  %s12452_s3 = inlined_call_operand.vmem [shape: bf16[256,256], index: 3, kind: input, shape index: {}]   ;;  %s12453_s4 = inlined_call_operand.vmem [shape: f32[1,256], index: 4, kind: input, shape index: {}]   ;;  %s12454_s5 = inlined_call_operand.vmem [shape: bf16[256,256], index: 5, kind: input, shape index: {}]   ;;  %s12455_s6 = inlined_call_operand.vmem [shape: f32[1,256], index: 6, kind: input, shape index: {}]   ;;  %s12456_s7 = inlined_call_operand.vmem [shape: bf16[256,256], index: 7, kind: input, shape index: {}]   ;;  %s12457_s8 = inlined_call_operand.vmem [shape: f32[1,256], index: 8, kind: input, shape index: {}]   ;;  %s12458_s9 = inlined_call_operand.vmem [shape: bf16[256,256], index: 9, kind: input, shape index: {}]   ;;  %s12459_s10 = inlined_call_operand.vmem [shape: f32[1,256], index: 10, kind: input, shape index: {}]   ;;  %s12460_s11 = inlined_call_operand.vmem [shape: bf16[3,256], index: 11, kind: input, shape index: {}]   ;;  %s12461_s12 = inlined_call_operand.hbm [shape: bf16[256,256], index: 12, kind: input, shape index: {}]   ;;  %s12462_s13 = inlined_call_operand.vmem [shape: f32[1,256], index: 13, kind: input, shape index: {}]   ;;  %s12463_s14 = inlined_call_operand.hbm [shape: bf16[256,256], index: 14, kind: input, shape index: {}]   ;;  %s12464_s15 = inlined_call_operand.vmem [shape: f32[1,256], index: 15, kind: input, shape index: {}]   ;;  %s12465_s16 = inlined_call_operand.hbm [shape: bf16[256,256], index: 16, kind: input, shape index: {}]   ;;  %s12466_s17 = inlined_call_operand.vmem [shape: f32[1,256], index: 17, kind: input, shape index: {}]   ;;  %s12467_s18 = inlined_call_operand.hbm [shape: bf16[256,128], index: 18, kind: input, shape index: {}]   ;;  %s12468_s19 = inlined_call_operand.vmem [shape: f32[1,128], index: 19, kind: input, shape index: {}]   ;;  %s12469_s20 = inlined_call_operand.hbm [shape: bf16[1024,128], index: 20, kind: output, shape index: {}]  }
   0x1   :  { %12489 = sst [smem:[#allocation80_spill]] %s12449_s0 }
   0x2   :  { %12490 = sst [smem:[#allocation81_spill]] %s12450_s1 }
   0x3   :  { %12491 = sst [smem:[#allocation82_spill]] %s12451_s2 }
   0x4   :  { %12492 = sst [smem:[#allocation83_spill]] %s12452_s3 }
   0x5   :  { %12493 = sst [smem:[#allocation84_spill]] %s12453_s4 }
   0x6   :  { %12494 = sst [smem:[#allocation85_spill]] %s12454_s5 }
   0x7   :  { %25 = vsyncpa [#allocation3], 0 }
   0x8   :  { %26 = vsyncpa [#allocation6], 0 }
   0x9   :  { %27 = vsyncpa [#allocation9], 0 }
   0xa   :  { %28 = vsyncpa [#allocation4], 0 }
   0xb   :  { %30 = vsyncpa [#allocation4 + $0x1], 0  ;;  %s9477_s1 = smov 0   ;;  %s9479_s22 = smov 0  }
   0xc   :  { %s9481_s23 = smov 0   ;;  %s9483_s24 = smov 0  }
   0xd LB: > { %12495 = sst [smem:[#allocation15_spill]] %s9345_s1  ;;  %s9498_s2 = sadd.s32 4294967295, %s9357_s24   ;;  %s9357_s24 = sphi %s9483_s24, %s12655_s24   ;;  %s9353_s23 = sphi %s9481_s23, %s12657_s23   ;;  %s9349_s22 = sphi %s9479_s22, %s12659_s22   ;;  %s9345_s1 = sphi %s9477_s1, %s12658_s1  }
   0xe   : > { %12496 = sst [smem:[#allocation16_spill]] %s9353_s23  ;;  %s8062_s25 = sadd.s32 4294967294, %s9357_s24  }
   0xf   : > { %12497 = sst [smem:[#allocation17_spill]] %s9357_s24  ;;  %s9502_s3 = sadd.s32 1, %s9357_s24  }
  0x10   : > { %12498 = sst [smem:[#allocation18_spill]] %s9502_s3  ;;  %s468_s26 = sadd.s32 1, %s9353_s23 }
  0x11   : > { %s465_s27 = ssub.s32 %s9357_s24, %s9502_s3  ;;  %p478_p0 = scmp.ne.s32.totalorder %s9353_s23, %s9349_s22 }
  0x12   : > { %p466_p1 = scmp.eq.s32.totalorder %s465_s27, 0  ;;  %p479_p2 = scmp.eq.s32.totalorder %s9498_s2, 1 }
  0x13   : > { %p484_p3 = scmp.ne.s32.totalorder %s9349_s22, %s9345_s1  ;;  %p485_p4 = scmp.eq.s32.totalorder %s8062_s25, 1 }
  0x14   : > { %s9513_s28 = scalar_select %p466_p1, %s9353_s23, %s468_s26  }
  0x15   : > { %p9515_p5 = por %p479_p2, %p478_p0  ;;  %p9519_p6 = por %p485_p4, %p484_p3 }
  0x16   : > { %12499 = sst [smem:[#allocation19_spill]] %s9513_s28  ;;  %p8063_p7 = scmp.ge.s32.totalorder %s9357_s24, 1 }
  0x17   : > { %s12500_s4 = scalar_select %p9515_p5, 1, 0 }
  0x18   : > { %s12501_s29 = scalar_select %p9519_p6, 1, 0 }
  0x19   : > { %p492_p8 = scmp.lt.s32.totalorder %s9357_s24, 3  ;;  %p12476_p9 = scmp.eq.s32.totalorder %s9498_s2, 0 }
  0x1a   : > { %12502 = sst [smem:[#allocation20_spill]] %s12501_s29  ;;  %s9359_s0 = smov [#allocation5]  }
  0x1b   : > { %p9526_p10 = pnand %p8063_p7, %p492_p8  ;;  %s553_s21 = sshll.u32 %s9359_s0, 4  ;;  %s554_s21 = int_to_ptr.vmem [resolvable:$true] %s553_s21 }
  0x1c   : > { %s9360_s26 = smov [#allocation2]   ;;  %s9361_s28 = smov [#allocation7]  }
  0x1d   : > { %p8759_p11 = pneg %p9526_p10  ;;  %s537_s27 = sshll.u32 %s9360_s26, 4  ;;  %s538_s27 = int_to_ptr.vmem [resolvable:$true] %s537_s27 }
  0x1e   : > { %s569_s23 = sshll.u32 %s9361_s28, 4  ;;  %s9192_s3 = scalar_lea.vmem %s554_s21, 4096  ;;  %s570_s23 = int_to_ptr.vmem [resolvable:$true] %s569_s23 }
  0x1f   : > { %p9534_p12 = pnand %p12476_p9, %p8759_p11  ;;  %p9193_p0 = scmp.ne.s32.totalorder %s554_s21, %s9192_s3 }
  0x20   : > { %p9200_p3 = scmp.lt.s32.totalorder %s554_s21, %s554_s21  ;;  %p9201_p4 = scmp.lt.s32.totalorder %s9192_s3, %s9192_s3 }
  0x21   : > { %p9183_p13 = pneg %p9534_p12 }
  0x22   : > { %p9202_p7 = por %p9201_p4, %p9200_p3 }
  0x23   : > { %p9195_p1 = pnand %p9193_p0, %p9183_p13 }
  0x25   : > { %p9196_p2 = pneg %p9195_p1 }
  0x27   : > { %p9203_p8 = pnand %p9202_p7, %p9196_p2 }
  0x29   : > { %9206 = shalt.err (!%p9203_p8)
}
  0x2a   : > { %s9362_s0 = smov 128   ;;  %s9363_s26 = smov 8  }
  0x2b   : > { %8765 = dma.hbm_to_vmem [thread:$0]  (!%p9534_p12), %s12463_s14, 4096, %s554_s21, [#allocation6], %s9362_s0, %s9362_s0, %s9363_s26  }
  0x2c   : > { %s9218_s1 = scalar_lea.vmem %s538_s27, 4096  ;;  %p9226_p9 = scmp.lt.s32.totalorder %s538_s27, %s538_s27 }
  0x2d   : > { %p9219_p11 = scmp.ne.s32.totalorder %s538_s27, %s9218_s1  ;;  %p9227_p6 = scmp.lt.s32.totalorder %s9218_s1, %s9218_s1 }
  0x2f   : > { %p9221_p0 = pnand %p9219_p11, %p9183_p13  ;;  %p9228_p3 = por %p9227_p6, %p9226_p9 }
  0x31   : > { %p9222_p1 = pneg %p9221_p0 }
  0x33   : > { %p9229_p2 = pnand %p9228_p3, %p9222_p1 }
  0x35   : > { %9232 = shalt.err (!%p9229_p2)
}
  0x36   : > { %8762 = dma.hbm_to_vmem [thread:$0]  (!%p9534_p12), %s12461_s12, 4096, %s538_s27, [#allocation3], %s9362_s0, %s9362_s0, %s9363_s26  }
  0x37   : > { %s9244_s29 = scalar_lea.vmem %s570_s23, 4096  ;;  %p9252_p11 = scmp.lt.s32.totalorder %s570_s23, %s570_s23 }
  0x38   : > { %p9245_p4 = scmp.ne.s32.totalorder %s570_s23, %s9244_s29  ;;  %p9253_p0 = scmp.lt.s32.totalorder %s9244_s29, %s9244_s29 }
  0x3a   : > { %p9247_p7 = pnand %p9245_p4, %p9183_p13  ;;  %p9254_p5 = por %p9253_p0, %p9252_p11 }
  0x3c   : > { %p9248_p8 = pneg %p9247_p7 }
  0x3e   : > { %p9255_p6 = pnand %p9254_p5, %p9248_p8 }
  0x40   : > { %9258 = shalt.err (!%p9255_p6)
}
  0x41   : > { %8768 = dma.hbm_to_vmem [thread:$0]  (!%p9534_p12), %s12465_s16, 4096, %s570_s23, [#allocation6], %s9362_s0, %s9362_s0, %s9363_s26  }
  0x42   : > { %s9364_s24 = smov [#allocation8]  }
  0x43   : > { %s585_s27 = sshll.u32 %s9364_s24, 4  ;;  %s586_s27 = int_to_ptr.vmem [resolvable:$true] %s585_s27 }
  0x44   : > { %s9270_s28 = scalar_lea.vmem %s586_s27, 2048  ;;  %p9278_p2 = scmp.lt.s32.totalorder %s586_s27, %s586_s27 }
  0x45   : > { %p9271_p9 = scmp.ne.s32.totalorder %s586_s27, %s9270_s28  ;;  %p9279_p4 = scmp.lt.s32.totalorder %s9270_s28, %s9270_s28 }
  0x47   : > { %p9273_p1 = pnand %p9271_p9, %p9183_p13  ;;  %p9280_p5 = por %p9279_p4, %p9278_p2 }
  0x49   : > { %p9274_p3 = pneg %p9273_p1 }
  0x4b   : > { %p9281_p7 = pnand %p9280_p5, %p9274_p3 }
  0x4d   : > { %9284 = shalt.err (!%p9281_p7)
}
  0x4e   : > { %s9365_s3 = smov 64   ;;  %s9366_s29 = smov 4  }
  0x4f   : > { %8771 = dma.hbm_to_vmem [thread:$0]  (!%p9534_p12), %s12467_s18, 2048, %s586_s27, [#allocation9], %s9365_s3, %s9365_s3, %s9366_s29  }
  0x50   : > { %613 = sbr.rel (%p9526_p10) target bundleno = 2274 (0x8e2), region = 100 }
  0x55   : > { %p12505_p8 = scmp.eq.s32.totalorder %s9498_s2, 0 }
  0x57   : > { %9328 = dma.done.wait (%p12505_p8), [#allocation3], 4096   ;;  %p12506_p13 = pmov %p12505_p8 }
  0x58   : > { %p12507_p11 = pmov %p12505_p8 }
  0x59   : > { %9330 = vsyncadd (%p12506_p13), [#allocation3], 4294963200 }
  0x5a   : > { %9332 = dma.done.wait (%p12507_p11), [#allocation6], 8192   ;;  %p12508_p0 = pmov %p12505_p8 }
  0x5c   : > { %9334 = vsyncadd (%p12508_p0), [#allocation6], 4294959104  ;;  %p12509_p6 = pmov %p12508_p0 }
  0x5d   : > { %p12510_p12 = pmov %p12508_p0 }
  0x5e   : > { %9336 = dma.done.wait (%p12509_p6), [#allocation9], 2048  }
  0x5f   : > { %9338 = vsyncadd (%p12510_p12), [#allocation9], 4294965248  ;;  %vm906_vm0 = vcmask 1040384   ;;  %v12479_v0 = vmov 0   ;;  %s8075_s30 = sshll.u32 %s9498_s2, 6  ;;  %vm907_vm1 = vcmask 1041408  }
  0x60   : > { %948 = vmatprep.mubr.bf16.mxu0 %v12479_v0  ;;  %p684_p10 = scmp.lt.s32.totalorder %s8075_s30, 127  ;;  %v9368_v1 = vmov 65535   ;;  %s12511_s21 = sld [smem:[#allocation81_spill]]  ;;  %vm809_vm2 = vcmask 23552  }
  0x61   : > { %v908_v2 = vsel %vm906_vm0, 4294967295, %v9368_v1  ;;  %s12512_s28 = sld [smem:[#allocation80_spill]]  ;;  %p12650_p1 = scmp.ne.s32.totalorder %s12500_s4, 0 }
  0x62   : > { %s12661_s30 = smov (!%p684_p10, %s8075_s30), 127  ;;  %v9588_v3 = vsel %vm907_vm1, %v908_v2, 0  ;;  %s12513_s23 = sld [smem:[#allocation83_spill]] }
  0x63   : > { %s8076_s25 = sshll.u32 %s12661_s30, 3  ;;  %s12515_s5 = sld [smem:[#allocation85_spill]] }
  0x64   : > { %s12517_s1 = sld [smem:[#allocation82_spill]]  ;;  %s9369_s0 = smov [#allocation10]  }
  0x65   : > { %s9289_s26 = sshll.u32 %s9369_s0, 4  ;;  %s9290_s26 = int_to_ptr.vmem [resolvable:$false] %s9289_s26 }
  0x66   : > { %v8077_v4 = vld.sshfl [vmem:[%s12511_s21] sm:$0x33 pattern:$0x76325410] }
  0x67   : > { %s9596_s3 = scalar_lea.vmem %s12512_s28, %s8076_s25  ;;  %v808_v5 = vcombine.high %v8077_v4, %v8077_v4  ;;  %v911_v6 = vand.u32 %v8077_v4, %v9588_v3  ;;  %s12520_s25 = sld [smem:[#allocation84_spill]] }
  0x68   : > { %v691_v7 = vld [vmem:[%s9596_s3] sm:$0xff]  ;;  %v692_v8 = vld [vmem:[%s9596_s3 + $0x8] sm:$0xff]  ;;  %v693_v11 = vld [vmem:[%s9596_s3 + $0x10] sm:$0xff]  ;;  %s12514_s30 = smov %s12513_s23 }
  0x69   : > { %v914_v9 = vand.u32 %v9588_v3, %v808_v5  ;;  %v9602_v10 = vpack.c.bf16 %v692_v8, %v691_v7  ;;  %v694_v12 = vld [vmem:[%s9596_s3 + $0x18] sm:$0xff]  ;;  %v695_v15 = vld [vmem:[%s9596_s3 + $0x20] sm:$0xff]  ;;  %v696_v16 = vld [vmem:[%s9596_s3 + $0x28] sm:$0xff] }
  0x6a   : > { %v9609_v13 = vpack.c.bf16 %v694_v12, %v693_v11  ;;  %v8829_v14 = vld [vmem:[%s12513_s23 + $0x74] ss:$8 sps:$4 sm:$0xff]   ;;  %v8831_v17 = vld [vmem:[%s12514_s30 + $0x70] ss:$8 sps:$4 sm:$0xff]   ;;  %v9622_v18 = vpack.c.bf16 %v696_v16, %v695_v15  ;;  %v8832_v19 = vld [vmem:[%s12514_s30 + $0x64] ss:$8 sps:$4 sm:$0xff]  }
  0x6b   : > { %930 = vmatprep.subr.bf16.mxu0 %v914_v9  ;;  %1665 = vmatprep.subr.bf16.mxu1 %v8829_v14  ;;  %v8834_v20 = vld [vmem:[%s12514_s30 + $0x60] ss:$8 sps:$4 sm:$0xff]   ;;  %v8835_v21 = vld [vmem:[%s12514_s30 + $0x54] ss:$8 sps:$4 sm:$0xff]   ;;  %v8837_v24 = vld [vmem:[%s12514_s30 + $0x50] ss:$8 sps:$4 sm:$0xff]  }
  0x6c   : > { %931 = vmatpush1.bf16.msra.mxu0 %v911_v6  ;;  %1666 = vmatpush1.bf16.msra.mxu1 %v8831_v17  ;;  %v697_v22 = vld [vmem:[%s9596_s3 + $0x30] sm:$0xff]  ;;  %v698_v23 = vld [vmem:[%s9596_s3 + $0x38] sm:$0xff]  ;;  %v699_v26 = vld [vmem:[%s9596_s3 + $0x40] sm:$0xff] }
  0x6d   : > { %1667 = vmatprep.subr.bf16.mxu1 %v8832_v19  ;;  %v9641_v25 = vpack.c.bf16 %v698_v23, %v697_v22  ;;  %v8838_v27 = vld [vmem:[%s12514_s30 + $0x44] ss:$8 sps:$4 sm:$0xff]   ;;  %v8840_v28 = vld [vmem:[%s12514_s30 + $0x40] ss:$8 sps:$4 sm:$0xff]   ;;  %v8841_v29 = vld [vmem:[%s12515_s5 + $0x70] ss:$8 sps:$4 sm:$0xff]  }
  0x6e   : > { %v700_v30 = vld [vmem:[%s9596_s3 + $0x48] sm:$0xff]  ;;  %v8843_v31 = vld [vmem:[%s12515_s5 + $0x74] ss:$8 sps:$4 sm:$0xff]   ;;  %v8846_v33 = vld [vmem:[%s12514_s30 + $0x30] ss:$8 sps:$4 sm:$0xff]  }
  0x6f   : > { %8078 = vmatmul.mubr.msk.bf16.vlgmr.msra.gmra.mxu0 %vm809_vm2, %v9602_v10  ;;  %v8844_v32 = vld [vmem:[%s12514_s30 + $0x34] ss:$8 sps:$4 sm:$0xff]   ;;  %2414 = vmatprep.subr.bf16.mxu0 %v8843_v31  ;;  %v9666_v34 = vpack.c.bf16 %v700_v30, %v699_v26  ;;  %v8847_v35 = vld [vmem:[%s12514_s30 + $0x24] ss:$8 sps:$4 sm:$0xff]   ;;  %v8849_v36 = vld [vmem:[%s12514_s30 + $0x20] ss:$8 sps:$4 sm:$0xff]  }
  0x70   : > { %958 = vmatprep.mubr.bf16.mxu0 %v12479_v0  ;;  %1668 = vmatpush1.bf16.msra.mxu1 %v8834_v20  ;;  %v8850_v37 = vld [vmem:[%s12514_s30 + $0x14] ss:$8 sps:$4 sm:$0xff]   ;;  %v8852_v40 = vld [vmem:[%s12514_s30 + $0x10] ss:$8 sps:$4 sm:$0xff]   ;;  %v703_v42 = vld [vmem:[%s9596_s3 + $0x60] sm:$0xff] }
  0x71   : > { %1669 = vmatprep.subr.bf16.mxu1 %v8835_v21  ;;  %2415 = vmatpush1.bf16.msra.mxu0 %v8841_v29  ;;  %v701_v38 = vld [vmem:[%s9596_s3 + $0x50] sm:$0xff]  ;;  %v702_v39 = vld [vmem:[%s9596_s3 + $0x58] sm:$0xff]  ;;  %v8853_v43 = vld [vmem:[%s12514_s30 + $0x4] ss:$8 sps:$4 sm:$0xff]  }
  0x72   : > { %v9685_v41 = vpack.c.bf16 %v702_v39, %v701_v38  ;;  %v8855_v44 = vld [vmem:[%s12514_s30] ss:$8 sps:$4 sm:$0xff]   ;;  %v8858_v47 = vld [vmem:[%s12515_s5 + $0x64] ss:$8 sps:$4 sm:$0xff]   ;;  %v8859_v48 = vld [vmem:[%s12514_s30 + $0xf4] ss:$8 sps:$4 sm:$0xff]  }
  0x73   : > { %v8856_v45 = vld [vmem:[%s12515_s5 + $0x60] ss:$8 sps:$4 sm:$0xff]   ;;  %v8861_v49 = vld [vmem:[%s12514_s30 + $0xf0] ss:$8 sps:$4 sm:$0xff]   ;;  %2416 = vmatprep.subr.bf16.mxu0 %v8858_v47  ;;  %v8862_v51 = vld [vmem:[%s12514_s30 + $0xe4] ss:$8 sps:$4 sm:$0xff]  }
  0x74   : > { %1670 = vmatpush1.bf16.msra.mxu1 %v8837_v24  ;;  %v704_v46 = vld [vmem:[%s9596_s3 + $0x68] sm:$0xff]  ;;  %v8865_v53 = vld [vmem:[%s12514_s30 + $0xd4] ss:$8 sps:$4 sm:$0xff]   ;;  %v8867_v56 = vld [vmem:[%s12514_s30 + $0xd0] ss:$8 sps:$4 sm:$0xff]  }
  0x75   : > { %1671 = vmatprep.subr.bf16.mxu1 %v8838_v27  ;;  %v9710_v50 = vpack.c.bf16 %v704_v46, %v703_v42  ;;  %2417 = vmatpush1.bf16.msra.mxu0 %v8856_v45  ;;  %v8864_v52 = vld [vmem:[%s12514_s30 + $0xe0] ss:$8 sps:$4 sm:$0xff]   ;;  %v705_v54 = vld [vmem:[%s9596_s3 + $0x70] sm:$0xff]  ;;  %v706_v55 = vld [vmem:[%s9596_s3 + $0x78] sm:$0xff] }
  0x76   : > { %v9729_v57 = vpack.c.bf16 %v706_v55, %v705_v54  ;;  %v707_v58 = vld [vmem:[%s9596_s3 + $0x80] sm:$0xff]  ;;  %v8871_v61 = vld [vmem:[%s12515_s5 + $0x50] ss:$8 sps:$4 sm:$0xff]   ;;  %v708_v62 = vld [vmem:[%s9596_s3 + $0x88] sm:$0xff] }
  0x77   : > { %8079 = vmatmul.mubr.msk.bf16.gmra.mxu0 %vm809_vm2, %v9609_v13  ;;  %v8868_v59 = vld [vmem:[%s12514_s30 + $0xc4] ss:$8 sps:$4 sm:$0xff]   ;;  %v8870_v60 = vld [vmem:[%s12514_s30 + $0xc0] ss:$8 sps:$4 sm:$0xff]   ;;  %v8873_v63 = vld [vmem:[%s12515_s5 + $0x54] ss:$8 sps:$4 sm:$0xff]   ;;  %v9754_v4 = vpack.c.bf16 %v708_v62, %v707_v58 }
  0x78   : > { %968 = vmatprep.mubr.bf16.mxu0 %v12479_v0  ;;  %1672 = vmatpush1.bf16.msra.mxu1 %v8840_v28  ;;  %v8874_v1 = vld [vmem:[%s12514_s30 + $0xb4] ss:$8 sps:$4 sm:$0xff]   ;;  %v8876_v2 = vld [vmem:[%s12514_s30 + $0xb0] ss:$8 sps:$4 sm:$0xff]   ;;  %v8877_v7 = vld [vmem:[%s12514_s30 + $0xa4] ss:$8 sps:$4 sm:$0xff]  }
  0x79   : > { %1673 = vmatprep.subr.bf16.mxu1 %v8844_v32  ;;  %2418 = vmatprep.subr.bf16.mxu0 %v8873_v63  ;;  %v709_v5 = vld [vmem:[%s9596_s3 + $0x90] sm:$0xff]  ;;  %v710_v6 = vld [vmem:[%s9596_s3 + $0x98] sm:$0xff]  ;;  %v8879_v8 = vld [vmem:[%s12514_s30 + $0xa0] ss:$8 sps:$4 sm:$0xff]  }
  0x7a   : > { %2419 = vmatpush1.bf16.msra.mxu0 %v8871_v61  ;;  %v9767_v9 = vpack.c.bf16 %v710_v6, %v709_v5  ;;  %v8880_v11 = vld [vmem:[%s12514_s30 + $0x94] ss:$8 sps:$4 sm:$0xff]   ;;  %v8882_v12 = vld [vmem:[%s12514_s30 + $0x90] ss:$8 sps:$4 sm:$0xff]   ;;  %v711_v14 = vld [vmem:[%s9596_s3 + $0xa0] sm:$0xff] }
  0x7b   : > { %v712_v15 = vld [vmem:[%s9596_s3 + $0xa8] sm:$0xff]  ;;  %v713_v22 = vld [vmem:[%s9596_s3 + $0xb0] sm:$0xff]  ;;  %v714_v23 = vld [vmem:[%s9596_s3 + $0xb8] sm:$0xff] }
  0x7c   : > { %1674 = vmatpush1.bf16.msra.mxu1 %v8846_v33  ;;  %v8883_v16 = vld [vmem:[%s12514_s30 + $0x84] ss:$8 sps:$4 sm:$0xff]   ;;  %v8885_v17 = vld [vmem:[%s12514_s30 + $0x80] ss:$8 sps:$4 sm:$0xff]   ;;  %v9786_v19 = vpack.c.bf16 %v712_v15, %v711_v14  ;;  %v9799_v24 = vpack.c.bf16 %v714_v23, %v713_v22  ;;  %v8889_v29 = vld [vmem:[%s12515_s5 + $0x30] ss:$8 sps:$4 sm:$0xff]   ;;  %v790_v22 = vlaneseq }
  0x7d   : > { %1675 = vmatprep.subr.bf16.mxu1 %v8847_v35  ;;  %v8886_v20 = vld [vmem:[%s12515_s5 + $0x40] ss:$8 sps:$4 sm:$0xff]   ;;  %v8888_v21 = vld [vmem:[%s12515_s5 + $0x44] ss:$8 sps:$4 sm:$0xff]   ;;  %v8891_v30 = vld [vmem:[%s12515_s5 + $0x34] ss:$8 sps:$4 sm:$0xff]  }
  0x7e   : > { %2420 = vmatprep.subr.bf16.mxu0 %v8888_v21  ;;  %v715_v26 = vld [vmem:[%s9596_s3 + $0xc0] sm:$0xff]  ;;  %v716_v27 = vld [vmem:[%s9596_s3 + $0xc8] sm:$0xff]  ;;  %v717_v31 = vld [vmem:[%s9596_s3 + $0xd0] sm:$0xff] }
  0x7f   : > { %8080 = vmatmul.mubr.msk.bf16.gmra.mxu0 %vm809_vm2, %v9622_v18  ;;  %v9806_v28 = vpack.c.bf16 %v716_v27, %v715_v26  ;;  %v718_v32 = vld [vmem:[%s9596_s3 + $0xd8] sm:$0xff]  ;;  %v719_v35 = vld [vmem:[%s9596_s3 + $0xe0] sm:$0xff]  ;;  %v724_v45 = vld [vmem:[%s9596_s3 + $0x108] sm:$0xff]  ;;  %v791_v27 = vshrl.u32 %v790_v22, 7 }
  0x80   : > { %978 = vmatprep.mubr.bf16.mxu0 %v12479_v0  ;;  %1676 = vmatpush1.bf16.msra.mxu1 %v8849_v36  ;;  %v9819_v33 = vpack.c.bf16 %v718_v32, %v717_v31  ;;  %v720_v36 = vld [vmem:[%s9596_s3 + $0xe8] sm:$0xff]  ;;  %v722_v42 = vld [vmem:[%s9596_s3 + $0xf8] sm:$0xff]  ;;  %v731_v62 = vld [vmem:[%s9596_s3 + $0x140] sm:$0xff] }
  0x81   : > { %1677 = vmatprep.subr.bf16.mxu1 %v8850_v37  ;;  %2421 = vmatpush1.bf16.msra.mxu0 %v8886_v20  ;;  %v9826_v37 = vpack.c.bf16 %v720_v36, %v719_v35  ;;  %v8892_v38 = vld [vmem:[%s12515_s5 + $0x20] ss:$8 sps:$4 sm:$0xff]   ;;  %v8894_v39 = vld [vmem:[%s12515_s5 + $0x24] ss:$8 sps:$4 sm:$0xff]   ;;  %v8895_v47 = vld [vmem:[%s12515_s5 + $0x10] ss:$8 sps:$4 sm:$0xff]  }
  0x82   : > { %2422 = vmatprep.subr.bf16.mxu0 %v8891_v30  ;;  %v728_v54 = vld [vmem:[%s9596_s3 + $0x128] sm:$0xff]  ;;  %v8903_v5 = vld [vmem:[%s12515_s5 + $0xf4] ss:$8 sps:$4 sm:$0xff]   ;;  %v739_v23 = vld [vmem:[%s9596_s3 + $0x180] sm:$0xff]  ;;  %v9928_v30 = vsub.s32 1, %v791_v27  ;;  %v9936_v35 = vsub.s32 0, %v791_v27 }
  0x83   : > { %v8900_v58 = vld [vmem:[%s12515_s5 + $0x4] ss:$8 sps:$4 sm:$0xff]   ;;  %v733_v6 = vld [vmem:[%s9596_s3 + $0x150] sm:$0xff]  ;;  %v8904_v15 = vld [vmem:[%s12515_s5 + $0xe0] ss:$8 sps:$4 sm:$0xff]  }
  0x84   : > { %1678 = vmatpush1.bf16.msra.mxu1 %v8852_v40  ;;  %v721_v40 = vld [vmem:[%s9596_s3 + $0xf0] sm:$0xff]  ;;  %v732_v63 = vld [vmem:[%s9596_s3 + $0x148] sm:$0xff]  ;;  %v738_v20 = vld [vmem:[%s9596_s3 + $0x178] sm:$0xff]  ;;  %12516 = vst [vmem:[#allocation21_spill] sm:$0xff] %v9928_v30 }
  0x85   : > { %1679 = vmatprep.subr.bf16.mxu1 %v8853_v43  ;;  %2423 = vmatpush1.bf16.msra.mxu0 %v8889_v29  ;;  %v9839_v43 = vpack.c.bf16 %v722_v42, %v721_v40  ;;  %v740_v26 = vld [vmem:[%s9596_s3 + $0x188] sm:$0xff]  ;;  %v8907_v31 = vld [vmem:[%s12515_s5 + $0xd0] ss:$8 sps:$4 sm:$0xff]   ;;  %v8909_v32 = vld [vmem:[%s12515_s5 + $0xd4] ss:$8 sps:$4 sm:$0xff]  }
  0x86   : > { %2424 = vmatprep.subr.bf16.mxu0 %v8894_v39  ;;  %v9926_v29 = vpack.c.bf16 %v740_v26, %v739_v23  ;;  %v788_v36 = vld [vmem:[%s12517_s1] sm:$0x3]  ;;  %v741_v40 = vld [vmem:[%s9596_s3 + $0x190] sm:$0xff]  ;;  %v742_v42 = vld [vmem:[%s9596_s3 + $0x198] sm:$0xff] }
  0x87   : > { %8081 = vmatmul.mubr.msk.bf16.gmra.mxu0 %vm809_vm2, %v9641_v25  ;;  %v9944_v39 = vrot.slane %v788_v36, %v9928_v30  ;;  %v8912_v22 = vld [vmem:[%s12515_s5 + $0xc4] ss:$8 sps:$4 sm:$0xff]  }
  0x88   : > { %988 = vmatprep.mubr.bf16.mxu0 %v12479_v0  ;;  %1680 = vmatpush1.bf16.msra.mxu1 %v8855_v44  ;;  %v723_v44 = vld [vmem:[%s9596_s3 + $0x100] sm:$0xff] }
  0x89   : > { %1681 = vmatprep.subr.bf16.mxu1 %v8859_v48  ;;  %2425 = vmatpush1.bf16.msra.mxu0 %v8892_v38  ;;  %v9846_v46 = vpack.c.bf16 %v724_v45, %v723_v44  ;;  %v8897_v48 = vld [vmem:[%s12515_s5 + $0x14] ss:$8 sps:$4 sm:$0xff]   ;;  %v9950_v44 = vrot.slane %v788_v36, %v9936_v35 }
  0x8a   : > { %2426 = vmatprep.subr.bf16.mxu0 %v8897_v48  ;;  %v9952_v48 = vpack.c.bf16 %v742_v42, %v741_v40  ;;  %v745_v40 = vld [vmem:[%s9596_s3 + $0x1b0] sm:$0xff]  ;;  %v746_v42 = vld [vmem:[%s9596_s3 + $0x1b8] sm:$0xff] }
  0x8c   : > { %1682 = vmatpush2.bf16.msra.mxu1 %v8861_v49  ;;  %v725_v49 = vld [vmem:[%s9596_s3 + $0x110] sm:$0xff] }
  0x8d   : > { %1683 = vmatprep.subr.bf16.mxu1 %v8862_v51  ;;  %v726_v51 = vld [vmem:[%s9596_s3 + $0x118] sm:$0xff]  ;;  %2427 = vmatpush1.bf16.msra.mxu0 %v8895_v47 }
  0x8e   : > { %2428 = vmatprep.subr.bf16.mxu0 %v8900_v58 }
  0x8f   : > { %8082 = vmatmul.mubr.msk.bf16.gmra.mxu0 %vm809_vm2, %v9666_v34 }
  0x90   : > { %998 = vmatprep.mubr.bf16.mxu0 %v12479_v0  ;;  %1684 = vmatpush2.bf16.msra.mxu1 %v8864_v52  ;;  %v9859_v52 = vpack.c.bf16 %v726_v51, %v725_v49 }
  0x91   : > { %1685 = vmatprep.subr.bf16.mxu1 %v8865_v53  ;;  %v727_v53 = vld [vmem:[%s9596_s3 + $0x120] sm:$0xff] }
  0x92   : > { %v9866_v55 = vpack.c.bf16 %v728_v54, %v727_v53 }
  0x94   : > { %1686 = vmatpush2.bf16.msra.mxu1 %v8867_v56  ;;  %v8898_v56 = vld [vmem:[%s12515_s5] ss:$8 sps:$4 sm:$0xff]  }
  0x95   : > { %1687 = vmatprep.subr.bf16.mxu1 %v8868_v59  ;;  %v729_v59 = vld [vmem:[%s9596_s3 + $0x130] sm:$0xff]  ;;  %2429 = vmatpush1.bf16.msra.mxu0 %v8898_v56 }
  0x96   : > { %2430 = vmatprep.subr.bf16.mxu0 %v8903_v5 }
  0x97   : > { %8083 = vmatmul.mubr.msk.bf16.gmra.mxu0 %vm809_vm2, %v9685_v41 }
  0x98   : > { %1008 = vmatprep.mubr.bf16.mxu0 %v12479_v0  ;;  %1688 = vmatpush2.bf16.msra.mxu1 %v8870_v60  ;;  %v730_v60 = vld [vmem:[%s9596_s3 + $0x138] sm:$0xff] }
  0x99   : > { %1689 = vmatprep.subr.bf16.mxu1 %v8874_v1  ;;  %v9879_v61 = vpack.c.bf16 %v730_v60, %v729_v59  ;;  %v9886_v1 = vpack.c.bf16 %v732_v63, %v731_v62  ;;  %v743_v63 = vld [vmem:[%s9596_s3 + $0x1a0] sm:$0xff] }
  0x9c   : > { %1690 = vmatpush2.bf16.msra.mxu1 %v8876_v2  ;;  %v8901_v2 = vld [vmem:[%s12515_s5 + $0xf0] ss:$8 sps:$4 sm:$0xff]  }
  0x9d   : > { %1691 = vmatprep.subr.bf16.mxu1 %v8877_v7  ;;  %v734_v7 = vld [vmem:[%s9596_s3 + $0x158] sm:$0xff]  ;;  %2431 = vmatpush2.bf16.msra.mxu0 %v8901_v2  ;;  %v744_v2 = vld [vmem:[%s9596_s3 + $0x1a8] sm:$0xff] }
  0x9f   : > { %8084 = vmatmul.mubr.msk.bf16.gmra.mxu0 %vm809_vm2, %v9710_v50 }
  0xa0   : > { %1018 = vmatprep.mubr.bf16.mxu0 %v12479_v0  ;;  %1692 = vmatpush2.bf16.msra.mxu1 %v8879_v8  ;;  %v9899_v8 = vpack.c.bf16 %v734_v7, %v733_v6 }
  0xa1   : > { %1693 = vmatprep.subr.bf16.mxu1 %v8880_v11  ;;  %v735_v11 = vld [vmem:[%s9596_s3 + $0x160] sm:$0xff] }
  0xa4   : > { %1694 = vmatpush2.bf16.msra.mxu1 %v8882_v12  ;;  %v736_v12 = vld [vmem:[%s9596_s3 + $0x168] sm:$0xff] }
  0xa5   : > { %1695 = vmatprep.subr.bf16.mxu1 %v8883_v16  ;;  %v9906_v14 = vpack.c.bf16 %v736_v12, %v735_v11  ;;  %v8906_v16 = vld [vmem:[%s12515_s5 + $0xe4] ss:$8 sps:$4 sm:$0xff]  }
  0xa6   : > { %2432 = vmatprep.subr.bf16.mxu0 %v8906_v16 }
  0xa7   : > { %8085 = vmatmul.mubr.msk.bf16.gmra.mxu0 %vm809_vm2, %v9729_v57 }
  0xa8   : > { %1028 = vmatprep.mubr.bf16.mxu0 %v12479_v0  ;;  %1696 = vmatpush2.bf16.msra.mxu1 %v8885_v17  ;;  %v737_v17 = vld [vmem:[%s9596_s3 + $0x170] sm:$0xff] }
  0xa9   : > { %2433 = vmatpush2.bf16.msra.mxu0 %v8904_v15  ;;  %v9919_v21 = vpack.c.bf16 %v738_v20, %v737_v17  ;;  %v9963_v15 = vpack.c.bf16 %v744_v2, %v743_v63  ;;  %v8910_v20 = vld [vmem:[%s12515_s5 + $0xc0] ss:$8 sps:$4 sm:$0xff]  }
  0xaa   : > { %2434 = vmatprep.subr.bf16.mxu0 %v8909_v32 }
  0xad   : > { %2435 = vmatpush2.bf16.msra.mxu0 %v8907_v31 }
  0xae   : > { %2436 = vmatprep.subr.bf16.mxu0 %v8912_v22 }
  0xaf   : > { %8086 = vmatmul.mubr.msk.bf16.gmra.mxu0 %vm809_vm2, %v9754_v4 }
  0xb0   : > { %1038 = vmatprep.mubr.bf16.mxu0 %v12479_v0 }
  0xb1   : > { %2437 = vmatpush2.bf16.msra.mxu0 %v8910_v20 }
  0xb7   : > { %8087 = vmatmul.mubr.msk.bf16.gmra.mxu0 %vm809_vm2, %v9767_v9 }
  0xb8   : > { %1048 = vmatprep.mubr.bf16.mxu0 %v12479_v0 }
  0xbf   : > { %8088 = vmatmul.mubr.msk.bf16.gmra.mxu0 %vm809_vm2, %v9786_v19 }
  0xc0   : > { %1058 = vmatprep.mubr.bf16.mxu0 %v12479_v0 }
  0xc7   : > { %8089 = vmatmul.mubr.msk.bf16.gmra.mxu0 %vm809_vm2, %v9799_v24 }
  0xc8   : > { %1068 = vmatprep.mubr.bf16.mxu0 %v12479_v0 }
  0xcf   : > { %8090 = vmatmul.mubr.msk.bf16.gmra.mxu0 %vm809_vm2, %v9806_v28 }
  0xd0   : > { %1078 = vmatprep.mubr.bf16.mxu0 %v12479_v0 }
  0xd7   : > { %8091 = vmatmul.mubr.msk.bf16.gmra.mxu0 %vm809_vm2, %v9819_v33 }
  0xd8   : > { %1088 = vmatprep.mubr.bf16.mxu0 %v12479_v0 }
  0xdf   : > { %8092 = vmatmul.mubr.msk.bf16.gmra.mxu0 %vm809_vm2, %v9826_v37 }
  0xe0   : > { %1098 = vmatprep.mubr.bf16.mxu0 %v12479_v0 }
  0xe7   : > { %8093 = vmatmul.mubr.msk.bf16.gmra.mxu0 %vm809_vm2, %v9839_v43 }
  0xe8   : > { %1108 = vmatprep.mubr.bf16.mxu0 %v12479_v0 }
  0xef   : > { %8094 = vmatmul.mubr.msk.bf16.gmra.mxu0 %vm809_vm2, %v9846_v46 }
  0xf0   : > { %1118 = vmatprep.mubr.bf16.mxu0 %v12479_v0 }
  0xf7   : > { %8095 = vmatmul.mubr.msk.bf16.gmra.mxu0 %vm809_vm2, %v9859_v52 }
  0xf8   : > { %1128 = vmatprep.mubr.bf16.mxu0 %v12479_v0 }
  0xff   : > { %8096 = vmatmul.mubr.msk.bf16.gmra.mxu0 %vm809_vm2, %v9866_v55 }
 0x100   : > { %1138 = vmatprep.mubr.bf16.mxu0 %v12479_v0 }
 0x107   : > { %8097 = vmatmul.mubr.msk.bf16.gmra.mxu0 %vm809_vm2, %v9879_v61 }
 0x108   : > { %1148 = vmatprep.mubr.bf16.mxu0 %v12479_v0 }
 0x10f   : > { %8098 = vmatmul.mubr.msk.bf16.gmra.mxu0 %vm809_vm2, %v9886_v1 }
 0x110   : > { %1158 = vmatprep.mubr.bf16.mxu0 %v12479_v0 }
 0x117   : > { %8099 = vmatmul.mubr.msk.bf16.gmra.mxu0 %vm809_vm2, %v9899_v8 }
 0x118   : > { %1168 = vmatprep.mubr.bf16.mxu0 %v12479_v0 }
 0x11f   : > { %8100 = vmatmul.mubr.msk.bf16.gmra.mxu0 %vm809_vm2, %v9906_v14 }
 0x120   : > { %1178 = vmatprep.mubr.bf16.mxu0 %v12479_v0 }
 0x127   : > { %8101 = vmatmul.mubr.msk.bf16.gmra.mxu0 %vm809_vm2, %v9919_v21 }
 0x128   : > { %1188 = vmatprep.mubr.bf16.mxu0 %v12479_v0 }
 0x12f   : > { %v950_v38 = vpop.f32.mrf.mxu0  ;;  %8102 = vmatmul.mubr.msk.bf16.gmra.mxu0 %vm809_vm2, %v9926_v29 }
 0x130   : > { %1198 = vmatprep.mubr.bf16.mxu0 %v12479_v0  ;;  %v951_v53 = vadd.f32 %v950_v38, %v9950_v44 }
 0x131   : > { %v952_v45 = vpop.f32.mrf.mxu0 }
 0x132   : > { %v953_v49 = vadd.f32 %v952_v45, %v9944_v39  ;;  %v1269_v5 = vmax.f32 %v951_v53, 0.0 }
 0x133   : > { %v954_v47 = vpop.f32.mrf.mxu0 }
 0x134   : > { %v955_v51 = vadd.f32 %v954_v47, %v9950_v44  ;;  %v1270_v60 = vmax.f32 %v953_v49, 0.0 }
 0x135   : > { %v956_v54 = vpop.f32.mrf.mxu0 }
 0x136   : > { %v957_v56 = vadd.f32 %v956_v54, %v9944_v39  ;;  %v1271_v58 = vmax.f32 %v955_v51, 0.0  ;;  %v9980_v54 = vpack.c.bf16 %v746_v42, %v745_v40 }
 0x137   : > { %v960_v59 = vpop.f32.mrf.mxu0  ;;  %8103 = vmatmul.mubr.msk.bf16.gmra.mxu0 %vm809_vm2, %v9952_v48 }
 0x138   : > { %v1272_v62 = vmax.f32 %v957_v56, 0.0  ;;  %1208 = vmatprep.mubr.bf16.mxu0 %v12479_v0  ;;  %v1397_v11 = vpack.c.bf16 %v1271_v58, %v1269_v5  ;;  %v961_v23 = vadd.f32 %v960_v59, %v9950_v44 }
 0x139   : > { %v962_v6 = vpop.f32.mrf.mxu0 }
 0x13a   : > { %v1398_v7 = vpack.c.bf16 %v1272_v62, %v1270_v60  ;;  %v963_v16 = vadd.f32 %v962_v6, %v9944_v39  ;;  %v1273_v45 = vmax.f32 %v961_v23, 0.0 }
 0x13b   : > { %v964_v12 = vpop.f32.mrf.mxu0 }
 0x13c   : > { %v965_v17 = vadd.f32 %v964_v12, %v9950_v44  ;;  %1697 = vmatprep.mubr.bf16.mxu1 %v1398_v7  ;;  %v1274_v36 = vmax.f32 %v963_v16, 0.0  ;;  %v747_v7 = vld [vmem:[%s9596_s3 + $0x1c0] sm:$0xff] }
 0x13d   : > { %v966_v26 = vpop.f32.mrf.mxu0  ;;  %1698 = vmatmul.mubr.bf16.vlgmr.msra.gmra.mxu1 %v1397_v11  ;;  %v748_v11 = vld [vmem:[%s9596_s3 + $0x1c8] sm:$0xff] }
 0x13e   : > { %v967_v27 = vadd.f32 %v966_v26, %v9944_v39  ;;  %v1275_v31 = vmax.f32 %v965_v17, 0.0  ;;  %v9991_v23 = vpack.c.bf16 %v748_v11, %v747_v7 }
 0x13f   : > { %v970_v32 = vpop.f32.mrf.mxu0  ;;  %8104 = vmatmul.mubr.msk.bf16.gmra.mxu0 %vm809_vm2, %v9963_v15 }
 0x140   : > { %v1276_v38 = vmax.f32 %v967_v27, 0.0  ;;  %1218 = vmatprep.mubr.bf16.mxu0 %v12479_v0  ;;  %v1399_v51 = vpack.c.bf16 %v1275_v31, %v1273_v45  ;;  %v971_v59 = vadd.f32 %v970_v32, %v9950_v44  ;;  %v8913_v31 = vld [vmem:[%s12515_s5 + $0xb0] ss:$8 sps:$4 sm:$0xff]   ;;  %v8915_v32 = vld [vmem:[%s12515_s5 + $0xb4] ss:$8 sps:$4 sm:$0xff]  }
 0x141   : > { %v972_v47 = vpop.f32.mrf.mxu0  ;;  %2438 = vmatprep.subr.bf16.mxu0 %v8915_v32 }
 0x142   : > { %v1400_v49 = vpack.c.bf16 %v1276_v38, %v1274_v36  ;;  %v973_v56 = vadd.f32 %v972_v47, %v9944_v39  ;;  %v1277_v12 = vmax.f32 %v971_v59, 0.0  ;;  %2439 = vmatpush2.bf16.msra.mxu0 %v8913_v31 }
 0x143   : > { %v974_v53 = vpop.f32.mrf.mxu0 }
 0x144   : > { %v975_v58 = vadd.f32 %v974_v53, %v9950_v44  ;;  %1707 = vmatprep.mubr.bf16.mxu1 %v1400_v49  ;;  %v1278_v5 = vmax.f32 %v973_v56, 0.0  ;;  %v750_v53 = vld [vmem:[%s9596_s3 + $0x1d8] sm:$0xff] }
 0x145   : > { %v976_v60 = vpop.f32.mrf.mxu0  ;;  %1708 = vmatmul.mubr.bf16.gmra.mxu1 %v1399_v51  ;;  %v749_v51 = vld [vmem:[%s9596_s3 + $0x1d0] sm:$0xff] }
 0x146   : > { %v977_v62 = vadd.f32 %v976_v60, %v9944_v39  ;;  %v1279_v63 = vmax.f32 %v975_v58, 0.0 }
 0x147   : > { %v980_v2 = vpop.f32.mrf.mxu0  ;;  %8105 = vmatmul.mubr.msk.bf16.gmra.mxu0 %vm809_vm2, %v9980_v54 }
 0x148   : > { %v1280_v6 = vmax.f32 %v977_v62, 0.0  ;;  %1228 = vmatprep.mubr.bf16.mxu0 %v12479_v0  ;;  %v1401_v20 = vpack.c.bf16 %v1279_v63, %v1277_v12  ;;  %v981_v36 = vadd.f32 %v980_v2, %v9950_v44  ;;  %v10008_v63 = vpack.c.bf16 %v750_v53, %v749_v51  ;;  %v8919_v51 = vld [vmem:[%s12515_s5 + $0xa0] ss:$8 sps:$4 sm:$0xff]   ;;  %v8921_v53 = vld [vmem:[%s12515_s5 + $0xa4] ss:$8 sps:$4 sm:$0xff]  }
 0x149   : > { %v982_v16 = vpop.f32.mrf.mxu0  ;;  %2440 = vmatprep.subr.bf16.mxu0 %v8921_v53 }
 0x14a   : > { %v1402_v17 = vpack.c.bf16 %v1280_v6, %v1278_v5  ;;  %v983_v26 = vadd.f32 %v982_v16, %v9944_v39  ;;  %v1281_v56 = vmax.f32 %v981_v36, 0.0  ;;  %v8916_v36 = vld [vmem:[%s12456_s7 + $0x70] ss:$8 sps:$4 sm:$0xff]   ;;  %2441 = vmatpush2.bf16.msra.mxu0 %v8919_v51 }
 0x14b   : > { %v984_v22 = vpop.f32.mrf.mxu0 }
 0x14c   : > { %v985_v27 = vadd.f32 %v984_v22, %v9950_v44  ;;  %1717 = vmatprep.mubr.bf16.mxu1 %v1402_v17  ;;  %v1282_v47 = vmax.f32 %v983_v26, 0.0  ;;  %v751_v22 = vld [vmem:[%s9596_s3 + $0x1e0] sm:$0xff]  ;;  %v752_v26 = vld [vmem:[%s9596_s3 + $0x1e8] sm:$0xff] }
 0x14d   : > { %v986_v38 = vpop.f32.mrf.mxu0  ;;  %1718 = vmatmul.mubr.bf16.gmra.mxu1 %v1401_v20 }
 0x14e   : > { %v987_v40 = vadd.f32 %v986_v38, %v9944_v39  ;;  %v1283_v42 = vmax.f32 %v985_v27, 0.0  ;;  %v8918_v38 = vld [vmem:[%s12456_s7 + $0x74] ss:$8 sps:$4 sm:$0xff]  }
 0x14f   : > { %v990_v45 = vpop.f32.mrf.mxu0  ;;  %8106 = vmatmul.mubr.msk.bf16.gmra.mxu0 %vm809_vm2, %v9991_v23  ;;  %3163 = vmatprep.subr.bf16.mxu1 %v8918_v38 }
 0x150   : > { %v1284_v49 = vmax.f32 %v987_v40, 0.0  ;;  %1238 = vmatprep.mubr.bf16.mxu0 %v12479_v0  ;;  %v1403_v60 = vpack.c.bf16 %v1283_v42, %v1281_v56  ;;  %v991_v6 = vadd.f32 %v990_v45, %v9950_v44  ;;  %v10025_v45 = vpack.c.bf16 %v752_v26, %v751_v22  ;;  %3164 = vmatpush1.bf16.msra.mxu1 %v8916_v36 }
 0x151   : > { %v992_v58 = vpop.f32.mrf.mxu0 }
 0x152   : > { %v1404_v59 = vpack.c.bf16 %v1284_v49, %v1282_v47  ;;  %v993_v2 = vadd.f32 %v992_v58, %v9944_v39  ;;  %v1285_v27 = vmax.f32 %v991_v6, 0.0  ;;  %12518 = vst [vmem:[#allocation22_spill] sm:$0xff] %v10025_v45  ;;  %v753_v6 = vld [vmem:[%s9596_s3 + $0x1f0] sm:$0xff] }
 0x153   : > { %v994_v62 = vpop.f32.mrf.mxu0 }
 0x154   : > { %v995_v5 = vadd.f32 %v994_v62, %v9950_v44  ;;  %1727 = vmatprep.mubr.bf16.mxu1 %v1404_v59  ;;  %v1286_v17 = vmax.f32 %v993_v2, 0.0 }
 0x155   : > { %v996_v7 = vpop.f32.mrf.mxu0  ;;  %1728 = vmatmul.mubr.bf16.gmra.mxu1 %v1403_v60 }
 0x156   : > { %v997_v11 = vadd.f32 %v996_v7, %v9944_v39  ;;  %v1287_v12 = vmax.f32 %v995_v5, 0.0  ;;  %v754_v7 = vld [vmem:[%s9596_s3 + $0x1f8] sm:$0xff]  ;;  %s8517_s3 = sshll.u32 %s9498_s2, 12 }
 0x157   : > { %v1000_v16 = vpop.f32.mrf.mxu0  ;;  %8107 = vmatmul.mubr.msk.bf16.gmra.mxu0 %vm809_vm2, %v10008_v63  ;;  %v10042_v22 = vpack.c.bf16 %v754_v7, %v753_v6  ;;  %v8927_v6 = vld [vmem:[%s12515_s5 + $0x94] ss:$8 sps:$4 sm:$0xff]   ;;  %s12402_s1 = scalar_lea.hbm %s12469_s20, %s8517_s3 }
 0x158   : > { %v1288_v20 = vmax.f32 %v997_v11, 0.0  ;;  %1248 = vmatprep.mubr.bf16.mxu0 %v12479_v0  ;;  %v1405_v40 = vpack.c.bf16 %v1287_v12, %v1285_v27  ;;  %v1001_v56 = vadd.f32 %v1000_v16, %v9950_v44  ;;  %2442 = vmatprep.subr.bf16.mxu0 %v8927_v6  ;;  %v8930_v6 = vld [vmem:[%s12456_s7 + $0x54] ss:$8 sps:$4 sm:$0xff]  }
 0x159   : > { %v1002_v31 = vpop.f32.mrf.mxu0  ;;  %12519 = vst [vmem:[#allocation23_spill] sm:$0xff] %v10042_v22 }
 0x15a   : > { %v1406_v32 = vpack.c.bf16 %v1288_v20, %v1286_v17  ;;  %v1003_v47 = vadd.f32 %v1002_v31, %v9944_v39  ;;  %v1289_v11 = vmax.f32 %v1001_v56, 0.0  ;;  %v8922_v56 = vld [vmem:[%s12456_s7 + $0x60] ss:$8 sps:$4 sm:$0xff]  }
 0x15b   : > { %v1004_v42 = vpop.f32.mrf.mxu0 }
 0x15c   : > { %v1005_v49 = vadd.f32 %v1004_v42, %v9950_v44  ;;  %1737 = vmatprep.mubr.bf16.mxu1 %v1406_v32  ;;  %v1290_v2 = vmax.f32 %v1003_v47, 0.0 }
 0x15d   : > { %v1006_v58 = vpop.f32.mrf.mxu0  ;;  %1738 = vmatmul.mubr.bf16.gmra.mxu1 %v1405_v40 }
 0x15e   : > { %v1007_v59 = vadd.f32 %v1006_v58, %v9944_v39  ;;  %v1291_v60 = vmax.f32 %v1005_v49, 0.0  ;;  %v8924_v58 = vld [vmem:[%s12456_s7 + $0x64] ss:$8 sps:$4 sm:$0xff]  }
 0x15f   : > { %v1010_v62 = vpop.f32.mrf.mxu0  ;;  %8108 = vmatmul.mubr.msk.bf16.gmra.mxu0 %vm809_vm2, %v10025_v45  ;;  %3165 = vmatprep.subr.bf16.mxu1 %v8924_v58 }
 0x160   : > { %v1292_v5 = vmax.f32 %v1007_v59, 0.0  ;;  %1258 = vmatprep.mubr.bf16.mxu0 %v12479_v0  ;;  %v1407_v17 = vpack.c.bf16 %v1291_v60, %v1289_v11  ;;  %v1011_v31 = vadd.f32 %v1010_v62, %v9950_v44  ;;  %3166 = vmatpush1.bf16.msra.mxu1 %v8922_v56 }
 0x161   : > { %v1012_v12 = vpop.f32.mrf.mxu0  ;;  %3167 = vmatprep.subr.bf16.mxu1 %v8930_v6 }
 0x162   : > { %v1408_v16 = vpack.c.bf16 %v1292_v5, %v1290_v2  ;;  %v1013_v26 = vadd.f32 %v1012_v12, %v9944_v39  ;;  %v1293_v49 = vmax.f32 %v1011_v31, 0.0  ;;  %v8925_v5 = vld [vmem:[%s12515_s5 + $0x90] ss:$8 sps:$4 sm:$0xff]  }
 0x163   : > { %v1014_v20 = vpop.f32.mrf.mxu0  ;;  %2443 = vmatpush2.bf16.msra.mxu0 %v8925_v5  ;;  %v8928_v5 = vld [vmem:[%s12456_s7 + $0x50] ss:$8 sps:$4 sm:$0xff]  }
 0x164   : > { %v1015_v27 = vadd.f32 %v1014_v20, %v9950_v44  ;;  %1747 = vmatprep.mubr.bf16.mxu1 %v1408_v16  ;;  %v1294_v42 = vmax.f32 %v1013_v26, 0.0  ;;  %3168 = vmatpush1.bf16.msra.mxu1 %v8928_v5 }
 0x165   : > { %v1016_v32 = vpop.f32.mrf.mxu0  ;;  %1748 = vmatmul.mubr.bf16.gmra.mxu1 %v1407_v17 }
 0x166   : > { %v1017_v36 = vadd.f32 %v1016_v32, %v9944_v39  ;;  %v1295_v38 = vmax.f32 %v1015_v27, 0.0 }
 0x167   : > { %v1020_v40 = vpop.f32.mrf.mxu0  ;;  %8109 = vmatmul.mubr.msk.bf16.gmra.mxu0 %vm809_vm2, %v10042_v22 }
 0x168   : > { %v1296_v47 = vmax.f32 %v1017_v36, 0.0  ;;  %v1409_v59 = vpack.c.bf16 %v1295_v38, %v1293_v49  ;;  %v1021_v7 = vadd.f32 %v1020_v40, %v9950_v44 }
 0x169   : > { %v1022_v51 = vpop.f32.mrf.mxu0 }
 0x16a   : > { %v1410_v53 = vpack.c.bf16 %v1296_v47, %v1294_v42  ;;  %v1023_v62 = vadd.f32 %v1022_v51, %v9944_v39  ;;  %v1297_v27 = vmax.f32 %v1021_v7, 0.0 }
 0x16b   : > { %v1024_v60 = vpop.f32.mrf.mxu0 }
 0x16c   : > { %v1025_v2 = vadd.f32 %v1024_v60, %v9950_v44  ;;  %1757 = vmatprep.mubr.bf16.mxu1 %v1410_v53  ;;  %v1298_v20 = vmax.f32 %v1023_v62, 0.0 }
 0x16d   : > { %v1026_v11 = vpop.f32.mrf.mxu0  ;;  %1758 = vmatmul.mubr.bf16.gmra.mxu1 %v1409_v59 }
 0x16e   : > { %v1027_v12 = vadd.f32 %v1026_v11, %v9944_v39  ;;  %v1299_v16 = vmax.f32 %v1025_v2, 0.0 }
 0x16f   : > { %v1030_v17 = vpop.f32.mrf.mxu0 }
 0x170   : > { %v1300_v26 = vmax.f32 %v1027_v12, 0.0  ;;  %v1411_v36 = vpack.c.bf16 %v1299_v16, %v1297_v27  ;;  %v1031_v47 = vadd.f32 %v1030_v17, %v9950_v44  ;;  %v8931_v17 = vld [vmem:[%s12515_s5 + $0x80] ss:$8 sps:$4 sm:$0xff]  }
 0x171   : > { %v1032_v31 = vpop.f32.mrf.mxu0 }
 0x172   : > { %v1412_v32 = vpack.c.bf16 %v1300_v26, %v1298_v20  ;;  %v1033_v42 = vadd.f32 %v1032_v31, %v9944_v39  ;;  %v1301_v60 = vmax.f32 %v1031_v47, 0.0  ;;  %v8933_v20 = vld [vmem:[%s12515_s5 + $0x84] ss:$8 sps:$4 sm:$0xff]  }
 0x173   : > { %v1034_v38 = vpop.f32.mrf.mxu0  ;;  %2444 = vmatprep.subr.bf16.mxu0 %v8933_v20  ;;  %v8936_v20 = vld [vmem:[%s12456_s7 + $0x44] ss:$8 sps:$4 sm:$0xff]  }
 0x174   : > { %v1035_v40 = vadd.f32 %v1034_v38, %v9950_v44  ;;  %1767 = vmatprep.mubr.bf16.mxu1 %v1412_v32  ;;  %v1302_v58 = vmax.f32 %v1033_v42, 0.0  ;;  %2445 = vmatpush2.bf16.msra.mxu0 %v8931_v17  ;;  %v8934_v17 = vld [vmem:[%s12456_s7 + $0x40] ss:$8 sps:$4 sm:$0xff]  }
 0x175   : > { %v1036_v49 = vpop.f32.mrf.mxu0  ;;  %1768 = vmatmul.mubr.bf16.gmra.mxu1 %v1411_v36  ;;  %3169 = vmatprep.subr.bf16.mxu1 %v8936_v20 }
 0x176   : > { %v1037_v51 = vadd.f32 %v1036_v49, %v9944_v39  ;;  %v1303_v53 = vmax.f32 %v1035_v40, 0.0  ;;  %3170 = vmatpush1.bf16.msra.mxu1 %v8934_v17 }
 0x177   : > { %v1040_v56 = vpop.f32.mrf.mxu0 }
 0x178   : > { %v1304_v59 = vmax.f32 %v1037_v51, 0.0  ;;  %v1413_v7 = vpack.c.bf16 %v1303_v53, %v1301_v60  ;;  %v1041_v26 = vadd.f32 %v1040_v56, %v9950_v44 }
 0x179   : > { %v1042_v62 = vpop.f32.mrf.mxu0 }
 0x17a   : > { %v1414_v2 = vpack.c.bf16 %v1304_v59, %v1302_v58  ;;  %v1043_v12 = vadd.f32 %v1042_v62, %v9944_v39  ;;  %v1305_v40 = vmax.f32 %v1041_v26, 0.0 }
 0x17b   : > { %v1044_v11 = vpop.f32.mrf.mxu0 }
 0x17c   : > { %v1045_v16 = vadd.f32 %v1044_v11, %v9950_v44  ;;  %1777 = vmatprep.mubr.bf16.mxu1 %v1414_v2  ;;  %v1306_v38 = vmax.f32 %v1043_v12, 0.0 }
 0x17d   : > { %v1046_v27 = vpop.f32.mrf.mxu0  ;;  %1778 = vmatmul.mubr.bf16.gmra.mxu1 %v1413_v7 }
 0x17e   : > { %v1047_v31 = vadd.f32 %v1046_v27, %v9944_v39  ;;  %v1307_v32 = vmax.f32 %v1045_v16, 0.0 }
 0x17f   : > { %v1050_v36 = vpop.f32.mrf.mxu0 }
 0x180   : > { %v1308_v42 = vmax.f32 %v1047_v31, 0.0  ;;  %v1415_v51 = vpack.c.bf16 %v1307_v32, %v1305_v40  ;;  %v1051_v59 = vadd.f32 %v1050_v36, %v9950_v44 }
 0x181   : > { %v1052_v47 = vpop.f32.mrf.mxu0 }
 0x182   : > { %v1416_v49 = vpack.c.bf16 %v1308_v42, %v1306_v38  ;;  %v1053_v58 = vadd.f32 %v1052_v47, %v9944_v39  ;;  %v1309_v11 = vmax.f32 %v1051_v59, 0.0 }
 0x183   : > { %v1054_v53 = vpop.f32.mrf.mxu0 }
 0x184   : > { %v1055_v56 = vadd.f32 %v1054_v53, %v9950_v44  ;;  %1787 = vmatprep.mubr.bf16.mxu1 %v1416_v49  ;;  %v1310_v6 = vmax.f32 %v1053_v58, 0.0 }
 0x185   : > { %v1056_v60 = vpop.f32.mrf.mxu0  ;;  %1788 = vmatmul.mubr.bf16.gmra.mxu1 %v1415_v51 }
 0x186   : > { %v1057_v62 = vadd.f32 %v1056_v60, %v9944_v39  ;;  %v1311_v2 = vmax.f32 %v1055_v56, 0.0 }
 0x187   : > { %v1060_v5 = vpop.f32.mrf.mxu0 }
 0x188   : > { %v1312_v7 = vmax.f32 %v1057_v62, 0.0  ;;  %v1417_v26 = vpack.c.bf16 %v1311_v2, %v1309_v11  ;;  %v1061_v36 = vadd.f32 %v1060_v5, %v9950_v44 }
 0x189   : > { %v1062_v12 = vpop.f32.mrf.mxu0 }
 0x18a   : > { %v1418_v16 = vpack.c.bf16 %v1312_v7, %v1310_v6  ;;  %v1063_v31 = vadd.f32 %v1062_v12, %v9944_v39  ;;  %v1313_v53 = vmax.f32 %v1061_v36, 0.0 }
 0x18b   : > { %v1064_v27 = vpop.f32.mrf.mxu0 }
 0x18c   : > { %v1065_v32 = vadd.f32 %v1064_v27, %v9950_v44  ;;  %1797 = vmatprep.mubr.bf16.mxu1 %v1418_v16  ;;  %v1314_v49 = vmax.f32 %v1063_v31, 0.0  ;;  %v8937_v31 = vld [vmem:[%s12456_s7 + $0x30] ss:$8 sps:$4 sm:$0xff]  }
 0x18d   : > { %v1066_v38 = vpop.f32.mrf.mxu0  ;;  %1798 = vmatmul.mubr.bf16.gmra.mxu1 %v1417_v26 }
 0x18e   : > { %v1067_v42 = vadd.f32 %v1066_v38, %v9944_v39  ;;  %v1315_v40 = vmax.f32 %v1065_v32, 0.0  ;;  %v8939_v32 = vld [vmem:[%s12456_s7 + $0x34] ss:$8 sps:$4 sm:$0xff]  }
 0x18f   : > { %v1070_v47 = vpop.f32.mrf.mxu0  ;;  %3171 = vmatprep.subr.bf16.mxu1 %v8939_v32 }
 0x190   : > { %v1316_v51 = vmax.f32 %v1067_v42, 0.0  ;;  %v1419_v59 = vpack.c.bf16 %v1315_v40, %v1313_v53  ;;  %v1071_v5 = vadd.f32 %v1070_v47, %v9950_v44  ;;  %3172 = vmatpush1.bf16.msra.mxu1 %v8937_v31 }
 0x191   : > { %v1072_v58 = vpop.f32.mrf.mxu0 }
 0x192   : > { %v1420_v56 = vpack.c.bf16 %v1316_v51, %v1314_v49  ;;  %v1073_v62 = vadd.f32 %v1072_v58, %v9944_v39  ;;  %v1317_v20 = vmax.f32 %v1071_v5, 0.0 }
 0x193   : > { %v1074_v60 = vpop.f32.mrf.mxu0 }
 0x194   : > { %v1075_v2 = vadd.f32 %v1074_v60, %v9950_v44  ;;  %1807 = vmatprep.mubr.bf16.mxu1 %v1420_v56  ;;  %v1318_v16 = vmax.f32 %v1073_v62, 0.0 }
 0x195   : > { %v1076_v6 = vpop.f32.mrf.mxu0  ;;  %1808 = vmatmul.mubr.bf16.gmra.mxu1 %v1419_v59 }
 0x196   : > { %v1077_v7 = vadd.f32 %v1076_v6, %v9944_v39  ;;  %v1319_v11 = vmax.f32 %v1075_v2, 0.0 }
 0x197   : > { %v1080_v12 = vpop.f32.mrf.mxu0 }
 0x198   : > { %v1320_v17 = vmax.f32 %v1077_v7, 0.0  ;;  %v1421_v36 = vpack.c.bf16 %v1319_v11, %v1317_v20  ;;  %v1081_v47 = vadd.f32 %v1080_v12, %v9950_v44 }
 0x199   : > { %v1082_v26 = vpop.f32.mrf.mxu0 }
 0x19a   : > { %v1422_v27 = vpack.c.bf16 %v1320_v17, %v1318_v16  ;;  %v1083_v42 = vadd.f32 %v1082_v26, %v9944_v39  ;;  %v1321_v60 = vmax.f32 %v1081_v47, 0.0 }
 0x19b   : > { %v1084_v38 = vpop.f32.mrf.mxu0 }
 0x19c   : > { %v1085_v40 = vadd.f32 %v1084_v38, %v9950_v44  ;;  %1817 = vmatprep.mubr.bf16.mxu1 %v1422_v27  ;;  %v1322_v56 = vmax.f32 %v1083_v42, 0.0  ;;  %v8940_v42 = vld [vmem:[%s12456_s7 + $0x20] ss:$8 sps:$4 sm:$0xff]  }
 0x19d   : > { %v1086_v49 = vpop.f32.mrf.mxu0  ;;  %1818 = vmatmul.mubr.bf16.gmra.mxu1 %v1421_v36 }
 0x19e   : > { %v1087_v51 = vadd.f32 %v1086_v49, %v9944_v39  ;;  %v1323_v53 = vmax.f32 %v1085_v40, 0.0  ;;  %v8942_v40 = vld [vmem:[%s12456_s7 + $0x24] ss:$8 sps:$4 sm:$0xff]  }
 0x19f   : > { %v1090_v58 = vpop.f32.mrf.mxu0  ;;  %3173 = vmatprep.subr.bf16.mxu1 %v8942_v40 }
 0x1a0   : > { %v1324_v59 = vmax.f32 %v1087_v51, 0.0  ;;  %v1423_v5 = vpack.c.bf16 %v1323_v53, %v1321_v60  ;;  %v1091_v12 = vadd.f32 %v1090_v58, %v9950_v44  ;;  %3174 = vmatpush1.bf16.msra.mxu1 %v8940_v42 }
 0x1a1   : > { %v1092_v62 = vpop.f32.mrf.mxu0 }
 0x1a2   : > { %v1424_v2 = vpack.c.bf16 %v1324_v59, %v1322_v56  ;;  %v1093_v7 = vadd.f32 %v1092_v62, %v9944_v39  ;;  %v1325_v32 = vmax.f32 %v1091_v12, 0.0 }
 0x1a3   : > { %v1094_v6 = vpop.f32.mrf.mxu0 }
 0x1a4   : > { %v1095_v11 = vadd.f32 %v1094_v6, %v9950_v44  ;;  %1827 = vmatprep.mubr.bf16.mxu1 %v1424_v2  ;;  %v1326_v27 = vmax.f32 %v1093_v7, 0.0 }
 0x1a5   : > { %v1096_v16 = vpop.f32.mrf.mxu0  ;;  %1828 = vmatmul.mubr.bf16.gmra.mxu1 %v1423_v5 }
 0x1a6   : > { %v1097_v17 = vadd.f32 %v1096_v16, %v9944_v39  ;;  %v1327_v20 = vmax.f32 %v1095_v11, 0.0 }
 0x1a7   : > { %v1100_v26 = vpop.f32.mrf.mxu0 }
 0x1a8   : > { %v1328_v31 = vmax.f32 %v1097_v17, 0.0  ;;  %v1425_v47 = vpack.c.bf16 %v1327_v20, %v1325_v32  ;;  %v1101_v58 = vadd.f32 %v1100_v26, %v9950_v44 }
 0x1a9   : > { %v1102_v36 = vpop.f32.mrf.mxu0 }
 0x1aa   : > { %v1426_v38 = vpack.c.bf16 %v1328_v31, %v1326_v27  ;;  %v1103_v51 = vadd.f32 %v1102_v36, %v9944_v39  ;;  %v1329_v6 = vmax.f32 %v1101_v58, 0.0 }
 0x1ab   : > { %v1104_v49 = vpop.f32.mrf.mxu0 }
 0x1ac   : > { %v1105_v53 = vadd.f32 %v1104_v49, %v9950_v44  ;;  %1837 = vmatprep.mubr.bf16.mxu1 %v1426_v38  ;;  %v1330_v2 = vmax.f32 %v1103_v51, 0.0  ;;  %v8943_v51 = vld [vmem:[%s12456_s7 + $0x10] ss:$8 sps:$4 sm:$0xff]  }
 0x1ad   : > { %v1106_v56 = vpop.f32.mrf.mxu0  ;;  %1838 = vmatmul.mubr.bf16.gmra.mxu1 %v1425_v47 }
 0x1ae   : > { %v1107_v59 = vadd.f32 %v1106_v56, %v9944_v39  ;;  %v1331_v60 = vmax.f32 %v1105_v53, 0.0  ;;  %v8945_v53 = vld [vmem:[%s12456_s7 + $0x14] ss:$8 sps:$4 sm:$0xff]  }
 0x1af   : > { %v1110_v62 = vpop.f32.mrf.mxu0  ;;  %3175 = vmatprep.subr.bf16.mxu1 %v8945_v53 }
 0x1b0   : > { %v1332_v5 = vmax.f32 %v1107_v59, 0.0  ;;  %v1427_v12 = vpack.c.bf16 %v1331_v60, %v1329_v6  ;;  %v1111_v26 = vadd.f32 %v1110_v62, %v9950_v44  ;;  %3176 = vmatpush1.bf16.msra.mxu1 %v8943_v51 }
 0x1b1   : > { %v1112_v7 = vpop.f32.mrf.mxu0 }
 0x1b2   : > { %v1428_v11 = vpack.c.bf16 %v1332_v5, %v1330_v2  ;;  %v1113_v17 = vadd.f32 %v1112_v7, %v9944_v39  ;;  %v1333_v40 = vmax.f32 %v1111_v26, 0.0 }
 0x1b3   : > { %v1114_v16 = vpop.f32.mrf.mxu0 }
 0x1b4   : > { %v1115_v20 = vadd.f32 %v1114_v16, %v9950_v44  ;;  %1847 = vmatprep.mubr.bf16.mxu1 %v1428_v11  ;;  %v1334_v38 = vmax.f32 %v1113_v17, 0.0 }
 0x1b5   : > { %v1116_v27 = vpop.f32.mrf.mxu0  ;;  %1848 = vmatmul.mubr.bf16.gmra.mxu1 %v1427_v12 }
 0x1b6   : > { %v1117_v31 = vadd.f32 %v1116_v27, %v9944_v39  ;;  %v1335_v32 = vmax.f32 %v1115_v20, 0.0 }
 0x1b7   : > { %v1120_v36 = vpop.f32.mrf.mxu0 }
 0x1b8   : > { %v1336_v42 = vmax.f32 %v1117_v31, 0.0  ;;  %v1429_v58 = vpack.c.bf16 %v1335_v32, %v1333_v40  ;;  %v1121_v62 = vadd.f32 %v1120_v36, %v9950_v44 }
 0x1b9   : > { %v1122_v47 = vpop.f32.mrf.mxu0 }
 0x1ba   : > { %v1430_v49 = vpack.c.bf16 %v1336_v42, %v1334_v38  ;;  %v1123_v59 = vadd.f32 %v1122_v47, %v9944_v39  ;;  %v1337_v16 = vmax.f32 %v1121_v62, 0.0 }
 0x1bb   : > { %v1124_v56 = vpop.f32.mrf.mxu0 }
 0x1bc   : > { %v1125_v60 = vadd.f32 %v1124_v56, %v9950_v44  ;;  %1857 = vmatprep.mubr.bf16.mxu1 %v1430_v49  ;;  %v1338_v11 = vmax.f32 %v1123_v59, 0.0  ;;  %v8946_v59 = vld [vmem:[%s12456_s7] ss:$8 sps:$4 sm:$0xff]  }
 0x1bd   : > { %v1126_v2 = vpop.f32.mrf.mxu0  ;;  %1858 = vmatmul.mubr.bf16.gmra.mxu1 %v1429_v58 }
 0x1be   : > { %v1127_v5 = vadd.f32 %v1126_v2, %v9944_v39  ;;  %v1339_v6 = vmax.f32 %v1125_v60, 0.0  ;;  %v8948_v60 = vld [vmem:[%s12456_s7 + $0x4] ss:$8 sps:$4 sm:$0xff]  }
 0x1bf   : > { %v1130_v7 = vpop.f32.mrf.mxu0  ;;  %3177 = vmatprep.subr.bf16.mxu1 %v8948_v60 }
 0x1c0   : > { %v1340_v12 = vmax.f32 %v1127_v5, 0.0  ;;  %v1431_v26 = vpack.c.bf16 %v1339_v6, %v1337_v16  ;;  %v1131_v36 = vadd.f32 %v1130_v7, %v9950_v44  ;;  %3178 = vmatpush1.bf16.msra.mxu1 %v8946_v59 }
 0x1c1   : > { %v1132_v17 = vpop.f32.mrf.mxu0 }
 0x1c2   : > { %v1432_v20 = vpack.c.bf16 %v1340_v12, %v1338_v11  ;;  %v1133_v31 = vadd.f32 %v1132_v17, %v9944_v39  ;;  %v1341_v53 = vmax.f32 %v1131_v36, 0.0 }
 0x1c3   : > { %v1134_v27 = vpop.f32.mrf.mxu0 }
 0x1c4   : > { %v1135_v32 = vadd.f32 %v1134_v27, %v9950_v44  ;;  %1867 = vmatprep.mubr.bf16.mxu1 %v1432_v20  ;;  %v1342_v49 = vmax.f32 %v1133_v31, 0.0 }
 0x1c5   : > { %v1136_v38 = vpop.f32.mrf.mxu0  ;;  %1868 = vmatmul.mubr.bf16.gmra.mxu1 %v1431_v26 }
 0x1c6   : > { %v1137_v42 = vadd.f32 %v1136_v38, %v9944_v39  ;;  %v1343_v40 = vmax.f32 %v1135_v32, 0.0 }
 0x1c7   : > { %v1140_v47 = vpop.f32.mrf.mxu0 }
 0x1c8   : > { %v1344_v51 = vmax.f32 %v1137_v42, 0.0  ;;  %v1433_v62 = vpack.c.bf16 %v1343_v40, %v1341_v53  ;;  %v1141_v7 = vadd.f32 %v1140_v47, %v9950_v44 }
 0x1c9   : > { %v1142_v58 = vpop.f32.mrf.mxu0 }
 0x1ca   : > { %v1434_v56 = vpack.c.bf16 %v1344_v51, %v1342_v49  ;;  %v1143_v5 = vadd.f32 %v1142_v58, %v9944_v39  ;;  %v1345_v27 = vmax.f32 %v1141_v7, 0.0 }
 0x1cb   : > { %v1144_v2 = vpop.f32.mrf.mxu0 }
 0x1cc   : > { %v1145_v6 = vadd.f32 %v1144_v2, %v9950_v44  ;;  %1877 = vmatprep.mubr.bf16.mxu1 %v1434_v56  ;;  %v1346_v20 = vmax.f32 %v1143_v5, 0.0  ;;  %v8949_v5 = vld [vmem:[%s12456_s7 + $0xf0] ss:$8 sps:$4 sm:$0xff]  }
 0x1cd   : > { %v1146_v11 = vpop.f32.mrf.mxu0  ;;  %1878 = vmatmul.mubr.bf16.gmra.mxu1 %v1433_v62 }
 0x1ce   : > { %v1147_v12 = vadd.f32 %v1146_v11, %v9944_v39  ;;  %v1347_v16 = vmax.f32 %v1145_v6, 0.0  ;;  %v8951_v6 = vld [vmem:[%s12456_s7 + $0xf4] ss:$8 sps:$4 sm:$0xff]  }
 0x1cf   : > { %v1150_v17 = vpop.f32.mrf.mxu0  ;;  %3179 = vmatprep.subr.bf16.mxu1 %v8951_v6 }
 0x1d0   : > { %v1348_v26 = vmax.f32 %v1147_v12, 0.0  ;;  %v1435_v36 = vpack.c.bf16 %v1347_v16, %v1345_v27  ;;  %v1151_v47 = vadd.f32 %v1150_v17, %v9950_v44  ;;  %3180 = vmatpush2.bf16.msra.mxu1 %v8949_v5 }
 0x1d1   : > { %v1152_v31 = vpop.f32.mrf.mxu0 }
 0x1d2   : > { %v1436_v32 = vpack.c.bf16 %v1348_v26, %v1346_v20  ;;  %v1153_v42 = vadd.f32 %v1152_v31, %v9944_v39  ;;  %v1349_v60 = vmax.f32 %v1151_v47, 0.0 }
 0x1d3   : > { %v1154_v38 = vpop.f32.mrf.mxu0 }
 0x1d4   : > { %v1155_v40 = vadd.f32 %v1154_v38, %v9950_v44  ;;  %1887 = vmatprep.mubr.bf16.mxu1 %v1436_v32  ;;  %v1350_v56 = vmax.f32 %v1153_v42, 0.0 }
 0x1d5   : > { %v1156_v49 = vpop.f32.mrf.mxu0  ;;  %1888 = vmatmul.mubr.bf16.gmra.mxu1 %v1435_v36 }
 0x1d6   : > { %v1157_v51 = vadd.f32 %v1156_v49, %v9944_v39  ;;  %v1351_v53 = vmax.f32 %v1155_v40, 0.0 }
 0x1d7   : > { %v1160_v58 = vpop.f32.mrf.mxu0 }
 0x1d8   : > { %v1352_v59 = vmax.f32 %v1157_v51, 0.0  ;;  %v1437_v7 = vpack.c.bf16 %v1351_v53, %v1349_v60  ;;  %v1161_v17 = vadd.f32 %v1160_v58, %v9950_v44 }
 0x1d9   : > { %v1162_v62 = vpop.f32.mrf.mxu0 }
 0x1da   : > { %v1438_v2 = vpack.c.bf16 %v1352_v59, %v1350_v56  ;;  %v1163_v12 = vadd.f32 %v1162_v62, %v9944_v39  ;;  %v1353_v38 = vmax.f32 %v1161_v17, 0.0 }
 0x1db   : > { %v1164_v11 = vpop.f32.mrf.mxu0 }
 0x1dc   : > { %v1165_v16 = vadd.f32 %v1164_v11, %v9950_v44  ;;  %1897 = vmatprep.mubr.bf16.mxu1 %v1438_v2  ;;  %v1354_v32 = vmax.f32 %v1163_v12, 0.0  ;;  %v8952_v12 = vld [vmem:[%s12456_s7 + $0xe0] ss:$8 sps:$4 sm:$0xff]  }
 0x1dd   : > { %v1166_v20 = vpop.f32.mrf.mxu0  ;;  %1898 = vmatmul.mubr.bf16.gmra.mxu1 %v1437_v7 }
 0x1de   : > { %v1167_v26 = vadd.f32 %v1166_v20, %v9944_v39  ;;  %v1355_v27 = vmax.f32 %v1165_v16, 0.0  ;;  %v8954_v16 = vld [vmem:[%s12456_s7 + $0xe4] ss:$8 sps:$4 sm:$0xff]  }
 0x1df   : > { %v1170_v31 = vpop.f32.mrf.mxu0  ;;  %3181 = vmatprep.subr.bf16.mxu1 %v8954_v16 }
 0x1e0   : > { %v1356_v36 = vmax.f32 %v1167_v26, 0.0  ;;  %v1439_v47 = vpack.c.bf16 %v1355_v27, %v1353_v38  ;;  %v1171_v58 = vadd.f32 %v1170_v31, %v9950_v44  ;;  %3182 = vmatpush2.bf16.msra.mxu1 %v8952_v12 }
 0x1e1   : > { %v1172_v42 = vpop.f32.mrf.mxu0 }
 0x1e2   : > { %v1440_v40 = vpack.c.bf16 %v1356_v36, %v1354_v32  ;;  %v1173_v51 = vadd.f32 %v1172_v42, %v9944_v39  ;;  %v1357_v6 = vmax.f32 %v1171_v58, 0.0 }
 0x1e3   : > { %v1174_v49 = vpop.f32.mrf.mxu0 }
 0x1e4   : > { %v1175_v53 = vadd.f32 %v1174_v49, %v9950_v44  ;;  %1907 = vmatprep.mubr.bf16.mxu1 %v1440_v40  ;;  %v1358_v2 = vmax.f32 %v1173_v51, 0.0 }
 0x1e5   : > { %v1176_v56 = vpop.f32.mrf.mxu0  ;;  %1908 = vmatmul.mubr.bf16.gmra.mxu1 %v1439_v47 }
 0x1e6   : > { %v1177_v59 = vadd.f32 %v1176_v56, %v9944_v39  ;;  %v1359_v60 = vmax.f32 %v1175_v53, 0.0 }
 0x1e7   : > { %v1180_v62 = vpop.f32.mrf.mxu0 }
 0x1e8   : > { %v1360_v5 = vmax.f32 %v1177_v59, 0.0  ;;  %v1441_v17 = vpack.c.bf16 %v1359_v60, %v1357_v6  ;;  %v1181_v31 = vadd.f32 %v1180_v62, %v9950_v44 }
 0x1e9   : > { %v1182_v7 = vpop.f32.mrf.mxu0 }
 0x1ea   : > { %v1442_v11 = vpack.c.bf16 %v1360_v5, %v1358_v2  ;;  %v1183_v26 = vadd.f32 %v1182_v7, %v9944_v39  ;;  %v1361_v49 = vmax.f32 %v1181_v31, 0.0 }
 0x1eb   : > { %v1184_v20 = vpop.f32.mrf.mxu0 }
 0x1ec   : > { %v1185_v27 = vadd.f32 %v1184_v20, %v9950_v44  ;;  %1917 = vmatprep.mubr.bf16.mxu1 %v1442_v11  ;;  %v1362_v40 = vmax.f32 %v1183_v26, 0.0  ;;  %v8955_v26 = vld [vmem:[%s12456_s7 + $0xd0] ss:$8 sps:$4 sm:$0xff]  }
 0x1ed   : > { %v1186_v32 = vpop.f32.mrf.mxu0  ;;  %1918 = vmatmul.mubr.bf16.gmra.mxu1 %v1441_v17 }
 0x1ee   : > { %v1187_v36 = vadd.f32 %v1186_v32, %v9944_v39  ;;  %v1363_v38 = vmax.f32 %v1185_v27, 0.0  ;;  %v8957_v27 = vld [vmem:[%s12456_s7 + $0xd4] ss:$8 sps:$4 sm:$0xff]  }
 0x1ef   : > { %v1190_v42 = vpop.f32.mrf.mxu0  ;;  %3183 = vmatprep.subr.bf16.mxu1 %v8957_v27 }
 0x1f0   : > { %v1364_v47 = vmax.f32 %v1187_v36, 0.0  ;;  %v1443_v58 = vpack.c.bf16 %v1363_v38, %v1361_v49  ;;  %v1191_v62 = vadd.f32 %v1190_v42, %v9950_v44  ;;  %3184 = vmatpush2.bf16.msra.mxu1 %v8955_v26 }
 0x1f1   : > { %v1192_v51 = vpop.f32.mrf.mxu0 }
 0x1f2   : > { %v1444_v53 = vpack.c.bf16 %v1364_v47, %v1362_v40  ;;  %v1193_v59 = vadd.f32 %v1192_v51, %v9944_v39  ;;  %v1365_v16 = vmax.f32 %v1191_v62, 0.0  ;;  %v1493_v47 = vld [vmem:[%s12520_s25] sm:$0x3]  ;;  %s680_s25 = sand.u32 1, %s9349_s22  }
 0x1f3   : > { %v1194_v56 = vpop.f32.mrf.mxu0  ;;  %s8074_s21 = sshll.u32 %s680_s25, 8  ;;  %s12409_s2 = scalar_lea.sflag [#allocation4], %s680_s25 }
 0x1f4   : > { %v1195_v60 = vadd.f32 %v1194_v56, %v9950_v44  ;;  %1927 = vmatprep.mubr.bf16.mxu1 %v1444_v53  ;;  %v1366_v11 = vmax.f32 %v1193_v59, 0.0  ;;  %v10202_v56 = vrot.slane %v1493_v47, %v9928_v30  ;;  %s12293_s24 = scalar_lea.vmem [#allocation10], %s8074_s21  ;;  %s9291_s21 = scalar_lea.vmem %s9290_s26, 8192 }
 0x1f5   : > { %v1196_v2 = vpop.f32.mrf.mxu0  ;;  %1928 = vmatmul.mubr.bf16.gmra.mxu1 %v1443_v58  ;;  %s7959_s27 = sshll.u32 %s12293_s24, 4  ;;  %s12404_s27 = int_to_ptr.vmem [resolvable:$true] %s7959_s27 }
 0x1f6   : > { %v1197_v5 = vadd.f32 %v1196_v2, %v9944_v39  ;;  %v1367_v6 = vmax.f32 %v1195_v60, 0.0  ;;  %v10205_v2 = vrot.slane %v1493_v47, %v9936_v35  ;;  %s9285_s23 = scalar_lea.vmem %s12404_s27, 4096  ;;  %p9292_p4 = scmp.lt.s32.totalorder %s12404_s27, %s9290_s26 }
 0x1f7   : > { %v1200_v7 = vpop.f32.mrf.mxu0  ;;  %p9286_p9 = scmp.ne.s32.totalorder %s12404_s27, %s9285_s23  ;;  %p9293_p5 = scmp.lt.s32.totalorder %s9291_s21, %s9285_s23 }
 0x1f8   : > { %v1368_v12 = vmax.f32 %v1197_v5, 0.0  ;;  %v1445_v31 = vpack.c.bf16 %v1367_v6, %v1365_v16  ;;  %v1201_v42 = vadd.f32 %v1200_v7, %v9950_v44 }
 0x1f9   : > { %v1202_v17 = vpop.f32.mrf.mxu0  ;;  %p9287_p3 = pnand %p9286_p9, %p12650_p1  ;;  %p9294_p7 = por %p9293_p5, %p9292_p4 }
 0x1fa   : > { %v1446_v20 = vpack.c.bf16 %v1368_v12, %v1366_v11  ;;  %v1203_v36 = vadd.f32 %v1202_v17, %v9944_v39  ;;  %v1369_v5 = vmax.f32 %v1201_v42, 0.0 }
 0x1fb   : > { %v1204_v32 = vpop.f32.mrf.mxu0  ;;  %p9288_p2 = pneg %p9287_p3 }
 0x1fc   : > { %v1205_v38 = vadd.f32 %v1204_v32, %v9950_v44  ;;  %1937 = vmatprep.mubr.bf16.mxu1 %v1446_v20  ;;  %v1370_v60 = vmax.f32 %v1203_v36, 0.0 }
 0x1fd   : > { %v1206_v40 = vpop.f32.mrf.mxu0  ;;  %v1699_v49 = vpop.f32.mrf.mxu1  ;;  %1938 = vmatmul.mubr.bf16.gmra.mxu1 %v1445_v31  ;;  %p9295_p8 = pnand %p9294_p7, %p9288_p2 }
 0x1fe   : > { %v1207_v51 = vadd.f32 %v1206_v40, %v9944_v39  ;;  %v1371_v53 = vmax.f32 %v1205_v38, 0.0  ;;  %v1700_v27 = vadd.f32 %v1699_v49, %v10205_v2 }
 0x1ff   : > { %v1210_v58 = vpop.f32.mrf.mxu0  ;;  %v1701_v59 = vpop.f32.mrf.mxu1 }
 0x200   : > { %v1372_v62 = vmax.f32 %v1207_v51, 0.0  ;;  %v1447_v16 = vpack.c.bf16 %v1371_v53, %v1369_v5  ;;  %v1702_v17 = vadd.f32 %v1701_v59, %v10202_v56  ;;  %v1211_v40 = vadd.f32 %v1210_v58, %v9950_v44  ;;  %v8958_v58 = vld [vmem:[%s12456_s7 + $0xc0] ss:$8 sps:$4 sm:$0xff]  }
 0x201   : > { %v1212_v6 = vpop.f32.mrf.mxu0  ;;  %v1703_v7 = vpop.f32.mrf.mxu1  ;;  %v2018_v49 = vmax.f32 %v1700_v27, 0.0 }
 0x202   : > { %v1704_v11 = vadd.f32 %v1703_v7, %v10205_v2  ;;  %v1448_v12 = vpack.c.bf16 %v1372_v62, %v1370_v60  ;;  %v1213_v36 = vadd.f32 %v1212_v6, %v9944_v39  ;;  %v2019_v59 = vmax.f32 %v1702_v17, 0.0 }
 0x203   : > { %v1214_v20 = vpop.f32.mrf.mxu0  ;;  %v1705_v26 = vpop.f32.mrf.mxu1  ;;  %v1373_v6 = vmax.f32 %v1211_v40, 0.0 }
 0x204   : > { %v1215_v31 = vadd.f32 %v1214_v20, %v9950_v44  ;;  %v1706_v32 = vadd.f32 %v1705_v26, %v10202_v56  ;;  %1947 = vmatprep.mubr.bf16.mxu1 %v1448_v12  ;;  %v2020_v47 = vmax.f32 %v1704_v11, 0.0  ;;  %v1374_v20 = vmax.f32 %v1213_v36, 0.0  ;;  %v8960_v11 = vld [vmem:[%s12456_s7 + $0xc4] ss:$8 sps:$4 sm:$0xff]  }
 0x205   : > { %v1216_v38 = vpop.f32.mrf.mxu0  ;;  %v1709_v42 = vpop.f32.mrf.mxu1  ;;  %1948 = vmatmul.mubr.bf16.gmra.mxu1 %v1447_v16  ;;  %3185 = vmatprep.subr.bf16.mxu1 %v8960_v11 }
 0x206   : > { %v2021_v51 = vmax.f32 %v1706_v32, 0.0  ;;  %v1217_v53 = vadd.f32 %v1216_v38, %v9944_v39  ;;  %v1375_v5 = vmax.f32 %v1215_v31, 0.0  ;;  %v2146_v22 = vpack.c.bf16 %v2020_v47, %v2018_v49  ;;  %3186 = vmatpush2.bf16.msra.mxu1 %v8958_v58 }
 0x207   : > { %v1220_v60 = vpop.f32.mrf.mxu0  ;;  %v1711_v62 = vpop.f32.mrf.mxu1  ;;  %v1710_v17 = vadd.f32 %v1709_v42, %v10205_v2 }
 0x208   : > { %v1376_v7 = vmax.f32 %v1217_v53, 0.0  ;;  %v2147_v0 = vpack.c.bf16 %v2021_v51, %v2019_v59  ;;  %v1712_v27 = vadd.f32 %v1711_v62, %v10202_v56  ;;  %v1449_v38 = vpack.c.bf16 %v1375_v5, %v1373_v6 }
 0x209   : > { %v1222_v26 = vpop.f32.mrf.mxu0  ;;  %v1713_v12 = vpop.f32.mrf.mxu1  ;;  %v1221_v42 = vadd.f32 %v1220_v60, %v9950_v44 }
 0x20a   : > { %v1714_v16 = vadd.f32 %v1713_v12, %v10205_v2  ;;  %2446 = vmatprep.mubr.bf16.mxu0 %v2147_v0  ;;  %v1450_v36 = vpack.c.bf16 %v1376_v7, %v1374_v20  ;;  %v1223_v51 = vadd.f32 %v1222_v26, %v9944_v39  ;;  %v2023_v5 = vmax.f32 %v1712_v27, 0.0 }
 0x20b   : > { %v1224_v31 = vpop.f32.mrf.mxu0  ;;  %v1715_v32 = vpop.f32.mrf.mxu1  ;;  %2447 = vmatmul.mubr.bf16.vlgmr.msra.gmra.mxu0 %v2146_v22  ;;  %v2022_v12 = vmax.f32 %v1710_v17, 0.0 }
 0x20c   : > { %v1225_v40 = vadd.f32 %v1224_v31, %v9950_v44  ;;  %v1716_v47 = vadd.f32 %v1715_v32, %v10202_v56  ;;  %1957 = vmatprep.mubr.bf16.mxu1 %v1450_v36  ;;  %v2024_v62 = vmax.f32 %v1714_v16, 0.0  ;;  %v1378_v11 = vmax.f32 %v1223_v51, 0.0 }
 0x20d   : > { %v1226_v53 = vpop.f32.mrf.mxu0  ;;  %v1719_v59 = vpop.f32.mrf.mxu1  ;;  %1958 = vmatmul.mubr.bf16.gmra.mxu1 %v1449_v38  ;;  %v1377_v36 = vmax.f32 %v1221_v42, 0.0 }
 0x20e   : > { %v2025_v0 = vmax.f32 %v1716_v47, 0.0  ;;  %v1227_v49 = vadd.f32 %v1226_v53, %v9944_v39  ;;  %v1379_v6 = vmax.f32 %v1225_v40, 0.0  ;;  %v2148_v45 = vpack.c.bf16 %v2024_v62, %v2022_v12 }
 0x20f   : > { %v1230_v7 = vpop.f32.mrf.mxu0  ;;  %v1721_v20 = vpop.f32.mrf.mxu1  ;;  %v1720_v53 = vadd.f32 %v1719_v59, %v10205_v2 }
 0x210   : > { %v1380_v22 = vmax.f32 %v1227_v49, 0.0  ;;  %v2149_v32 = vpack.c.bf16 %v2025_v0, %v2023_v5  ;;  %v1722_v60 = vadd.f32 %v1721_v20, %v10202_v56  ;;  %v1451_v27 = vpack.c.bf16 %v1379_v6, %v1377_v36 }
 0x211   : > { %v1232_v31 = vpop.f32.mrf.mxu0  ;;  %v1723_v26 = vpop.f32.mrf.mxu1  ;;  %v1231_v0 = vadd.f32 %v1230_v7, %v9950_v44  ;;  %v8961_v7 = vld [vmem:[%s12456_s7 + $0xb0] ss:$8 sps:$4 sm:$0xff]  }
 0x212   : > { %v1724_v58 = vadd.f32 %v1723_v26, %v10205_v2  ;;  %2456 = vmatprep.mubr.bf16.mxu0 %v2149_v32  ;;  %v1452_v38 = vpack.c.bf16 %v1380_v22, %v1378_v11  ;;  %v1233_v51 = vadd.f32 %v1232_v31, %v9944_v39  ;;  %v2027_v12 = vmax.f32 %v1722_v60, 0.0 }
 0x213   : > { %v1234_v16 = vpop.f32.mrf.mxu0  ;;  %v1725_v47 = vpop.f32.mrf.mxu1  ;;  %2457 = vmatmul.mubr.bf16.gmra.mxu0 %v2148_v45  ;;  %v2026_v22 = vmax.f32 %v1720_v53, 0.0 }
 0x214   : > { %v1235_v17 = vadd.f32 %v1234_v16, %v9950_v44  ;;  %v1726_v40 = vadd.f32 %v1725_v47, %v10202_v56  ;;  %1967 = vmatprep.mubr.bf16.mxu1 %v1452_v38  ;;  %v2028_v49 = vmax.f32 %v1724_v58, 0.0  ;;  %v1382_v32 = vmax.f32 %v1233_v51, 0.0  ;;  %v8963_v58 = vld [vmem:[%s12456_s7 + $0xb4] ss:$8 sps:$4 sm:$0xff]  }
 0x215   : > { %v1236_v42 = vpop.f32.mrf.mxu0  ;;  %v1729_v62 = vpop.f32.mrf.mxu1  ;;  %1968 = vmatmul.mubr.bf16.gmra.mxu1 %v1451_v27  ;;  %v1381_v16 = vmax.f32 %v1231_v0, 0.0  ;;  %3187 = vmatprep.subr.bf16.mxu1 %v8963_v58 }
 0x216   : > { %v2029_v5 = vmax.f32 %v1726_v40, 0.0  ;;  %v1237_v20 = vadd.f32 %v1236_v42, %v9944_v39  ;;  %v1383_v11 = vmax.f32 %v1235_v17, 0.0  ;;  %v2150_v47 = vpack.c.bf16 %v2028_v49, %v2026_v22  ;;  %3188 = vmatpush2.bf16.msra.mxu1 %v8961_v7 }
 0x217   : > { %v1240_v6 = vpop.f32.mrf.mxu0  ;;  %v1731_v59 = vpop.f32.mrf.mxu1  ;;  %v1730_v60 = vadd.f32 %v1729_v62, %v10205_v2 }
 0x218   : > { %v1384_v26 = vmax.f32 %v1237_v20, 0.0  ;;  %v2151_v31 = vpack.c.bf16 %v2029_v5, %v2027_v12  ;;  %v1732_v27 = vadd.f32 %v1731_v59, %v10202_v56  ;;  %v1453_v51 = vpack.c.bf16 %v1383_v11, %v1381_v16 }
 0x219   : > { %v1242_v45 = vpop.f32.mrf.mxu0  ;;  %v1733_v36 = vpop.f32.mrf.mxu1  ;;  %v1241_v62 = vadd.f32 %v1240_v6, %v9950_v44 }
 0x21a   : > { %v1734_v38 = vadd.f32 %v1733_v36, %v10205_v2  ;;  %2466 = vmatprep.mubr.bf16.mxu0 %v2151_v31  ;;  %v1454_v40 = vpack.c.bf16 %v1384_v26, %v1382_v32  ;;  %v1243_v49 = vadd.f32 %v1242_v45, %v9944_v39  ;;  %v2031_v11 = vmax.f32 %v1732_v27, 0.0 }
 0x21b   : > { %v1244_v53 = vpop.f32.mrf.mxu0  ;;  %v1735_v17 = vpop.f32.mrf.mxu1  ;;  %2467 = vmatmul.mubr.bf16.gmra.mxu0 %v2150_v47  ;;  %v2030_v36 = vmax.f32 %v1730_v60, 0.0 }
 0x21c   : > { %v1245_v42 = vadd.f32 %v1244_v53, %v9950_v44  ;;  %v1736_v0 = vadd.f32 %v1735_v17, %v10202_v56  ;;  %1977 = vmatprep.mubr.bf16.mxu1 %v1454_v40  ;;  %v2032_v12 = vmax.f32 %v1734_v38, 0.0  ;;  %v1386_v47 = vmax.f32 %v1243_v49, 0.0 }
 0x21d   : > { %v1246_v5 = vpop.f32.mrf.mxu0  ;;  %v1739_v20 = vpop.f32.mrf.mxu1  ;;  %1978 = vmatmul.mubr.bf16.gmra.mxu1 %v1453_v51  ;;  %v1385_v17 = vmax.f32 %v1241_v62, 0.0 }
 0x21e   : > { %v2033_v59 = vmax.f32 %v1736_v0, 0.0  ;;  %v1247_v22 = vadd.f32 %v1246_v5, %v9944_v39  ;;  %v1387_v31 = vmax.f32 %v1245_v42, 0.0  ;;  %v2152_v40 = vpack.c.bf16 %v2032_v12, %v2030_v36 }
 0x21f   : > { %v1250_v26 = vpop.f32.mrf.mxu0  ;;  %v1741_v32 = vpop.f32.mrf.mxu1  ;;  %v1740_v5 = vadd.f32 %v1739_v20, %v10205_v2 }
 0x220   : > { %v1388_v16 = vmax.f32 %v1247_v22, 0.0  ;;  %v2153_v53 = vpack.c.bf16 %v2033_v59, %v2031_v11  ;;  %v1742_v6 = vadd.f32 %v1741_v32, %v10202_v56  ;;  %v1455_v27 = vpack.c.bf16 %v1387_v31, %v1385_v17 }
 0x221   : > { %v1252_v58 = vpop.f32.mrf.mxu0  ;;  %v1743_v45 = vpop.f32.mrf.mxu1  ;;  %v1251_v49 = vadd.f32 %v1250_v26, %v9950_v44  ;;  %v8964_v26 = vld [vmem:[%s12458_s9 + $0x70] ss:$8 sps:$4 sm:$0xff]  }
 0x222   : > { %v1744_v7 = vadd.f32 %v1743_v45, %v10205_v2  ;;  %2476 = vmatprep.mubr.bf16.mxu0 %v2153_v53  ;;  %v1456_v51 = vpack.c.bf16 %v1388_v16, %v1386_v47  ;;  %v1253_v62 = vadd.f32 %v1252_v58, %v9944_v39  ;;  %v2035_v36 = vmax.f32 %v1742_v6, 0.0  ;;  %v8966_v58 = vld [vmem:[%s12458_s9 + $0x74] ss:$8 sps:$4 sm:$0xff]  }
 0x223   : > { %v1254_v38 = vpop.f32.mrf.mxu0  ;;  %v1745_v0 = vpop.f32.mrf.mxu1  ;;  %2477 = vmatmul.mubr.bf16.gmra.mxu0 %v2152_v40  ;;  %v2034_v47 = vmax.f32 %v1740_v5, 0.0  ;;  %v1389_v53 = vmax.f32 %v1251_v49, 0.0  ;;  %3912 = vmatprep.subr.bf16.mxu0 %v8966_v58  ;;  %v8969_v5 = vld [vmem:[%s12456_s7 + $0xa4] ss:$8 sps:$4 sm:$0xff]  }
 0x224   : > { %v1255_v60 = vadd.f32 %v1254_v38, %v9950_v44  ;;  %v1746_v42 = vadd.f32 %v1745_v0, %v10202_v56  ;;  %1987 = vmatprep.mubr.bf16.mxu1 %v1456_v51  ;;  %v2036_v22 = vmax.f32 %v1744_v7, 0.0  ;;  %v1390_v17 = vmax.f32 %v1253_v62, 0.0  ;;  %3913 = vmatpush1.bf16.msra.mxu0 %v8964_v26 }
 0x225   : > { %v1256_v12 = vpop.f32.mrf.mxu0  ;;  %v1749_v59 = vpop.f32.mrf.mxu1  ;;  %1988 = vmatmul.mubr.bf16.gmra.mxu1 %v1455_v27  ;;  %v8967_v27 = vld [vmem:[%s12456_s7 + $0xa0] ss:$8 sps:$4 sm:$0xff]   ;;  %3189 = vmatprep.subr.bf16.mxu1 %v8969_v5 }
 0x226   : > { %v2037_v11 = vmax.f32 %v1746_v42, 0.0  ;;  %v1257_v32 = vadd.f32 %v1256_v12, %v9944_v39  ;;  %v1391_v31 = vmax.f32 %v1255_v60, 0.0  ;;  %v2154_v0 = vpack.c.bf16 %v2036_v22, %v2034_v47  ;;  %3190 = vmatpush2.bf16.msra.mxu1 %v8967_v27 }
 0x227   : > { %v1260_v20 = vpop.f32.mrf.mxu0  ;;  %v1751_v16 = vpop.f32.mrf.mxu1  ;;  %v1750_v42 = vadd.f32 %v1749_v59, %v10205_v2 }
 0x228   : > { %v1392_v45 = vmax.f32 %v1257_v32, 0.0  ;;  %v2155_v38 = vpack.c.bf16 %v2037_v11, %v2035_v36  ;;  %v1752_v6 = vadd.f32 %v1751_v16, %v10202_v56  ;;  %v1457_v60 = vpack.c.bf16 %v1391_v31, %v1389_v53 }
 0x229   : > { %v1262_v40 = vpop.f32.mrf.mxu0  ;;  %v1753_v7 = vpop.f32.mrf.mxu1  ;;  %v1261_v36 = vadd.f32 %v1260_v20, %v9950_v44  ;;  %v2038_v26 = vmax.f32 %v1750_v42, 0.0 }
 0x22a   : > { %v1754_v51 = vadd.f32 %v1753_v7, %v10205_v2  ;;  %2486 = vmatprep.mubr.bf16.mxu0 %v2155_v38  ;;  %v1458_v12 = vpack.c.bf16 %v1392_v45, %v1390_v17  ;;  %v1263_v22 = vadd.f32 %v1262_v40, %v9944_v39  ;;  %v2039_v59 = vmax.f32 %v1752_v6, 0.0 }
 0x22b   : > { %v1264_v49 = vpop.f32.mrf.mxu0  ;;  %v1755_v62 = vpop.f32.mrf.mxu1  ;;  %2487 = vmatmul.mubr.bf16.gmra.mxu0 %v2154_v0  ;;  %v1393_v0 = vmax.f32 %v1261_v36, 0.0 }
 0x22c   : > { %v1265_v11 = vadd.f32 %v1264_v49, %v9950_v44  ;;  %v1756_v32 = vadd.f32 %v1755_v62, %v10202_v56  ;;  %1997 = vmatprep.mubr.bf16.mxu1 %v1458_v12  ;;  %v2040_v47 = vmax.f32 %v1754_v51, 0.0  ;;  %v1394_v17 = vmax.f32 %v1263_v22, 0.0 }
 0x22d   : > { %v1266_v16 = vpop.f32.mrf.mxu0  ;;  %v1759_v31 = vpop.f32.mrf.mxu1  ;;  %1998 = vmatmul.mubr.bf16.gmra.mxu1 %v1457_v60 }
 0x22e   : > { %v2041_v58 = vmax.f32 %v1756_v32, 0.0  ;;  %v1267_v45 = vadd.f32 %v1266_v16, %v9944_v39  ;;  %v1395_v40 = vmax.f32 %v1265_v11, 0.0  ;;  %v2156_v49 = vpack.c.bf16 %v2040_v47, %v2038_v26  ;;  %v8970_v16 = vld [vmem:[%s12458_s9 + $0x60] ss:$8 sps:$4 sm:$0xff]   ;;  %v8973_v26 = vld [vmem:[%s12456_s7 + $0x90] ss:$8 sps:$4 sm:$0xff]  }
 0x22f   : > { %v1761_v53 = vpop.f32.mrf.mxu1  ;;  %v1760_v39 = vadd.f32 %v1759_v31, %v10205_v2  ;;  %v8972_v31 = vld [vmem:[%s12458_s9 + $0x64] ss:$8 sps:$4 sm:$0xff]  }
 0x230   : > { %v1396_v7 = vmax.f32 %v1267_v45, 0.0  ;;  %v2157_v38 = vpack.c.bf16 %v2041_v58, %v2039_v59  ;;  %v1762_v44 = vadd.f32 %v1761_v53, %v10202_v56  ;;  %v1459_v27 = vpack.c.bf16 %v1395_v40, %v1393_v0  ;;  %3914 = vmatprep.subr.bf16.mxu0 %v8972_v31  ;;  %v8975_v53 = vld [vmem:[%s12456_s7 + $0x94] ss:$8 sps:$4 sm:$0xff]  }
 0x231   : > { %v1763_v5 = vpop.f32.mrf.mxu1  ;;  %v2042_v32 = vmax.f32 %v1760_v39, 0.0  ;;  %3915 = vmatpush1.bf16.msra.mxu0 %v8970_v16  ;;  %3191 = vmatprep.subr.bf16.mxu1 %v8975_v53 }
 0x232   : > { %v1764_v20 = vadd.f32 %v1763_v5, %v10205_v2  ;;  %2496 = vmatprep.mubr.bf16.mxu0 %v2157_v38  ;;  %v1460_v6 = vpack.c.bf16 %v1396_v7, %v1394_v17  ;;  %v2043_v62 = vmax.f32 %v1762_v44, 0.0  ;;  %3192 = vmatpush2.bf16.msra.mxu1 %v8973_v26 }
 0x233   : > { %v1765_v51 = vpop.f32.mrf.mxu1  ;;  %2497 = vmatmul.mubr.bf16.gmra.mxu0 %v2156_v49 }
 0x234   : > { %v1766_v60 = vadd.f32 %v1765_v51, %v10202_v56  ;;  %2007 = vmatprep.mubr.bf16.mxu1 %v1460_v6  ;;  %v2044_v12 = vmax.f32 %v1764_v20, 0.0 }
 0x235   : > { %v1769_v42 = vpop.f32.mrf.mxu1  ;;  %2008 = vmatmul.mubr.bf16.gmra.mxu1 %v1459_v27 }
 0x236   : > { %v2045_v22 = vmax.f32 %v1766_v60, 0.0  ;;  %v2158_v47 = vpack.c.bf16 %v2044_v12, %v2042_v32  ;;  %v1770_v40 = vadd.f32 %v1769_v42, %v10205_v2 }
 0x237   : > { %v1771_v11 = vpop.f32.mrf.mxu1 }
 0x238   : > { %v2159_v36 = vpack.c.bf16 %v2045_v22, %v2043_v62  ;;  %v1772_v58 = vadd.f32 %v1771_v11, %v10202_v56  ;;  %v2046_v20 = vmax.f32 %v1770_v40, 0.0  ;;  %v8979_v40 = vld [vmem:[%s12456_s7 + $0x80] ss:$8 sps:$4 sm:$0xff]  }
 0x239   : > { %v1773_v59 = vpop.f32.mrf.mxu1 }
 0x23a   : > { %v1774_v45 = vadd.f32 %v1773_v59, %v10205_v2  ;;  %2506 = vmatprep.mubr.bf16.mxu0 %v2159_v36  ;;  %v2047_v0 = vmax.f32 %v1772_v58, 0.0  ;;  %v8978_v58 = vld [vmem:[%s12458_s9 + $0x54] ss:$8 sps:$4 sm:$0xff]  }
 0x23b   : > { %v1775_v17 = vpop.f32.mrf.mxu1  ;;  %2507 = vmatmul.mubr.bf16.gmra.mxu0 %v2158_v47  ;;  %v8976_v47 = vld [vmem:[%s12458_s9 + $0x50] ss:$8 sps:$4 sm:$0xff]   ;;  %3916 = vmatprep.subr.bf16.mxu0 %v8978_v58 }
 0x23c   : > { %v1776_v7 = vadd.f32 %v1775_v17, %v10202_v56  ;;  %v2048_v5 = vmax.f32 %v1774_v45, 0.0  ;;  %3917 = vmatpush1.bf16.msra.mxu0 %v8976_v47 }
 0x23d   : > { %v1779_v38 = vpop.f32.mrf.mxu1 }
 0x23e   : > { %v2049_v49 = vmax.f32 %v1776_v7, 0.0  ;;  %v2160_v27 = vpack.c.bf16 %v2048_v5, %v2046_v20  ;;  %v1780_v62 = vadd.f32 %v1779_v38, %v10205_v2  ;;  %v8981_v7 = vld [vmem:[%s12456_s7 + $0x84] ss:$8 sps:$4 sm:$0xff]  }
 0x23f   : > { %v1781_v44 = vpop.f32.mrf.mxu1  ;;  %3193 = vmatprep.subr.bf16.mxu1 %v8981_v7 }
 0x240   : > { %v2161_v6 = vpack.c.bf16 %v2049_v49, %v2047_v0  ;;  %v1782_v39 = vadd.f32 %v1781_v44, %v10202_v56  ;;  %v2050_v31 = vmax.f32 %v1780_v62, 0.0  ;;  %3194 = vmatpush2.bf16.msra.mxu1 %v8979_v40 }
 0x241   : > { %v1783_v51 = vpop.f32.mrf.mxu1 }
 0x242   : > { %v1784_v60 = vadd.f32 %v1783_v51, %v10205_v2  ;;  %2516 = vmatprep.mubr.bf16.mxu0 %v2161_v6  ;;  %v2051_v11 = vmax.f32 %v1782_v39, 0.0 }
 0x243   : > { %v1785_v42 = vpop.f32.mrf.mxu1  ;;  %2517 = vmatmul.mubr.bf16.gmra.mxu0 %v2160_v27 }
 0x244   : > { %v1786_v12 = vadd.f32 %v1785_v42, %v10202_v56  ;;  %v2052_v32 = vmax.f32 %v1784_v60, 0.0 }
 0x245   : > { %v1789_v22 = vpop.f32.mrf.mxu1 }
 0x246   : > { %v2053_v36 = vmax.f32 %v1786_v12, 0.0  ;;  %v2162_v26 = vpack.c.bf16 %v2052_v32, %v2050_v31  ;;  %v1790_v0 = vadd.f32 %v1789_v22, %v10205_v2 }
 0x247   : > { %v1791_v16 = vpop.f32.mrf.mxu1 }
 0x248   : > { %v2163_v59 = vpack.c.bf16 %v2053_v36, %v2051_v11  ;;  %v1792_v53 = vadd.f32 %v1791_v16, %v10202_v56  ;;  %v2054_v27 = vmax.f32 %v1790_v0, 0.0 }
 0x249   : > { %v1793_v45 = vpop.f32.mrf.mxu1 }
 0x24a   : > { %v1794_v17 = vadd.f32 %v1793_v45, %v10205_v2  ;;  %2526 = vmatprep.mubr.bf16.mxu0 %v2163_v59  ;;  %v2055_v44 = vmax.f32 %v1792_v53, 0.0  ;;  %v8982_v53 = vld [vmem:[%s12458_s9 + $0x40] ss:$8 sps:$4 sm:$0xff]  }
 0x24b   : > { %v1795_v38 = vpop.f32.mrf.mxu1  ;;  %2527 = vmatmul.mubr.bf16.gmra.mxu0 %v2162_v26 }
 0x24c   : > { %v1796_v5 = vadd.f32 %v1795_v38, %v10202_v56  ;;  %v2056_v20 = vmax.f32 %v1794_v17, 0.0  ;;  %v8984_v17 = vld [vmem:[%s12458_s9 + $0x44] ss:$8 sps:$4 sm:$0xff]  }
 0x24d   : > { %v1799_v49 = vpop.f32.mrf.mxu1  ;;  %3918 = vmatprep.subr.bf16.mxu0 %v8984_v17  ;;  %v8985_v17 = vld [vmem:[%s12458_s9 + $0x30] ss:$8 sps:$4 sm:$0xff]  }
 0x24e   : > { %v2057_v6 = vmax.f32 %v1796_v5, 0.0  ;;  %v2164_v42 = vpack.c.bf16 %v2056_v20, %v2054_v27  ;;  %v1800_v11 = vadd.f32 %v1799_v49, %v10205_v2  ;;  %3919 = vmatpush1.bf16.msra.mxu0 %v8982_v53 }
 0x24f   : > { %v1801_v51 = vpop.f32.mrf.mxu1 }
 0x250   : > { %v2165_v39 = vpack.c.bf16 %v2057_v6, %v2055_v44  ;;  %v1802_v62 = vadd.f32 %v1801_v51, %v10202_v56  ;;  %v2058_v58 = vmax.f32 %v1800_v11, 0.0 }
 0x251   : > { %v1803_v60 = vpop.f32.mrf.mxu1 }
 0x252   : > { %v1804_v12 = vadd.f32 %v1803_v60, %v10205_v2  ;;  %2536 = vmatprep.mubr.bf16.mxu0 %v2165_v39  ;;  %v2059_v16 = vmax.f32 %v1802_v62, 0.0 }
 0x253   : > { %v1805_v22 = vpop.f32.mrf.mxu1  ;;  %2537 = vmatmul.mubr.bf16.gmra.mxu0 %v2164_v42 }
 0x254   : > { %v1806_v32 = vadd.f32 %v1805_v22, %v10202_v56  ;;  %v2060_v31 = vmax.f32 %v1804_v12, 0.0 }
 0x255   : > { %v1809_v36 = vpop.f32.mrf.mxu1 }
 0x256   : > { %v2061_v59 = vmax.f32 %v1806_v32, 0.0  ;;  %v2166_v40 = vpack.c.bf16 %v2060_v31, %v2058_v58  ;;  %v1810_v5 = vadd.f32 %v1809_v36, %v10205_v2 }
 0x257   : > { %v1811_v47 = vpop.f32.mrf.mxu1 }
 0x258   : > { %v2167_v45 = vpack.c.bf16 %v2061_v59, %v2059_v16  ;;  %v1812_v7 = vadd.f32 %v1811_v47, %v10202_v56  ;;  %v2062_v39 = vmax.f32 %v1810_v5, 0.0 }
 0x259   : > { %v1813_v26 = vpop.f32.mrf.mxu1 }
 0x25a   : > { %v1814_v38 = vadd.f32 %v1813_v26, %v10205_v2  ;;  %2546 = vmatprep.mubr.bf16.mxu0 %v2167_v45  ;;  %v2063_v20 = vmax.f32 %v1812_v7, 0.0 }
 0x25b   : > { %v1815_v0 = vpop.f32.mrf.mxu1  ;;  %2547 = vmatmul.mubr.bf16.gmra.mxu0 %v2166_v40  ;;  %v8987_v40 = vld [vmem:[%s12458_s9 + $0x34] ss:$8 sps:$4 sm:$0xff]  }
 0x25c   : > { %v1816_v49 = vadd.f32 %v1815_v0, %v10202_v56  ;;  %v2064_v6 = vmax.f32 %v1814_v38, 0.0  ;;  %3920 = vmatprep.subr.bf16.mxu0 %v8987_v40  ;;  %v8988_v40 = vld [vmem:[%s12458_s9 + $0x20] ss:$8 sps:$4 sm:$0xff]  }
 0x25d   : > { %v1819_v44 = vpop.f32.mrf.mxu1  ;;  %3921 = vmatpush1.bf16.msra.mxu0 %v8985_v17 }
 0x25e   : > { %v2065_v51 = vmax.f32 %v1816_v49, 0.0  ;;  %v2168_v62 = vpack.c.bf16 %v2064_v6, %v2062_v39  ;;  %v1820_v32 = vadd.f32 %v1819_v44, %v10205_v2 }
 0x25f   : > { %v1821_v27 = vpop.f32.mrf.mxu1 }
 0x260   : > { %v2169_v60 = vpack.c.bf16 %v2065_v51, %v2063_v20  ;;  %v1822_v12 = vadd.f32 %v1821_v27, %v10202_v56  ;;  %v2066_v45 = vmax.f32 %v1820_v32, 0.0 }
 0x261   : > { %v1823_v42 = vpop.f32.mrf.mxu1 }
 0x262   : > { %v1824_v22 = vadd.f32 %v1823_v42, %v10205_v2  ;;  %2556 = vmatprep.mubr.bf16.mxu0 %v2169_v60  ;;  %v2067_v31 = vmax.f32 %v1822_v12, 0.0 }
 0x263   : > { %v1825_v11 = vpop.f32.mrf.mxu1  ;;  %2557 = vmatmul.mubr.bf16.gmra.mxu0 %v2168_v62 }
 0x264   : > { %v1826_v36 = vadd.f32 %v1825_v11, %v10202_v56  ;;  %v2068_v59 = vmax.f32 %v1824_v22, 0.0 }
 0x265   : > { %v1829_v16 = vpop.f32.mrf.mxu1 }
 0x266   : > { %v2069_v47 = vmax.f32 %v1826_v36, 0.0  ;;  %v2170_v7 = vpack.c.bf16 %v2068_v59, %v2066_v45  ;;  %v1830_v49 = vadd.f32 %v1829_v16, %v10205_v2 }
 0x267   : > { %v1831_v58 = vpop.f32.mrf.mxu1 }
 0x268   : > { %v2171_v26 = vpack.c.bf16 %v2069_v47, %v2067_v31  ;;  %v1832_v38 = vadd.f32 %v1831_v58, %v10202_v56  ;;  %v2070_v60 = vmax.f32 %v1830_v49, 0.0 }
 0x269   : > { %v1833_v53 = vpop.f32.mrf.mxu1 }
 0x26a   : > { %v1834_v0 = vadd.f32 %v1833_v53, %v10205_v2  ;;  %2566 = vmatprep.mubr.bf16.mxu0 %v2171_v26  ;;  %v2071_v6 = vmax.f32 %v1832_v38, 0.0 }
 0x26b   : > { %v1835_v5 = vpop.f32.mrf.mxu1  ;;  %2567 = vmatmul.mubr.bf16.gmra.mxu0 %v2170_v7  ;;  %v8990_v7 = vld [vmem:[%s12458_s9 + $0x24] ss:$8 sps:$4 sm:$0xff]  }
 0x26c   : > { %v1836_v44 = vadd.f32 %v1835_v5, %v10202_v56  ;;  %v2072_v51 = vmax.f32 %v1834_v0, 0.0  ;;  %3922 = vmatprep.subr.bf16.mxu0 %v8990_v7  ;;  %v8991_v7 = vld [vmem:[%s12458_s9 + $0x10] ss:$8 sps:$4 sm:$0xff]  }
 0x26d   : > { %v1839_v20 = vpop.f32.mrf.mxu1  ;;  %3923 = vmatpush1.bf16.msra.mxu0 %v8988_v40 }
 0x26e   : > { %v2073_v27 = vmax.f32 %v1836_v44, 0.0  ;;  %v2172_v12 = vpack.c.bf16 %v2072_v51, %v2070_v60  ;;  %v1840_v36 = vadd.f32 %v1839_v20, %v10205_v2 }
 0x26f   : > { %v1841_v39 = vpop.f32.mrf.mxu1 }
 0x270   : > { %v2173_v42 = vpack.c.bf16 %v2073_v27, %v2071_v6  ;;  %v1842_v22 = vadd.f32 %v1841_v39, %v10202_v56  ;;  %v2074_v26 = vmax.f32 %v1840_v36, 0.0 }
 0x271   : > { %v1843_v62 = vpop.f32.mrf.mxu1 }
 0x272   : > { %v1844_v11 = vadd.f32 %v1843_v62, %v10205_v2  ;;  %2576 = vmatprep.mubr.bf16.mxu0 %v2173_v42  ;;  %v2075_v59 = vmax.f32 %v1842_v22, 0.0 }
 0x273   : > { %v1845_v32 = vpop.f32.mrf.mxu1  ;;  %2577 = vmatmul.mubr.bf16.gmra.mxu0 %v2172_v12 }
 0x274   : > { %v1846_v16 = vadd.f32 %v1845_v32, %v10202_v56  ;;  %v2076_v47 = vmax.f32 %v1844_v11, 0.0 }
 0x275   : > { %v1849_v31 = vpop.f32.mrf.mxu1 }
 0x276   : > { %v2077_v58 = vmax.f32 %v1846_v16, 0.0  ;;  %v2174_v38 = vpack.c.bf16 %v2076_v47, %v2074_v26  ;;  %v1850_v44 = vadd.f32 %v1849_v31, %v10205_v2 }
 0x277   : > { %v1851_v45 = vpop.f32.mrf.mxu1 }
 0x278   : > { %v2175_v53 = vpack.c.bf16 %v2077_v58, %v2075_v59  ;;  %v1852_v0 = vadd.f32 %v1851_v45, %v10202_v56  ;;  %v2078_v42 = vmax.f32 %v1850_v44, 0.0 }
 0x279   : > { %v1853_v17 = vpop.f32.mrf.mxu1 }
 0x27a   : > { %v1854_v5 = vadd.f32 %v1853_v17, %v10205_v2  ;;  %2586 = vmatprep.mubr.bf16.mxu0 %v2175_v53  ;;  %v2079_v51 = vmax.f32 %v1852_v0, 0.0 }
 0x27b   : > { %v1855_v49 = vpop.f32.mrf.mxu1  ;;  %2587 = vmatmul.mubr.bf16.gmra.mxu0 %v2174_v38  ;;  %v8993_v38 = vld [vmem:[%s12458_s9 + $0x14] ss:$8 sps:$4 sm:$0xff]  }
 0x27c   : > { %v1856_v20 = vadd.f32 %v1855_v49, %v10202_v56  ;;  %v2080_v27 = vmax.f32 %v1854_v5, 0.0  ;;  %3924 = vmatprep.subr.bf16.mxu0 %v8993_v38  ;;  %v8994_v38 = vld [vmem:[%s12458_s9] ss:$8 sps:$4 sm:$0xff]  }
 0x27d   : > { %v1859_v6 = vpop.f32.mrf.mxu1  ;;  %3925 = vmatpush1.bf16.msra.mxu0 %v8991_v7 }
 0x27e   : > { %v2081_v39 = vmax.f32 %v1856_v20, 0.0  ;;  %v2176_v22 = vpack.c.bf16 %v2080_v27, %v2078_v42  ;;  %v1860_v16 = vadd.f32 %v1859_v6, %v10205_v2 }
 0x27f   : > { %v1861_v60 = vpop.f32.mrf.mxu1 }
 0x280   : > { %v2177_v62 = vpack.c.bf16 %v2081_v39, %v2079_v51  ;;  %v1862_v11 = vadd.f32 %v1861_v60, %v10202_v56  ;;  %v2082_v53 = vmax.f32 %v1860_v16, 0.0 }
 0x281   : > { %v1863_v12 = vpop.f32.mrf.mxu1 }
 0x282   : > { %v1864_v32 = vadd.f32 %v1863_v12, %v10205_v2  ;;  %2596 = vmatprep.mubr.bf16.mxu0 %v2177_v62  ;;  %v2083_v47 = vmax.f32 %v1862_v11, 0.0 }
 0x283   : > { %v1865_v36 = vpop.f32.mrf.mxu1  ;;  %2597 = vmatmul.mubr.bf16.gmra.mxu0 %v2176_v22 }
 0x284   : > { %v1866_v31 = vadd.f32 %v1865_v36, %v10202_v56  ;;  %v2084_v58 = vmax.f32 %v1864_v32, 0.0 }
 0x285   : > { %v1869_v59 = vpop.f32.mrf.mxu1 }
 0x286   : > { %v2085_v45 = vmax.f32 %v1866_v31, 0.0  ;;  %v2178_v0 = vpack.c.bf16 %v2084_v58, %v2082_v53  ;;  %v1870_v20 = vadd.f32 %v1869_v59, %v10205_v2 }
 0x287   : > { %v1871_v26 = vpop.f32.mrf.mxu1 }
 0x288   : > { %v2179_v17 = vpack.c.bf16 %v2085_v45, %v2083_v47  ;;  %v1872_v5 = vadd.f32 %v1871_v26, %v10202_v56  ;;  %v2086_v62 = vmax.f32 %v1870_v20, 0.0 }
 0x289   : > { %v1873_v40 = vpop.f32.mrf.mxu1 }
 0x28a   : > { %v1874_v49 = vadd.f32 %v1873_v40, %v10205_v2  ;;  %2606 = vmatprep.mubr.bf16.mxu0 %v2179_v17  ;;  %v2087_v27 = vmax.f32 %v1872_v5, 0.0 }
 0x28b   : > { %v1875_v44 = vpop.f32.mrf.mxu1  ;;  %2607 = vmatmul.mubr.bf16.gmra.mxu0 %v2178_v0  ;;  %v8996_v0 = vld [vmem:[%s12458_s9 + $0x4] ss:$8 sps:$4 sm:$0xff]  }
 0x28c   : > { %v1876_v6 = vadd.f32 %v1875_v44, %v10202_v56  ;;  %v2088_v39 = vmax.f32 %v1874_v49, 0.0  ;;  %3926 = vmatprep.subr.bf16.mxu0 %v8996_v0  ;;  %v8997_v0 = vld [vmem:[%s12458_s9 + $0xf0] ss:$8 sps:$4 sm:$0xff]  }
 0x28d   : > { %v1879_v51 = vpop.f32.mrf.mxu1  ;;  %3927 = vmatpush1.bf16.msra.mxu0 %v8994_v38 }
 0x28e   : > { %v2089_v60 = vmax.f32 %v1876_v6, 0.0  ;;  %v2180_v11 = vpack.c.bf16 %v2088_v39, %v2086_v62  ;;  %v1880_v31 = vadd.f32 %v1879_v51, %v10205_v2 }
 0x28f   : > { %v1881_v42 = vpop.f32.mrf.mxu1 }
 0x290   : > { %v2181_v12 = vpack.c.bf16 %v2089_v60, %v2087_v27  ;;  %v1882_v32 = vadd.f32 %v1881_v42, %v10202_v56  ;;  %v2090_v17 = vmax.f32 %v1880_v31, 0.0 }
 0x291   : > { %v1883_v22 = vpop.f32.mrf.mxu1 }
 0x292   : > { %v1884_v36 = vadd.f32 %v1883_v22, %v10205_v2  ;;  %2616 = vmatprep.mubr.bf16.mxu0 %v2181_v12  ;;  %v2091_v58 = vmax.f32 %v1882_v32, 0.0 }
 0x293   : > { %v1885_v16 = vpop.f32.mrf.mxu1  ;;  %2617 = vmatmul.mubr.bf16.gmra.mxu0 %v2180_v11 }
 0x294   : > { %v1886_v59 = vadd.f32 %v1885_v16, %v10202_v56  ;;  %v2092_v45 = vmax.f32 %v1884_v36, 0.0 }
 0x295   : > { %v1889_v47 = vpop.f32.mrf.mxu1 }
 0x296   : > { %v2093_v26 = vmax.f32 %v1886_v59, 0.0  ;;  %v2182_v5 = vpack.c.bf16 %v2092_v45, %v2090_v17  ;;  %v1890_v6 = vadd.f32 %v1889_v47, %v10205_v2 }
 0x297   : > { %v1891_v53 = vpop.f32.mrf.mxu1 }
 0x298   : > { %v2183_v40 = vpack.c.bf16 %v2093_v26, %v2091_v58  ;;  %v1892_v49 = vadd.f32 %v1891_v53, %v10202_v56  ;;  %v2094_v12 = vmax.f32 %v1890_v6, 0.0 }
 0x299   : > { %v1893_v7 = vpop.f32.mrf.mxu1 }
 0x29a   : > { %v1894_v44 = vadd.f32 %v1893_v7, %v10205_v2  ;;  %2626 = vmatprep.mubr.bf16.mxu0 %v2183_v40  ;;  %v2095_v39 = vmax.f32 %v1892_v49, 0.0 }
 0x29b   : > { %v1895_v20 = vpop.f32.mrf.mxu1  ;;  %2627 = vmatmul.mubr.bf16.gmra.mxu0 %v2182_v5  ;;  %v8999_v5 = vld [vmem:[%s12458_s9 + $0xf4] ss:$8 sps:$4 sm:$0xff]  }
 0x29c   : > { %v1896_v51 = vadd.f32 %v1895_v20, %v10202_v56  ;;  %v2096_v60 = vmax.f32 %v1894_v44, 0.0  ;;  %3928 = vmatprep.subr.bf16.mxu0 %v8999_v5  ;;  %v9000_v5 = vld [vmem:[%s12458_s9 + $0xe0] ss:$8 sps:$4 sm:$0xff]  }
 0x29d   : > { %v1899_v27 = vpop.f32.mrf.mxu1  ;;  %3929 = vmatpush2.bf16.msra.mxu0 %v8997_v0 }
 0x29e   : > { %v2097_v42 = vmax.f32 %v1896_v51, 0.0  ;;  %v2184_v32 = vpack.c.bf16 %v2096_v60, %v2094_v12  ;;  %v1900_v59 = vadd.f32 %v1899_v27, %v10205_v2 }
 0x29f   : > { %v1901_v62 = vpop.f32.mrf.mxu1 }
 0x2a0   : > { %v2185_v22 = vpack.c.bf16 %v2097_v42, %v2095_v39  ;;  %v1902_v36 = vadd.f32 %v1901_v62, %v10202_v56  ;;  %v2098_v40 = vmax.f32 %v1900_v59, 0.0 }
 0x2a1   : > { %v1903_v11 = vpop.f32.mrf.mxu1 }
 0x2a2   : > { %v1904_v16 = vadd.f32 %v1903_v11, %v10205_v2  ;;  %2636 = vmatprep.mubr.bf16.mxu0 %v2185_v22  ;;  %v2099_v45 = vmax.f32 %v1902_v36, 0.0 }
 0x2a3   : > { %v1905_v31 = vpop.f32.mrf.mxu1  ;;  %2637 = vmatmul.mubr.bf16.gmra.mxu0 %v2184_v32 }
 0x2a4   : > { %v1906_v47 = vadd.f32 %v1905_v31, %v10202_v56  ;;  %v2100_v26 = vmax.f32 %v1904_v16, 0.0 }
 0x2a5   : > { %v1909_v58 = vpop.f32.mrf.mxu1 }
 0x2a6   : > { %v2101_v53 = vmax.f32 %v1906_v47, 0.0  ;;  %v2186_v49 = vpack.c.bf16 %v2100_v26, %v2098_v40  ;;  %v1910_v51 = vadd.f32 %v1909_v58, %v10205_v2 }
 0x2a7   : > { %v1911_v17 = vpop.f32.mrf.mxu1 }
 0x2a8   : > { %v2187_v7 = vpack.c.bf16 %v2101_v53, %v2099_v45  ;;  %v1912_v44 = vadd.f32 %v1911_v17, %v10202_v56  ;;  %v2102_v22 = vmax.f32 %v1910_v51, 0.0 }
 0x2a9   : > { %v1913_v38 = vpop.f32.mrf.mxu1 }
 0x2aa   : > { %v1914_v20 = vadd.f32 %v1913_v38, %v10205_v2  ;;  %2646 = vmatprep.mubr.bf16.mxu0 %v2187_v7  ;;  %v2103_v60 = vmax.f32 %v1912_v44, 0.0 }
 0x2ab   : > { %v1915_v6 = vpop.f32.mrf.mxu1  ;;  %2647 = vmatmul.mubr.bf16.gmra.mxu0 %v2186_v49  ;;  %v9002_v49 = vld [vmem:[%s12458_s9 + $0xe4] ss:$8 sps:$4 sm:$0xff]  }
 0x2ac   : > { %v1916_v27 = vadd.f32 %v1915_v6, %v10202_v56  ;;  %v2104_v42 = vmax.f32 %v1914_v20, 0.0  ;;  %3930 = vmatprep.subr.bf16.mxu0 %v9002_v49  ;;  %v9003_v49 = vld [vmem:[%s12458_s9 + $0xd0] ss:$8 sps:$4 sm:$0xff]  }
 0x2ad   : > { %v1919_v39 = vpop.f32.mrf.mxu1  ;;  %3931 = vmatpush2.bf16.msra.mxu0 %v9000_v5 }
 0x2ae   : > { %v2105_v62 = vmax.f32 %v1916_v27, 0.0  ;;  %v2188_v36 = vpack.c.bf16 %v2104_v42, %v2102_v22  ;;  %v1920_v47 = vadd.f32 %v1919_v39, %v10205_v2 }
 0x2af   : > { %v1921_v12 = vpop.f32.mrf.mxu1 }
 0x2b0   : > { %v2189_v11 = vpack.c.bf16 %v2105_v62, %v2103_v60  ;;  %v1922_v16 = vadd.f32 %v1921_v12, %v10202_v56  ;;  %v2106_v7 = vmax.f32 %v1920_v47, 0.0 }
 0x2b1   : > { %v1923_v32 = vpop.f32.mrf.mxu1 }
 0x2b2   : > { %v1924_v31 = vadd.f32 %v1923_v32, %v10205_v2  ;;  %2656 = vmatprep.mubr.bf16.mxu0 %v2189_v11  ;;  %v2107_v26 = vmax.f32 %v1922_v16, 0.0 }
 0x2b3   : > { %v1925_v59 = vpop.f32.mrf.mxu1  ;;  %2657 = vmatmul.mubr.bf16.gmra.mxu0 %v2188_v36 }
 0x2b4   : > { %v1926_v58 = vadd.f32 %v1925_v59, %v10202_v56  ;;  %v2108_v53 = vmax.f32 %v1924_v31, 0.0 }
 0x2b5   : > { %v1929_v45 = vpop.f32.mrf.mxu1 }
 0x2b6   : > { %v2109_v17 = vmax.f32 %v1926_v58, 0.0  ;;  %v2190_v44 = vpack.c.bf16 %v2108_v53, %v2106_v7  ;;  %v1930_v27 = vadd.f32 %v1929_v45, %v10205_v2 }
 0x2b7   : > { %v1931_v40 = vpop.f32.mrf.mxu1 }
 0x2b8   : > { %v2191_v38 = vpack.c.bf16 %v2109_v17, %v2107_v26  ;;  %v1932_v20 = vadd.f32 %v1931_v40, %v10202_v56  ;;  %v2110_v11 = vmax.f32 %v1930_v27, 0.0 }
 0x2b9   : > { %v1933_v0 = vpop.f32.mrf.mxu1 }
 0x2ba   : > { %v1934_v6 = vadd.f32 %v1933_v0, %v10205_v2  ;;  %2666 = vmatprep.mubr.bf16.mxu0 %v2191_v38  ;;  %v2111_v42 = vmax.f32 %v1932_v20, 0.0 }
 0x2bb   : > { %v1935_v51 = vpop.f32.mrf.mxu1  ;;  %2667 = vmatmul.mubr.bf16.gmra.mxu0 %v2190_v44  ;;  %v9005_v44 = vld [vmem:[%s12458_s9 + $0xd4] ss:$8 sps:$4 sm:$0xff]  }
 0x2bc   : > { %v1936_v39 = vadd.f32 %v1935_v51, %v10202_v56  ;;  %v2112_v62 = vmax.f32 %v1934_v6, 0.0  ;;  %3932 = vmatprep.subr.bf16.mxu0 %v9005_v44 }
 0x2bd   : > { %v1939_v60 = vpop.f32.mrf.mxu1  ;;  %3933 = vmatpush2.bf16.msra.mxu0 %v9003_v49 }
 0x2be   : > { %v2113_v12 = vmax.f32 %v1936_v39, 0.0  ;;  %v2192_v16 = vpack.c.bf16 %v2112_v62, %v2110_v11  ;;  %v1940_v58 = vadd.f32 %v1939_v60, %v10205_v2 }
 0x2bf   : > { %v1941_v22 = vpop.f32.mrf.mxu1 }
 0x2c0   : > { %v2193_v32 = vpack.c.bf16 %v2113_v12, %v2111_v42  ;;  %v1942_v31 = vadd.f32 %v1941_v22, %v10202_v56  ;;  %v2114_v38 = vmax.f32 %v1940_v58, 0.0  ;;  %v2242_v42 = vld [vmem:[%s12455_s6] sm:$0x3] }
 0x2c1   : > { %v1943_v36 = vpop.f32.mrf.mxu1 }
 0x2c2   : > { %v1944_v59 = vadd.f32 %v1943_v36, %v10205_v2  ;;  %2676 = vmatprep.mubr.bf16.mxu0 %v2193_v32  ;;  %v2115_v53 = vmax.f32 %v1942_v31, 0.0  ;;  %v10435_v36 = vrot.slane %v2242_v42, %v9928_v30  ;;  %v10438_v31 = vrot.slane %v2242_v42, %v9936_v35 }
 0x2c3   : > { %v1945_v47 = vpop.f32.mrf.mxu1  ;;  %2677 = vmatmul.mubr.bf16.gmra.mxu0 %v2192_v16 }
 0x2c4   : > { %v1946_v45 = vadd.f32 %v1945_v47, %v10202_v56  ;;  %v2116_v17 = vmax.f32 %v1944_v59, 0.0 }
 0x2c5   : > { %v1949_v26 = vpop.f32.mrf.mxu1 }
 0x2c6   : > { %v2117_v40 = vmax.f32 %v1946_v45, 0.0  ;;  %v2194_v20 = vpack.c.bf16 %v2116_v17, %v2114_v38  ;;  %v1950_v39 = vadd.f32 %v1949_v26, %v10205_v2 }
 0x2c7   : > { %v1951_v7 = vpop.f32.mrf.mxu1 }
 0x2c8   : > { %v2195_v0 = vpack.c.bf16 %v2117_v40, %v2115_v53  ;;  %v1952_v6 = vadd.f32 %v1951_v7, %v10202_v56  ;;  %v2118_v59 = vmax.f32 %v1950_v39, 0.0 }
 0x2c9   : > { %v1953_v5 = vpop.f32.mrf.mxu1 }
 0x2ca   : > { %v1954_v51 = vadd.f32 %v1953_v5, %v10205_v2  ;;  %2686 = vmatprep.mubr.bf16.mxu0 %v2195_v0  ;;  %v2119_v12 = vmax.f32 %v1952_v6, 0.0 }
 0x2cb   : > { %v1955_v27 = vpop.f32.mrf.mxu1  ;;  %v2448_v62 = vpop.f32.mrf.mxu0  ;;  %2687 = vmatmul.mubr.bf16.gmra.mxu0 %v2194_v20 }
 0x2cc   : > { %v1956_v60 = vadd.f32 %v1955_v27, %v10202_v56  ;;  %v2120_v22 = vmax.f32 %v1954_v51, 0.0  ;;  %v2449_v38 = vadd.f32 %v2448_v62, %v10438_v31 }
 0x2cd   : > { %v1959_v32 = vpop.f32.mrf.mxu1  ;;  %v2450_v16 = vpop.f32.mrf.mxu0 }
 0x2ce   : > { %v2121_v11 = vmax.f32 %v1956_v60, 0.0  ;;  %v2196_v53 = vpack.c.bf16 %v2120_v22, %v2118_v59  ;;  %v2451_v17 = vadd.f32 %v2450_v16, %v10435_v36  ;;  %v1960_v6 = vadd.f32 %v1959_v32, %v10205_v2  ;;  %v9006_v32 = vld [vmem:[%s12458_s9 + $0xc0] ss:$8 sps:$4 sm:$0xff]  }
 0x2cf   : > { %v1961_v47 = vpop.f32.mrf.mxu1  ;;  %v2452_v58 = vpop.f32.mrf.mxu0  ;;  %v2767_v22 = vmax.f32 %v2449_v38, 0.0 }
 0x2d0   : > { %v2197_v45 = vpack.c.bf16 %v2121_v11, %v2119_v12  ;;  %v2453_v26 = vadd.f32 %v2452_v58, %v10438_v31  ;;  %v1962_v49 = vadd.f32 %v1961_v47, %v10202_v56  ;;  %v2768_v60 = vmax.f32 %v2451_v17, 0.0 }
 0x2d1   : > { %v1963_v40 = vpop.f32.mrf.mxu1  ;;  %v2454_v7 = vpop.f32.mrf.mxu0  ;;  %v2122_v47 = vmax.f32 %v1960_v6, 0.0 }
 0x2d2   : > { %2696 = vmatprep.mubr.bf16.mxu0 %v2197_v45  ;;  %v1964_v0 = vadd.f32 %v1963_v40, %v10205_v2  ;;  %v2455_v5 = vadd.f32 %v2454_v7, %v10435_v36  ;;  %v2769_v51 = vmax.f32 %v2453_v26, 0.0  ;;  %v2123_v16 = vmax.f32 %v1962_v49, 0.0  ;;  %v9008_v26 = vld [vmem:[%s12458_s9 + $0xc4] ss:$8 sps:$4 sm:$0xff]  }
 0x2d3   : > { %v1965_v44 = vpop.f32.mrf.mxu1  ;;  %v2458_v20 = vpop.f32.mrf.mxu0  ;;  %2697 = vmatmul.mubr.bf16.gmra.mxu0 %v2196_v53  ;;  %3934 = vmatprep.subr.bf16.mxu0 %v9008_v26 }
 0x2d4   : > { %v2770_v27 = vmax.f32 %v2455_v5, 0.0  ;;  %v1966_v39 = vadd.f32 %v1965_v44, %v10202_v56  ;;  %v2124_v62 = vmax.f32 %v1964_v0, 0.0  ;;  %v2895_v40 = vpack.c.bf16 %v2769_v51, %v2767_v22  ;;  %3935 = vmatpush2.bf16.msra.mxu0 %v9006_v32 }
 0x2d5   : > { %v1969_v42 = vpop.f32.mrf.mxu1  ;;  %v2460_v12 = vpop.f32.mrf.mxu0  ;;  %v2459_v17 = vadd.f32 %v2458_v20, %v10438_v31 }
 0x2d6   : > { %v2125_v11 = vmax.f32 %v1966_v39, 0.0  ;;  %v2896_v45 = vpack.c.bf16 %v2770_v27, %v2768_v60  ;;  %v2461_v7 = vadd.f32 %v2460_v12, %v10435_v36  ;;  %v2198_v49 = vpack.c.bf16 %v2124_v62, %v2122_v47 }
 0x2d7   : > { %v1971_v59 = vpop.f32.mrf.mxu1  ;;  %v2462_v58 = vpop.f32.mrf.mxu0  ;;  %v1970_v20 = vadd.f32 %v1969_v42, %v10205_v2 }
 0x2d8   : > { %v2463_v53 = vadd.f32 %v2462_v58, %v10438_v31  ;;  %3195 = vmatprep.mubr.bf16.mxu1 %v2896_v45  ;;  %v2199_v5 = vpack.c.bf16 %v2125_v11, %v2123_v16  ;;  %v1972_v51 = vadd.f32 %v1971_v59, %v10202_v56  ;;  %v2772_v62 = vmax.f32 %v2461_v7, 0.0 }
 0x2d9   : > { %v1973_v38 = vpop.f32.mrf.mxu1  ;;  %v2464_v0 = vpop.f32.mrf.mxu0  ;;  %3196 = vmatmul.mubr.bf16.vlgmr.msra.gmra.mxu1 %v2895_v40  ;;  %v2771_v58 = vmax.f32 %v2459_v17, 0.0 }
 0x2da   : > { %v1974_v44 = vadd.f32 %v1973_v38, %v10205_v2  ;;  %v2465_v6 = vadd.f32 %v2464_v0, %v10435_v36  ;;  %2706 = vmatprep.mubr.bf16.mxu0 %v2199_v5  ;;  %v2773_v60 = vmax.f32 %v2463_v53, 0.0  ;;  %v2127_v40 = vmax.f32 %v1972_v51, 0.0 }
 0x2db   : > { %v1975_v27 = vpop.f32.mrf.mxu1  ;;  %v2468_v39 = vpop.f32.mrf.mxu0  ;;  %2707 = vmatmul.mubr.bf16.gmra.mxu0 %v2198_v49  ;;  %v2126_v0 = vmax.f32 %v1970_v20, 0.0 }
 0x2dc   : > { %v2774_v12 = vmax.f32 %v2465_v6, 0.0  ;;  %v1976_v22 = vadd.f32 %v1975_v27, %v10202_v56  ;;  %v2128_v45 = vmax.f32 %v1974_v44, 0.0  ;;  %v2897_v5 = vpack.c.bf16 %v2773_v60, %v2771_v58 }
 0x2dd   : > { %v1979_v11 = vpop.f32.mrf.mxu1  ;;  %v2470_v16 = vpop.f32.mrf.mxu0  ;;  %v2469_v27 = vadd.f32 %v2468_v39, %v10438_v31 }
 0x2de   : > { %v2129_v47 = vmax.f32 %v1976_v22, 0.0  ;;  %v2898_v38 = vpack.c.bf16 %v2774_v12, %v2772_v62  ;;  %v2471_v42 = vadd.f32 %v2470_v16, %v10435_v36  ;;  %v2200_v7 = vpack.c.bf16 %v2128_v45, %v2126_v0 }
 0x2df   : > { %v1981_v26 = vpop.f32.mrf.mxu1  ;;  %v2472_v59 = vpop.f32.mrf.mxu0  ;;  %v1980_v12 = vadd.f32 %v1979_v11, %v10205_v2  ;;  %v9009_v11 = vld [vmem:[%s12458_s9 + $0xb0] ss:$8 sps:$4 sm:$0xff]  }
 0x2e0   : > { %v2473_v32 = vadd.f32 %v2472_v59, %v10438_v31  ;;  %3205 = vmatprep.mubr.bf16.mxu1 %v2898_v38  ;;  %v2201_v49 = vpack.c.bf16 %v2129_v47, %v2127_v40  ;;  %v1982_v51 = vadd.f32 %v1981_v26, %v10202_v56  ;;  %v2776_v58 = vmax.f32 %v2471_v42, 0.0 }
 0x2e1   : > { %v1983_v53 = vpop.f32.mrf.mxu1  ;;  %v2474_v6 = vpop.f32.mrf.mxu0  ;;  %3206 = vmatmul.mubr.bf16.gmra.mxu1 %v2897_v5  ;;  %v2775_v47 = vmax.f32 %v2469_v27, 0.0 }
 0x2e2   : > { %v1984_v17 = vadd.f32 %v1983_v53, %v10205_v2  ;;  %v2475_v44 = vadd.f32 %v2474_v6, %v10435_v36  ;;  %2716 = vmatprep.mubr.bf16.mxu0 %v2201_v49  ;;  %v2777_v22 = vmax.f32 %v2473_v32, 0.0  ;;  %v2131_v38 = vmax.f32 %v1982_v51, 0.0  ;;  %v9011_v32 = vld [vmem:[%s12458_s9 + $0xb4] ss:$8 sps:$4 sm:$0xff]  }
 0x2e3   : > { %v1985_v20 = vpop.f32.mrf.mxu1  ;;  %v2478_v60 = vpop.f32.mrf.mxu0  ;;  %2717 = vmatmul.mubr.bf16.gmra.mxu0 %v2200_v7  ;;  %v2130_v53 = vmax.f32 %v1980_v12, 0.0  ;;  %3936 = vmatprep.subr.bf16.mxu0 %v9011_v32 }
 0x2e4   : > { %v2778_v62 = vmax.f32 %v2475_v44, 0.0  ;;  %v1986_v16 = vadd.f32 %v1985_v20, %v10202_v56  ;;  %v2132_v40 = vmax.f32 %v1984_v17, 0.0  ;;  %v2899_v6 = vpack.c.bf16 %v2777_v22, %v2775_v47  ;;  %3937 = vmatpush2.bf16.msra.mxu0 %v9009_v11 }
 0x2e5   : > { %v1989_v45 = vpop.f32.mrf.mxu1  ;;  %v2480_v39 = vpop.f32.mrf.mxu0  ;;  %v2479_v42 = vadd.f32 %v2478_v60, %v10438_v31 }
 0x2e6   : > { %v2133_v59 = vmax.f32 %v1986_v16, 0.0  ;;  %v2900_v26 = vpack.c.bf16 %v2778_v62, %v2776_v58  ;;  %v2481_v7 = vadd.f32 %v2480_v39, %v10435_v36  ;;  %v2202_v51 = vpack.c.bf16 %v2132_v40, %v2130_v53 }
 0x2e7   : > { %v1991_v0 = vpop.f32.mrf.mxu1  ;;  %v2482_v5 = vpop.f32.mrf.mxu0  ;;  %v1990_v60 = vadd.f32 %v1989_v45, %v10205_v2 }
 0x2e8   : > { %v2483_v49 = vadd.f32 %v2482_v5, %v10438_v31  ;;  %3215 = vmatprep.mubr.bf16.mxu1 %v2900_v26  ;;  %v2203_v44 = vpack.c.bf16 %v2133_v59, %v2131_v38  ;;  %v1992_v22 = vadd.f32 %v1991_v0, %v10202_v56  ;;  %v2780_v40 = vmax.f32 %v2481_v7, 0.0 }
 0x2e9   : > { %v1993_v27 = vpop.f32.mrf.mxu1  ;;  %v2484_v17 = vpop.f32.mrf.mxu0  ;;  %3216 = vmatmul.mubr.bf16.gmra.mxu1 %v2899_v6  ;;  %v2779_v5 = vmax.f32 %v2479_v42, 0.0 }
 0x2ea   : > { %v1994_v20 = vadd.f32 %v1993_v27, %v10205_v2  ;;  %v2485_v12 = vadd.f32 %v2484_v17, %v10435_v36  ;;  %2726 = vmatprep.mubr.bf16.mxu0 %v2203_v44  ;;  %v2781_v58 = vmax.f32 %v2483_v49, 0.0  ;;  %v2135_v6 = vmax.f32 %v1992_v22, 0.0 }
 0x2eb   : > { %v1995_v62 = vpop.f32.mrf.mxu1  ;;  %v2488_v16 = vpop.f32.mrf.mxu0  ;;  %2727 = vmatmul.mubr.bf16.gmra.mxu0 %v2202_v51  ;;  %v2134_v17 = vmax.f32 %v1990_v60, 0.0 }
 0x2ec   : > { %v2782_v39 = vmax.f32 %v2485_v12, 0.0  ;;  %v1996_v47 = vadd.f32 %v1995_v62, %v10202_v56  ;;  %v2136_v26 = vmax.f32 %v1994_v20, 0.0  ;;  %v2901_v44 = vpack.c.bf16 %v2781_v58, %v2779_v5 }
 0x2ed   : > { %v1999_v59 = vpop.f32.mrf.mxu1  ;;  %v2490_v38 = vpop.f32.mrf.mxu0  ;;  %v2489_v62 = vadd.f32 %v2488_v16, %v10438_v31 }
 0x2ee   : > { %v2137_v53 = vmax.f32 %v1996_v47, 0.0  ;;  %v2902_v27 = vpack.c.bf16 %v2782_v39, %v2780_v40  ;;  %v2491_v45 = vadd.f32 %v2490_v38, %v10435_v36  ;;  %v2204_v7 = vpack.c.bf16 %v2136_v26, %v2134_v17 }
 0x2ef   : > { %v2001_v32 = vpop.f32.mrf.mxu1  ;;  %v2492_v0 = vpop.f32.mrf.mxu0  ;;  %v2000_v22 = vadd.f32 %v1999_v59, %v10205_v2 }
 0x2f0   : > { %v2493_v11 = vadd.f32 %v2492_v0, %v10438_v31  ;;  %3225 = vmatprep.mubr.bf16.mxu1 %v2902_v27  ;;  %v2205_v51 = vpack.c.bf16 %v2137_v53, %v2135_v6  ;;  %v2002_v60 = vadd.f32 %v2001_v32, %v10202_v56  ;;  %v2784_v5 = vmax.f32 %v2491_v45, 0.0  ;;  %v9014_v45 = vld [vmem:[%s12458_s9 + $0xa4] ss:$8 sps:$4 sm:$0xff]  }
 0x2f1   : > { %v2003_v49 = vpop.f32.mrf.mxu1  ;;  %v2494_v12 = vpop.f32.mrf.mxu0  ;;  %3226 = vmatmul.mubr.bf16.gmra.mxu1 %v2901_v44  ;;  %v2783_v6 = vmax.f32 %v2489_v62, 0.0  ;;  %v2138_v27 = vmax.f32 %v2000_v22, 0.0  ;;  %3938 = vmatprep.subr.bf16.mxu0 %v9014_v45 }
 0x2f2   : > { %v2004_v42 = vadd.f32 %v2003_v49, %v10205_v2  ;;  %v2495_v20 = vadd.f32 %v2494_v12, %v10435_v36  ;;  %2736 = vmatprep.mubr.bf16.mxu0 %v2205_v51  ;;  %v2785_v47 = vmax.f32 %v2493_v11, 0.0  ;;  %v2139_v17 = vmax.f32 %v2002_v60, 0.0  ;;  %v9012_v51 = vld [vmem:[%s12458_s9 + $0xa0] ss:$8 sps:$4 sm:$0xff]  }
 0x2f3   : > { %v2005_v58 = vpop.f32.mrf.mxu1  ;;  %v2498_v39 = vpop.f32.mrf.mxu0  ;;  %2737 = vmatmul.mubr.bf16.gmra.mxu0 %v2204_v7  ;;  %v8238_v60 = vld.sshfl [vmem:[%s12460_s11] sm:$0x33 pattern:$0x76325410] }
 0x2f4   : > { %v2786_v40 = vmax.f32 %v2495_v20, 0.0  ;;  %v2006_v38 = vadd.f32 %v2005_v58, %v10202_v56  ;;  %v2140_v26 = vmax.f32 %v2004_v42, 0.0  ;;  %v2903_v32 = vpack.c.bf16 %v2785_v47, %v2783_v6  ;;  %3939 = vmatpush2.bf16.msra.mxu0 %v9012_v51 }
 0x2f5   : > { %v2009_v16 = vpop.f32.mrf.mxu1  ;;  %v2500_v53 = vpop.f32.mrf.mxu0  ;;  %v2499_v62 = vadd.f32 %v2498_v39, %v10438_v31 }
 0x2f6   : > { %v2141_v0 = vmax.f32 %v2006_v38, 0.0  ;;  %v2904_v49 = vpack.c.bf16 %v2786_v40, %v2784_v5  ;;  %v2501_v12 = vadd.f32 %v2500_v53, %v10435_v36  ;;  %v2206_v7 = vpack.c.bf16 %v2140_v26, %v2138_v27 }
 0x2f7   : > { %v2011_v44 = vpop.f32.mrf.mxu1  ;;  %v2502_v59 = vpop.f32.mrf.mxu0  ;;  %v4466_v26 = vcombine.high %v8238_v60, %v8238_v60  ;;  %v2010_v53 = vadd.f32 %v2009_v16, %v10205_v2 }
 0x2f8   : > { %v2503_v11 = vadd.f32 %v2502_v59, %v10438_v31  ;;  %3235 = vmatprep.mubr.bf16.mxu1 %v2904_v49  ;;  %v2207_v22 = vpack.c.bf16 %v2141_v0, %v2139_v17  ;;  %v2012_v58 = vadd.f32 %v2011_v44, %v10202_v56  ;;  %v2788_v6 = vmax.f32 %v2501_v12, 0.0 }
 0x2f9   : > { %v2013_v42 = vpop.f32.mrf.mxu1  ;;  %v2504_v20 = vpop.f32.mrf.mxu0  ;;  %3236 = vmatmul.mubr.bf16.gmra.mxu1 %v2903_v32  ;;  %v2787_v17 = vmax.f32 %v2499_v62, 0.0  ;;  %v4471_v59 = vand.u32 %v4466_v26, %v9588_v3  ;;  %v4468_v49 = vand.u32 %v8238_v60, %v9588_v3  ;;  %v2142_v51 = vmax.f32 %v2010_v53, 0.0 }
 0x2fa   : > { %v2014_v47 = vadd.f32 %v2013_v42, %v10205_v2  ;;  %v2505_v40 = vadd.f32 %v2504_v20, %v10435_v36  ;;  %v2789_v38 = vmax.f32 %v2503_v11, 0.0  ;;  %2746 = vmatprep.mubr.bf16.mxu0 %v2207_v22  ;;  %v2143_v32 = vmax.f32 %v2012_v58, 0.0 }
 0x2fb   : > { %v2015_v5 = vpop.f32.mrf.mxu1  ;;  %v2508_v39 = vpop.f32.mrf.mxu0  ;;  %2747 = vmatmul.mubr.bf16.gmra.mxu0 %v2206_v7  ;;  %4487 = vmatprep.subr.bf16.mxu1 %v4471_v59 }
 0x2fc   : > { %v2790_v0 = vmax.f32 %v2505_v40, 0.0  ;;  %v2016_v27 = vadd.f32 %v2015_v5, %v10202_v56  ;;  %v2144_v11 = vmax.f32 %v2014_v47, 0.0  ;;  %v2905_v20 = vpack.c.bf16 %v2789_v38, %v2787_v17  ;;  %4488 = vmatpush1.bf16.msra.mxu1 %v4468_v49  ;;  %v9017_v17 = vld [vmem:[%s12458_s9 + $0x94] ss:$8 sps:$4 sm:$0xff]  }
 0x2fd   : > { %v2510_v44 = vpop.f32.mrf.mxu0  ;;  %v2509_v62 = vadd.f32 %v2508_v39, %v10438_v31  ;;  %v9015_v39 = vld [vmem:[%s12458_s9 + $0x90] ss:$8 sps:$4 sm:$0xff]   ;;  %3940 = vmatprep.subr.bf16.mxu0 %v9017_v17  ;;  %v9020_v17 = vld [vmem:[%s12458_s9 + $0x84] ss:$8 sps:$4 sm:$0xff]  }
 0x2fe   : > { %v2145_v45 = vmax.f32 %v2016_v27, 0.0  ;;  %v2906_v42 = vpack.c.bf16 %v2790_v0, %v2788_v6  ;;  %v2511_v2 = vadd.f32 %v2510_v44, %v10435_v36  ;;  %v2208_v7 = vpack.c.bf16 %v2144_v11, %v2142_v51  ;;  %3941 = vmatpush2.bf16.msra.mxu0 %v9015_v39  ;;  %v9018_v39 = vld [vmem:[%s12458_s9 + $0x80] ss:$8 sps:$4 sm:$0xff]  }
 0x2ff   : > { %v2512_v22 = vpop.f32.mrf.mxu0  ;;  %v2791_v5 = vmax.f32 %v2509_v62, 0.0  ;;  %3942 = vmatprep.subr.bf16.mxu0 %v9020_v17 }
 0x300   : > { %v2513_v16 = vadd.f32 %v2512_v22, %v10438_v31  ;;  %3245 = vmatprep.mubr.bf16.mxu1 %v2906_v42  ;;  %v2209_v56 = vpack.c.bf16 %v2145_v45, %v2143_v32  ;;  %v2792_v58 = vmax.f32 %v2511_v2, 0.0 }
 0x301   : > { %v2514_v12 = vpop.f32.mrf.mxu0  ;;  %3246 = vmatmul.mubr.bf16.gmra.mxu1 %v2905_v20 }
 0x302   : > { %v2515_v3 = vadd.f32 %v2514_v12, %v10435_v36  ;;  %2756 = vmatprep.mubr.bf16.mxu0 %v2209_v56  ;;  %v2793_v47 = vmax.f32 %v2513_v16, 0.0  ;;  %3943 = vmatpush2.bf16.msra.mxu0 %v9018_v39 }
 0x303   : > { %v2518_v60 = vpop.f32.mrf.mxu0  ;;  %2757 = vmatmul.mubr.bf16.gmra.mxu0 %v2208_v7 }
 0x304   : > { %v2794_v40 = vmax.f32 %v2515_v3, 0.0  ;;  %v2907_v6 = vpack.c.bf16 %v2793_v47, %v2791_v5  ;;  %v2519_v59 = vadd.f32 %v2518_v60, %v10438_v31 }
 0x305   : > { %v2520_v38 = vpop.f32.mrf.mxu0 }
 0x306   : > { %v2908_v26 = vpack.c.bf16 %v2794_v40, %v2792_v58  ;;  %v2521_v0 = vadd.f32 %v2520_v38, %v10435_v36  ;;  %v2795_v22 = vmax.f32 %v2519_v59, 0.0 }
 0x307   : > { %v2522_v53 = vpop.f32.mrf.mxu0 }
 0x308   : > { %v2523_v27 = vadd.f32 %v2522_v53, %v10438_v31  ;;  %3255 = vmatprep.mubr.bf16.mxu1 %v2908_v26  ;;  %v2796_v11 = vmax.f32 %v2521_v0, 0.0 }
 0x309   : > { %v2524_v44 = vpop.f32.mrf.mxu0  ;;  %3256 = vmatmul.mubr.bf16.gmra.mxu1 %v2907_v6 }
 0x30a   : > { %v2525_v49 = vadd.f32 %v2524_v44, %v10435_v36  ;;  %v2797_v45 = vmax.f32 %v2523_v27, 0.0 }
 0x30b   : > { %v2528_v32 = vpop.f32.mrf.mxu0 }
 0x30c   : > { %v2798_v42 = vmax.f32 %v2525_v49, 0.0  ;;  %v2909_v16 = vpack.c.bf16 %v2797_v45, %v2795_v22  ;;  %v2529_v62 = vadd.f32 %v2528_v32, %v10438_v31 }
 0x30d   : > { %v2530_v20 = vpop.f32.mrf.mxu0 }
 0x30e   : > { %v2910_v51 = vpack.c.bf16 %v2798_v42, %v2796_v11  ;;  %v2531_v56 = vadd.f32 %v2530_v20, %v10435_v36  ;;  %v2799_v5 = vmax.f32 %v2529_v62, 0.0 }
 0x30f   : > { %v2532_v2 = vpop.f32.mrf.mxu0 }
 0x310   : > { %v2533_v12 = vadd.f32 %v2532_v2, %v10438_v31  ;;  %3265 = vmatprep.mubr.bf16.mxu1 %v2910_v51  ;;  %v2800_v58 = vmax.f32 %v2531_v56, 0.0 }
 0x311   : > { %v2534_v7 = vpop.f32.mrf.mxu0  ;;  %3266 = vmatmul.mubr.bf16.gmra.mxu1 %v2909_v16 }
 0x312   : > { %v2535_v3 = vadd.f32 %v2534_v7, %v10435_v36  ;;  %v2801_v47 = vmax.f32 %v2533_v12, 0.0 }
 0x313   : > { %v2538_v60 = vpop.f32.mrf.mxu0 }
 0x314   : > { %v2802_v40 = vmax.f32 %v2535_v3, 0.0  ;;  %v2911_v6 = vpack.c.bf16 %v2801_v47, %v2799_v5  ;;  %v2539_v59 = vadd.f32 %v2538_v60, %v10438_v31 }
 0x315   : > { %v2540_v38 = vpop.f32.mrf.mxu0 }
 0x316   : > { %v2912_v26 = vpack.c.bf16 %v2802_v40, %v2800_v58  ;;  %v2541_v0 = vadd.f32 %v2540_v38, %v10435_v36  ;;  %v2803_v22 = vmax.f32 %v2539_v59, 0.0 }
 0x317   : > { %v2542_v53 = vpop.f32.mrf.mxu0 }
 0x318   : > { %v2543_v27 = vadd.f32 %v2542_v53, %v10438_v31  ;;  %3275 = vmatprep.mubr.bf16.mxu1 %v2912_v26  ;;  %v2804_v11 = vmax.f32 %v2541_v0, 0.0 }
 0x319   : > { %v2544_v44 = vpop.f32.mrf.mxu0  ;;  %3276 = vmatmul.mubr.bf16.gmra.mxu1 %v2911_v6 }
 0x31a   : > { %v2545_v49 = vadd.f32 %v2544_v44, %v10435_v36  ;;  %v2805_v45 = vmax.f32 %v2543_v27, 0.0 }
 0x31b   : > { %v2548_v32 = vpop.f32.mrf.mxu0 }
 0x31c   : > { %v2806_v42 = vmax.f32 %v2545_v49, 0.0  ;;  %v2913_v16 = vpack.c.bf16 %v2805_v45, %v2803_v22  ;;  %v2549_v62 = vadd.f32 %v2548_v32, %v10438_v31  ;;  %v9023_v49 = vld [vmem:[#allocation2 + $0x74] ss:$8 sps:$4 sm:$0xff]  }
 0x31d   : > { %v2550_v20 = vpop.f32.mrf.mxu0  ;;  %5018 = vmatprep.subr.bf16.mxu0 %v9023_v49 }
 0x31e   : > { %v2914_v51 = vpack.c.bf16 %v2806_v42, %v2804_v11  ;;  %v2551_v56 = vadd.f32 %v2550_v20, %v10435_v36  ;;  %v2807_v5 = vmax.f32 %v2549_v62, 0.0 }
 0x31f   : > { %v2552_v2 = vpop.f32.mrf.mxu0 }
 0x320   : > { %v2553_v12 = vadd.f32 %v2552_v2, %v10438_v31  ;;  %3285 = vmatprep.mubr.bf16.mxu1 %v2914_v51  ;;  %v2808_v58 = vmax.f32 %v2551_v56, 0.0 }
 0x321   : > { %v2554_v7 = vpop.f32.mrf.mxu0  ;;  %3286 = vmatmul.mubr.bf16.gmra.mxu1 %v2913_v16 }
 0x322   : > { %v2555_v3 = vadd.f32 %v2554_v7, %v10435_v36  ;;  %v2809_v47 = vmax.f32 %v2553_v12, 0.0 }
 0x323   : > { %v2558_v60 = vpop.f32.mrf.mxu0 }
 0x324   : > { %v2810_v40 = vmax.f32 %v2555_v3, 0.0  ;;  %v2915_v6 = vpack.c.bf16 %v2809_v47, %v2807_v5  ;;  %v2559_v17 = vadd.f32 %v2558_v60, %v10438_v31 }
 0x325   : > { %v2560_v38 = vpop.f32.mrf.mxu0 }
 0x326   : > { %v2916_v26 = vpack.c.bf16 %v2810_v40, %v2808_v58  ;;  %v2561_v0 = vadd.f32 %v2560_v38, %v10435_v36  ;;  %v2811_v20 = vmax.f32 %v2559_v17, 0.0 }
 0x327   : > { %v2562_v53 = vpop.f32.mrf.mxu0 }
 0x328   : > { %v2563_v27 = vadd.f32 %v2562_v53, %v10438_v31  ;;  %3295 = vmatprep.mubr.bf16.mxu1 %v2916_v26  ;;  %v2812_v32 = vmax.f32 %v2561_v0, 0.0 }
 0x329   : > { %v2564_v39 = vpop.f32.mrf.mxu0  ;;  %3296 = vmatmul.mubr.bf16.gmra.mxu1 %v2915_v6 }
 0x32a   : > { %v2565_v44 = vadd.f32 %v2564_v39, %v10435_v36  ;;  %v2813_v11 = vmax.f32 %v2563_v27, 0.0 }
 0x32b   : > { %v2568_v59 = vpop.f32.mrf.mxu0 }
 0x32c   : > { %v2814_v45 = vmax.f32 %v2565_v44, 0.0  ;;  %v2917_v2 = vpack.c.bf16 %v2813_v11, %v2811_v20  ;;  %v2569_v7 = vadd.f32 %v2568_v59, %v10438_v31 }
 0x32d   : > { %v2570_v42 = vpop.f32.mrf.mxu0 }
 0x32e   : > { %v2918_v22 = vpack.c.bf16 %v2814_v45, %v2812_v32  ;;  %v2571_v16 = vadd.f32 %v2570_v42, %v10435_v36  ;;  %v2815_v38 = vmax.f32 %v2569_v7, 0.0 }
 0x32f   : > { %v2572_v51 = vpop.f32.mrf.mxu0 }
 0x330   : > { %v2573_v56 = vadd.f32 %v2572_v51, %v10438_v31  ;;  %3305 = vmatprep.mubr.bf16.mxu1 %v2918_v22  ;;  %v2816_v60 = vmax.f32 %v2571_v16, 0.0 }
 0x331   : > { %v2574_v12 = vpop.f32.mrf.mxu0  ;;  %3306 = vmatmul.mubr.bf16.gmra.mxu1 %v2917_v2 }
 0x332   : > { %v2575_v62 = vadd.f32 %v2574_v12, %v10435_v36  ;;  %v2817_v58 = vmax.f32 %v2573_v56, 0.0 }
 0x333   : > { %v2578_v3 = vpop.f32.mrf.mxu0 }
 0x334   : > { %v2818_v47 = vmax.f32 %v2575_v62, 0.0  ;;  %v2919_v53 = vpack.c.bf16 %v2817_v58, %v2815_v38  ;;  %v2579_v39 = vadd.f32 %v2578_v3, %v10438_v31 }
 0x335   : > { %v2580_v40 = vpop.f32.mrf.mxu0 }
 0x336   : > { %v2920_v5 = vpack.c.bf16 %v2818_v47, %v2816_v60  ;;  %v2581_v6 = vadd.f32 %v2580_v40, %v10435_v36  ;;  %v2819_v45 = vmax.f32 %v2579_v39, 0.0 }
 0x337   : > { %v2582_v26 = vpop.f32.mrf.mxu0 }
 0x338   : > { %v2583_v0 = vadd.f32 %v2582_v26, %v10438_v31  ;;  %3315 = vmatprep.mubr.bf16.mxu1 %v2920_v5  ;;  %v2820_v59 = vmax.f32 %v2581_v6, 0.0 }
 0x339   : > { %v2584_v27 = vpop.f32.mrf.mxu0  ;;  %3316 = vmatmul.mubr.bf16.gmra.mxu1 %v2919_v53 }
 0x33a   : > { %v2585_v17 = vadd.f32 %v2584_v27, %v10435_v36  ;;  %v2821_v49 = vmax.f32 %v2583_v0, 0.0 }
 0x33b   : > { %v2588_v44 = vpop.f32.mrf.mxu0 }
 0x33c   : > { %v2822_v32 = vmax.f32 %v2585_v17, 0.0  ;;  %v2921_v22 = vpack.c.bf16 %v2821_v49, %v2819_v45  ;;  %v2589_v56 = vadd.f32 %v2588_v44, %v10438_v31 }
 0x33d   : > { %v2590_v11 = vpop.f32.mrf.mxu0 }
 0x33e   : > { %v2922_v42 = vpack.c.bf16 %v2822_v32, %v2820_v59  ;;  %v2591_v51 = vadd.f32 %v2590_v11, %v10435_v36  ;;  %v2823_v47 = vmax.f32 %v2589_v56, 0.0 }
 0x33f   : > { %v2592_v20 = vpop.f32.mrf.mxu0 }
 0x340   : > { %v2593_v2 = vadd.f32 %v2592_v20, %v10438_v31  ;;  %3325 = vmatprep.mubr.bf16.mxu1 %v2922_v42  ;;  %v2824_v62 = vmax.f32 %v2591_v51, 0.0 }
 0x341   : > { %v2594_v16 = vpop.f32.mrf.mxu0  ;;  %3326 = vmatmul.mubr.bf16.gmra.mxu1 %v2921_v22 }
 0x342   : > { %v2595_v12 = vadd.f32 %v2594_v16, %v10435_v36  ;;  %v2825_v3 = vmax.f32 %v2593_v2, 0.0 }
 0x343   : > { %v2598_v7 = vpop.f32.mrf.mxu0 }
 0x344   : > { %v2826_v60 = vmax.f32 %v2595_v12, 0.0  ;;  %v2923_v5 = vpack.c.bf16 %v2825_v3, %v2823_v47  ;;  %v2599_v0 = vadd.f32 %v2598_v7, %v10438_v31 }
 0x345   : > { %v2600_v58 = vpop.f32.mrf.mxu0 }
 0x346   : > { %v2924_v40 = vpack.c.bf16 %v2826_v60, %v2824_v62  ;;  %v2601_v26 = vadd.f32 %v2600_v58, %v10435_v36  ;;  %v2827_v32 = vmax.f32 %v2599_v0, 0.0 }
 0x347   : > { %v2602_v38 = vpop.f32.mrf.mxu0 }
 0x348   : > { %v2603_v53 = vadd.f32 %v2602_v38, %v10438_v31  ;;  %3335 = vmatprep.mubr.bf16.mxu1 %v2924_v40  ;;  %v2828_v17 = vmax.f32 %v2601_v26, 0.0 }
 0x349   : > { %v2604_v6 = vpop.f32.mrf.mxu0  ;;  %3336 = vmatmul.mubr.bf16.gmra.mxu1 %v2923_v5 }
 0x34a   : > { %v2605_v27 = vadd.f32 %v2604_v6, %v10435_v36  ;;  %v2829_v44 = vmax.f32 %v2603_v53, 0.0 }
 0x34b   : > { %v2608_v39 = vpop.f32.mrf.mxu0 }
 0x34c   : > { %v2830_v59 = vmax.f32 %v2605_v27, 0.0  ;;  %v2925_v42 = vpack.c.bf16 %v2829_v44, %v2827_v32  ;;  %v2609_v2 = vadd.f32 %v2608_v39, %v10438_v31 }
 0x34d   : > { %v2610_v49 = vpop.f32.mrf.mxu0 }
 0x34e   : > { %v2926_v11 = vpack.c.bf16 %v2830_v59, %v2828_v17  ;;  %v2611_v20 = vadd.f32 %v2610_v49, %v10435_v36  ;;  %v2831_v60 = vmax.f32 %v2609_v2, 0.0 }
 0x34f   : > { %v2612_v45 = vpop.f32.mrf.mxu0 }
 0x350   : > { %v2613_v22 = vadd.f32 %v2612_v45, %v10438_v31  ;;  %3345 = vmatprep.mubr.bf16.mxu1 %v2926_v11  ;;  %v2832_v12 = vmax.f32 %v2611_v20, 0.0 }
 0x351   : > { %v2614_v51 = vpop.f32.mrf.mxu0  ;;  %3346 = vmatmul.mubr.bf16.gmra.mxu1 %v2925_v42 }
 0x352   : > { %v2615_v16 = vadd.f32 %v2614_v51, %v10435_v36  ;;  %v2833_v7 = vmax.f32 %v2613_v22, 0.0 }
 0x353   : > { %v2618_v56 = vpop.f32.mrf.mxu0 }
 0x354   : > { %v2834_v62 = vmax.f32 %v2615_v16, 0.0  ;;  %v2927_v40 = vpack.c.bf16 %v2833_v7, %v2831_v60  ;;  %v2619_v53 = vadd.f32 %v2618_v56, %v10438_v31 }
 0x355   : > { %v2620_v3 = vpop.f32.mrf.mxu0 }
 0x356   : > { %v2928_v58 = vpack.c.bf16 %v2834_v62, %v2832_v12  ;;  %v2621_v38 = vadd.f32 %v2620_v3, %v10435_v36  ;;  %v2835_v59 = vmax.f32 %v2619_v53, 0.0 }
 0x357   : > { %v2622_v47 = vpop.f32.mrf.mxu0 }
 0x358   : > { %v2623_v5 = vadd.f32 %v2622_v47, %v10438_v31  ;;  %3355 = vmatprep.mubr.bf16.mxu1 %v2928_v58  ;;  %v2836_v27 = vmax.f32 %v2621_v38, 0.0 }
 0x359   : > { %v2624_v26 = vpop.f32.mrf.mxu0  ;;  %3356 = vmatmul.mubr.bf16.gmra.mxu1 %v2927_v40 }
 0x35a   : > { %v2625_v6 = vadd.f32 %v2624_v26, %v10435_v36  ;;  %v2837_v39 = vmax.f32 %v2623_v5, 0.0 }
 0x35b   : > { %v2628_v0 = vpop.f32.mrf.mxu0 }
 0x35c   : > { %v2838_v17 = vmax.f32 %v2625_v6, 0.0  ;;  %v2929_v11 = vpack.c.bf16 %v2837_v39, %v2835_v59  ;;  %v2629_v22 = vadd.f32 %v2628_v0, %v10438_v31 }
 0x35d   : > { %v2630_v44 = vpop.f32.mrf.mxu0 }
 0x35e   : > { %v2930_v49 = vpack.c.bf16 %v2838_v17, %v2836_v27  ;;  %v2631_v45 = vadd.f32 %v2630_v44, %v10435_v36  ;;  %v2839_v62 = vmax.f32 %v2629_v22, 0.0 }
 0x35f   : > { %v2632_v32 = vpop.f32.mrf.mxu0 }
 0x360   : > { %v2633_v42 = vadd.f32 %v2632_v32, %v10438_v31  ;;  %3365 = vmatprep.mubr.bf16.mxu1 %v2930_v49  ;;  %v2840_v16 = vmax.f32 %v2631_v45, 0.0 }
 0x361   : > { %v2634_v20 = vpop.f32.mrf.mxu0  ;;  %3366 = vmatmul.mubr.bf16.gmra.mxu1 %v2929_v11 }
 0x362   : > { %v2635_v51 = vadd.f32 %v2634_v20, %v10435_v36  ;;  %v2841_v56 = vmax.f32 %v2633_v42, 0.0 }
 0x363   : > { %v2638_v2 = vpop.f32.mrf.mxu0 }
 0x364   : > { %v2842_v12 = vmax.f32 %v2635_v51, 0.0  ;;  %v2931_v58 = vpack.c.bf16 %v2841_v56, %v2839_v62  ;;  %v2639_v5 = vadd.f32 %v2638_v2, %v10438_v31 }
 0x365   : > { %v2640_v7 = vpop.f32.mrf.mxu0 }
 0x366   : > { %v2932_v3 = vpack.c.bf16 %v2842_v12, %v2840_v16  ;;  %v2641_v47 = vadd.f32 %v2640_v7, %v10435_v36  ;;  %v2843_v17 = vmax.f32 %v2639_v5, 0.0 }
 0x367   : > { %v2642_v60 = vpop.f32.mrf.mxu0 }
 0x368   : > { %v2643_v40 = vadd.f32 %v2642_v60, %v10438_v31  ;;  %3375 = vmatprep.mubr.bf16.mxu1 %v2932_v3  ;;  %v2844_v6 = vmax.f32 %v2641_v47, 0.0 }
 0x369   : > { %v2644_v38 = vpop.f32.mrf.mxu0  ;;  %3376 = vmatmul.mubr.bf16.gmra.mxu1 %v2931_v58 }
 0x36a   : > { %v2645_v26 = vadd.f32 %v2644_v38, %v10435_v36  ;;  %v2845_v0 = vmax.f32 %v2643_v40, 0.0 }
 0x36b   : > { %v2648_v53 = vpop.f32.mrf.mxu0 }
 0x36c   : > { %v2846_v27 = vmax.f32 %v2645_v26, 0.0  ;;  %v2933_v49 = vpack.c.bf16 %v2845_v0, %v2843_v17  ;;  %v2649_v42 = vadd.f32 %v2648_v53, %v10438_v31 }
 0x36d   : > { %v2650_v39 = vpop.f32.mrf.mxu0 }
 0x36e   : > { %v2934_v44 = vpack.c.bf16 %v2846_v27, %v2844_v6  ;;  %v2651_v32 = vadd.f32 %v2650_v39, %v10435_v36  ;;  %v2847_v12 = vmax.f32 %v2649_v42, 0.0 }
 0x36f   : > { %v2652_v59 = vpop.f32.mrf.mxu0 }
 0x370   : > { %v2653_v11 = vadd.f32 %v2652_v59, %v10438_v31  ;;  %3385 = vmatprep.mubr.bf16.mxu1 %v2934_v44  ;;  %v2848_v51 = vmax.f32 %v2651_v32, 0.0 }
 0x371   : > { %v2654_v45 = vpop.f32.mrf.mxu0  ;;  %3386 = vmatmul.mubr.bf16.gmra.mxu1 %v2933_v49 }
 0x372   : > { %v2655_v20 = vadd.f32 %v2654_v45, %v10435_v36  ;;  %v2849_v2 = vmax.f32 %v2653_v11, 0.0 }
 0x373   : > { %v2658_v22 = vpop.f32.mrf.mxu0 }
 0x374   : > { %v2850_v16 = vmax.f32 %v2655_v20, 0.0  ;;  %v2935_v3 = vpack.c.bf16 %v2849_v2, %v2847_v12  ;;  %v2659_v40 = vadd.f32 %v2658_v22, %v10438_v31 }
 0x375   : > { %v2660_v56 = vpop.f32.mrf.mxu0 }
 0x376   : > { %v2936_v7 = vpack.c.bf16 %v2850_v16, %v2848_v51  ;;  %v2661_v60 = vadd.f32 %v2660_v56, %v10435_v36  ;;  %v2851_v27 = vmax.f32 %v2659_v40, 0.0 }
 0x377   : > { %v2662_v62 = vpop.f32.mrf.mxu0 }
 0x378   : > { %v2663_v58 = vadd.f32 %v2662_v62, %v10438_v31  ;;  %3395 = vmatprep.mubr.bf16.mxu1 %v2936_v7  ;;  %v2852_v26 = vmax.f32 %v2661_v60, 0.0 }
 0x379   : > { %v2664_v47 = vpop.f32.mrf.mxu0  ;;  %3396 = vmatmul.mubr.bf16.gmra.mxu1 %v2935_v3 }
 0x37a   : > { %v2665_v38 = vadd.f32 %v2664_v47, %v10435_v36  ;;  %v2853_v53 = vmax.f32 %v2663_v58, 0.0 }
 0x37b   : > { %v2668_v5 = vpop.f32.mrf.mxu0 }
 0x37c   : > { %v2854_v6 = vmax.f32 %v2665_v38, 0.0  ;;  %v2937_v44 = vpack.c.bf16 %v2853_v53, %v2851_v27  ;;  %v2669_v11 = vadd.f32 %v2668_v5, %v10438_v31 }
 0x37d   : > { %v2670_v0 = vpop.f32.mrf.mxu0 }
 0x37e   : > { %v2938_v39 = vpack.c.bf16 %v2854_v6, %v2852_v26  ;;  %v2671_v59 = vadd.f32 %v2670_v0, %v10435_v36  ;;  %v2855_v16 = vmax.f32 %v2669_v11, 0.0 }
 0x37f   : > { %v2672_v17 = vpop.f32.mrf.mxu0 }
 0x380   : > { %v2673_v49 = vadd.f32 %v2672_v17, %v10438_v31  ;;  %3405 = vmatprep.mubr.bf16.mxu1 %v2938_v39  ;;  %v2856_v20 = vmax.f32 %v2671_v59, 0.0 }
 0x381   : > { %v2674_v32 = vpop.f32.mrf.mxu0  ;;  %3406 = vmatmul.mubr.bf16.gmra.mxu1 %v2937_v44 }
 0x382   : > { %v2675_v45 = vadd.f32 %v2674_v32, %v10435_v36  ;;  %v2857_v22 = vmax.f32 %v2673_v49, 0.0 }
 0x383   : > { %v2678_v42 = vpop.f32.mrf.mxu0 }
 0x384   : > { %v2858_v51 = vmax.f32 %v2675_v45, 0.0  ;;  %v2939_v7 = vpack.c.bf16 %v2857_v22, %v2855_v16  ;;  %v2679_v58 = vadd.f32 %v2678_v42, %v10438_v31 }
 0x385   : > { %v2680_v2 = vpop.f32.mrf.mxu0 }
 0x386   : > { %v2940_v56 = vpack.c.bf16 %v2858_v51, %v2856_v20  ;;  %v2681_v62 = vadd.f32 %v2680_v2, %v10435_v36  ;;  %v2859_v6 = vmax.f32 %v2679_v58, 0.0  ;;  %v2991_v58 = vld [vmem:[%s12457_s8] sm:$0x3] }
 0x387   : > { %v2682_v12 = vpop.f32.mrf.mxu0 }
 0x388   : > { %v2683_v3 = vadd.f32 %v2682_v12, %v10438_v31  ;;  %3415 = vmatprep.mubr.bf16.mxu1 %v2940_v56  ;;  %v2860_v38 = vmax.f32 %v2681_v62, 0.0 }
 0x389   : > { %v2684_v60 = vpop.f32.mrf.mxu0  ;;  %3416 = vmatmul.mubr.bf16.gmra.mxu1 %v2939_v7 }
 0x38a   : > { %v2685_v47 = vadd.f32 %v2684_v60, %v10435_v36  ;;  %v2861_v5 = vmax.f32 %v2683_v3, 0.0 }
 0x38b   : > { %v2688_v40 = vpop.f32.mrf.mxu0 }
 0x38c   : > { %v2862_v26 = vmax.f32 %v2685_v47, 0.0  ;;  %v2941_v39 = vpack.c.bf16 %v2861_v5, %v2859_v6  ;;  %v2689_v49 = vadd.f32 %v2688_v40, %v10438_v31 }
 0x38d   : > { %v2690_v53 = vpop.f32.mrf.mxu0 }
 0x38e   : > { %v2942_v0 = vpack.c.bf16 %v2862_v26, %v2860_v38  ;;  %v2691_v17 = vadd.f32 %v2690_v53, %v10435_v36  ;;  %v2863_v51 = vmax.f32 %v2689_v49, 0.0  ;;  %v10607_v53 = vrot.slane %v2991_v58, %v9928_v30 }
 0x38f   : > { %v2692_v27 = vpop.f32.mrf.mxu0 }
 0x390   : > { %v2693_v44 = vadd.f32 %v2692_v27, %v10438_v31  ;;  %3425 = vmatprep.mubr.bf16.mxu1 %v2942_v0  ;;  %v2864_v45 = vmax.f32 %v2691_v17, 0.0  ;;  %v10610_v0 = vrot.slane %v2991_v58, %v9936_v35 }
 0x391   : > { %v2694_v59 = vpop.f32.mrf.mxu0  ;;  %3426 = vmatmul.mubr.bf16.gmra.mxu1 %v2941_v39 }
 0x392   : > { %v2695_v32 = vadd.f32 %v2694_v59, %v10435_v36  ;;  %v2865_v42 = vmax.f32 %v2693_v44, 0.0 }
 0x393   : > { %v2698_v11 = vpop.f32.mrf.mxu0 }
 0x394   : > { %v2866_v20 = vmax.f32 %v2695_v32, 0.0  ;;  %v2943_v56 = vpack.c.bf16 %v2865_v42, %v2863_v51  ;;  %v2699_v3 = vadd.f32 %v2698_v11, %v10438_v31 }
 0x395   : > { %v2700_v22 = vpop.f32.mrf.mxu0 }
 0x396   : > { %v2944_v2 = vpack.c.bf16 %v2866_v20, %v2864_v45  ;;  %v2701_v12 = vadd.f32 %v2700_v22, %v10435_v36  ;;  %v2867_v27 = vmax.f32 %v2699_v3, 0.0 }
 0x397   : > { %v2702_v16 = vpop.f32.mrf.mxu0 }
 0x398   : > { %v2703_v7 = vadd.f32 %v2702_v16, %v10438_v31  ;;  %3435 = vmatprep.mubr.bf16.mxu1 %v2944_v2  ;;  %v2868_v40 = vmax.f32 %v2701_v12, 0.0 }
 0x399   : > { %v2704_v62 = vpop.f32.mrf.mxu0  ;;  %v3197_v47 = vpop.f32.mrf.mxu1  ;;  %3436 = vmatmul.mubr.bf16.gmra.mxu1 %v2943_v56 }
 0x39a   : > { %v2705_v60 = vadd.f32 %v2704_v62, %v10435_v36  ;;  %v2869_v38 = vmax.f32 %v2703_v7, 0.0  ;;  %v3198_v42 = vadd.f32 %v3197_v47, %v10610_v0 }
 0x39b   : > { %v2708_v26 = vpop.f32.mrf.mxu0  ;;  %v3199_v6 = vpop.f32.mrf.mxu1 }
 0x39c   : > { %v2870_v5 = vmax.f32 %v2705_v60, 0.0  ;;  %v2945_v49 = vpack.c.bf16 %v2869_v38, %v2867_v27  ;;  %v3200_v32 = vadd.f32 %v3199_v6, %v10607_v53  ;;  %v2709_v56 = vadd.f32 %v2708_v26, %v10438_v31  ;;  %v9026_v26 = vld [vmem:[#allocation2 + $0x64] ss:$8 sps:$4 sm:$0xff]  }
 0x39d   : > { %v2710_v39 = vpop.f32.mrf.mxu0  ;;  %v3201_v17 = vpop.f32.mrf.mxu1 }
 0x39e   : > { %v2946_v44 = vpack.c.bf16 %v2870_v5, %v2868_v40  ;;  %v3202_v59 = vadd.f32 %v3201_v17, %v10610_v0  ;;  %v2711_v51 = vadd.f32 %v2710_v39, %v10435_v36  ;;  %v3517_v3 = vmax.f32 %v3200_v32, 0.0  ;;  %v9021_v39 = vld [vmem:[#allocation2 + $0x70] ss:$8 sps:$4 sm:$0xff]  }
 0x39f   : > { %v2712_v11 = vpop.f32.mrf.mxu0  ;;  %v3203_v45 = vpop.f32.mrf.mxu1  ;;  %v3516_v40 = vmax.f32 %v3198_v42, 0.0 }
 0x3a0   : > { %3445 = vmatprep.mubr.bf16.mxu1 %v2946_v44  ;;  %v2713_v20 = vadd.f32 %v2712_v11, %v10438_v31  ;;  %v3204_v22 = vadd.f32 %v3203_v45, %v10607_v53  ;;  %v3518_v12 = vmax.f32 %v3202_v59, 0.0  ;;  %v2872_v5 = vmax.f32 %v2711_v51, 0.0 }
 0x3a1   : > { %v2714_v2 = vpop.f32.mrf.mxu0  ;;  %v3207_v16 = vpop.f32.mrf.mxu1  ;;  %3446 = vmatmul.mubr.bf16.gmra.mxu1 %v2945_v49  ;;  %v2871_v44 = vmax.f32 %v2709_v56, 0.0 }
 0x3a2   : > { %v3519_v7 = vmax.f32 %v3204_v22, 0.0  ;;  %v2715_v62 = vadd.f32 %v2714_v2, %v10435_v36  ;;  %v2873_v47 = vmax.f32 %v2713_v20, 0.0  ;;  %v3644_v11 = vpack.c.bf16 %v3518_v12, %v3516_v40 }
 0x3a3   : > { %v2718_v60 = vpop.f32.mrf.mxu0  ;;  %v3209_v58 = vpop.f32.mrf.mxu1  ;;  %v3208_v42 = vadd.f32 %v3207_v16, %v10610_v0  ;;  %v9029_v16 = vld [vmem:[#allocation2 + $0x54] ss:$8 sps:$4 sm:$0xff]  }
 0x3a4   : > { %v2874_v38 = vmax.f32 %v2715_v62, 0.0  ;;  %v3645_v17 = vpack.c.bf16 %v3519_v7, %v3517_v3  ;;  %v3210_v59 = vadd.f32 %v3209_v58, %v10607_v53  ;;  %v2947_v2 = vpack.c.bf16 %v2873_v47, %v2871_v44  ;;  %v9024_v62 = vld [vmem:[#allocation2 + $0x60] ss:$8 sps:$4 sm:$0xff]  }
 0x3a5   : > { %v2720_v6 = vpop.f32.mrf.mxu0  ;;  %v3211_v27 = vpop.f32.mrf.mxu1  ;;  %v2719_v3 = vadd.f32 %v2718_v60, %v10438_v31 }
 0x3a6   : > { %v3212_v49 = vadd.f32 %v3211_v27, %v10610_v0  ;;  %3944 = vmatprep.mubr.bf16.mxu0 %v3645_v17  ;;  %v2948_v22 = vpack.c.bf16 %v2874_v38, %v2872_v5  ;;  %v2721_v56 = vadd.f32 %v2720_v6, %v10435_v36  ;;  %v3521_v38 = vmax.f32 %v3210_v59, 0.0 }
 0x3a7   : > { %v2722_v45 = vpop.f32.mrf.mxu0  ;;  %v3213_v32 = vpop.f32.mrf.mxu1  ;;  %3945 = vmatmul.mubr.bf16.vlgmr.msra.gmra.mxu0 %v3644_v11  ;;  %v3520_v17 = vmax.f32 %v3208_v42, 0.0  ;;  %v2875_v60 = vmax.f32 %v2719_v3, 0.0 }
 0x3a8   : > { %v2723_v20 = vadd.f32 %v2722_v45, %v10438_v31  ;;  %v3214_v51 = vadd.f32 %v3213_v32, %v10607_v53  ;;  %5019 = vmatpush1.bf16.msra.mxu0 %v9021_v39  ;;  %3455 = vmatprep.mubr.bf16.mxu1 %v2948_v22  ;;  %v3522_v58 = vmax.f32 %v3212_v49, 0.0  ;;  %v2876_v39 = vmax.f32 %v2721_v56, 0.0  ;;  %v9027_v22 = vld [vmem:[#allocation2 + $0x50] ss:$8 sps:$4 sm:$0xff]  }
 0x3a9   : > { %v2724_v12 = vpop.f32.mrf.mxu0  ;;  %v3217_v7 = vpop.f32.mrf.mxu1  ;;  %3456 = vmatmul.mubr.bf16.gmra.mxu1 %v2947_v2  ;;  %5020 = vmatprep.subr.bf16.mxu0 %v9026_v26  ;;  %v9032_v2 = vld [vmem:[#allocation2 + $0x44] ss:$8 sps:$4 sm:$0xff]  }
 0x3aa   : > { %v3523_v40 = vmax.f32 %v3214_v51, 0.0  ;;  %v2725_v47 = vadd.f32 %v2724_v12, %v10435_v36  ;;  %v2877_v44 = vmax.f32 %v2723_v20, 0.0  ;;  %v3646_v49 = vpack.c.bf16 %v3522_v58, %v3520_v17 }
 0x3ab   : > { %v2728_v5 = vpop.f32.mrf.mxu0  ;;  %v3219_v27 = vpop.f32.mrf.mxu1  ;;  %v3218_v56 = vadd.f32 %v3217_v7, %v10610_v0  ;;  %v9035_v7 = vld [vmem:[#allocation2 + $0x34] ss:$8 sps:$4 sm:$0xff]  }
 0x3ac   : > { %v2878_v6 = vmax.f32 %v2725_v47, 0.0  ;;  %v3647_v32 = vpack.c.bf16 %v3523_v40, %v3521_v38  ;;  %5021 = vmatpush1.bf16.msra.mxu0 %v9024_v62  ;;  %v3220_v26 = vadd.f32 %v3219_v27, %v10607_v53  ;;  %v2949_v20 = vpack.c.bf16 %v2877_v44, %v2875_v60 }
 0x3ad   : > { %v2730_v11 = vpop.f32.mrf.mxu0  ;;  %v3221_v45 = vpop.f32.mrf.mxu1  ;;  %5022 = vmatprep.subr.bf16.mxu0 %v9029_v16  ;;  %v9030_v16 = vld [vmem:[#allocation2 + $0x40] ss:$8 sps:$4 sm:$0xff]   ;;  %v2729_v38 = vadd.f32 %v2728_v5, %v10438_v31 }
 0x3ae   : > { %v3222_v51 = vadd.f32 %v3221_v45, %v10610_v0  ;;  %3954 = vmatprep.mubr.bf16.mxu0 %v3647_v32  ;;  %v2950_v42 = vpack.c.bf16 %v2878_v6, %v2876_v39  ;;  %v2731_v3 = vadd.f32 %v2730_v11, %v10435_v36  ;;  %v3525_v6 = vmax.f32 %v3220_v26, 0.0 }
 0x3af   : > { %v2732_v59 = vpop.f32.mrf.mxu0  ;;  %v3223_v12 = vpop.f32.mrf.mxu1  ;;  %3955 = vmatmul.mubr.bf16.gmra.mxu0 %v3646_v49  ;;  %v3524_v32 = vmax.f32 %v3218_v56, 0.0  ;;  %v2879_v5 = vmax.f32 %v2729_v38, 0.0 }
 0x3b0   : > { %v2733_v47 = vadd.f32 %v2732_v59, %v10438_v31  ;;  %v3224_v62 = vadd.f32 %v3223_v12, %v10607_v53  ;;  %3465 = vmatprep.mubr.bf16.mxu1 %v2950_v42  ;;  %5023 = vmatpush1.bf16.msra.mxu0 %v9027_v22  ;;  %v3526_v27 = vmax.f32 %v3222_v51, 0.0  ;;  %v2880_v49 = vmax.f32 %v2731_v3, 0.0  ;;  %v9033_v42 = vld [vmem:[#allocation2 + $0x30] ss:$8 sps:$4 sm:$0xff]  }
 0x3b1   : > { %v2734_v58 = vpop.f32.mrf.mxu0  ;;  %v3227_v40 = vpop.f32.mrf.mxu1  ;;  %3466 = vmatmul.mubr.bf16.gmra.mxu1 %v2949_v20  ;;  %5024 = vmatprep.subr.bf16.mxu0 %v9032_v2  ;;  %v9038_v20 = vld [vmem:[#allocation2 + $0x24] ss:$8 sps:$4 sm:$0xff]  }
 0x3b2   : > { %v3527_v17 = vmax.f32 %v3224_v62, 0.0  ;;  %v2735_v44 = vadd.f32 %v2734_v58, %v10435_v36  ;;  %v2881_v60 = vmax.f32 %v2733_v47, 0.0  ;;  %v3648_v51 = vpack.c.bf16 %v3526_v27, %v3524_v32 }
 0x3b3   : > { %v2738_v39 = vpop.f32.mrf.mxu0  ;;  %v3229_v45 = vpop.f32.mrf.mxu1  ;;  %v3228_v3 = vadd.f32 %v3227_v40, %v10610_v0  ;;  %v9041_v40 = vld [vmem:[#allocation2 + $0x14] ss:$8 sps:$4 sm:$0xff]  }
 0x3b4   : > { %v2882_v11 = vmax.f32 %v2735_v44, 0.0  ;;  %v3649_v22 = vpack.c.bf16 %v3527_v17, %v3525_v6  ;;  %5025 = vmatpush1.bf16.msra.mxu0 %v9030_v16  ;;  %v3230_v2 = vadd.f32 %v3229_v45, %v10607_v53  ;;  %v2951_v47 = vpack.c.bf16 %v2881_v60, %v2879_v5 }
 0x3b5   : > { %v2740_v59 = vpop.f32.mrf.mxu0  ;;  %v3231_v12 = vpop.f32.mrf.mxu1  ;;  %5026 = vmatprep.subr.bf16.mxu0 %v9035_v7  ;;  %v9036_v7 = vld [vmem:[#allocation2 + $0x20] ss:$8 sps:$4 sm:$0xff]   ;;  %v2739_v6 = vadd.f32 %v2738_v39, %v10438_v31 }
 0x3b6   : > { %v3232_v62 = vadd.f32 %v3231_v12, %v10610_v0  ;;  %3964 = vmatprep.mubr.bf16.mxu0 %v3649_v22  ;;  %v2952_v56 = vpack.c.bf16 %v2882_v11, %v2880_v49  ;;  %v2741_v38 = vadd.f32 %v2740_v59, %v10435_v36  ;;  %v3529_v11 = vmax.f32 %v3230_v2, 0.0 }
 0x3b7   : > { %v2742_v26 = vpop.f32.mrf.mxu0  ;;  %v3233_v58 = vpop.f32.mrf.mxu1  ;;  %3965 = vmatmul.mubr.bf16.gmra.mxu0 %v3648_v51  ;;  %v3528_v22 = vmax.f32 %v3228_v3, 0.0  ;;  %v2883_v39 = vmax.f32 %v2739_v6, 0.0 }
 0x3b8   : > { %v2743_v44 = vadd.f32 %v2742_v26, %v10438_v31  ;;  %v3234_v16 = vadd.f32 %v3233_v58, %v10607_v53  ;;  %3475 = vmatprep.mubr.bf16.mxu1 %v2952_v56  ;;  %5027 = vmatpush1.bf16.msra.mxu0 %v9033_v42  ;;  %v3530_v45 = vmax.f32 %v3232_v62, 0.0  ;;  %v2884_v51 = vmax.f32 %v2741_v38, 0.0  ;;  %v9039_v56 = vld [vmem:[#allocation2 + $0x10] ss:$8 sps:$4 sm:$0xff]  }
 0x3b9   : > { %v2744_v27 = vpop.f32.mrf.mxu0  ;;  %v3237_v17 = vpop.f32.mrf.mxu1  ;;  %3476 = vmatmul.mubr.bf16.gmra.mxu1 %v2951_v47  ;;  %5028 = vmatprep.subr.bf16.mxu0 %v9038_v20  ;;  %v9044_v47 = vld [vmem:[#allocation2 + $0x4] ss:$8 sps:$4 sm:$0xff]  }
 0x3ba   : > { %v3531_v32 = vmax.f32 %v3234_v16, 0.0  ;;  %v2745_v60 = vadd.f32 %v2744_v27, %v10435_v36  ;;  %v2885_v5 = vmax.f32 %v2743_v44, 0.0  ;;  %v3650_v62 = vpack.c.bf16 %v3530_v45, %v3528_v22 }
 0x3bb   : > { %v2748_v49 = vpop.f32.mrf.mxu0  ;;  %v3239_v12 = vpop.f32.mrf.mxu1  ;;  %v3238_v38 = vadd.f32 %v3237_v17, %v10610_v0  ;;  %v9047_v17 = vld [vmem:[#allocation2 + $0xf4] ss:$8 sps:$4 sm:$0xff]  }
 0x3bc   : > { %v2886_v59 = vmax.f32 %v2745_v60, 0.0  ;;  %v3651_v42 = vpack.c.bf16 %v3531_v32, %v3529_v11  ;;  %5029 = vmatpush1.bf16.msra.mxu0 %v9036_v7  ;;  %v3240_v20 = vadd.f32 %v3239_v12, %v10607_v53  ;;  %v2953_v44 = vpack.c.bf16 %v2885_v5, %v2883_v39 }
 0x3bd   : > { %v2750_v26 = vpop.f32.mrf.mxu0  ;;  %v3241_v58 = vpop.f32.mrf.mxu1  ;;  %5030 = vmatprep.subr.bf16.mxu0 %v9041_v40  ;;  %v9042_v40 = vld [vmem:[#allocation2] ss:$8 sps:$4 sm:$0xff]   ;;  %v2749_v11 = vadd.f32 %v2748_v49, %v10438_v31 }
 0x3be   : > { %v3242_v16 = vadd.f32 %v3241_v58, %v10610_v0  ;;  %3974 = vmatprep.mubr.bf16.mxu0 %v3651_v42  ;;  %v2954_v3 = vpack.c.bf16 %v2886_v59, %v2884_v51  ;;  %v2751_v6 = vadd.f32 %v2750_v26, %v10435_v36  ;;  %v3533_v59 = vmax.f32 %v3240_v20, 0.0 }
 0x3bf   : > { %v2752_v2 = vpop.f32.mrf.mxu0  ;;  %v3243_v27 = vpop.f32.mrf.mxu1  ;;  %3975 = vmatmul.mubr.bf16.gmra.mxu0 %v3650_v62  ;;  %v3532_v42 = vmax.f32 %v3238_v38, 0.0  ;;  %v2887_v49 = vmax.f32 %v2749_v11, 0.0 }
 0x3c0   : > { %v2753_v60 = vadd.f32 %v2752_v2, %v10438_v31  ;;  %v3244_v7 = vadd.f32 %v3243_v27, %v10607_v53  ;;  %3485 = vmatprep.mubr.bf16.mxu1 %v2954_v3  ;;  %5031 = vmatpush1.bf16.msra.mxu0 %v9039_v56  ;;  %v3534_v12 = vmax.f32 %v3242_v16, 0.0  ;;  %v2888_v62 = vmax.f32 %v2751_v6, 0.0  ;;  %v9045_v3 = vld [vmem:[#allocation2 + $0xf0] ss:$8 sps:$4 sm:$0xff]  }
 0x3c1   : > { %v2754_v45 = vpop.f32.mrf.mxu0  ;;  %v3247_v32 = vpop.f32.mrf.mxu1  ;;  %3486 = vmatmul.mubr.bf16.gmra.mxu1 %v2953_v44  ;;  %5032 = vmatprep.subr.bf16.mxu0 %v9044_v47  ;;  %v9050_v47 = vld [vmem:[#allocation2 + $0xe4] ss:$8 sps:$4 sm:$0xff]  }
 0x3c2   : > { %v3535_v22 = vmax.f32 %v3244_v7, 0.0  ;;  %v2755_v5 = vadd.f32 %v2754_v45, %v10435_v36  ;;  %v2889_v39 = vmax.f32 %v2753_v60, 0.0  ;;  %v3652_v16 = vpack.c.bf16 %v3534_v12, %v3532_v42 }
 0x3c3   : > { %v2758_v51 = vpop.f32.mrf.mxu0  ;;  %v3249_v58 = vpop.f32.mrf.mxu1  ;;  %v3248_v20 = vadd.f32 %v3247_v32, %v10610_v0 }
 0x3c4   : > { %v2890_v26 = vmax.f32 %v2755_v5, 0.0  ;;  %v3653_v56 = vpack.c.bf16 %v3535_v22, %v3533_v59  ;;  %5033 = vmatpush1.bf16.msra.mxu0 %v9042_v40  ;;  %v3250_v7 = vadd.f32 %v3249_v58, %v10607_v53  ;;  %v2955_v6 = vpack.c.bf16 %v2889_v39, %v2887_v49  ;;  %v9053_v39 = vld [vmem:[#allocation2 + $0xd4] ss:$8 sps:$4 sm:$0xff]  }
 0x3c5   : > { %v2760_v2 = vpop.f32.mrf.mxu0  ;;  %v3251_v27 = vpop.f32.mrf.mxu1  ;;  %5034 = vmatprep.subr.bf16.mxu0 %v9047_v17  ;;  %v9048_v17 = vld [vmem:[#allocation2 + $0xe0] ss:$8 sps:$4 sm:$0xff]   ;;  %v2759_v32 = vadd.f32 %v2758_v51, %v10438_v31 }
 0x3c6   : > { %v3252_v44 = vadd.f32 %v3251_v27, %v10610_v0  ;;  %3984 = vmatprep.mubr.bf16.mxu0 %v3653_v56  ;;  %v2956_v45 = vpack.c.bf16 %v2890_v26, %v2888_v62  ;;  %v2761_v5 = vadd.f32 %v2760_v2, %v10435_v36  ;;  %v3537_v58 = vmax.f32 %v3250_v7, 0.0 }
 0x3c7   : > { %v2762_v38 = vpop.f32.mrf.mxu0  ;;  %v3253_v60 = vpop.f32.mrf.mxu1  ;;  %3985 = vmatmul.mubr.bf16.gmra.mxu0 %v3652_v16  ;;  %v3536_v62 = vmax.f32 %v3248_v20, 0.0 }
 0x3c8   : > { %v2763_v40 = vadd.f32 %v2762_v38, %v10438_v31  ;;  %v3254_v11 = vadd.f32 %v3253_v60, %v10607_v53  ;;  %v3538_v12 = vmax.f32 %v3252_v44, 0.0  ;;  %3495 = vmatprep.mubr.bf16.mxu1 %v2956_v45  ;;  %5035 = vmatpush2.bf16.msra.mxu0 %v9045_v3  ;;  %v2892_v27 = vmax.f32 %v2761_v5, 0.0  ;;  %v9051_v3 = vld [vmem:[#allocation2 + $0xd0] ss:$8 sps:$4 sm:$0xff]  }
 0x3c9   : > { %v2764_v22 = vpop.f32.mrf.mxu0  ;;  %v3257_v59 = vpop.f32.mrf.mxu1  ;;  %3496 = vmatmul.mubr.bf16.gmra.mxu1 %v2955_v6  ;;  %5036 = vmatprep.subr.bf16.mxu0 %v9050_v47  ;;  %v2891_v60 = vmax.f32 %v2759_v32, 0.0 }
 0x3ca   : > { %v3539_v42 = vmax.f32 %v3254_v11, 0.0  ;;  %v2765_v26 = vadd.f32 %v2764_v22, %v10435_v36  ;;  %v2893_v56 = vmax.f32 %v2763_v40, 0.0  ;;  %v3654_v44 = vpack.c.bf16 %v3538_v12, %v3536_v62 }
 0x3cb   : > { %v3259_v2 = vpop.f32.mrf.mxu1  ;;  %v3258_v20 = vadd.f32 %v3257_v59, %v10610_v0  ;;  %v12521_v22 = vmov 0  }
 0x3cc   : > { %v2894_v49 = vmax.f32 %v2765_v26, 0.0  ;;  %v3655_v16 = vpack.c.bf16 %v3539_v42, %v3537_v58  ;;  %5037 = vmatpush2.bf16.msra.mxu0 %v9048_v17  ;;  %v3260_v31 = vadd.f32 %v3259_v2, %v10607_v53  ;;  %v2957_v47 = vpack.c.bf16 %v2893_v56, %v2891_v60 }
 0x3cd   : > { %v3261_v38 = vpop.f32.mrf.mxu1  ;;  %5038 = vmatprep.subr.bf16.mxu0 %v9053_v39  ;;  %v3540_v17 = vmax.f32 %v3258_v20, 0.0 }
 0x3ce   : > { %v3262_v51 = vadd.f32 %v3261_v38, %v10610_v0  ;;  %3994 = vmatprep.mubr.bf16.mxu0 %v3655_v16  ;;  %v2958_v36 = vpack.c.bf16 %v2894_v49, %v2892_v27  ;;  %v3541_v5 = vmax.f32 %v3260_v31, 0.0  ;;  %v9056_v38 = vld [vmem:[#allocation2 + $0xc4] ss:$8 sps:$4 sm:$0xff]  }
 0x3cf   : > { %v3263_v7 = vpop.f32.mrf.mxu1  ;;  %3995 = vmatmul.mubr.bf16.gmra.mxu0 %v3654_v44  ;;  %v9054_v44 = vld [vmem:[#allocation2 + $0xc0] ss:$8 sps:$4 sm:$0xff]  }
 0x3d0   : > { %v3264_v45 = vadd.f32 %v3263_v7, %v10607_v53  ;;  %3505 = vmatprep.mubr.bf16.mxu1 %v2958_v36  ;;  %5039 = vmatpush2.bf16.msra.mxu0 %v9051_v3  ;;  %v3542_v40 = vmax.f32 %v3262_v51, 0.0 }
 0x3d1   : > { %v3267_v6 = vpop.f32.mrf.mxu1  ;;  %3506 = vmatmul.mubr.bf16.gmra.mxu1 %v2957_v47  ;;  %5040 = vmatprep.subr.bf16.mxu0 %v9056_v38 }
 0x3d2   : > { %v3543_v11 = vmax.f32 %v3264_v45, 0.0  ;;  %4505 = vmatprep.mubr.bf16.mxu1 %v12521_v22  ;;  %v3656_v26 = vpack.c.bf16 %v3542_v40, %v3540_v17  ;;  %v3268_v62 = vadd.f32 %v3267_v6, %v10610_v0 }
 0x3d3   : > { %v3269_v12 = vpop.f32.mrf.mxu1 }
 0x3d4   : > { %v3657_v32 = vpack.c.bf16 %v3543_v11, %v3541_v5  ;;  %v3270_v58 = vadd.f32 %v3269_v12, %v10607_v53  ;;  %v3544_v60 = vmax.f32 %v3268_v62, 0.0  ;;  %5041 = vmatpush2.bf16.msra.mxu0 %v9054_v44  ;;  %v9059_v44 = vld [vmem:[#allocation2 + $0xb4] ss:$8 sps:$4 sm:$0xff]  }
 0x3d5   : > { %v3271_v42 = vpop.f32.mrf.mxu1  ;;  %5042 = vmatprep.subr.bf16.mxu0 %v9059_v44 }
 0x3d6   : > { %v3272_v59 = vadd.f32 %v3271_v42, %v10610_v0  ;;  %4004 = vmatprep.mubr.bf16.mxu0 %v3657_v32  ;;  %v3545_v27 = vmax.f32 %v3270_v58, 0.0 }
 0x3d7   : > { %v3273_v39 = vpop.f32.mrf.mxu1  ;;  %4005 = vmatmul.mubr.bf16.gmra.mxu0 %v3656_v26 }
 0x3d8   : > { %v3274_v2 = vadd.f32 %v3273_v39, %v10607_v53  ;;  %v3546_v49 = vmax.f32 %v3272_v59, 0.0 }
 0x3d9   : > { %v3277_v56 = vpop.f32.mrf.mxu1  ;;  %8239 = vmatmul.mubr.msk.bf16.vlgmr.msra.gmra.mxu1 %vm809_vm2, %v9602_v10 }
 0x3da   : > { %v3547_v16 = vmax.f32 %v3274_v2, 0.0  ;;  %4515 = vmatprep.mubr.bf16.mxu1 %v12521_v22  ;;  %v3658_v36 = vpack.c.bf16 %v3546_v49, %v3544_v60  ;;  %v3278_v45 = vadd.f32 %v3277_v56, %v10610_v0 }
 0x3db   : > { %v3279_v3 = vpop.f32.mrf.mxu1 }
 0x3dc   : > { %v3659_v31 = vpack.c.bf16 %v3547_v16, %v3545_v27  ;;  %v3280_v7 = vadd.f32 %v3279_v3, %v10607_v53  ;;  %v3548_v17 = vmax.f32 %v3278_v45, 0.0  ;;  %v9057_v16 = vld [vmem:[#allocation2 + $0xb0] ss:$8 sps:$4 sm:$0xff]  }
 0x3dd   : > { %v3281_v51 = vpop.f32.mrf.mxu1  ;;  %5043 = vmatpush2.bf16.msra.mxu0 %v9057_v16  ;;  %v9063_v16 = vld [vmem:[#allocation5 + $0x70] ss:$8 sps:$4 sm:$0xff]  }
 0x3de   : > { %v3282_v47 = vadd.f32 %v3281_v51, %v10610_v0  ;;  %4014 = vmatprep.mubr.bf16.mxu0 %v3659_v31  ;;  %v3549_v5 = vmax.f32 %v3280_v7, 0.0 }
 0x3df   : > { %v3283_v20 = vpop.f32.mrf.mxu1  ;;  %4015 = vmatmul.mubr.bf16.gmra.mxu0 %v3658_v36 }
 0x3e0   : > { %v3284_v6 = vadd.f32 %v3283_v20, %v10607_v53  ;;  %v3550_v40 = vmax.f32 %v3282_v47, 0.0 }
 0x3e1   : > { %v3287_v10 = vpop.f32.mrf.mxu1  ;;  %8240 = vmatmul.mubr.msk.bf16.gmra.mxu1 %vm809_vm2, %v9609_v13 }
 0x3e2   : > { %v3551_v11 = vmax.f32 %v3284_v6, 0.0  ;;  %4525 = vmatprep.mubr.bf16.mxu1 %v12521_v22  ;;  %v3660_v26 = vpack.c.bf16 %v3550_v40, %v3548_v17  ;;  %v3288_v62 = vadd.f32 %v3287_v10, %v10610_v0 }
 0x3e3   : > { %v3289_v12 = vpop.f32.mrf.mxu1 }
 0x3e4   : > { %v3661_v32 = vpack.c.bf16 %v3551_v11, %v3549_v5  ;;  %v3290_v58 = vadd.f32 %v3289_v12, %v10607_v53  ;;  %v3552_v3 = vmax.f32 %v3288_v62, 0.0 }
 0x3e5   : > { %v3291_v42 = vpop.f32.mrf.mxu1 }
 0x3e6   : > { %v3292_v59 = vadd.f32 %v3291_v42, %v10610_v0  ;;  %4024 = vmatprep.mubr.bf16.mxu0 %v3661_v32  ;;  %v3553_v27 = vmax.f32 %v3290_v58, 0.0 }
 0x3e7   : > { %v3293_v39 = vpop.f32.mrf.mxu1  ;;  %4025 = vmatmul.mubr.bf16.gmra.mxu0 %v3660_v26 }
 0x3e8   : > { %v3294_v2 = vadd.f32 %v3293_v39, %v10607_v53  ;;  %v3554_v56 = vmax.f32 %v3292_v59, 0.0 }
 0x3e9   : > { %v3297_v13 = vpop.f32.mrf.mxu1  ;;  %8241 = vmatmul.mubr.msk.bf16.gmra.mxu1 %vm809_vm2, %v9622_v18 }
 0x3ea   : > { %v3555_v49 = vmax.f32 %v3294_v2, 0.0  ;;  %4535 = vmatprep.mubr.bf16.mxu1 %v12521_v22  ;;  %v3662_v51 = vpack.c.bf16 %v3554_v56, %v3552_v3  ;;  %v3298_v20 = vadd.f32 %v3297_v13, %v10610_v0  ;;  %v9060_v56 = vld [vmem:[#allocation2 + $0xa0] ss:$8 sps:$4 sm:$0xff]   ;;  %v9065_v3 = vld [vmem:[#allocation5 + $0x74] ss:$8 sps:$4 sm:$0xff]  }
 0x3eb   : > { %v3299_v38 = vpop.f32.mrf.mxu1  ;;  %5907 = vmatprep.subr.bf16.mxu1 %v9065_v3 }
 0x3ec   : > { %v3663_v60 = vpack.c.bf16 %v3555_v49, %v3553_v27  ;;  %v3300_v36 = vadd.f32 %v3299_v38, %v10607_v53  ;;  %v3556_v11 = vmax.f32 %v3298_v20, 0.0  ;;  %v9062_v49 = vld [vmem:[#allocation2 + $0xa4] ss:$8 sps:$4 sm:$0xff]   ;;  %5908 = vmatpush1.bf16.msra.mxu1 %v9063_v16 }
 0x3ed   : > { %v3301_v31 = vpop.f32.mrf.mxu1  ;;  %5044 = vmatprep.subr.bf16.mxu0 %v9062_v49  ;;  %v9071_v16 = vld [vmem:[#allocation5 + $0x64] ss:$8 sps:$4 sm:$0xff]  }
 0x3ee   : > { %v3302_v7 = vadd.f32 %v3301_v31, %v10610_v0  ;;  %4034 = vmatprep.mubr.bf16.mxu0 %v3663_v60  ;;  %v3557_v6 = vmax.f32 %v3300_v36, 0.0  ;;  %5045 = vmatpush2.bf16.msra.mxu0 %v9060_v56 }
 0x3ef   : > { %v3303_v47 = vpop.f32.mrf.mxu1  ;;  %4035 = vmatmul.mubr.bf16.gmra.mxu0 %v3662_v51  ;;  %5909 = vmatprep.subr.bf16.mxu1 %v9071_v16 }
 0x3f0   : > { %v3304_v45 = vadd.f32 %v3303_v47, %v10607_v53  ;;  %v3558_v10 = vmax.f32 %v3302_v7, 0.0 }
 0x3f1   : > { %v3307_v18 = vpop.f32.mrf.mxu1  ;;  %8242 = vmatmul.mubr.msk.bf16.gmra.mxu1 %vm809_vm2, %v9641_v25 }
 0x3f2   : > { %v3559_v5 = vmax.f32 %v3304_v45, 0.0  ;;  %4545 = vmatprep.mubr.bf16.mxu1 %v12521_v22  ;;  %v3664_v32 = vpack.c.bf16 %v3558_v10, %v3556_v11  ;;  %v3308_v59 = vadd.f32 %v3307_v18, %v10610_v0 }
 0x3f3   : > { %v3309_v40 = vpop.f32.mrf.mxu1 }
 0x3f4   : > { %v3665_v12 = vpack.c.bf16 %v3559_v5, %v3557_v6  ;;  %v3310_v58 = vadd.f32 %v3309_v40, %v10607_v53  ;;  %v3560_v44 = vmax.f32 %v3308_v59, 0.0 }
 0x3f5   : > { %v3311_v17 = vpop.f32.mrf.mxu1 }
 0x3f6   : > { %v3312_v42 = vadd.f32 %v3311_v17, %v10610_v0  ;;  %4044 = vmatprep.mubr.bf16.mxu0 %v3665_v12  ;;  %v3561_v25 = vmax.f32 %v3310_v58, 0.0 }
 0x3f7   : > { %v3313_v26 = vpop.f32.mrf.mxu1  ;;  %4045 = vmatmul.mubr.bf16.gmra.mxu0 %v3664_v32 }
 0x3f8   : > { %v3314_v39 = vadd.f32 %v3313_v26, %v10607_v53  ;;  %v3562_v2 = vmax.f32 %v3312_v42, 0.0 }
 0x3f9   : > { %v3317_v62 = vpop.f32.mrf.mxu1  ;;  %8243 = vmatmul.mubr.msk.bf16.gmra.mxu1 %vm809_vm2, %v9666_v34 }
 0x3fa   : > { %v3563_v27 = vmax.f32 %v3314_v39, 0.0  ;;  %4555 = vmatprep.mubr.bf16.mxu1 %v12521_v22  ;;  %v3666_v31 = vpack.c.bf16 %v3562_v2, %v3560_v44  ;;  %v3318_v34 = vadd.f32 %v3317_v62, %v10610_v0  ;;  %v9066_v2 = vld [vmem:[#allocation2 + $0x90] ss:$8 sps:$4 sm:$0xff]  }
 0x3fb   : > { %v3319_v13 = vpop.f32.mrf.mxu1 }
 0x3fc   : > { %v3667_v38 = vpack.c.bf16 %v3563_v27, %v3561_v25  ;;  %v3320_v51 = vadd.f32 %v3319_v13, %v10607_v53  ;;  %v3564_v5 = vmax.f32 %v3318_v34, 0.0  ;;  %v9068_v27 = vld [vmem:[#allocation2 + $0x94] ss:$8 sps:$4 sm:$0xff]   ;;  %v9069_v13 = vld [vmem:[#allocation5 + $0x60] ss:$8 sps:$4 sm:$0xff]  }
 0x3fd   : > { %v3321_v60 = vpop.f32.mrf.mxu1  ;;  %5046 = vmatprep.subr.bf16.mxu0 %v9068_v27  ;;  %5910 = vmatpush1.bf16.msra.mxu1 %v9069_v13 }
 0x3fe   : > { %v3322_v36 = vadd.f32 %v3321_v60, %v10610_v0  ;;  %4054 = vmatprep.mubr.bf16.mxu0 %v3667_v38  ;;  %v3565_v45 = vmax.f32 %v3320_v51, 0.0  ;;  %5047 = vmatpush2.bf16.msra.mxu0 %v9066_v2  ;;  %v9077_v2 = vld [vmem:[#allocation5 + $0x54] ss:$8 sps:$4 sm:$0xff]  }
 0x3ff   : > { %v3323_v7 = vpop.f32.mrf.mxu1  ;;  %4055 = vmatmul.mubr.bf16.gmra.mxu0 %v3666_v31  ;;  %5911 = vmatprep.subr.bf16.mxu1 %v9077_v2 }
 0x400   : > { %v3324_v47 = vadd.f32 %v3323_v7, %v10607_v53  ;;  %v3566_v18 = vmax.f32 %v3322_v36, 0.0 }
 0x401   : > { %v3327_v20 = vpop.f32.mrf.mxu1  ;;  %8244 = vmatmul.mubr.msk.bf16.gmra.mxu1 %vm809_vm2, %v9685_v41 }
 0x402   : > { %v3567_v6 = vmax.f32 %v3324_v47, 0.0  ;;  %4565 = vmatprep.mubr.bf16.mxu1 %v12521_v22  ;;  %v3668_v12 = vpack.c.bf16 %v3566_v18, %v3564_v5  ;;  %v3328_v42 = vadd.f32 %v3327_v20, %v10610_v0 }
 0x403   : > { %v3329_v10 = vpop.f32.mrf.mxu1 }
 0x404   : > { %v3669_v40 = vpack.c.bf16 %v3567_v6, %v3565_v45  ;;  %v3330_v17 = vadd.f32 %v3329_v10, %v10607_v53  ;;  %v3568_v56 = vmax.f32 %v3328_v42, 0.0 }
 0x405   : > { %v3331_v11 = vpop.f32.mrf.mxu1 }
 0x406   : > { %v3332_v32 = vadd.f32 %v3331_v11, %v10610_v0  ;;  %4064 = vmatprep.mubr.bf16.mxu0 %v3669_v40  ;;  %v3569_v41 = vmax.f32 %v3330_v17, 0.0 }
 0x407   : > { %v3333_v58 = vpop.f32.mrf.mxu1  ;;  %4065 = vmatmul.mubr.bf16.gmra.mxu0 %v3668_v12 }
 0x408   : > { %v3334_v26 = vadd.f32 %v3333_v58, %v10607_v53  ;;  %v3570_v39 = vmax.f32 %v3332_v32, 0.0 }
 0x409   : > { %v3337_v59 = vpop.f32.mrf.mxu1  ;;  %8245 = vmatmul.mubr.msk.bf16.gmra.mxu1 %vm809_vm2, %v9710_v50 }
 0x40a   : > { %v3571_v62 = vmax.f32 %v3334_v26, 0.0  ;;  %4575 = vmatprep.mubr.bf16.mxu1 %v12521_v22  ;;  %v3670_v38 = vpack.c.bf16 %v3570_v39, %v3568_v56  ;;  %v3338_v50 = vadd.f32 %v3337_v59, %v10610_v0  ;;  %v9072_v59 = vld [vmem:[#allocation2 + $0x80] ss:$8 sps:$4 sm:$0xff]   ;;  %v9075_v39 = vld [vmem:[#allocation5 + $0x50] ss:$8 sps:$4 sm:$0xff]  }
 0x40b   : > { %v3339_v25 = vpop.f32.mrf.mxu1  ;;  %5912 = vmatpush1.bf16.msra.mxu1 %v9075_v39 }
 0x40c   : > { %v3671_v49 = vpack.c.bf16 %v3571_v62, %v3569_v41  ;;  %v3340_v3 = vadd.f32 %v3339_v25, %v10607_v53  ;;  %v3572_v45 = vmax.f32 %v3338_v50, 0.0  ;;  %v9074_v41 = vld [vmem:[#allocation2 + $0x84] ss:$8 sps:$4 sm:$0xff]  }
 0x40d   : > { %v3341_v44 = vpop.f32.mrf.mxu1  ;;  %5048 = vmatprep.subr.bf16.mxu0 %v9074_v41 }
 0x40e   : > { %v3342_v60 = vadd.f32 %v3341_v44, %v10610_v0  ;;  %4074 = vmatprep.mubr.bf16.mxu0 %v3671_v49  ;;  %v3573_v7 = vmax.f32 %v3340_v3, 0.0  ;;  %5049 = vmatpush2.bf16.msra.mxu0 %v9072_v59 }
 0x40f   : > { %v3343_v31 = vpop.f32.mrf.mxu1  ;;  %4075 = vmatmul.mubr.bf16.gmra.mxu0 %v3670_v38 }
 0x410   : > { %v3344_v51 = vadd.f32 %v3343_v31, %v10607_v53  ;;  %v3574_v34 = vmax.f32 %v3342_v60, 0.0 }
 0x411   : > { %v3347_v36 = vpop.f32.mrf.mxu1  ;;  %8246 = vmatmul.mubr.msk.bf16.gmra.mxu1 %vm809_vm2, %v9729_v57 }
 0x412   : > { %v3575_v47 = vmax.f32 %v3344_v51, 0.0  ;;  %4585 = vmatprep.mubr.bf16.mxu1 %v12521_v22  ;;  %v3672_v10 = vpack.c.bf16 %v3574_v34, %v3572_v45  ;;  %v3348_v12 = vadd.f32 %v3347_v36, %v10610_v0 }
 0x413   : > { %v3349_v20 = vpop.f32.mrf.mxu1 }
 0x414   : > { %v3673_v18 = vpack.c.bf16 %v3575_v47, %v3573_v7  ;;  %v3350_v5 = vadd.f32 %v3349_v20, %v10607_v53  ;;  %v3576_v62 = vmax.f32 %v3348_v12, 0.0 }
 0x415   : > { %v3351_v6 = vpop.f32.mrf.mxu1 }
 0x416   : > { %v3352_v40 = vadd.f32 %v3351_v6, %v10610_v0  ;;  %4084 = vmatprep.mubr.bf16.mxu0 %v3673_v18  ;;  %v3577_v57 = vmax.f32 %v3350_v5, 0.0  ;;  %v9080_v5 = vld [vmem:[#allocation5 + $0x44] ss:$8 sps:$4 sm:$0xff]  }
 0x417   : > { %v3353_v11 = vpop.f32.mrf.mxu1  ;;  %4085 = vmatmul.mubr.bf16.gmra.mxu0 %v3672_v10  ;;  %5913 = vmatprep.subr.bf16.mxu1 %v9080_v5 }
 0x418   : > { %v3354_v17 = vadd.f32 %v3353_v11, %v10607_v53  ;;  %v3578_v58 = vmax.f32 %v3352_v40, 0.0 }
 0x419   : > { %v3357_v32 = vpop.f32.mrf.mxu1  ;;  %8247 = vmatmul.mubr.msk.bf16.gmra.mxu1 %vm809_vm2, %v9754_v4 }
 0x41a   : > { %v3579_v42 = vmax.f32 %v3354_v17, 0.0  ;;  %4595 = vmatprep.mubr.bf16.mxu1 %v12521_v22  ;;  %v3674_v13 = vpack.c.bf16 %v3578_v58, %v3576_v62  ;;  %v3358_v4 = vadd.f32 %v3357_v32, %v10610_v0 }
 0x41b   : > { %v3359_v26 = vpop.f32.mrf.mxu1 }
 0x41c   : > { %v3675_v25 = vpack.c.bf16 %v3579_v42, %v3577_v57  ;;  %v3360_v56 = vadd.f32 %v3359_v26, %v10607_v53  ;;  %v3580_v51 = vmax.f32 %v3358_v4, 0.0 }
 0x41d   : > { %v3361_v27 = vpop.f32.mrf.mxu1 }
 0x41e   : > { %v3362_v49 = vadd.f32 %v3361_v27, %v10610_v0  ;;  %4094 = vmatprep.mubr.bf16.mxu0 %v3675_v25  ;;  %v3581_v3 = vmax.f32 %v3360_v56, 0.0 }
 0x41f   : > { %v3363_v16 = vpop.f32.mrf.mxu1  ;;  %4095 = vmatmul.mubr.bf16.gmra.mxu0 %v3674_v13 }
 0x420   : > { %v3364_v44 = vadd.f32 %v3363_v16, %v10607_v53  ;;  %v3582_v60 = vmax.f32 %v3362_v49, 0.0 }
 0x421   : > { %v3367_v38 = vpop.f32.mrf.mxu1  ;;  %8248 = vmatmul.mubr.msk.bf16.gmra.mxu1 %vm809_vm2, %v9767_v9  ;;  %v9078_v9 = vld [vmem:[#allocation5 + $0x40] ss:$8 sps:$4 sm:$0xff]  }
 0x422   : > { %v3583_v31 = vmax.f32 %v3364_v44, 0.0  ;;  %4605 = vmatprep.mubr.bf16.mxu1 %v12521_v22  ;;  %v3676_v34 = vpack.c.bf16 %v3582_v60, %v3580_v51  ;;  %v3368_v18 = vadd.f32 %v3367_v38, %v10610_v0  ;;  %5914 = vmatpush1.bf16.msra.mxu1 %v9078_v9  ;;  %v9083_v51 = vld [vmem:[#allocation5 + $0x34] ss:$8 sps:$4 sm:$0xff]  }
 0x423   : > { %v3369_v50 = vpop.f32.mrf.mxu1  ;;  %5915 = vmatprep.subr.bf16.mxu1 %v9083_v51 }
 0x424   : > { %v3677_v36 = vpack.c.bf16 %v3583_v31, %v3581_v3  ;;  %v3370_v47 = vadd.f32 %v3369_v50, %v10607_v53  ;;  %v3584_v32 = vmax.f32 %v3368_v18, 0.0 }
 0x425   : > { %v3371_v7 = vpop.f32.mrf.mxu1 }
 0x426   : > { %v3372_v20 = vadd.f32 %v3371_v7, %v10610_v0  ;;  %4104 = vmatprep.mubr.bf16.mxu0 %v3677_v36  ;;  %v3585_v40 = vmax.f32 %v3370_v47, 0.0 }
 0x427   : > { %v3373_v45 = vpop.f32.mrf.mxu1  ;;  %4105 = vmatmul.mubr.bf16.gmra.mxu0 %v3676_v34 }
 0x428   : > { %v3374_v6 = vadd.f32 %v3373_v45, %v10607_v53  ;;  %v3586_v11 = vmax.f32 %v3372_v20, 0.0 }
 0x429   : > { %v3377_v10 = vpop.f32.mrf.mxu1  ;;  %8249 = vmatmul.mubr.msk.bf16.gmra.mxu1 %vm809_vm2, %v9786_v19 }
 0x42a   : > { %v3587_v12 = vmax.f32 %v3374_v6, 0.0  ;;  %4615 = vmatprep.mubr.bf16.mxu1 %v12521_v22  ;;  %v3678_v42 = vpack.c.bf16 %v3586_v11, %v3584_v32  ;;  %v3378_v39 = vadd.f32 %v3377_v10, %v10610_v0 }
 0x42b   : > { %v3379_v17 = vpop.f32.mrf.mxu1 }
 0x42c   : > { %v3679_v57 = vpack.c.bf16 %v3587_v12, %v3585_v40  ;;  %v3380_v26 = vadd.f32 %v3379_v17, %v10607_v53  ;;  %v3588_v56 = vmax.f32 %v3378_v39, 0.0 }
 0x42d   : > { %v3381_v58 = vpop.f32.mrf.mxu1 }
 0x42e   : > { %v3382_v59 = vadd.f32 %v3381_v58, %v10610_v0  ;;  %4114 = vmatprep.mubr.bf16.mxu0 %v3679_v57  ;;  %v3589_v25 = vmax.f32 %v3380_v26, 0.0 }
 0x42f   : > { %v3383_v41 = vpop.f32.mrf.mxu1  ;;  %4115 = vmatmul.mubr.bf16.gmra.mxu0 %v3678_v42 }
 0x430   : > { %v3384_v62 = vadd.f32 %v3383_v41, %v10607_v53  ;;  %v3590_v2 = vmax.f32 %v3382_v59, 0.0 }
 0x431   : > { %v3387_v19 = vpop.f32.mrf.mxu1  ;;  %8250 = vmatmul.mubr.msk.bf16.gmra.mxu1 %vm809_vm2, %v9799_v24  ;;  %v9081_v24 = vld [vmem:[#allocation5 + $0x30] ss:$8 sps:$4 sm:$0xff]  }
 0x432   : > { %v3591_v27 = vmax.f32 %v3384_v62, 0.0  ;;  %4625 = vmatprep.mubr.bf16.mxu1 %v12521_v22  ;;  %v3680_v4 = vpack.c.bf16 %v3590_v2, %v3588_v56  ;;  %v3388_v60 = vadd.f32 %v3387_v19, %v10610_v0  ;;  %5916 = vmatpush1.bf16.msra.mxu1 %v9081_v24 }
 0x433   : > { %v3389_v13 = vpop.f32.mrf.mxu1 }
 0x434   : > { %v3681_v49 = vpack.c.bf16 %v3591_v27, %v3589_v25  ;;  %v3390_v44 = vadd.f32 %v3389_v13, %v10607_v53  ;;  %v3592_v20 = vmax.f32 %v3388_v60, 0.0  ;;  %v9086_v27 = vld [vmem:[#allocation5 + $0x24] ss:$8 sps:$4 sm:$0xff]  }
 0x435   : > { %v3391_v16 = vpop.f32.mrf.mxu1  ;;  %5917 = vmatprep.subr.bf16.mxu1 %v9086_v27 }
 0x436   : > { %v3392_v38 = vadd.f32 %v3391_v16, %v10610_v0  ;;  %4124 = vmatprep.mubr.bf16.mxu0 %v3681_v49  ;;  %v3593_v36 = vmax.f32 %v3390_v44, 0.0 }
 0x437   : > { %v3393_v3 = vpop.f32.mrf.mxu1  ;;  %4125 = vmatmul.mubr.bf16.gmra.mxu0 %v3680_v4 }
 0x438   : > { %v3394_v31 = vadd.f32 %v3393_v3, %v10607_v53  ;;  %v3594_v7 = vmax.f32 %v3392_v38, 0.0 }
 0x439   : > { %v3397_v50 = vpop.f32.mrf.mxu1  ;;  %8251 = vmatmul.mubr.msk.bf16.gmra.mxu1 %vm809_vm2, %v9806_v28 }
 0x43a   : > { %v3595_v34 = vmax.f32 %v3394_v31, 0.0  ;;  %4635 = vmatprep.mubr.bf16.mxu1 %v12521_v22  ;;  %v3682_v6 = vpack.c.bf16 %v3594_v7, %v3592_v20  ;;  %v3398_v40 = vadd.f32 %v3397_v50, %v10610_v0 }
 0x43b   : > { %v3399_v47 = vpop.f32.mrf.mxu1 }
 0x43c   : > { %v3683_v45 = vpack.c.bf16 %v3595_v34, %v3593_v36  ;;  %v3400_v10 = vadd.f32 %v3399_v47, %v10607_v53  ;;  %v3596_v58 = vmax.f32 %v3398_v40, 0.0 }
 0x43d   : > { %v3401_v18 = vpop.f32.mrf.mxu1 }
 0x43e   : > { %v3402_v9 = vadd.f32 %v3401_v18, %v10610_v0  ;;  %4134 = vmatprep.mubr.bf16.mxu0 %v3683_v45  ;;  %v3597_v12 = vmax.f32 %v3400_v10, 0.0 }
 0x43f   : > { %v3403_v5 = vpop.f32.mrf.mxu1  ;;  %4135 = vmatmul.mubr.bf16.gmra.mxu0 %v3682_v6 }
 0x440   : > { %v3404_v11 = vadd.f32 %v3403_v5, %v10607_v53  ;;  %v3598_v17 = vmax.f32 %v3402_v9, 0.0 }
 0x441   : > { %v3407_v28 = vpop.f32.mrf.mxu1  ;;  %8252 = vmatmul.mubr.msk.bf16.gmra.mxu1 %vm809_vm2, %v9819_v33  ;;  %v9084_v33 = vld [vmem:[#allocation5 + $0x20] ss:$8 sps:$4 sm:$0xff]  }
 0x442   : > { %v3599_v32 = vmax.f32 %v3404_v11, 0.0  ;;  %4645 = vmatprep.mubr.bf16.mxu1 %v12521_v22  ;;  %v3684_v59 = vpack.c.bf16 %v3598_v17, %v3596_v58  ;;  %v3408_v19 = vadd.f32 %v3407_v28, %v10610_v0  ;;  %5918 = vmatpush1.bf16.msra.mxu1 %v9084_v33 }
 0x443   : > { %v3409_v57 = vpop.f32.mrf.mxu1 }
 0x444   : > { %v3685_v42 = vpack.c.bf16 %v3599_v32, %v3597_v12  ;;  %v3410_v41 = vadd.f32 %v3409_v57, %v10607_v53  ;;  %v3600_v4 = vmax.f32 %v3408_v19, 0.0  ;;  %v9089_v12 = vld [vmem:[#allocation5 + $0x14] ss:$8 sps:$4 sm:$0xff]  }
 0x445   : > { %v3411_v26 = vpop.f32.mrf.mxu1  ;;  %5919 = vmatprep.subr.bf16.mxu1 %v9089_v12 }
 0x446   : > { %v3412_v39 = vadd.f32 %v3411_v26, %v10610_v0  ;;  %4144 = vmatprep.mubr.bf16.mxu0 %v3685_v42  ;;  %v3601_v13 = vmax.f32 %v3410_v41, 0.0 }
 0x447   : > { %v3413_v62 = vpop.f32.mrf.mxu1  ;;  %4145 = vmatmul.mubr.bf16.gmra.mxu0 %v3684_v59 }
 0x448   : > { %v3414_v25 = vadd.f32 %v3413_v62, %v10607_v53  ;;  %v3602_v56 = vmax.f32 %v3412_v39, 0.0 }
 0x449   : > { %v3417_v2 = vpop.f32.mrf.mxu1  ;;  %8253 = vmatmul.mubr.msk.bf16.gmra.mxu1 %vm809_vm2, %v9826_v37 }
 0x44a   : > { %v3603_v49 = vmax.f32 %v3414_v25, 0.0  ;;  %4655 = vmatprep.mubr.bf16.mxu1 %v12521_v22  ;;  %v3686_v3 = vpack.c.bf16 %v3602_v56, %v3600_v4  ;;  %v3418_v24 = vadd.f32 %v3417_v2, %v10610_v0 }
 0x44b   : > { %v3419_v16 = vpop.f32.mrf.mxu1 }
 0x44c   : > { %v3687_v44 = vpack.c.bf16 %v3603_v49, %v3601_v13  ;;  %v3420_v60 = vadd.f32 %v3419_v16, %v10607_v53  ;;  %v3604_v20 = vmax.f32 %v3418_v24, 0.0 }
 0x44d   : > { %v3421_v38 = vpop.f32.mrf.mxu1 }
 0x44e   : > { %v3422_v31 = vadd.f32 %v3421_v38, %v10610_v0  ;;  %4154 = vmatprep.mubr.bf16.mxu0 %v3687_v44  ;;  %v3605_v36 = vmax.f32 %v3420_v60, 0.0 }
 0x44f   : > { %v3423_v50 = vpop.f32.mrf.mxu1  ;;  %4155 = vmatmul.mubr.bf16.gmra.mxu0 %v3686_v3 }
 0x450   : > { %v3424_v51 = vadd.f32 %v3423_v50, %v10607_v53  ;;  %v3606_v7 = vmax.f32 %v3422_v31, 0.0 }
 0x451   : > { %v3427_v37 = vpop.f32.mrf.mxu1  ;;  %8254 = vmatmul.mubr.msk.bf16.gmra.mxu1 %vm809_vm2, %v9839_v43  ;;  %v9087_v43 = vld [vmem:[#allocation5 + $0x10] ss:$8 sps:$4 sm:$0xff]  }
 0x452   : > { %v3607_v34 = vmax.f32 %v3424_v51, 0.0  ;;  %4665 = vmatprep.mubr.bf16.mxu1 %v12521_v22  ;;  %v3688_v6 = vpack.c.bf16 %v3606_v7, %v3604_v20  ;;  %v3428_v40 = vadd.f32 %v3427_v37, %v10610_v0  ;;  %5920 = vmatpush1.bf16.msra.mxu1 %v9087_v43  ;;  %v9092_v51 = vld [vmem:[#allocation5 + $0x4] ss:$8 sps:$4 sm:$0xff]  }
 0x453   : > { %v3429_v47 = vpop.f32.mrf.mxu1  ;;  %5921 = vmatprep.subr.bf16.mxu1 %v9092_v51 }
 0x454   : > { %v3689_v45 = vpack.c.bf16 %v3607_v34, %v3605_v36  ;;  %v3430_v10 = vadd.f32 %v3429_v47, %v10607_v53  ;;  %v3608_v42 = vmax.f32 %v3428_v40, 0.0 }
 0x455   : > { %v3431_v18 = vpop.f32.mrf.mxu1 }
 0x456   : > { %v3432_v9 = vadd.f32 %v3431_v18, %v10610_v0  ;;  %4164 = vmatprep.mubr.bf16.mxu0 %v3689_v45  ;;  %v3609_v17 = vmax.f32 %v3430_v10, 0.0 }
 0x457   : > { %v3433_v5 = vpop.f32.mrf.mxu1  ;;  %4165 = vmatmul.mubr.bf16.gmra.mxu0 %v3688_v6 }
 0x458   : > { %v3434_v11 = vadd.f32 %v3433_v5, %v10607_v53  ;;  %v3610_v32 = vmax.f32 %v3432_v9, 0.0 }
 0x459   : > { %v3437_v28 = vpop.f32.mrf.mxu1  ;;  %8255 = vmatmul.mubr.msk.bf16.gmra.mxu1 %vm809_vm2, %v9846_v46 }
 0x45a   : > { %v3611_v57 = vmax.f32 %v3434_v11, 0.0  ;;  %4675 = vmatprep.mubr.bf16.mxu1 %v12521_v22  ;;  %v3690_v41 = vpack.c.bf16 %v3610_v32, %v3608_v42  ;;  %v3438_v25 = vadd.f32 %v3437_v28, %v10610_v0 }
 0x45b   : > { %v3439_v58 = vpop.f32.mrf.mxu1 }
 0x45c   : > { %v3691_v26 = vpack.c.bf16 %v3611_v57, %v3609_v17  ;;  %v3440_v39 = vadd.f32 %v3439_v58, %v10607_v53  ;;  %v3612_v49 = vmax.f32 %v3438_v25, 0.0 }
 0x45d   : > { %v3441_v59 = vpop.f32.mrf.mxu1 }
 0x45e   : > { %v3442_v62 = vadd.f32 %v3441_v59, %v10610_v0  ;;  %4174 = vmatprep.mubr.bf16.mxu0 %v3691_v26  ;;  %v3613_v33 = vmax.f32 %v3440_v39, 0.0 }
 0x45f   : > { %v3443_v19 = vpop.f32.mrf.mxu1  ;;  %4175 = vmatmul.mubr.bf16.gmra.mxu0 %v3690_v41 }
 0x460   : > { %v3444_v2 = vadd.f32 %v3443_v19, %v10607_v53  ;;  %v3614_v27 = vmax.f32 %v3442_v62, 0.0 }
 0x461   : > { %v3447_v46 = vpop.f32.mrf.mxu1  ;;  %8256 = vmatmul.mubr.msk.bf16.gmra.mxu1 %vm809_vm2, %v9859_v52  ;;  %v9090_v52 = vld [vmem:[#allocation5] ss:$8 sps:$4 sm:$0xff]  }
 0x462   : > { %v3615_v13 = vmax.f32 %v3444_v2, 0.0  ;;  %4685 = vmatprep.mubr.bf16.mxu1 %v12521_v22  ;;  %v3692_v44 = vpack.c.bf16 %v3614_v27, %v3612_v49  ;;  %v3448_v31 = vadd.f32 %v3447_v46, %v10610_v0  ;;  %5922 = vmatpush1.bf16.msra.mxu1 %v9090_v52  ;;  %v9095_v49 = vld [vmem:[#allocation5 + $0xf4] ss:$8 sps:$4 sm:$0xff]  }
 0x463   : > { %v3449_v56 = vpop.f32.mrf.mxu1  ;;  %5923 = vmatprep.subr.bf16.mxu1 %v9095_v49 }
 0x464   : > { %v3693_v16 = vpack.c.bf16 %v3615_v13, %v3613_v33  ;;  %v3450_v38 = vadd.f32 %v3449_v56, %v10607_v53  ;;  %v3616_v20 = vmax.f32 %v3448_v31, 0.0  ;;  %v9093_v56 = vld [vmem:[#allocation5 + $0xf0] ss:$8 sps:$4 sm:$0xff]  }
 0x465   : > { %v3451_v4 = vpop.f32.mrf.mxu1 }
 0x466   : > { %v3452_v3 = vadd.f32 %v3451_v4, %v10610_v0  ;;  %4184 = vmatprep.mubr.bf16.mxu0 %v3693_v16  ;;  %v3617_v37 = vmax.f32 %v3450_v38, 0.0  ;;  %5924 = vmatpush2.bf16.msra.mxu1 %v9093_v56 }
 0x467   : > { %v3453_v60 = vpop.f32.mrf.mxu1  ;;  %v10795_v24 = vpop.f32.mrf.mxu0  ;;  %4185 = vmatmul.mubr.bf16.gmra.mxu0 %v3692_v44 }
 0x468   : > { %v3454_v50 = vadd.f32 %v3453_v60, %v10607_v53  ;;  %v3618_v36 = vmax.f32 %v3452_v3, 0.0 }
 0x469   : > { %v3457_v34 = vpop.f32.mrf.mxu1  ;;  %v10797_v47 = vpop.f32.mrf.mxu0  ;;  %8257 = vmatmul.mubr.msk.bf16.gmra.mxu1 %vm809_vm2, %v9866_v55 }
 0x46a   : > { %v3619_v7 = vmax.f32 %v3454_v50, 0.0  ;;  %4695 = vmatprep.mubr.bf16.mxu1 %v12521_v22  ;;  %v3694_v10 = vpack.c.bf16 %v3618_v36, %v3616_v20  ;;  %v3458_v43 = vadd.f32 %v3457_v34, %v10610_v0 }
 0x46b   : > { %v3459_v45 = vpop.f32.mrf.mxu1  ;;  %v10802_v18 = vpop.f32.mrf.mxu0 }
 0x46c   : > { %v3695_v6 = vpack.c.bf16 %v3619_v7, %v3617_v37  ;;  %v3460_v11 = vadd.f32 %v3459_v45, %v10607_v53  ;;  %v3620_v41 = vmax.f32 %v3458_v43, 0.0 }
 0x46d   : > { %v3461_v9 = vpop.f32.mrf.mxu1  ;;  %v10804_v5 = vpop.f32.mrf.mxu0 }
 0x46e   : > { %4194 = vmatprep.mubr.bf16.mxu0 %v3695_v6  ;;  %v3462_v40 = vadd.f32 %v3461_v9, %v10610_v0  ;;  %v3621_v42 = vmax.f32 %v3460_v11, 0.0 }
 0x46f   : > { %v3463_v28 = vpop.f32.mrf.mxu1  ;;  %v10808_v55 = vpop.f32.mrf.mxu0  ;;  %4195 = vmatmul.mubr.bf16.gmra.mxu0 %v3694_v10 }
 0x470   : > { %v3464_v12 = vadd.f32 %v3463_v28, %v10607_v53  ;;  %v3622_v57 = vmax.f32 %v3462_v40, 0.0 }
 0x471   : > { %v3467_v17 = vpop.f32.mrf.mxu1  ;;  %v10812_v32 = vpop.f32.mrf.mxu0  ;;  %8258 = vmatmul.mubr.msk.bf16.gmra.mxu1 %vm809_vm2, %v9879_v61 }
 0x472   : > { %v3623_v58 = vmax.f32 %v3464_v12, 0.0  ;;  %4705 = vmatprep.mubr.bf16.mxu1 %v12521_v22  ;;  %v3696_v25 = vpack.c.bf16 %v3622_v57, %v3620_v41  ;;  %v3468_v27 = vadd.f32 %v3467_v17, %v10610_v0 }
 0x473   : > { %v3469_v26 = vpop.f32.mrf.mxu1  ;;  %v10817_v59 = vpop.f32.mrf.mxu0 }
 0x474   : > { %v3697_v19 = vpack.c.bf16 %v3623_v58, %v3621_v42  ;;  %v3470_v46 = vadd.f32 %v3469_v26, %v10607_v53  ;;  %v3624_v50 = vmax.f32 %v3468_v27, 0.0 }
 0x475   : > { %v3471_v39 = vpop.f32.mrf.mxu1  ;;  %v10819_v62 = vpop.f32.mrf.mxu0 }
 0x476   : > { %v3472_v2 = vadd.f32 %v3471_v39, %v10610_v0  ;;  %4204 = vmatprep.mubr.bf16.mxu0 %v3697_v19  ;;  %v3625_v3 = vmax.f32 %v3470_v46, 0.0  ;;  %v9096_v46 = vld [vmem:[#allocation5 + $0xe0] ss:$8 sps:$4 sm:$0xff]  }
 0x477   : > { %v3473_v61 = vpop.f32.mrf.mxu1  ;;  %v10823_v33 = vpop.f32.mrf.mxu0  ;;  %4205 = vmatmul.mubr.bf16.gmra.mxu0 %v3696_v25 }
 0x478   : > { %v3474_v13 = vadd.f32 %v3473_v61, %v10607_v53  ;;  %v3626_v44 = vmax.f32 %v3472_v2, 0.0  ;;  %v9098_v61 = vld [vmem:[#allocation5 + $0xe4] ss:$8 sps:$4 sm:$0xff]  }
 0x479   : > { %v3477_v16 = vpop.f32.mrf.mxu1  ;;  %v10827_v4 = vpop.f32.mrf.mxu0  ;;  %8259 = vmatmul.mubr.msk.bf16.gmra.mxu1 %vm809_vm2, %v9886_v1  ;;  %5925 = vmatprep.subr.bf16.mxu1 %v9098_v61 }
 0x47a   : > { %v3627_v38 = vmax.f32 %v3474_v13, 0.0  ;;  %4715 = vmatprep.mubr.bf16.mxu1 %v12521_v22  ;;  %v3698_v36 = vpack.c.bf16 %v3626_v44, %v3624_v50  ;;  %v3478_v45 = vadd.f32 %v3477_v16, %v10610_v0  ;;  %5926 = vmatpush2.bf16.msra.mxu1 %v9096_v46 }
 0x47b   : > { %v3479_v60 = vpop.f32.mrf.mxu1  ;;  %v10832_v31 = vpop.f32.mrf.mxu0 }
 0x47c   : > { %v3699_v37 = vpack.c.bf16 %v3627_v38, %v3625_v3  ;;  %v3480_v1 = vadd.f32 %v3479_v60, %v10607_v53  ;;  %v3628_v17 = vmax.f32 %v3478_v45, 0.0 }
 0x47d   : > { %v3481_v52 = vpop.f32.mrf.mxu1  ;;  %v10834_v51 = vpop.f32.mrf.mxu0 }
 0x47e   : > { %v3482_v7 = vadd.f32 %v3481_v52, %v10610_v0  ;;  %4214 = vmatprep.mubr.bf16.mxu0 %v3699_v37  ;;  %v3629_v28 = vmax.f32 %v3480_v1, 0.0 }
 0x47f   : > { %v3483_v34 = vpop.f32.mrf.mxu1  ;;  %v10838_v20 = vpop.f32.mrf.mxu0  ;;  %4215 = vmatmul.mubr.bf16.gmra.mxu0 %v3698_v36 }
 0x480   : > { %v3484_v6 = vadd.f32 %v3483_v34, %v10607_v53  ;;  %v3630_v40 = vmax.f32 %v3482_v7, 0.0 }
 0x481   : > { %v3487_v10 = vpop.f32.mrf.mxu1  ;;  %v10842_v9 = vpop.f32.mrf.mxu0  ;;  %8260 = vmatmul.mubr.msk.bf16.gmra.mxu1 %vm809_vm2, %v9899_v8 }
 0x482   : > { %v3631_v11 = vmax.f32 %v3484_v6, 0.0  ;;  %4725 = vmatprep.mubr.bf16.mxu1 %v12521_v22  ;;  %v3700_v26 = vpack.c.bf16 %v3630_v40, %v3628_v17  ;;  %v3488_v25 = vadd.f32 %v3487_v10, %v10610_v0 }
 0x483   : > { %v3489_v43 = vpop.f32.mrf.mxu1  ;;  %v10847_v12 = vpop.f32.mrf.mxu0 }
 0x484   : > { %v3701_v42 = vpack.c.bf16 %v3631_v11, %v3629_v28  ;;  %v3490_v39 = vadd.f32 %v3489_v43, %v10607_v53  ;;  %v3632_v3 = vmax.f32 %v3488_v25, 0.0 }
 0x485   : > { %v3491_v57 = vpop.f32.mrf.mxu1  ;;  %v10849_v58 = vpop.f32.mrf.mxu0 }
 0x486   : > { %v3492_v41 = vadd.f32 %v3491_v57, %v10610_v0  ;;  %4224 = vmatprep.mubr.bf16.mxu0 %v3701_v42  ;;  %v3633_v16 = vmax.f32 %v3490_v39, 0.0  ;;  %v3740_v57 = vld [vmem:[%s12459_s10] sm:$0x3] }
 0x487   : > { %v3493_v8 = vpop.f32.mrf.mxu1  ;;  %v10853_v19 = vpop.f32.mrf.mxu0  ;;  %4225 = vmatmul.mubr.bf16.gmra.mxu0 %v3700_v26  ;;  %v10883_v26 = vrot.slane %v3740_v57, %v9928_v30 }
 0x488   : > { %v3494_v2 = vadd.f32 %v3493_v8, %v10607_v53  ;;  %v3634_v56 = vmax.f32 %v3492_v41, 0.0 }
 0x489   : > { %v3497_v27 = vpop.f32.mrf.mxu1  ;;  %v10857_v13 = vpop.f32.mrf.mxu0  ;;  %8261 = vmatmul.mubr.msk.bf16.gmra.mxu1 %vm809_vm2, %v9906_v14  ;;  %v3953_v46 = vadd.f32 %v10804_v5, %v10883_v26 }
 0x48a   : > { %v3635_v49 = vmax.f32 %v3494_v2, 0.0  ;;  %4735 = vmatprep.mubr.bf16.mxu1 %v12521_v22  ;;  %v3702_v37 = vpack.c.bf16 %v3634_v56, %v3632_v3  ;;  %v3498_v34 = vadd.f32 %v3497_v27, %v10610_v0  ;;  %v3949_v3 = vadd.f32 %v10797_v47, %v10883_v26 }
 0x48b   : > { %v3499_v44 = vpop.f32.mrf.mxu1  ;;  %v10862_v38 = vpop.f32.mrf.mxu0 }
 0x48c   : > { %v3703_v52 = vpack.c.bf16 %v3635_v49, %v3633_v16  ;;  %v3500_v14 = vadd.f32 %v3499_v44, %v10607_v53  ;;  %v3636_v42 = vmax.f32 %v3498_v34, 0.0  ;;  %v9099_v16 = vld [vmem:[#allocation5 + $0xd0] ss:$8 sps:$4 sm:$0xff]   ;;  %v9101_v44 = vld [vmem:[#allocation5 + $0xd4] ss:$8 sps:$4 sm:$0xff]  }
 0x48d   : > { %v3501_v60 = vpop.f32.mrf.mxu1  ;;  %v10864_v50 = vpop.f32.mrf.mxu0  ;;  %5927 = vmatprep.subr.bf16.mxu1 %v9101_v44 }
 0x48e   : > { %v3502_v36 = vadd.f32 %v3501_v60, %v10610_v0  ;;  %4234 = vmatprep.mubr.bf16.mxu0 %v3703_v52  ;;  %v3637_v28 = vmax.f32 %v3500_v14, 0.0  ;;  %5928 = vmatpush2.bf16.msra.mxu1 %v9099_v16 }
 0x48f   : > { %v3503_v7 = vpop.f32.mrf.mxu1  ;;  %v10868_v1 = vpop.f32.mrf.mxu0  ;;  %4235 = vmatmul.mubr.bf16.gmra.mxu0 %v3702_v37 }
 0x490   : > { %v3504_v45 = vadd.f32 %v3503_v7, %v10607_v53  ;;  %v3638_v40 = vmax.f32 %v3502_v36, 0.0  ;;  %v4266_v7 = vmax.f32 %v3949_v3, 0.0 }
 0x491   : > { %v3507_v6 = vpop.f32.mrf.mxu1  ;;  %v10872_v10 = vpop.f32.mrf.mxu0  ;;  %8262 = vmatmul.mubr.msk.bf16.gmra.mxu1 %vm809_vm2, %v9919_v21 }
 0x492   : > { %v3639_v11 = vmax.f32 %v3504_v45, 0.0  ;;  %4745 = vmatprep.mubr.bf16.mxu1 %v12521_v22  ;;  %v3704_v8 = vpack.c.bf16 %v3638_v40, %v3636_v42  ;;  %v3508_v56 = vadd.f32 %v3507_v6, %v10610_v0  ;;  %v3963_v6 = vadd.f32 %v10819_v62, %v10883_v26 }
 0x493   : > { %v3509_v43 = vpop.f32.mrf.mxu1  ;;  %v10877_v17 = vpop.f32.mrf.mxu0 }
 0x494   : > { %v3705_v21 = vpack.c.bf16 %v3639_v11, %v3637_v28  ;;  %v3510_v25 = vadd.f32 %v3509_v43, %v10607_v53  ;;  %v3640_v14 = vmax.f32 %v3508_v56, 0.0  ;;  %v3959_v43 = vadd.f32 %v10812_v32, %v10883_v26  ;;  %v9104_v56 = vld [vmem:[#allocation5 + $0xc4] ss:$8 sps:$4 sm:$0xff]  }
 0x495   : > { %v3511_v41 = vpop.f32.mrf.mxu1  ;;  %v10885_v39 = vpop.f32.mrf.mxu0  ;;  %v4272_v62 = vmax.f32 %v3963_v6, 0.0  ;;  %5929 = vmatprep.subr.bf16.mxu1 %v9104_v56 }
 0x496   : > { %v3512_v2 = vadd.f32 %v3511_v41, %v10610_v0  ;;  %4244 = vmatprep.mubr.bf16.mxu0 %v3705_v21  ;;  %v3641_v5 = vmax.f32 %v3510_v25, 0.0  ;;  %v4268_v0 = vmax.f32 %v3953_v46, 0.0  ;;  %v4270_v21 = vmax.f32 %v3959_v43, 0.0 }
 0x497   : > { %v3513_v61 = vpop.f32.mrf.mxu1  ;;  %v10891_v27 = vpop.f32.mrf.mxu0  ;;  %4245 = vmatmul.mubr.bf16.gmra.mxu0 %v3704_v8  ;;  %v3973_v25 = vadd.f32 %v10834_v51, %v10883_v26 }
 0x498   : > { %v3514_v49 = vadd.f32 %v3513_v61, %v10607_v53  ;;  %v3642_v52 = vmax.f32 %v3512_v2, 0.0  ;;  %v10905_v53 = vrot.slane %v3740_v57, %v9936_v35  ;;  %v4394_v11 = vpack.c.bf16 %v4268_v0, %v4266_v7  ;;  %v9102_v61 = vld [vmem:[#allocation5 + $0xc0] ss:$8 sps:$4 sm:$0xff]  }
 0x499   : > { %v10897_v60 = vpop.f32.mrf.mxu0  ;;  %8263 = vmatmul.mubr.msk.bf16.gmra.mxu1 %vm809_vm2, %v9926_v29  ;;  %v4276_v51 = vmax.f32 %v3973_v25, 0.0 }
 0x49a   : > { %v3643_v37 = vmax.f32 %v3514_v49, 0.0  ;;  %4755 = vmatprep.mubr.bf16.mxu1 %v12521_v22  ;;  %v3951_v29 = vadd.f32 %v10802_v18, %v10905_v53  ;;  %v3706_v45 = vpack.c.bf16 %v3642_v52, %v3640_v14  ;;  %v3947_v28 = vadd.f32 %v10795_v24, %v10905_v53  ;;  %5930 = vmatpush2.bf16.msra.mxu1 %v9102_v61 }
 0x49b   : > { %v10902_v36 = vpop.f32.mrf.mxu0  ;;  %v3961_v32 = vadd.f32 %v10817_v59, %v10905_v53  ;;  %v3957_v46 = vadd.f32 %v10808_v55, %v10905_v53  ;;  %v3969_v49 = vadd.f32 %v10827_v4, %v10883_v26  ;;  %v3971_v4 = vadd.f32 %v10832_v31, %v10905_v53 }
 0x49c   : > { %v3707_v47 = vpack.c.bf16 %v3643_v37, %v3641_v5  ;;  %v4267_v18 = vmax.f32 %v3951_v29, 0.0  ;;  %v4265_v41 = vmax.f32 %v3947_v28, 0.0  ;;  %v3983_v37 = vadd.f32 %v10849_v58, %v10883_v26  ;;  %v10961_v29 = vpop.f32.mrf.mxu1 }
 0x49d   : > { %v10907_v34 = vpop.f32.mrf.mxu0  ;;  %v4271_v59 = vmax.f32 %v3961_v32, 0.0  ;;  %v4269_v55 = vmax.f32 %v3957_v46, 0.0  ;;  %v4274_v3 = vmax.f32 %v3969_v49, 0.0  ;;  %v3967_v14 = vadd.f32 %v10823_v33, %v10905_v53  ;;  %v9107_v32 = vld [vmem:[#allocation5 + $0xb4] ss:$8 sps:$4 sm:$0xff]  }
 0x49e   : > { %4254 = vmatprep.mubr.bf16.mxu0 %v3707_v47  ;;  %v4393_v24 = vpack.c.bf16 %v4267_v18, %v4265_v41  ;;  %v3979_v47 = vadd.f32 %v10842_v9, %v10883_v26  ;;  %v4275_v31 = vmax.f32 %v3971_v4, 0.0  ;;  %v4280_v58 = vmax.f32 %v3983_v37, 0.0  ;;  %v10966_v33 = vpop.f32.mrf.mxu1  ;;  %5931 = vmatprep.subr.bf16.mxu1 %v9107_v32 }
 0x49f   : > { %v10913_v40 = vpop.f32.mrf.mxu0  ;;  %4255 = vmatmul.mubr.bf16.gmra.mxu0 %v3706_v45  ;;  %v4395_v52 = vpack.c.bf16 %v4271_v59, %v4269_v55  ;;  %v4398_v0 = vpack.c.bf16 %v4276_v51, %v4274_v3  ;;  %v4273_v6 = vmax.f32 %v3967_v14, 0.0  ;;  %v3981_v43 = vadd.f32 %v10847_v12, %v10905_v53 }
 0x4a0   : > { %5050 = vmatprep.mubr.bf16.mxu0 %v4394_v11  ;;  %v4278_v11 = vmax.f32 %v3979_v47, 0.0  ;;  %v10972_v18 = vpop.f32.mrf.mxu1  ;;  %v4003_v3 = vadd.f32 %v10885_v39, %v10883_v26  ;;  %v3987_v37 = vadd.f32 %v10853_v19, %v10905_v53  ;;  %v3999_v14 = vadd.f32 %v10872_v10, %v10883_v26 }
 0x4a1   : > { %v10919_v57 = vpop.f32.mrf.mxu0  ;;  %8264 = vmatmul.mubr.msk.bf16.gmra.mxu1 %vm809_vm2, %v9952_v48  ;;  %v4396_v48 = vpack.c.bf16 %v4272_v62, %v4270_v21  ;;  %v4397_v9 = vpack.c.bf16 %v4275_v31, %v4273_v6  ;;  %v3977_v21 = vadd.f32 %v10838_v20, %v10905_v53 }
 0x4a2   : > { %4765 = vmatprep.mubr.bf16.mxu1 %v12521_v22  ;;  %v4400_v41 = vpack.c.bf16 %v4280_v58, %v4278_v11  ;;  %v10980_v25 = vpop.f32.mrf.mxu1  ;;  %v4288_v31 = vmax.f32 %v4003_v3, 0.0  ;;  %v4281_v19 = vmax.f32 %v3987_v37, 0.0  ;;  %v4286_v11 = vmax.f32 %v3999_v14, 0.0 }
 0x4a3   : > { %v10924_v42 = vpop.f32.mrf.mxu0  ;;  %v4277_v56 = vmax.f32 %v3977_v21, 0.0 }
 0x4a4   : > { %v10988_v46 = vpop.f32.mrf.mxu1  ;;  %v4404_v21 = vpack.c.bf16 %v4288_v31, %v4286_v11  ;;  %v4011_v31 = vadd.f32 %v10902_v36, %v10905_v53  ;;  %v12523_v36 = vld [vmem:[#allocation23_spill] sm:$0xff] }
 0x4a5   : > { %v10926_v8 = vpop.f32.mrf.mxu0 }
 0x4a6   : > { %v10993_v49 = vpop.f32.mrf.mxu1  ;;  %v4023_v11 = vadd.f32 %v10926_v8, %v10883_v26 }
 0x4a7   : > { %v10932_v2 = vpop.f32.mrf.mxu0  ;;  %5051 = vmatmul.mubr.bf16.vlgmr.msra.gmra.mxu0 %v4393_v24  ;;  %v9105_v24 = vld [vmem:[#allocation5 + $0xb0] ss:$8 sps:$4 sm:$0xff]  }
 0x4a8   : > { %5060 = vmatprep.mubr.bf16.mxu0 %v4396_v48  ;;  %v3989_v48 = vadd.f32 %v10857_v13, %v10883_v26  ;;  %5932 = vmatpush2.bf16.msra.mxu1 %v9105_v24  ;;  %v10999_v55 = vpop.f32.mrf.mxu1  ;;  %v3997_v24 = vadd.f32 %v10868_v1, %v10905_v53 }
 0x4a9   : > { %v10938_v16 = vpop.f32.mrf.mxu0  ;;  %8265 = vmatmul.mubr.msk.bf16.gmra.mxu1 %vm809_vm2, %v9963_v15 }
 0x4aa   : > { %4775 = vmatprep.mubr.bf16.mxu1 %v12521_v22  ;;  %v4282_v13 = vmax.f32 %v3989_v48, 0.0  ;;  %v4009_v48 = vadd.f32 %v10897_v60, %v10883_v26  ;;  %v4285_v60 = vmax.f32 %v3997_v24, 0.0  ;;  %v4019_v24 = vadd.f32 %v10919_v57, %v10883_v26 }
 0x4ab   : > { %v10943_v44 = vpop.f32.mrf.mxu0  ;;  %v4021_v57 = vadd.f32 %v10924_v42, %v10905_v53  ;;  %v9114_v42 = vld [vmem:[#allocation7 + $0x60] ss:$8 sps:$4 sm:$0xff]  }
 0x4ac   : > { %v4290_v37 = vmax.f32 %v4009_v48, 0.0 }
 0x4ad   : > { %v10945_v5 = vpop.f32.mrf.mxu0 }
 0x4af   : > { %v10951_v15 = vpop.f32.mrf.mxu0  ;;  %5061 = vmatmul.mubr.bf16.gmra.mxu0 %v4395_v52 }
 0x4b0   : > { %5070 = vmatprep.mubr.bf16.mxu0 %v4398_v0  ;;  %v11007_v0 = vpop.f32.mrf.mxu1 }
 0x4b1   : > { %v10957_v7 = vpop.f32.mrf.mxu0  ;;  %8266 = vmatmul.mubr.msk.bf16.gmra.mxu1 %vm809_vm2, %v9980_v54  ;;  %v3993_v54 = vadd.f32 %v10864_v50, %v10883_v26  ;;  %v4279_v50 = vmax.f32 %v3981_v43, 0.0  ;;  %v4001_v43 = vadd.f32 %v10877_v17, %v10905_v53  ;;  %v9108_v17 = vld [vmem:[#allocation7 + $0x70] ss:$8 sps:$4 sm:$0xff]  }
 0x4b2   : > { %4785 = vmatprep.mubr.bf16.mxu1 %v12521_v22  ;;  %v11015_v39 = vpop.f32.mrf.mxu1 }
 0x4b3   : > { %v10964_v45 = vpop.f32.mrf.mxu0  ;;  %v4284_v20 = vmax.f32 %v3993_v54, 0.0  ;;  %v4399_v51 = vpack.c.bf16 %v4279_v50, %v4277_v56  ;;  %v9111_v56 = vld [vmem:[#allocation5 + $0xa0] ss:$8 sps:$4 sm:$0xff]  }
 0x4b4   : > { %v11020_v6 = vpop.f32.mrf.mxu1 }
 0x4b5   : > { %v10968_v28 = vpop.f32.mrf.mxu0  ;;  %v4402_v4 = vpack.c.bf16 %v4284_v20, %v4282_v13  ;;  %v9110_v20 = vld [vmem:[#allocation7 + $0x74] ss:$8 sps:$4 sm:$0xff]   ;;  %v12522_v13 = vld [vmem:[#allocation22_spill] sm:$0xff] }
 0x4b6   : > { %v11026_v54 = vpop.f32.mrf.mxu1  ;;  %6656 = vmatprep.subr.bf16.mxu0 %v9110_v20  ;;  %v4296_v20 = vmax.f32 %v4023_v11, 0.0  ;;  %v4017_v11 = vadd.f32 %v10913_v40, %v10905_v53 }
 0x4b7   : > { %v10976_v62 = vpop.f32.mrf.mxu0  ;;  %5071 = vmatmul.mubr.bf16.gmra.mxu0 %v4397_v9 }
 0x4b8   : > { %5080 = vmatprep.mubr.bf16.mxu0 %v4400_v41  ;;  %v11034_v32 = vpop.f32.mrf.mxu1  ;;  %6657 = vmatpush1.bf16.msra.mxu0 %v9108_v17  ;;  %v4291_v17 = vmax.f32 %v4011_v31, 0.0  ;;  %v4293_v40 = vmax.f32 %v4017_v11, 0.0 }
 0x4b9   : > { %v10984_v12 = vpop.f32.mrf.mxu0  ;;  %8267 = vmatmul.mubr.msk.bf16.gmra.mxu1 %vm809_vm2, %v9991_v23  ;;  %v3991_v23 = vadd.f32 %v10862_v38, %v10905_v53 }
 0x4ba   : > { %4795 = vmatprep.mubr.bf16.mxu1 %v12521_v22 }
 0x4bb   : > { %v10991_v61 = vpop.f32.mrf.mxu0  ;;  %v4283_v38 = vmax.f32 %v3991_v23, 0.0  ;;  %v11042_v23 = vpop.f32.mrf.mxu1 }
 0x4bd   : > { %v10995_v59 = vpop.f32.mrf.mxu0  ;;  %v4401_v10 = vpack.c.bf16 %v4283_v38, %v4281_v19 }
 0x4bf   : > { %v11003_v52 = vpop.f32.mrf.mxu0  ;;  %5081 = vmatmul.mubr.bf16.gmra.mxu0 %v4399_v51  ;;  %v9113_v51 = vld [vmem:[#allocation5 + $0xa4] ss:$8 sps:$4 sm:$0xff]  }
 0x4c0   : > { %5090 = vmatprep.mubr.bf16.mxu0 %v4402_v4  ;;  %5933 = vmatprep.subr.bf16.mxu1 %v9113_v51  ;;  %v11047_v4 = vpop.f32.mrf.mxu1 }
 0x4c1   : > { %v11011_v47 = vpop.f32.mrf.mxu0  ;;  %8268 = vmatmul.mubr.msk.bf16.gmra.mxu1 %vm809_vm2, %v10008_v63  ;;  %v4013_v63 = vadd.f32 %v10907_v34, %v10883_v26  ;;  %v4287_v34 = vmax.f32 %v4001_v43, 0.0 }
 0x4c2   : > { %4805 = vmatprep.mubr.bf16.mxu1 %v12521_v22  ;;  %5934 = vmatpush2.bf16.msra.mxu1 %v9111_v56  ;;  %v11053_v19 = vpop.f32.mrf.mxu1 }
 0x4c3   : > { %v11018_v58 = vpop.f32.mrf.mxu0  ;;  %v4292_v1 = vmax.f32 %v4013_v63, 0.0  ;;  %v4403_v38 = vpack.c.bf16 %v4287_v34, %v4285_v60  ;;  %v4007_v63 = vadd.f32 %v10891_v27, %v10905_v53  ;;  %v4294_v34 = vmax.f32 %v4019_v24, 0.0 }
 0x4c5   : > { %v11022_v9 = vpop.f32.mrf.mxu0  ;;  %v4406_v43 = vpack.c.bf16 %v4292_v1, %v4290_v37  ;;  %v4033_v37 = vadd.f32 %v10945_v5, %v10883_v26  ;;  %v4408_v31 = vpack.c.bf16 %v4296_v20, %v4294_v34  ;;  %v9119_v5 = vld [vmem:[#allocation5 + $0x94] ss:$8 sps:$4 sm:$0xff]  }
 0x4c6   : > { %5935 = vmatprep.subr.bf16.mxu1 %v9119_v5 }
 0x4c7   : > { %v11030_v41 = vpop.f32.mrf.mxu0  ;;  %5091 = vmatmul.mubr.bf16.gmra.mxu0 %v4401_v10  ;;  %v4300_v20 = vmax.f32 %v4033_v37, 0.0  ;;  %v4043_v37 = vadd.f32 %v10968_v28, %v10883_v26 }
 0x4c8   : > { %5100 = vmatprep.mubr.bf16.mxu0 %v4404_v21  ;;  %v11061_v21 = vpop.f32.mrf.mxu1 }
 0x4c9   : > { %v11038_v50 = vpop.f32.mrf.mxu0  ;;  %8269 = vmatmul.mubr.msk.bf16.gmra.mxu1 %vm809_vm2, %v12522_v13  ;;  %v4289_v13 = vmax.f32 %v4007_v63, 0.0  ;;  %v4029_v63 = vadd.f32 %v10938_v16, %v10883_v26  ;;  %v4304_v5 = vmax.f32 %v4043_v37, 0.0 }
 0x4ca   : > { %4815 = vmatprep.mubr.bf16.mxu1 %v12521_v22  ;;  %v11069_v8 = vpop.f32.mrf.mxu1 }
 0x4cb   : > { %v11045_v3 = vpop.f32.mrf.mxu0  ;;  %12524 = vst [vmem:[#allocation22_spill] sm:$0xff] %v11069_v8  ;;  %v4405_v1 = vpack.c.bf16 %v4291_v17, %v4289_v13  ;;  %v9117_v17 = vld [vmem:[#allocation5 + $0x90] ss:$8 sps:$4 sm:$0xff]   ;;  %v4295_v13 = vmax.f32 %v4021_v57, 0.0  ;;  %v4298_v16 = vmax.f32 %v4029_v63, 0.0  ;;  %v4031_v57 = vadd.f32 %v10943_v44, %v10905_v53 }
 0x4cc   : > { %v11073_v27 = vpop.f32.mrf.mxu1  ;;  %5936 = vmatpush2.bf16.msra.mxu1 %v9117_v17 }
 0x4cd   : > { %v11049_v14 = vpop.f32.mrf.mxu0  ;;  %v4410_v11 = vpack.c.bf16 %v4300_v20, %v4298_v16  ;;  %v4299_v44 = vmax.f32 %v4031_v57, 0.0  ;;  %v4053_v57 = vadd.f32 %v10995_v59, %v10883_v26  ;;  %v9125_v59 = vld [vmem:[#allocation5 + $0x84] ss:$8 sps:$4 sm:$0xff]  }
 0x4ce   : > { %v11079_v60 = vpop.f32.mrf.mxu1  ;;  %5937 = vmatprep.subr.bf16.mxu1 %v9125_v59 }
 0x4cf   : > { %v11057_v10 = vpop.f32.mrf.mxu0  ;;  %5101 = vmatmul.mubr.bf16.gmra.mxu0 %v4403_v38  ;;  %12525 = vst [vmem:[#allocation23_spill] sm:$0xff] %v11079_v60 }
 0x4d0   : > { %5110 = vmatprep.mubr.bf16.mxu0 %v4406_v43  ;;  %v11087_v43 = vpop.f32.mrf.mxu1 }
 0x4d1   : > { %v11065_v48 = vpop.f32.mrf.mxu0  ;;  %8270 = vmatmul.mubr.msk.bf16.gmra.mxu1 %vm809_vm2, %v12523_v36  ;;  %12526 = vst [vmem:[#allocation24_spill] sm:$0xff] %v11087_v43  ;;  %v9116_v36 = vld [vmem:[#allocation7 + $0x64] ss:$8 sps:$4 sm:$0xff]   ;;  %v4407_v43 = vpack.c.bf16 %v4295_v13, %v4293_v40 }
 0x4d2   : > { %v11093_v60 = vpop.f32.mrf.mxu1  ;;  %6658 = vmatprep.subr.bf16.mxu0 %v9116_v36  ;;  %v4039_v36 = vadd.f32 %v10957_v7, %v10883_v26 }
 0x4d3   : > { %v11071_v56 = vpop.f32.mrf.mxu0  ;;  %12527 = vst [vmem:[#allocation25_spill] sm:$0xff] %v11093_v60  ;;  %6659 = vmatpush1.bf16.msra.mxu0 %v9114_v42  ;;  %v4027_v42 = vadd.f32 %v10932_v2, %v10905_v53 }
 0x4d4   : > { %v4302_v16 = vmax.f32 %v4039_v36, 0.0  ;;  %v4049_v36 = vadd.f32 %v10984_v12, %v10883_v26 }
 0x4d5   : > { %v11075_v51 = vpop.f32.mrf.mxu0  ;;  %v4297_v40 = vmax.f32 %v4027_v42, 0.0  ;;  %v4037_v42 = vadd.f32 %v10951_v15, %v10905_v53 }
 0x4d6   : > { %v4412_v37 = vpack.c.bf16 %v4304_v5, %v4302_v16  ;;  %v4308_v5 = vmax.f32 %v4053_v57, 0.0  ;;  %v4306_v12 = vmax.f32 %v4049_v36, 0.0  ;;  %v4063_v57 = vadd.f32 %v11022_v9, %v10883_v26 }
 0x4d7   : > { %v11083_v38 = vpop.f32.mrf.mxu0  ;;  %5111 = vmatmul.mubr.bf16.gmra.mxu0 %v4405_v1  ;;  %v11097_v1 = vpop.f32.mrf.mxu1  ;;  %v4301_v15 = vmax.f32 %v4037_v42, 0.0  ;;  %v4047_v36 = vadd.f32 %v10976_v62, %v10905_v53 }
 0x4d8   : > { %5120 = vmatprep.mubr.bf16.mxu0 %v4408_v31  ;;  %12528 = vst [vmem:[#allocation26_spill] sm:$0xff] %v11097_v1 }
 0x4d9   : > { %v11091_v24 = vpop.f32.mrf.mxu0  ;;  %v11103_v8 = vpop.f32.mrf.mxu1 }
 0x4da   : > { %12529 = vst [vmem:[#allocation27_spill] sm:$0xff] %v11103_v8 }
 0x4db   : > { %v11095_v34 = vpop.f32.mrf.mxu0  ;;  %v11111_v63 = vpop.f32.mrf.mxu1 }
 0x4dc   : > { %12530 = vst [vmem:[#allocation28_spill] sm:$0xff] %v11111_v63  ;;  %v4041_v63 = vadd.f32 %v10964_v45, %v10905_v53  ;;  %v9120_v45 = vld [vmem:[#allocation7 + $0x50] ss:$8 sps:$4 sm:$0xff]  }
 0x4dd   : > { %v11099_v31 = vpop.f32.mrf.mxu0  ;;  %v11117_v13 = vpop.f32.mrf.mxu1 }
 0x4de   : > { %12531 = vst [vmem:[#allocation29_spill] sm:$0xff] %v11117_v13 }
 0x4df   : > { %v11107_v60 = vpop.f32.mrf.mxu0  ;;  %5121 = vmatmul.mubr.bf16.gmra.mxu0 %v4407_v43  ;;  %v11121_v20 = vpop.f32.mrf.mxu1  ;;  %v4409_v43 = vpack.c.bf16 %v4299_v44, %v4297_v40  ;;  %v9122_v40 = vld [vmem:[#allocation7 + $0x54] ss:$8 sps:$4 sm:$0xff]  }
 0x4e0   : > { %5130 = vmatprep.mubr.bf16.mxu0 %v4410_v11  ;;  %12532 = vst [vmem:[#allocation30_spill] sm:$0xff] %v11121_v20  ;;  %v4303_v20 = vmax.f32 %v4041_v63, 0.0  ;;  %6660 = vmatprep.subr.bf16.mxu0 %v9122_v40  ;;  %v4051_v63 = vadd.f32 %v10991_v61, %v10905_v53 }
 0x4e1   : > { %v11115_v17 = vpop.f32.mrf.mxu0  ;;  %v11127_v7 = vpop.f32.mrf.mxu1  ;;  %6661 = vmatpush1.bf16.msra.mxu0 %v9120_v45  ;;  %v4414_v45 = vpack.c.bf16 %v4308_v5, %v4306_v12 }
 0x4e2   : > { %12533 = vst [vmem:[#allocation31_spill] sm:$0xff] %v11127_v7  ;;  %v9123_v7 = vld [vmem:[#allocation5 + $0x80] ss:$8 sps:$4 sm:$0xff]  }
 0x4e3   : > { %v11119_v28 = vpop.f32.mrf.mxu0  ;;  %v11135_v13 = vpop.f32.mrf.mxu1  ;;  %5938 = vmatpush2.bf16.msra.mxu1 %v9123_v7  ;;  %v4307_v7 = vmax.f32 %v4051_v63, 0.0  ;;  %v4073_v63 = vadd.f32 %v11049_v14, %v10883_v26 }
 0x4e4   : > { %12534 = vst [vmem:[#allocation32_spill] sm:$0xff] %v11135_v13  ;;  %v4411_v13 = vpack.c.bf16 %v4303_v20, %v4301_v15  ;;  %8709 = vmatprep.subr.bf16.mxu1 %v12521_v22  ;;  %v4059_v20 = vadd.f32 %v11011_v47, %v10883_v26  ;;  %v4312_v15 = vmax.f32 %v4063_v57, 0.0  ;;  %v4305_v22 = vmax.f32 %v4047_v36, 0.0 }
 0x4e5   : > { %v11123_v2 = vpop.f32.mrf.mxu0  ;;  %v11141_v8 = vpop.f32.mrf.mxu1  ;;  %v4057_v36 = vadd.f32 %v11003_v52, %v10905_v53 }
 0x4e6   : > { %v4310_v12 = vmax.f32 %v4059_v20, 0.0 }
 0x4e7   : > { %v11131_v11 = vpop.f32.mrf.mxu0  ;;  %5131 = vmatmul.mubr.bf16.gmra.mxu0 %v4409_v43  ;;  %v11145_v43 = vpop.f32.mrf.mxu1 }
 0x4e8   : > { %5140 = vmatprep.mubr.bf16.mxu0 %v4412_v37  ;;  %v4416_v57 = vpack.c.bf16 %v4312_v15, %v4310_v12  ;;  %v9128_v15 = vld [vmem:[#allocation7 + $0x44] ss:$8 sps:$4 sm:$0xff]   ;;  %v4309_v12 = vmax.f32 %v4057_v36, 0.0  ;;  %v4067_v36 = vadd.f32 %v11030_v41, %v10905_v53 }
 0x4e9   : > { %v11139_v44 = vpop.f32.mrf.mxu0  ;;  %v11151_v1 = vpop.f32.mrf.mxu1  ;;  %6662 = vmatprep.subr.bf16.mxu0 %v9128_v15 }
 0x4ea   : > { %12535 = vst [vmem:[#allocation33_spill] sm:$0xff] %v11151_v1 }
 0x4eb   : > { %v11143_v16 = vpop.f32.mrf.mxu0  ;;  %v11160_v40 = vpop.f32.mrf.mxu1 }
 0x4ec   : > { %12536 = vst [vmem:[#allocation34_spill] sm:$0xff] %v11160_v40  ;;  %v4061_v40 = vadd.f32 %v11018_v58, %v10905_v53 }
 0x4ed   : > { %v11147_v37 = vpop.f32.mrf.mxu0  ;;  %v11166_v59 = vpop.f32.mrf.mxu1 }
 0x4ee   : > { %12537 = vst [vmem:[#allocation35_spill] sm:$0xff] %v11166_v59  ;;  %v4311_v58 = vmax.f32 %v4061_v40, 0.0 }
 0x4ef   : > { %v11156_v42 = vpop.f32.mrf.mxu0  ;;  %5141 = vmatmul.mubr.bf16.gmra.mxu0 %v4411_v13  ;;  %v11170_v5 = vpop.f32.mrf.mxu1  ;;  %v4413_v13 = vpack.c.bf16 %v4307_v7, %v4305_v22  ;;  %v4069_v22 = vadd.f32 %v11038_v50, %v10883_v26  ;;  %v4071_v50 = vadd.f32 %v11045_v3, %v10905_v53 }
 0x4f0   : > { %5150 = vmatprep.mubr.bf16.mxu0 %v4414_v45  ;;  %12538 = vst [vmem:[#allocation36_spill] sm:$0xff] %v11170_v5  ;;  %v9126_v5 = vld [vmem:[#allocation7 + $0x40] ss:$8 sps:$4 sm:$0xff]  }
 0x4f1   : > { %v11164_v61 = vpop.f32.mrf.mxu0  ;;  %v11176_v47 = vpop.f32.mrf.mxu1  ;;  %v4314_v52 = vmax.f32 %v4069_v22, 0.0  ;;  %6663 = vmatpush1.bf16.msra.mxu0 %v9126_v5  ;;  %v4315_v5 = vmax.f32 %v4071_v50, 0.0 }
 0x4f2   : > { %12539 = vst [vmem:[#allocation37_spill] sm:$0xff] %v11176_v47  ;;  %v4316_v47 = vmax.f32 %v4073_v63, 0.0  ;;  %v4083_v63 = vadd.f32 %v11075_v51, %v10883_v26 }
 0x4f3   : > { %v11168_v9 = vpop.f32.mrf.mxu0  ;;  %v11184_v59 = vpop.f32.mrf.mxu1 }
 0x4f4   : > { %12540 = vst [vmem:[#allocation38_spill] sm:$0xff] %v11184_v59  ;;  %v4415_v59 = vpack.c.bf16 %v4311_v58, %v4309_v12  ;;  %v4079_v58 = vadd.f32 %v11065_v48, %v10883_v26  ;;  %v4320_v12 = vmax.f32 %v4083_v63, 0.0 }
 0x4f5   : > { %v11172_v62 = vpop.f32.mrf.mxu0  ;;  %v11190_v7 = vpop.f32.mrf.mxu1 }
 0x4f6   : > { %12541 = vst [vmem:[#allocation39_spill] sm:$0xff] %v11190_v7  ;;  %v4418_v7 = vpack.c.bf16 %v4316_v47, %v4314_v52  ;;  %v4318_v52 = vmax.f32 %v4079_v58, 0.0 }
 0x4f7   : > { %v11180_v45 = vpop.f32.mrf.mxu0  ;;  %5151 = vmatmul.mubr.bf16.gmra.mxu0 %v4413_v13  ;;  %v11194_v1 = vpop.f32.mrf.mxu1 }
 0x4f8   : > { %5160 = vmatprep.mubr.bf16.mxu0 %v4416_v57  ;;  %12542 = vst [vmem:[#allocation40_spill] sm:$0xff] %v11194_v1  ;;  %v4420_v63 = vpack.c.bf16 %v4320_v12, %v4318_v52  ;;  %v9131_v12 = vld [vmem:[#allocation7 + $0x34] ss:$8 sps:$4 sm:$0xff]  }
 0x4f9   : > { %v11188_v20 = vpop.f32.mrf.mxu0  ;;  %v11200_v40 = vpop.f32.mrf.mxu1  ;;  %6664 = vmatprep.subr.bf16.mxu0 %v9131_v12 }
 0x4fa   : > { %12543 = vst [vmem:[#allocation41_spill] sm:$0xff] %v11200_v40  ;;  %v4313_v40 = vmax.f32 %v4067_v36, 0.0  ;;  %v4077_v36 = vadd.f32 %v11057_v10, %v10905_v53 }
 0x4fb   : > { %v11192_v14 = vpop.f32.mrf.mxu0  ;;  %v11208_v22 = vpop.f32.mrf.mxu1 }
 0x4fc   : > { %12544 = vst [vmem:[#allocation42_spill] sm:$0xff] %v11208_v22  ;;  %v4081_v22 = vadd.f32 %v11071_v56, %v10905_v53  ;;  %v4317_v52 = vmax.f32 %v4077_v36, 0.0  ;;  %v4087_v36 = vadd.f32 %v11083_v38, %v10905_v53 }
 0x4fd   : > { %v11196_v13 = vpop.f32.mrf.mxu0  ;;  %v11214_v15 = vpop.f32.mrf.mxu1 }
 0x4fe   : > { %12545 = vst [vmem:[#allocation43_spill] sm:$0xff] %v11214_v15  ;;  %v4319_v56 = vmax.f32 %v4081_v22, 0.0 }
 0x4ff   : > { %v11204_v57 = vpop.f32.mrf.mxu0  ;;  %5161 = vmatmul.mubr.bf16.gmra.mxu0 %v4415_v59  ;;  %v11218_v47 = vpop.f32.mrf.mxu1  ;;  %v4417_v59 = vpack.c.bf16 %v4315_v5, %v4313_v40  ;;  %v4089_v40 = vadd.f32 %v11091_v24, %v10883_v26  ;;  %v4091_v24 = vadd.f32 %v11095_v34, %v10905_v53 }
 0x500   : > { %5170 = vmatprep.mubr.bf16.mxu0 %v4418_v7  ;;  %12546 = vst [vmem:[#allocation44_spill] sm:$0xff] %v11218_v47  ;;  %v4093_v7 = vadd.f32 %v11099_v31, %v10883_v26  ;;  %v9129_v47 = vld [vmem:[#allocation7 + $0x30] ss:$8 sps:$4 sm:$0xff]  }
 0x501   : > { %v11212_v3 = vpop.f32.mrf.mxu0  ;;  %v11224_v48 = vpop.f32.mrf.mxu1  ;;  %v4322_v10 = vmax.f32 %v4089_v40, 0.0  ;;  %6665 = vmatpush1.bf16.msra.mxu0 %v9129_v47  ;;  %v4323_v47 = vmax.f32 %v4091_v24, 0.0 }
 0x502   : > { %12547 = vst [vmem:[#allocation45_spill] sm:$0xff] %v11224_v48  ;;  %v4324_v48 = vmax.f32 %v4093_v7, 0.0  ;;  %v4103_v7 = vadd.f32 %v11123_v2, %v10883_v26 }
 0x503   : > { %v11216_v51 = vpop.f32.mrf.mxu0  ;;  %v11232_v15 = vpop.f32.mrf.mxu1 }
 0x504   : > { %12548 = vst [vmem:[#allocation46_spill] sm:$0xff] %v11232_v15  ;;  %v4419_v15 = vpack.c.bf16 %v4319_v56, %v4317_v52  ;;  %v4099_v56 = vadd.f32 %v11115_v17, %v10883_v26  ;;  %v4328_v52 = vmax.f32 %v4103_v7, 0.0 }
 0x505   : > { %v11220_v41 = vpop.f32.mrf.mxu0  ;;  %v11238_v5 = vpop.f32.mrf.mxu1 }
 0x506   : > { %12549 = vst [vmem:[#allocation47_spill] sm:$0xff] %v11238_v5  ;;  %v4422_v5 = vpack.c.bf16 %v4324_v48, %v4322_v10  ;;  %v4326_v10 = vmax.f32 %v4099_v56, 0.0 }
 0x507   : > { %v11228_v50 = vpop.f32.mrf.mxu0  ;;  %5171 = vmatmul.mubr.bf16.gmra.mxu0 %v4417_v59  ;;  %v11242_v1 = vpop.f32.mrf.mxu1 }
 0x508   : > { %5180 = vmatprep.mubr.bf16.mxu0 %v4420_v63  ;;  %12550 = vst [vmem:[#allocation48_spill] sm:$0xff] %v11242_v1  ;;  %v4424_v7 = vpack.c.bf16 %v4328_v52, %v4326_v10  ;;  %v9134_v52 = vld [vmem:[#allocation7 + $0x24] ss:$8 sps:$4 sm:$0xff]  }
 0x509   : > { %v11236_v58 = vpop.f32.mrf.mxu0  ;;  %v11248_v22 = vpop.f32.mrf.mxu1  ;;  %6666 = vmatprep.subr.bf16.mxu0 %v9134_v52 }
 0x50a   : > { %12551 = vst [vmem:[#allocation49_spill] sm:$0xff] %v11248_v22  ;;  %v4321_v22 = vmax.f32 %v4087_v36, 0.0  ;;  %v4097_v36 = vadd.f32 %v11107_v60, %v10905_v53 }
 0x50b   : > { %v11240_v31 = vpop.f32.mrf.mxu0  ;;  %v11256_v40 = vpop.f32.mrf.mxu1 }
 0x50c   : > { %12552 = vst [vmem:[#allocation50_spill] sm:$0xff] %v11256_v40  ;;  %v4101_v40 = vadd.f32 %v11119_v28, %v10905_v53  ;;  %v4325_v10 = vmax.f32 %v4097_v36, 0.0  ;;  %v4107_v36 = vadd.f32 %v11131_v11, %v10905_v53 }
 0x50d   : > { %v11244_v59 = vpop.f32.mrf.mxu0  ;;  %v11262_v12 = vpop.f32.mrf.mxu1 }
 0x50e   : > { %12553 = vst [vmem:[#allocation51_spill] sm:$0xff] %v11262_v12  ;;  %v4327_v28 = vmax.f32 %v4101_v40, 0.0 }
 0x50f   : > { %v11252_v63 = vpop.f32.mrf.mxu0  ;;  %5181 = vmatmul.mubr.bf16.gmra.mxu0 %v4419_v15  ;;  %v11266_v48 = vpop.f32.mrf.mxu1  ;;  %v4421_v15 = vpack.c.bf16 %v4323_v47, %v4321_v22  ;;  %v4109_v22 = vadd.f32 %v11139_v44, %v10883_v26  ;;  %v4111_v44 = vadd.f32 %v11143_v16, %v10905_v53 }
 0x510   : > { %5190 = vmatprep.mubr.bf16.mxu0 %v4422_v5  ;;  %12554 = vst [vmem:[#allocation52_spill] sm:$0xff] %v11266_v48  ;;  %v4113_v5 = vadd.f32 %v11147_v37, %v10883_v26  ;;  %v9132_v48 = vld [vmem:[#allocation7 + $0x20] ss:$8 sps:$4 sm:$0xff]  }
 0x511   : > { %v11260_v34 = vpop.f32.mrf.mxu0  ;;  %v11272_v17 = vpop.f32.mrf.mxu1  ;;  %v4330_v60 = vmax.f32 %v4109_v22, 0.0  ;;  %6667 = vmatpush1.bf16.msra.mxu0 %v9132_v48  ;;  %v4331_v48 = vmax.f32 %v4111_v44, 0.0 }
 0x512   : > { %12555 = vst [vmem:[#allocation53_spill] sm:$0xff] %v11272_v17  ;;  %v4332_v17 = vmax.f32 %v4113_v5, 0.0  ;;  %v4123_v5 = vadd.f32 %v11172_v62, %v10883_v26 }
 0x513   : > { %v11264_v2 = vpop.f32.mrf.mxu0  ;;  %v11280_v12 = vpop.f32.mrf.mxu1 }
 0x514   : > { %12556 = vst [vmem:[#allocation54_spill] sm:$0xff] %v11280_v12  ;;  %v4423_v12 = vpack.c.bf16 %v4327_v28, %v4325_v10  ;;  %v4119_v28 = vadd.f32 %v11164_v61, %v10883_v26  ;;  %v4336_v10 = vmax.f32 %v4123_v5, 0.0 }
 0x515   : > { %v11268_v38 = vpop.f32.mrf.mxu0  ;;  %v11286_v47 = vpop.f32.mrf.mxu1 }
 0x516   : > { %12557 = vst [vmem:[#allocation55_spill] sm:$0xff] %v11286_v47  ;;  %v4426_v47 = vpack.c.bf16 %v4332_v17, %v4330_v60  ;;  %v4334_v60 = vmax.f32 %v4119_v28, 0.0 }
 0x517   : > { %v11276_v24 = vpop.f32.mrf.mxu0  ;;  %5191 = vmatmul.mubr.bf16.gmra.mxu0 %v4421_v15  ;;  %v11290_v1 = vpop.f32.mrf.mxu1 }
 0x518   : > { %5200 = vmatprep.mubr.bf16.mxu0 %v4424_v7  ;;  %12558 = vst [vmem:[#allocation56_spill] sm:$0xff] %v11290_v1  ;;  %v4428_v5 = vpack.c.bf16 %v4336_v10, %v4334_v60  ;;  %v9137_v10 = vld [vmem:[#allocation7 + $0x14] ss:$8 sps:$4 sm:$0xff]  }
 0x519   : > { %v11284_v56 = vpop.f32.mrf.mxu0  ;;  %v11296_v40 = vpop.f32.mrf.mxu1  ;;  %6668 = vmatprep.subr.bf16.mxu0 %v9137_v10 }
 0x51a   : > { %12559 = vst [vmem:[#allocation57_spill] sm:$0xff] %v11296_v40  ;;  %v4329_v40 = vmax.f32 %v4107_v36, 0.0  ;;  %v4117_v36 = vadd.f32 %v11156_v42, %v10905_v53 }
 0x51b   : > { %v11288_v37 = vpop.f32.mrf.mxu0  ;;  %v11304_v22 = vpop.f32.mrf.mxu1 }
 0x51c   : > { %12560 = vst [vmem:[#allocation58_spill] sm:$0xff] %v11304_v22  ;;  %v4121_v22 = vadd.f32 %v11168_v9, %v10905_v53  ;;  %v4333_v60 = vmax.f32 %v4117_v36, 0.0  ;;  %v4127_v36 = vadd.f32 %v11180_v45, %v10905_v53  ;;  %v4141_v45 = vadd.f32 %v11216_v51, %v10905_v53 }
 0x51d   : > { %v11292_v15 = vpop.f32.mrf.mxu0  ;;  %v11310_v52 = vpop.f32.mrf.mxu1 }
 0x51e   : > { %12561 = vst [vmem:[#allocation59_spill] sm:$0xff] %v11310_v52  ;;  %v4335_v9 = vmax.f32 %v4121_v22, 0.0  ;;  %v4143_v22 = vadd.f32 %v11220_v41, %v10883_v26  ;;  %v4337_v41 = vmax.f32 %v4127_v36, 0.0  ;;  %v4343_v36 = vmax.f32 %v4141_v45, 0.0 }
 0x51f   : > { %v11300_v7 = vpop.f32.mrf.mxu0  ;;  %5201 = vmatmul.mubr.bf16.gmra.mxu0 %v4423_v12  ;;  %v11314_v17 = vpop.f32.mrf.mxu1  ;;  %v4425_v12 = vpack.c.bf16 %v4331_v48, %v4329_v40  ;;  %v4129_v40 = vadd.f32 %v11188_v20, %v10883_v26  ;;  %v4131_v20 = vadd.f32 %v11192_v14, %v10905_v53  ;;  %v4163_v45 = vadd.f32 %v11268_v38, %v10883_v26 }
 0x520   : > { %5210 = vmatprep.mubr.bf16.mxu0 %v4426_v47  ;;  %12562 = vst [vmem:[#allocation60_spill] sm:$0xff] %v11314_v17  ;;  %v4133_v47 = vadd.f32 %v11196_v13, %v10883_v26  ;;  %v9135_v17 = vld [vmem:[#allocation7 + $0x10] ss:$8 sps:$4 sm:$0xff]   ;;  %v4344_v10 = vmax.f32 %v4143_v22, 0.0  ;;  %v4149_v22 = vadd.f32 %v11236_v58, %v10883_v26 }
 0x521   : > { %v11308_v16 = vpop.f32.mrf.mxu0  ;;  %v11320_v61 = vpop.f32.mrf.mxu1  ;;  %v4338_v1 = vmax.f32 %v4129_v40, 0.0  ;;  %6669 = vmatpush1.bf16.msra.mxu0 %v9135_v17  ;;  %v4139_v40 = vadd.f32 %v11212_v3, %v10883_v26  ;;  %v4339_v14 = vmax.f32 %v4131_v20, 0.0  ;;  %v4153_v3 = vadd.f32 %v11244_v59, %v10883_v26 }
 0x522   : > { %12563 = vst [vmem:[#allocation61_spill] sm:$0xff] %v11320_v61  ;;  %v4340_v61 = vmax.f32 %v4133_v47, 0.0 }
 0x523   : > { %v11312_v62 = vpop.f32.mrf.mxu0  ;;  %v11328_v52 = vpop.f32.mrf.mxu1 }
 0x524   : > { %12564 = vst [vmem:[#allocation62_spill] sm:$0xff] %v11328_v52 }
 0x525   : > { %v11316_v11 = vpop.f32.mrf.mxu0  ;;  %v11334_v48 = vpop.f32.mrf.mxu1 }
 0x526   : > { %12565 = vst [vmem:[#allocation63_spill] sm:$0xff] %v11334_v48  ;;  %v4430_v48 = vpack.c.bf16 %v4340_v61, %v4338_v1  ;;  %v4429_v1 = vpack.c.bf16 %v4339_v14, %v4337_v41  ;;  %v4348_v14 = vmax.f32 %v4153_v3, 0.0  ;;  %v9138_v41 = vld [vmem:[#allocation7] ss:$8 sps:$4 sm:$0xff]  }
 0x527   : > { %v11324_v44 = vpop.f32.mrf.mxu0  ;;  %5211 = vmatmul.mubr.bf16.gmra.mxu0 %v4425_v12  ;;  %v4427_v12 = vpack.c.bf16 %v4335_v9, %v4333_v60 }
 0x528   : > { %5220 = vmatprep.mubr.bf16.mxu0 %v4428_v5  ;;  %v11342_v5 = vpop.f32.mrf.mxu1 }
 0x529   : > { %v11332_v28 = vpop.f32.mrf.mxu0  ;;  %12566 = vst [vmem:[#allocation64_spill] sm:$0xff] %v11342_v5  ;;  %v4342_v5 = vmax.f32 %v4139_v40, 0.0 }
 0x52a   : > { %v11354_v17 = vpop.f32.mrf.mxu1 }
 0x52b   : > { %v11336_v13 = vpop.f32.mrf.mxu0  ;;  %12567 = vst [vmem:[#allocation65_spill] sm:$0xff] %v11354_v17 }
 0x52c   : > { %v11362_v61 = vpop.f32.mrf.mxu1 }
 0x52d   : > { %v11338_v42 = vpop.f32.mrf.mxu0  ;;  %12568 = vst [vmem:[#allocation66_spill] sm:$0xff] %v11362_v61  ;;  %v9140_v61 = vld [vmem:[#allocation7 + $0x4] ss:$8 sps:$4 sm:$0xff]  }
 0x52e   : > { %v11374_v51 = vpop.f32.mrf.mxu1  ;;  %6670 = vmatprep.subr.bf16.mxu0 %v9140_v61  ;;  %v4159_v61 = vadd.f32 %v11260_v34, %v10883_v26  ;;  %v4173_v34 = vadd.f32 %v11292_v15, %v10883_v26 }
 0x52f   : > { %v11346_v47 = vpop.f32.mrf.mxu0  ;;  %5221 = vmatmul.mubr.bf16.gmra.mxu0 %v4427_v12  ;;  %v4137_v12 = vadd.f32 %v11204_v57, %v10905_v53  ;;  %12569 = vst [vmem:[#allocation67_spill] sm:$0xff] %v11374_v51 }
 0x530   : > { %5230 = vmatprep.mubr.bf16.mxu0 %v4430_v48  ;;  %v4432_v48 = vpack.c.bf16 %v4344_v10, %v4342_v5  ;;  %v4346_v10 = vmax.f32 %v4149_v22, 0.0  ;;  %v11382_v58 = vpop.f32.mrf.mxu1  ;;  %6671 = vmatpush1.bf16.msra.mxu0 %v9138_v41  ;;  %v4352_v41 = vmax.f32 %v4163_v45, 0.0  ;;  %v4350_v38 = vmax.f32 %v4159_v61, 0.0 }
 0x531   : > { %v11352_v9 = vpop.f32.mrf.mxu0  ;;  %v4341_v59 = vmax.f32 %v4137_v12, 0.0  ;;  %12570 = vst [vmem:[#allocation68_spill] sm:$0xff] %v11382_v58 }
 0x532   : > { %v4434_v3 = vpack.c.bf16 %v4348_v14, %v4346_v10 }
 0x533   : > { %v11356_v60 = vpop.f32.mrf.mxu0  ;;  %v4431_v57 = vpack.c.bf16 %v4343_v36, %v4341_v59  ;;  %v11394_v36 = vpop.f32.mrf.mxu1 }
 0x534   : > { %12571 = vst [vmem:[#allocation69_spill] sm:$0xff] %v11394_v36  ;;  %v9143_v36 = vld [vmem:[#allocation7 + $0xf4] ss:$8 sps:$4 sm:$0xff]  }
 0x535   : > { %v11358_v52 = vpop.f32.mrf.mxu0  ;;  %6672 = vmatprep.subr.bf16.mxu0 %v9143_v36  ;;  %v4179_v36 = vadd.f32 %v11308_v16, %v10883_v26  ;;  %v4193_v16 = vadd.f32 %v11338_v42, %v10883_v26 }
 0x537   : > { %v11368_v20 = vpop.f32.mrf.mxu0  ;;  %5231 = vmatmul.mubr.bf16.gmra.mxu0 %v4429_v1  ;;  %v4151_v1 = vadd.f32 %v11240_v31, %v10905_v53 }
 0x538   : > { %5240 = vmatprep.mubr.bf16.mxu0 %v4432_v48  ;;  %v4147_v48 = vadd.f32 %v11228_v50, %v10905_v53  ;;  %v4161_v50 = vadd.f32 %v11264_v2, %v10905_v53 }
 0x539   : > { %v11372_v40 = vpop.f32.mrf.mxu0  ;;  %v4347_v31 = vmax.f32 %v4151_v1, 0.0  ;;  %v4436_v1 = vpack.c.bf16 %v4352_v41, %v4350_v38 }
 0x53a   : > { %v4345_v59 = vmax.f32 %v4147_v48, 0.0  ;;  %v4169_v48 = vadd.f32 %v11284_v56, %v10883_v26  ;;  %v4351_v61 = vmax.f32 %v4161_v50, 0.0  ;;  %v4183_v50 = vadd.f32 %v11316_v11, %v10883_v26 }
 0x53b   : > { %v11376_v5 = vpop.f32.mrf.mxu0  ;;  %v4358_v11 = vmax.f32 %v4179_v36, 0.0 }
 0x53c   : > { %v4433_v14 = vpack.c.bf16 %v4347_v31, %v4345_v59  ;;  %v4356_v59 = vmax.f32 %v4173_v34, 0.0  ;;  %v4354_v38 = vmax.f32 %v4169_v48, 0.0 }
 0x53d   : > { %v11380_v17 = vpop.f32.mrf.mxu0 }
 0x53e   : > { %v4438_v34 = vpack.c.bf16 %v4356_v59, %v4354_v38 }
 0x53f   : > { %v11388_v12 = vpop.f32.mrf.mxu0  ;;  %5241 = vmatmul.mubr.bf16.gmra.mxu0 %v4431_v57  ;;  %v11402_v57 = vpop.f32.mrf.mxu1 }
 0x540   : > { %5250 = vmatprep.mubr.bf16.mxu0 %v4434_v3  ;;  %12572 = vst [vmem:[#allocation70_spill] sm:$0xff] %v11402_v57  ;;  %v4157_v3 = vadd.f32 %v11252_v63, %v10905_v53  ;;  %v9141_v57 = vld [vmem:[#allocation7 + $0xf0] ss:$8 sps:$4 sm:$0xff]  }
 0x541   : > { %v11392_v22 = vpop.f32.mrf.mxu0  ;;  %v11414_v31 = vpop.f32.mrf.mxu1  ;;  %6673 = vmatpush2.bf16.msra.mxu0 %v9141_v57  ;;  %v4360_v57 = vmax.f32 %v4183_v50, 0.0 }
 0x542   : > { %12573 = vst [vmem:[#allocation71_spill] sm:$0xff] %v11414_v31  ;;  %v4349_v15 = vmax.f32 %v4157_v3, 0.0 }
 0x543   : > { %v11396_v51 = vpop.f32.mrf.mxu0  ;;  %v11422_v56 = vpop.f32.mrf.mxu1 }
 0x544   : > { %v4435_v63 = vpack.c.bf16 %v4351_v61, %v4349_v15  ;;  %12574 = vst [vmem:[#allocation72_spill] sm:$0xff] %v11422_v56 }
 0x545   : > { %v11400_v10 = vpop.f32.mrf.mxu0  ;;  %v11434_v61 = vpop.f32.mrf.mxu1 }
 0x546   : > { %12575 = vst [vmem:[#allocation73_spill] sm:$0xff] %v11434_v61  ;;  %v9146_v61 = vld [vmem:[#allocation7 + $0xe4] ss:$8 sps:$4 sm:$0xff]  }
 0x547   : > { %v11408_v45 = vpop.f32.mrf.mxu0  ;;  %5251 = vmatmul.mubr.bf16.gmra.mxu0 %v4433_v14  ;;  %v4171_v14 = vadd.f32 %v11288_v37, %v10905_v53  ;;  %6674 = vmatprep.subr.bf16.mxu0 %v9146_v61  ;;  %v4199_v61 = vadd.f32 %v11352_v9, %v10883_v26 }
 0x548   : > { %5260 = vmatprep.mubr.bf16.mxu0 %v4436_v1  ;;  %v4167_v1 = vadd.f32 %v11276_v24, %v10905_v53  ;;  %v4181_v24 = vadd.f32 %v11312_v62, %v10905_v53 }
 0x549   : > { %v11412_v2 = vpop.f32.mrf.mxu0  ;;  %v4355_v37 = vmax.f32 %v4171_v14, 0.0  ;;  %v4440_v14 = vpack.c.bf16 %v4360_v57, %v4358_v11 }
 0x54a   : > { %v4353_v15 = vmax.f32 %v4167_v1, 0.0  ;;  %v4189_v1 = vadd.f32 %v11332_v28, %v10883_v26  ;;  %v4359_v36 = vmax.f32 %v4181_v24, 0.0  ;;  %v4203_v24 = vadd.f32 %v11358_v52, %v10883_v26 }
 0x54b   : > { %v11416_v41 = vpop.f32.mrf.mxu0  ;;  %v4366_v52 = vmax.f32 %v4199_v61, 0.0 }
 0x54c   : > { %v4437_v59 = vpack.c.bf16 %v4355_v37, %v4353_v15  ;;  %v4364_v15 = vmax.f32 %v4193_v16, 0.0  ;;  %v4362_v11 = vmax.f32 %v4189_v1, 0.0 }
 0x54d   : > { %v11420_v58 = vpop.f32.mrf.mxu0 }
 0x54e   : > { %v4442_v16 = vpack.c.bf16 %v4364_v15, %v4362_v11  ;;  %v4213_v11 = vadd.f32 %v11380_v17, %v10883_v26 }
 0x54f   : > { %v11428_v3 = vpop.f32.mrf.mxu0  ;;  %5261 = vmatmul.mubr.bf16.gmra.mxu0 %v4435_v63  ;;  %v11442_v63 = vpop.f32.mrf.mxu1 }
 0x550   : > { %5270 = vmatprep.mubr.bf16.mxu0 %v4438_v34  ;;  %12576 = vst [vmem:[#allocation74_spill] sm:$0xff] %v11442_v63  ;;  %v4177_v34 = vadd.f32 %v11300_v7, %v10905_v53  ;;  %v9144_v63 = vld [vmem:[#allocation7 + $0xe0] ss:$8 sps:$4 sm:$0xff]   ;;  %v4372_v17 = vmax.f32 %v4213_v11, 0.0 }
 0x551   : > { %v11432_v48 = vpop.f32.mrf.mxu0  ;;  %v11454_v37 = vpop.f32.mrf.mxu1  ;;  %6675 = vmatpush2.bf16.msra.mxu0 %v9144_v63  ;;  %v4368_v63 = vmax.f32 %v4203_v24, 0.0  ;;  %v4209_v24 = vadd.f32 %v11372_v40, %v10883_v26 }
 0x552   : > { %12577 = vst [vmem:[#allocation75_spill] sm:$0xff] %v11454_v37  ;;  %v4357_v42 = vmax.f32 %v4177_v34, 0.0 }
 0x553   : > { %v11436_v31 = vpop.f32.mrf.mxu0  ;;  %v11462_v28 = vpop.f32.mrf.mxu1 }
 0x554   : > { %v4439_v7 = vpack.c.bf16 %v4359_v36, %v4357_v42  ;;  %12578 = vst [vmem:[#allocation76_spill] sm:$0xff] %v11462_v28 }
 0x555   : > { %v11440_v38 = vpop.f32.mrf.mxu0  ;;  %v11474_v36 = vpop.f32.mrf.mxu1 }
 0x556   : > { %12579 = vst [vmem:[#allocation77_spill] sm:$0xff] %v11474_v36  ;;  %v4370_v36 = vmax.f32 %v4209_v24, 0.0 }
 0x557   : > { %v11448_v50 = vpop.f32.mrf.mxu0  ;;  %5271 = vmatmul.mubr.bf16.gmra.mxu0 %v4437_v59  ;;  %v4191_v59 = vadd.f32 %v11336_v13, %v10905_v53  ;;  %v11484_v9 = vpop.f32.mrf.mxu1 }
 0x558   : > { %5280 = vmatprep.mubr.bf16.mxu0 %v4440_v14  ;;  %v4187_v14 = vadd.f32 %v11324_v44, %v10905_v53  ;;  %v4201_v44 = vadd.f32 %v11356_v60, %v10905_v53  ;;  %12580 = vst [vmem:[#allocation78_spill] sm:$0xff] %v11484_v9  ;;  %v5371_v60 = vld [vmem:[%s12462_s13] sm:$0x3]  ;;  %v9149_v9 = vld [vmem:[#allocation7 + $0xd4] ss:$8 sps:$4 sm:$0xff]  }
 0x559   : > { %v11452_v62 = vpop.f32.mrf.mxu0  ;;  %v4363_v13 = vmax.f32 %v4191_v59, 0.0  ;;  %v4444_v59 = vpack.c.bf16 %v4368_v63, %v4366_v52  ;;  %v11497_v52 = vrot.slane %v5371_v60, %v9928_v30  ;;  %v11501_v28 = vrot.slane %v5371_v60, %v9936_v35  ;;  %6676 = vmatprep.subr.bf16.mxu0 %v9149_v9 }
 0x55a   : > { %v4361_v42 = vmax.f32 %v4187_v14, 0.0  ;;  %v4367_v61 = vmax.f32 %v4201_v44, 0.0  ;;  %v4446_v30 = vpack.c.bf16 %v4372_v17, %v4370_v36  ;;  %v4219_v36 = vadd.f32 %v11392_v22, %v10883_v26 }
 0x55b   : > { %v11456_v57 = vpop.f32.mrf.mxu0 }
 0x55c   : > { %v4441_v15 = vpack.c.bf16 %v4363_v13, %v4361_v42  ;;  %v11493_v42 = vpop.f32.mrf.mxu1 }
 0x55d   : > { %v11460_v56 = vpop.f32.mrf.mxu0  ;;  %12581 = vst [vmem:[#allocation79_spill] sm:$0xff] %v11493_v42 }
 0x55e   : > { %v11506_v42 = vpop.f32.mrf.mxu1 }
 0x55f   : > { %v11468_v34 = vpop.f32.mrf.mxu0  ;;  %5281 = vmatmul.mubr.bf16.gmra.mxu0 %v4439_v7 }
 0x560   : > { %5290 = vmatprep.mubr.bf16.mxu0 %v4442_v16  ;;  %v4197_v16 = vadd.f32 %v11346_v47, %v10905_v53  ;;  %v9147_v47 = vld [vmem:[#allocation7 + $0xd0] ss:$8 sps:$4 sm:$0xff]  }
 0x561   : > { %v11472_v1 = vpop.f32.mrf.mxu0  ;;  %6677 = vmatpush2.bf16.msra.mxu0 %v9147_v47 }
 0x562   : > { %v4365_v40 = vmax.f32 %v4197_v16, 0.0  ;;  %v4223_v16 = vadd.f32 %v11400_v10, %v10883_v26 }
 0x563   : > { %v11476_v37 = vpop.f32.mrf.mxu0 }
 0x564   : > { %v4443_v11 = vpack.c.bf16 %v4367_v61, %v4365_v40  ;;  %v4376_v47 = vmax.f32 %v4223_v16, 0.0  ;;  %v4233_v16 = vadd.f32 %v11420_v58, %v10883_v26 }
 0x565   : > { %v11482_v7 = vpop.f32.mrf.mxu0 }
 0x567   : > { %v5052_v14 = vpop.f32.mrf.mxu0  ;;  %5291 = vmatmul.mubr.bf16.gmra.mxu0 %v4441_v15 }
 0x568   : > { %5300 = vmatprep.mubr.bf16.mxu0 %v4444_v59  ;;  %v5053_v15 = vadd.f32 %v5052_v14, %v10961_v29 }
 0x569   : > { %v5054_v13 = vpop.f32.mrf.mxu0 }
 0x56a   : > { %v5055_v63 = vadd.f32 %v5054_v13, %v10966_v33  ;;  %v4211_v33 = vadd.f32 %v11376_v5, %v10905_v53  ;;  %v5383_v9 = vadd.f32 %v11501_v28, %v5053_v15 }
 0x56b   : > { %v5056_v59 = vpop.f32.mrf.mxu0 }
 0x56c   : > { %v5057_v44 = vadd.f32 %v5056_v59, %v10972_v18  ;;  %v5384_v29 = vadd.f32 %v11497_v52, %v5055_v63  ;;  %v4207_v18 = vadd.f32 %v11368_v20, %v10905_v53  ;;  %v4371_v10 = vmax.f32 %v4211_v33, 0.0  ;;  %v11519_v63 = vpop.f32.mrf.mxu1 }
 0x56d   : > { %v5058_v13 = vpop.f32.mrf.mxu0  ;;  %v5511_v15 = vmax.f32 %v5383_v9, 0.0  ;;  %v4221_v33 = vadd.f32 %v11396_v51, %v10905_v53  ;;  %v4217_v9 = vadd.f32 %v11388_v12, %v10905_v53  ;;  %v4229_v51 = vadd.f32 %v11412_v2, %v10883_v26  ;;  %v9152_v2 = vld [vmem:[#allocation7 + $0xc4] ss:$8 sps:$4 sm:$0xff]  }
 0x56e   : > { %v5385_v24 = vadd.f32 %v11501_v28, %v5057_v44  ;;  %v5059_v14 = vadd.f32 %v5058_v13, %v10980_v25  ;;  %v5512_v25 = vmax.f32 %v5384_v29, 0.0  ;;  %v4369_v59 = vmax.f32 %v4207_v18, 0.0  ;;  %6678 = vmatprep.subr.bf16.mxu0 %v9152_v2 }
 0x56f   : > { %v5062_v5 = vpop.f32.mrf.mxu0  ;;  %5301 = vmatmul.mubr.bf16.gmra.mxu0 %v4443_v11  ;;  %v4374_v13 = vmax.f32 %v4219_v36, 0.0 }
 0x570   : > { %v5386_v60 = vadd.f32 %v11497_v52, %v5059_v14  ;;  %5310 = vmatprep.mubr.bf16.mxu0 %v4446_v30  ;;  %v5513_v61 = vmax.f32 %v5385_v24, 0.0  ;;  %v5063_v44 = vadd.f32 %v5062_v5, %v10988_v46  ;;  %v4445_v30 = vpack.c.bf16 %v4371_v10, %v4369_v59 }
 0x571   : > { %v5064_v17 = vpop.f32.mrf.mxu0  ;;  %v4375_v10 = vmax.f32 %v4221_v33, 0.0  ;;  %v4373_v59 = vmax.f32 %v4217_v9, 0.0  ;;  %v4231_v33 = vadd.f32 %v11416_v41, %v10905_v53  ;;  %v4239_v9 = vadd.f32 %v11432_v48, %v10883_v26 }
 0x572   : > { %v5514_v40 = vmax.f32 %v5386_v60, 0.0  ;;  %v5065_v20 = vadd.f32 %v5064_v17, %v10993_v49  ;;  %v5639_v29 = vpack.c.bf16 %v5513_v61, %v5511_v15  ;;  %v11528_v60 = vpop.f32.mrf.mxu1  ;;  %v5387_v58 = vadd.f32 %v11501_v28, %v5063_v44 }
 0x573   : > { %v5066_v11 = vpop.f32.mrf.mxu0  ;;  %v4380_v61 = vmax.f32 %v4233_v16, 0.0  ;;  %v4378_v15 = vmax.f32 %v4229_v51, 0.0  ;;  %v4379_v51 = vmax.f32 %v4231_v33, 0.0 }
 0x574   : > { %v5067_v22 = vadd.f32 %v5066_v11, %v10999_v55  ;;  %v5640_v14 = vpack.c.bf16 %v5514_v40, %v5512_v25  ;;  %v5388_v49 = vadd.f32 %v11497_v52, %v5065_v20  ;;  %v4448_v55 = vpack.c.bf16 %v4376_v47, %v4374_v13  ;;  %v11539_v25 = vpop.f32.mrf.mxu1  ;;  %v9150_v20 = vld [vmem:[#allocation7 + $0xc0] ss:$8 sps:$4 sm:$0xff]  }
 0x575   : > { %v5068_v24 = vpop.f32.mrf.mxu0  ;;  %v5515_v44 = vmax.f32 %v5387_v58, 0.0  ;;  %6679 = vmatpush2.bf16.msra.mxu0 %v9150_v20 }
 0x576   : > { %v5389_v46 = vadd.f32 %v11501_v28, %v5067_v22  ;;  %v5069_v18 = vadd.f32 %v5068_v24, %v11007_v0  ;;  %5939 = vmatprep.mubr.bf16.mxu1 %v5640_v14  ;;  %v5516_v47 = vmax.f32 %v5388_v49, 0.0  ;;  %v4450_v24 = vpack.c.bf16 %v4380_v61, %v4378_v15 }
 0x577   : > { %v5072_v5 = vpop.f32.mrf.mxu0  ;;  %5311 = vmatmul.mubr.bf16.gmra.mxu0 %v4445_v30  ;;  %5940 = vmatmul.mubr.bf16.vlgmr.msra.gmra.mxu1 %v5639_v29  ;;  %v4447_v30 = vpack.c.bf16 %v4375_v10, %v4373_v59  ;;  %v4243_v49 = vadd.f32 %v11440_v38, %v10883_v26  ;;  %v4241_v59 = vadd.f32 %v11436_v31, %v10905_v53 }
 0x578   : > { %v5390_v36 = vadd.f32 %v11497_v52, %v5069_v18  ;;  %5320 = vmatprep.mubr.bf16.mxu0 %v4448_v55  ;;  %v5517_v17 = vmax.f32 %v5389_v46, 0.0  ;;  %v5073_v11 = vadd.f32 %v5072_v5, %v11015_v39  ;;  %v4227_v18 = vadd.f32 %v11408_v45, %v10905_v53 }
 0x579   : > { %v5074_v0 = vpop.f32.mrf.mxu0  ;;  %v4253_v15 = vadd.f32 %v11460_v56, %v10883_v26  ;;  %v4249_v31 = vadd.f32 %v11452_v62, %v10883_v26  ;;  %v9155_v62 = vld [vmem:[#allocation7 + $0xb4] ss:$8 sps:$4 sm:$0xff]  }
 0x57a   : > { %v5518_v40 = vmax.f32 %v5390_v36, 0.0  ;;  %v5075_v12 = vadd.f32 %v5074_v0, %v11020_v6  ;;  %v5641_v16 = vpack.c.bf16 %v5517_v17, %v5515_v44  ;;  %v11546_v6 = vpop.f32.mrf.mxu1  ;;  %v5391_v41 = vadd.f32 %v11501_v28, %v5073_v11  ;;  %6680 = vmatprep.subr.bf16.mxu0 %v9155_v62 }
 0x57b   : > { %v5076_v13 = vpop.f32.mrf.mxu0  ;;  %v4377_v17 = vmax.f32 %v4227_v18, 0.0 }
 0x57c   : > { %v5077_v22 = vadd.f32 %v5076_v13, %v11026_v54  ;;  %v5642_v14 = vpack.c.bf16 %v5518_v40, %v5516_v47  ;;  %v5392_v39 = vadd.f32 %v11497_v52, %v5075_v12  ;;  %v11559_v36 = vpop.f32.mrf.mxu1  ;;  %v5519_v0 = vmax.f32 %v5391_v41, 0.0 }
 0x57d   : > { %v5078_v29 = vpop.f32.mrf.mxu0  ;;  %v4382_v12 = vmax.f32 %v4239_v9, 0.0  ;;  %v4449_v2 = vpack.c.bf16 %v4379_v51, %v4377_v17  ;;  %v4386_v41 = vmax.f32 %v4249_v31, 0.0  ;;  %v12582_v9 = vld [vmem:[#allocation22_spill] sm:$0xff] }
 0x57e   : > { %v5393_v46 = vadd.f32 %v11501_v28, %v5077_v22  ;;  %v5079_v54 = vadd.f32 %v5078_v29, %v11034_v32  ;;  %5949 = vmatprep.mubr.bf16.mxu1 %v5642_v14  ;;  %v4384_v32 = vmax.f32 %v4243_v49, 0.0  ;;  %v5520_v10 = vmax.f32 %v5392_v39, 0.0  ;;  %v11568_v13 = vpop.f32.mrf.mxu1 }
 0x57f   : > { %v5082_v55 = vpop.f32.mrf.mxu0  ;;  %5321 = vmatmul.mubr.bf16.gmra.mxu0 %v4447_v30  ;;  %5950 = vmatmul.mubr.bf16.gmra.mxu1 %v5641_v16  ;;  %v4237_v14 = vadd.f32 %v11428_v3, %v10905_v53  ;;  %v4383_v16 = vmax.f32 %v4241_v59, 0.0  ;;  %v4388_v29 = vmax.f32 %v4253_v15, 0.0  ;;  %v4259_v15 = vadd.f32 %v11472_v1, %v10883_v26 }
 0x580   : > { %v5394_v38 = vadd.f32 %v11497_v52, %v5079_v54  ;;  %5330 = vmatprep.mubr.bf16.mxu0 %v4450_v24  ;;  %v5521_v58 = vmax.f32 %v5393_v46, 0.0  ;;  %v5083_v47 = vadd.f32 %v5082_v55, %v11042_v23  ;;  %v11579_v49 = vpop.f32.mrf.mxu1  ;;  %v9153_v54 = vld [vmem:[#allocation7 + $0xb0] ss:$8 sps:$4 sm:$0xff]  }
 0x581   : > { %v5084_v5 = vpop.f32.mrf.mxu0  ;;  %v4381_v18 = vmax.f32 %v4237_v14, 0.0  ;;  %6681 = vmatpush2.bf16.msra.mxu0 %v9153_v54 }
 0x582   : > { %v5522_v61 = vmax.f32 %v5394_v38, 0.0  ;;  %v5085_v45 = vadd.f32 %v5084_v5, %v11047_v4  ;;  %v5643_v44 = vpack.c.bf16 %v5521_v58, %v5519_v0  ;;  %v5395_v56 = vadd.f32 %v11501_v28, %v5083_v47  ;;  %v12583_v58 = vld [vmem:[#allocation23_spill] sm:$0xff] }
 0x583   : > { %v5086_v40 = vpop.f32.mrf.mxu0  ;;  %v4454_v0 = vpack.c.bf16 %v4388_v29, %v4386_v41  ;;  %v4263_v47 = vadd.f32 %v11482_v7, %v10883_v26  ;;  %v12587_v26 = vld [vmem:[#allocation27_spill] sm:$0xff] }
 0x584   : > { %v5087_v48 = vadd.f32 %v5086_v40, %v11053_v19  ;;  %v5644_v20 = vpack.c.bf16 %v5522_v61, %v5520_v10  ;;  %v5396_v4 = vadd.f32 %v11497_v52, %v5085_v45  ;;  %v4452_v19 = vpack.c.bf16 %v4384_v32, %v4382_v12 }
 0x585   : > { %v5088_v11 = vpop.f32.mrf.mxu0  ;;  %v5523_v55 = vmax.f32 %v5395_v56, 0.0  ;;  %v4451_v10 = vpack.c.bf16 %v4383_v16, %v4381_v18  ;;  %v4251_v61 = vadd.f32 %v11456_v57, %v10905_v53 }
 0x586   : > { %v5397_v23 = vadd.f32 %v11501_v28, %v5087_v48  ;;  %v5089_v22 = vadd.f32 %v5088_v11, %v11061_v21  ;;  %5959 = vmatprep.mubr.bf16.mxu1 %v5644_v20  ;;  %v5524_v39 = vmax.f32 %v5396_v4, 0.0  ;;  %v12584_v48 = vld [vmem:[#allocation24_spill] sm:$0xff] }
 0x587   : > { %v5092_v30 = vpop.f32.mrf.mxu0  ;;  %5331 = vmatmul.mubr.bf16.gmra.mxu0 %v4449_v2  ;;  %5960 = vmatmul.mubr.bf16.gmra.mxu1 %v5643_v44  ;;  %v4247_v2 = vadd.f32 %v11448_v50, %v10905_v53  ;;  %v4387_v44 = vmax.f32 %v4251_v61, 0.0  ;;  %v12585_v50 = vld [vmem:[#allocation26_spill] sm:$0xff] }
 0x588   : > { %v5398_v33 = vadd.f32 %v11497_v52, %v5089_v22  ;;  %5340 = vmatprep.mubr.bf16.mxu0 %v4452_v19  ;;  %v5525_v24 = vmax.f32 %v5397_v23, 0.0  ;;  %v5093_v38 = vadd.f32 %v5092_v30, %v12582_v9  ;;  %v4392_v22 = vmax.f32 %v4263_v47, 0.0  ;;  %v12589_v47 = vld [vmem:[#allocation30_spill] sm:$0xff] }
 0x589   : > { %v5094_v21 = vpop.f32.mrf.mxu0  ;;  %v4385_v56 = vmax.f32 %v4247_v2, 0.0 }
 0x58a   : > { %v5526_v46 = vmax.f32 %v5398_v33, 0.0  ;;  %v5095_v3 = vadd.f32 %v5094_v21, %v11073_v27  ;;  %v5645_v45 = vpack.c.bf16 %v5525_v24, %v5523_v55  ;;  %v11586_v27 = vpop.f32.mrf.mxu1  ;;  %v5399_v57 = vadd.f32 %v11501_v28, %v5093_v38  ;;  %v12586_v33 = vld [vmem:[#allocation25_spill] sm:$0xff]  ;;  %v12588_v55 = vld [vmem:[#allocation28_spill] sm:$0xff] }
 0x58b   : > { %v5096_v51 = vpop.f32.mrf.mxu0  ;;  %v4390_v24 = vmax.f32 %v4259_v15, 0.0 }
 0x58c   : > { %v5097_v5 = vadd.f32 %v5096_v51, %v12583_v58  ;;  %v5646_v32 = vpack.c.bf16 %v5526_v46, %v5524_v39  ;;  %v5400_v40 = vadd.f32 %v11497_v52, %v5095_v3  ;;  %v11599_v23 = vpop.f32.mrf.mxu1  ;;  %v5527_v30 = vmax.f32 %v5399_v57, 0.0 }
 0x58d   : > { %v5098_v17 = vpop.f32.mrf.mxu0  ;;  %v4453_v39 = vpack.c.bf16 %v4387_v44, %v4385_v56  ;;  %v4261_v46 = vadd.f32 %v11476_v37, %v10905_v53  ;;  %v4456_v38 = vpack.c.bf16 %v4392_v22, %v4390_v24  ;;  %v4257_v51 = vadd.f32 %v11468_v34, %v10905_v53 }
 0x58e   : > { %v5401_v12 = vadd.f32 %v11501_v28, %v5097_v5  ;;  %v5099_v20 = vadd.f32 %v5098_v17, %v12584_v48  ;;  %5969 = vmatprep.mubr.bf16.mxu1 %v5646_v32  ;;  %v5528_v19 = vmax.f32 %v5400_v40, 0.0  ;;  %v11606_v62 = vpop.f32.mrf.mxu1  ;;  %v9158_v48 = vld [vmem:[#allocation7 + $0xa4] ss:$8 sps:$4 sm:$0xff]  }
 0x58f   : > { %v5102_v59 = vpop.f32.mrf.mxu0  ;;  %5341 = vmatmul.mubr.bf16.gmra.mxu0 %v4451_v10  ;;  %5970 = vmatmul.mubr.bf16.gmra.mxu1 %v5645_v45  ;;  %v4391_v32 = vmax.f32 %v4261_v46, 0.0  ;;  %v4389_v53 = vmax.f32 %v4257_v51, 0.0 }
 0x590   : > { %v5402_v7 = vadd.f32 %v11497_v52, %v5099_v20  ;;  %5350 = vmatprep.mubr.bf16.mxu0 %v4454_v0  ;;  %v5529_v11 = vmax.f32 %v5401_v12, 0.0  ;;  %v5103_v16 = vadd.f32 %v5102_v59, %v12586_v33  ;;  %v11615_v45 = vpop.f32.mrf.mxu1  ;;  %v9156_v12 = vld [vmem:[#allocation7 + $0xa0] ss:$8 sps:$4 sm:$0xff]   ;;  %v12591_v59 = vld [vmem:[#allocation31_spill] sm:$0xff]  ;;  %6682 = vmatprep.subr.bf16.mxu0 %v9158_v48 }
 0x591   : > { %v5104_v4 = vpop.f32.mrf.mxu0  ;;  %v12590_v20 = vld [vmem:[#allocation29_spill] sm:$0xff]  ;;  %v4455_v44 = vpack.c.bf16 %v4391_v32, %v4389_v53  ;;  %6683 = vmatpush2.bf16.msra.mxu0 %v9156_v12  ;;  %v9159_v48 = vld [vmem:[#allocation7 + $0x90] ss:$8 sps:$4 sm:$0xff]   ;;  %v9161_v53 = vld [vmem:[#allocation7 + $0x94] ss:$8 sps:$4 sm:$0xff]  }
 0x592   : > { %v5530_v14 = vmax.f32 %v5402_v7, 0.0  ;;  %v5105_v31 = vadd.f32 %v5104_v4, %v12585_v50  ;;  %v5647_v3 = vpack.c.bf16 %v5529_v11, %v5527_v30  ;;  %v5403_v58 = vadd.f32 %v11501_v28, %v5103_v16  ;;  %v11620_v22 = vpop.f32.mrf.mxu1  ;;  %v12592_v50 = vld [vmem:[#allocation32_spill] sm:$0xff]  ;;  %6684 = vmatprep.subr.bf16.mxu0 %v9161_v53 }
 0x593   : > { %v5106_v29 = vpop.f32.mrf.mxu0 }
 0x594   : > { %v5107_v1 = vadd.f32 %v5106_v29, %v12587_v26  ;;  %v5648_v21 = vpack.c.bf16 %v5530_v14, %v5528_v19  ;;  %v5404_v18 = vadd.f32 %v11497_v52, %v5105_v31  ;;  %v5531_v34 = vmax.f32 %v5403_v58, 0.0  ;;  %v11627_v24 = vpop.f32.mrf.mxu1 }
 0x595   : > { %v5108_v54 = vpop.f32.mrf.mxu0  ;;  %6685 = vmatpush2.bf16.msra.mxu0 %v9159_v48 }
 0x596   : > { %v5405_v41 = vadd.f32 %v11501_v28, %v5107_v1  ;;  %v5109_v9 = vadd.f32 %v5108_v54, %v12588_v55  ;;  %5979 = vmatprep.mubr.bf16.mxu1 %v5648_v21  ;;  %v5532_v17 = vmax.f32 %v5404_v18, 0.0  ;;  %v12593_v54 = vld [vmem:[#allocation33_spill] sm:$0xff] }
 0x597   : > { %v5112_v5 = vpop.f32.mrf.mxu0  ;;  %5351 = vmatmul.mubr.bf16.gmra.mxu0 %v4453_v39  ;;  %5980 = vmatmul.mubr.bf16.gmra.mxu1 %v5647_v3 }
 0x598   : > { %v5406_v37 = vadd.f32 %v11497_v52, %v5109_v9  ;;  %5360 = vmatprep.mubr.bf16.mxu0 %v4456_v38  ;;  %v5533_v10 = vmax.f32 %v5405_v41, 0.0  ;;  %v5113_v2 = vadd.f32 %v5112_v5, %v12590_v20  ;;  %v11632_v38 = vpop.f32.mrf.mxu1  ;;  %v12594_v5 = vld [vmem:[#allocation34_spill] sm:$0xff]  ;;  %v12596_v20 = vld [vmem:[#allocation35_spill] sm:$0xff] }
 0x599   : > { %v5114_v61 = vpop.f32.mrf.mxu0 }
 0x59a   : > { %v5534_v0 = vmax.f32 %v5406_v37, 0.0  ;;  %v5115_v40 = vadd.f32 %v5114_v61, %v12589_v47  ;;  %v5649_v11 = vpack.c.bf16 %v5533_v10, %v5531_v34  ;;  %v5407_v56 = vadd.f32 %v11501_v28, %v5113_v2 }
 0x59b   : > { %v5116_v57 = vpop.f32.mrf.mxu0 }
 0x59c   : > { %v5117_v15 = vadd.f32 %v5116_v57, %v12591_v59  ;;  %v5650_v7 = vpack.c.bf16 %v5534_v0, %v5532_v17  ;;  %v5408_v19 = vadd.f32 %v11497_v52, %v5115_v40  ;;  %v5535_v39 = vmax.f32 %v5407_v56, 0.0  ;;  %v11639_v17 = vpop.f32.mrf.mxu1  ;;  %v12595_v40 = vld [vmem:[#allocation36_spill] sm:$0xff]  ;;  %v12597_v59 = vld [vmem:[#allocation37_spill] sm:$0xff] }
 0x59d   : > { %v5118_v4 = vpop.f32.mrf.mxu0 }
 0x59e   : > { %v5409_v14 = vadd.f32 %v11501_v28, %v5117_v15  ;;  %v5119_v31 = vadd.f32 %v5118_v4, %v12592_v50  ;;  %5989 = vmatprep.mubr.bf16.mxu1 %v5650_v7  ;;  %v5536_v26 = vmax.f32 %v5408_v19, 0.0  ;;  %v11644_v4 = vpop.f32.mrf.mxu1  ;;  %v12598_v50 = vld [vmem:[#allocation38_spill] sm:$0xff] }
 0x59f   : > { %v5122_v30 = vpop.f32.mrf.mxu0  ;;  %5361 = vmatmul.mubr.bf16.gmra.mxu0 %v4455_v44  ;;  %5990 = vmatmul.mubr.bf16.gmra.mxu1 %v5649_v11 }
 0x5a0   : > { %v5410_v33 = vadd.f32 %v11497_v52, %v5119_v31  ;;  %v5537_v16 = vmax.f32 %v5409_v14, 0.0  ;;  %v5123_v46 = vadd.f32 %v5122_v30, %v11141_v8 }
 0x5a1   : > { %v5124_v29 = vpop.f32.mrf.mxu0 }
 0x5a2   : > { %v5538_v1 = vmax.f32 %v5410_v33, 0.0  ;;  %v5125_v21 = vadd.f32 %v5124_v29, %v11145_v43  ;;  %v5651_v55 = vpack.c.bf16 %v5537_v16, %v5535_v39  ;;  %v5411_v43 = vadd.f32 %v11501_v28, %v5123_v46  ;;  %v12599_v39 = vld [vmem:[#allocation40_spill] sm:$0xff] }
 0x5a3   : > { %v5126_v3 = vpop.f32.mrf.mxu0 }
 0x5a4   : > { %v5127_v18 = vadd.f32 %v5126_v3, %v12593_v54  ;;  %v5652_v41 = vpack.c.bf16 %v5538_v1, %v5536_v26  ;;  %v5412_v51 = vadd.f32 %v11497_v52, %v5125_v21  ;;  %v5539_v34 = vmax.f32 %v5411_v43, 0.0  ;;  %v11651_v26 = vpop.f32.mrf.mxu1  ;;  %v11654_v3 = vld [vmem:[#allocation8 + $0x38] sm:$0xff]  }
 0x5a5   : > { %v5128_v9 = vpop.f32.mrf.mxu0  ;;  %8725 = vmatpush1.bf16.msra.mxu1 %v11654_v3 }
 0x5a6   : > { %v5413_v58 = vadd.f32 %v11501_v28, %v5127_v18  ;;  %v5129_v37 = vadd.f32 %v5128_v9, %v12594_v5  ;;  %5999 = vmatprep.mubr.bf16.mxu1 %v5652_v41  ;;  %v5540_v0 = vmax.f32 %v5412_v51, 0.0  ;;  %v12600_v18 = vld [vmem:[#allocation39_spill] sm:$0xff]  ;;  %v12601_v9 = vld [vmem:[#allocation41_spill] sm:$0xff]  ;;  %v11659_v43 = vpop.f32.mrf.mxu1 }
 0x5a7   : > { %v5132_v32 = vpop.f32.mrf.mxu0  ;;  %6000 = vmatmul.mubr.bf16.gmra.mxu1 %v5651_v55 }
 0x5a8   : > { %v5414_v8 = vadd.f32 %v11497_v52, %v5129_v37  ;;  %v5541_v10 = vmax.f32 %v5413_v58, 0.0  ;;  %v5133_v2 = vadd.f32 %v5132_v32, %v12596_v20  ;;  %v12602_v32 = vmov 0  }
 0x5a9   : > { %v5134_v61 = vpop.f32.mrf.mxu0  ;;  %8710 = vmatprep.subr.bf16.mxu1 %v12602_v32 }
 0x5aa   : > { %v5542_v47 = vmax.f32 %v5414_v8, 0.0  ;;  %v5135_v12 = vadd.f32 %v5134_v61, %v12595_v40  ;;  %v5653_v44 = vpack.c.bf16 %v5541_v10, %v5539_v34  ;;  %v5415_v56 = vadd.f32 %v11501_v28, %v5133_v2  ;;  %v12603_v61 = vld [vmem:[#allocation42_spill] sm:$0xff]  ;;  %v11667_v34 = vpop.f32.mrf.mxu1 }
 0x5ab   : > { %v5136_v57 = vpop.f32.mrf.mxu0 }
 0x5ac   : > { %v5137_v15 = vadd.f32 %v5136_v57, %v12597_v59  ;;  %v5654_v7 = vpack.c.bf16 %v5542_v47, %v5540_v0  ;;  %v5416_v19 = vadd.f32 %v11497_v52, %v5135_v12  ;;  %v5543_v54 = vmax.f32 %v5415_v56, 0.0  ;;  %v12604_v57 = vld [vmem:[#allocation44_spill] sm:$0xff] }
 0x5ad   : > { %v5138_v11 = vpop.f32.mrf.mxu0 }
 0x5ae   : > { %v5417_v14 = vadd.f32 %v11501_v28, %v5137_v15  ;;  %v5139_v31 = vadd.f32 %v5138_v11, %v12598_v50  ;;  %6009 = vmatprep.mubr.bf16.mxu1 %v5654_v7  ;;  %v5544_v1 = vmax.f32 %v5416_v19, 0.0  ;;  %v9163_v15 = vld [vmem:[#allocation7 + $0x80] ss:$8 sps:$4 sm:$0xff]   ;;  %v9165_v7 = vld [vmem:[#allocation7 + $0x84] ss:$8 sps:$4 sm:$0xff]   ;;  %v12605_v11 = vld [vmem:[#allocation43_spill] sm:$0xff] }
 0x5af   : > { %v5142_v30 = vpop.f32.mrf.mxu0  ;;  %6010 = vmatmul.mubr.bf16.gmra.mxu1 %v5653_v44  ;;  %v12606_v50 = vld [vmem:[#allocation45_spill] sm:$0xff]  ;;  %6686 = vmatprep.subr.bf16.mxu0 %v9165_v7 }
 0x5b0   : > { %v5418_v33 = vadd.f32 %v11497_v52, %v5139_v31  ;;  %v5545_v16 = vmax.f32 %v5417_v14, 0.0  ;;  %v5143_v41 = vadd.f32 %v5142_v30, %v12600_v18  ;;  %6687 = vmatpush2.bf16.msra.mxu0 %v9163_v15  ;;  %v12611_v15 = vld [vmem:[#allocation50_spill] sm:$0xff] }
 0x5b1   : > { %v5144_v29 = vpop.f32.mrf.mxu0  ;;  %7336 = vmatprep.subr.bf16.mxu0 %v12602_v32 }
 0x5b2   : > { %v5546_v21 = vmax.f32 %v5418_v33, 0.0  ;;  %v5145_v46 = vadd.f32 %v5144_v29, %v12599_v39  ;;  %v5655_v5 = vpack.c.bf16 %v5545_v16, %v5543_v54  ;;  %v5419_v47 = vadd.f32 %v11501_v28, %v5143_v41  ;;  %v11672_v16 = vpop.f32.mrf.mxu1 }
 0x5b3   : > { %v5146_v55 = vpop.f32.mrf.mxu0 }
 0x5b4   : > { %v5147_v51 = vadd.f32 %v5146_v55, %v12601_v9  ;;  %v5656_v58 = vpack.c.bf16 %v5546_v21, %v5544_v1  ;;  %v5420_v8 = vadd.f32 %v11497_v52, %v5145_v46  ;;  %v5547_v44 = vmax.f32 %v5419_v47, 0.0  ;;  %v12607_v21 = vld [vmem:[#allocation46_spill] sm:$0xff]  ;;  %v11680_v9 = vpop.f32.mrf.mxu1 }
 0x5b5   : > { %v5148_v37 = vpop.f32.mrf.mxu0 }
 0x5b6   : > { %v5421_v10 = vadd.f32 %v11501_v28, %v5147_v51  ;;  %v5149_v0 = vadd.f32 %v5148_v37, %v12603_v61  ;;  %6019 = vmatprep.mubr.bf16.mxu1 %v5656_v58  ;;  %v5548_v20 = vmax.f32 %v5420_v8, 0.0  ;;  %v11683_v8 = vld [vmem:[#allocation8 + $0x30] sm:$0xff]  }
 0x5b7   : > { %v5152_v40 = vpop.f32.mrf.mxu0  ;;  %6020 = vmatmul.mubr.bf16.gmra.mxu1 %v5655_v5  ;;  %v12608_v5 = vld [vmem:[#allocation48_spill] sm:$0xff]  ;;  %v12609_v61 = vld [vmem:[#allocation47_spill] sm:$0xff] }
 0x5b8   : > { %v5422_v12 = vadd.f32 %v11497_v52, %v5149_v0  ;;  %v5549_v48 = vmax.f32 %v5421_v10, 0.0  ;;  %v5153_v19 = vadd.f32 %v5152_v40, %v12605_v11  ;;  %v12610_v40 = vld [vmem:[#allocation49_spill] sm:$0xff]  ;;  %8726 = vmatpush1.bf16.msra.mxu1 %v11683_v8 }
 0x5b9   : > { %v5154_v53 = vpop.f32.mrf.mxu0  ;;  %8711 = vmatprep.subr.bf16.mxu1 %v12602_v32 }
 0x5ba   : > { %v5550_v2 = vmax.f32 %v5422_v12, 0.0  ;;  %v5155_v59 = vadd.f32 %v5154_v53, %v12604_v57  ;;  %v5657_v30 = vpack.c.bf16 %v5549_v48, %v5547_v44  ;;  %v5423_v46 = vadd.f32 %v11501_v28, %v5153_v19 }
 0x5bb   : > { %v5156_v14 = vpop.f32.mrf.mxu0 }
 0x5bc   : > { %v5157_v31 = vadd.f32 %v5156_v14, %v12606_v50  ;;  %v5658_v56 = vpack.c.bf16 %v5550_v2, %v5548_v20  ;;  %v5424_v29 = vadd.f32 %v11497_v52, %v5155_v59  ;;  %v5551_v10 = vmax.f32 %v5423_v46, 0.0  ;;  %v11688_v2 = vpop.f32.mrf.mxu1 }
 0x5bd   : > { %v5158_v33 = vpop.f32.mrf.mxu0 }
 0x5be   : > { %v5425_v1 = vadd.f32 %v11501_v28, %v5157_v31  ;;  %v5159_v39 = vadd.f32 %v5158_v33, %v12607_v21  ;;  %6029 = vmatprep.mubr.bf16.mxu1 %v5658_v56  ;;  %v5552_v51 = vmax.f32 %v5424_v29, 0.0  ;;  %v11696_v31 = vpop.f32.mrf.mxu1  ;;  %v12612_v33 = vld [vmem:[#allocation52_spill] sm:$0xff]  ;;  %v12613_v21 = vld [vmem:[#allocation51_spill] sm:$0xff] }
 0x5bf   : > { %v5162_v54 = vpop.f32.mrf.mxu0  ;;  %6030 = vmatmul.mubr.bf16.gmra.mxu1 %v5657_v30 }
 0x5c0   : > { %v5426_v18 = vadd.f32 %v11497_v52, %v5159_v39  ;;  %v5553_v41 = vmax.f32 %v5425_v1, 0.0  ;;  %v5163_v0 = vadd.f32 %v5162_v54, %v12609_v61  ;;  %v12614_v54 = vld [vmem:[#allocation53_spill] sm:$0xff] }
 0x5c1   : > { %v5164_v55 = vpop.f32.mrf.mxu0 }
 0x5c2   : > { %v5554_v58 = vmax.f32 %v5426_v18, 0.0  ;;  %v5165_v37 = vadd.f32 %v5164_v55, %v12608_v5  ;;  %v5659_v53 = vpack.c.bf16 %v5553_v41, %v5551_v10  ;;  %v5427_v44 = vadd.f32 %v11501_v28, %v5163_v0  ;;  %v12615_v10 = vld [vmem:[#allocation54_spill] sm:$0xff] }
 0x5c3   : > { %v5166_v47 = vpop.f32.mrf.mxu0 }
 0x5c4   : > { %v5167_v12 = vadd.f32 %v5166_v47, %v12610_v40  ;;  %v5660_v48 = vpack.c.bf16 %v5554_v58, %v5552_v51  ;;  %v5428_v57 = vadd.f32 %v11497_v52, %v5165_v37  ;;  %v5555_v1 = vmax.f32 %v5427_v44, 0.0  ;;  %v11701_v58 = vpop.f32.mrf.mxu1 }
 0x5c5   : > { %v5168_v20 = vpop.f32.mrf.mxu0 }
 0x5c6   : > { %v5429_v59 = vadd.f32 %v11501_v28, %v5167_v12  ;;  %v5169_v7 = vadd.f32 %v5168_v20, %v12611_v15  ;;  %6039 = vmatprep.mubr.bf16.mxu1 %v5660_v48  ;;  %v5556_v56 = vmax.f32 %v5428_v57, 0.0 }
 0x5c7   : > { %v5172_v11 = vpop.f32.mrf.mxu0  ;;  %6040 = vmatmul.mubr.bf16.gmra.mxu1 %v5659_v53  ;;  %v11708_v53 = vpop.f32.mrf.mxu1 }
 0x5c8   : > { %v5430_v19 = vadd.f32 %v11497_v52, %v5169_v7  ;;  %v5557_v14 = vmax.f32 %v5429_v59, 0.0  ;;  %v5173_v39 = vadd.f32 %v5172_v11, %v12613_v21  ;;  %v12616_v59 = vld [vmem:[#allocation56_spill] sm:$0xff]  ;;  %v11711_v7 = vld [vmem:[#allocation8 + $0x28] sm:$0xff]   ;;  %v12618_v11 = vld [vmem:[#allocation55_spill] sm:$0xff] }
 0x5c9   : > { %v5174_v50 = vpop.f32.mrf.mxu0  ;;  %12617 = vst [vmem:[#allocation22_spill] sm:$0xff] %v11711_v7  ;;  %8727 = vmatpush1.bf16.msra.mxu1 %v11711_v7 }
 0x5ca   : > { %v5558_v30 = vmax.f32 %v5430_v19, 0.0  ;;  %v5175_v29 = vadd.f32 %v5174_v50, %v12612_v33  ;;  %v5661_v55 = vpack.c.bf16 %v5557_v14, %v5555_v1  ;;  %v5431_v0 = vadd.f32 %v11501_v28, %v5173_v39  ;;  %v12619_v50 = vld [vmem:[#allocation57_spill] sm:$0xff]  ;;  %v11716_v1 = vpop.f32.mrf.mxu1  ;;  %8712 = vmatprep.subr.bf16.mxu1 %v12602_v32 }
 0x5cb   : > { %v5176_v46 = vpop.f32.mrf.mxu0 }
 0x5cc   : > { %v5177_v18 = vadd.f32 %v5176_v46, %v12614_v54  ;;  %v5662_v41 = vpack.c.bf16 %v5558_v30, %v5556_v56  ;;  %v5432_v5 = vadd.f32 %v11497_v52, %v5175_v29  ;;  %v5559_v44 = vmax.f32 %v5431_v0, 0.0  ;;  %v12620_v46 = vld [vmem:[#allocation58_spill] sm:$0xff]  ;;  %v12621_v0 = vld [vmem:[#allocation60_spill] sm:$0xff] }
 0x5cd   : > { %v5178_v51 = vpop.f32.mrf.mxu0 }
 0x5ce   : > { %v5433_v37 = vadd.f32 %v11501_v28, %v5177_v18  ;;  %v5179_v61 = vadd.f32 %v5178_v51, %v12615_v10  ;;  %6049 = vmatprep.mubr.bf16.mxu1 %v5662_v41  ;;  %v5560_v20 = vmax.f32 %v5432_v5, 0.0 }
 0x5cf   : > { %v5182_v47 = vpop.f32.mrf.mxu0  ;;  %6050 = vmatmul.mubr.bf16.gmra.mxu1 %v5661_v55 }
 0x5d0   : > { %v5434_v40 = vadd.f32 %v11497_v52, %v5179_v61  ;;  %v5561_v12 = vmax.f32 %v5433_v37, 0.0  ;;  %v5183_v19 = vadd.f32 %v5182_v47, %v12618_v11  ;;  %v11724_v37 = vpop.f32.mrf.mxu1 }
 0x5d1   : > { %v5184_v48 = vpop.f32.mrf.mxu0 }
 0x5d2   : > { %v5562_v57 = vmax.f32 %v5434_v40, 0.0  ;;  %v5185_v15 = vadd.f32 %v5184_v48, %v12616_v59  ;;  %v5663_v33 = vpack.c.bf16 %v5561_v12, %v5559_v44  ;;  %v5435_v18 = vadd.f32 %v11501_v28, %v5183_v19  ;;  %v12622_v12 = vld [vmem:[#allocation59_spill] sm:$0xff]  ;;  %v11729_v19 = vpop.f32.mrf.mxu1 }
 0x5d3   : > { %v5186_v14 = vpop.f32.mrf.mxu0 }
 0x5d4   : > { %v5187_v56 = vadd.f32 %v5186_v14, %v12619_v50  ;;  %v5664_v30 = vpack.c.bf16 %v5562_v57, %v5560_v20  ;;  %v5436_v21 = vadd.f32 %v11497_v52, %v5185_v15  ;;  %v5563_v40 = vmax.f32 %v5435_v18, 0.0  ;;  %v12623_v57 = vld [vmem:[#allocation61_spill] sm:$0xff] }
 0x5d5   : > { %v5188_v29 = vpop.f32.mrf.mxu0 }
 0x5d6   : > { %v5437_v39 = vadd.f32 %v11501_v28, %v5187_v56  ;;  %v5189_v54 = vadd.f32 %v5188_v29, %v12620_v46  ;;  %6059 = vmatprep.mubr.bf16.mxu1 %v5664_v30  ;;  %v5564_v10 = vmax.f32 %v5436_v21, 0.0  ;;  %v12624_v56 = vld [vmem:[#allocation62_spill] sm:$0xff] }
 0x5d7   : > { %v5192_v41 = vpop.f32.mrf.mxu0  ;;  %6060 = vmatmul.mubr.bf16.gmra.mxu1 %v5663_v33 }
 0x5d8   : > { %v5438_v55 = vadd.f32 %v11497_v52, %v5189_v54  ;;  %v5565_v51 = vmax.f32 %v5437_v39, 0.0  ;;  %v5193_v48 = vadd.f32 %v5192_v41, %v12622_v12  ;;  %v11736_v54 = vpop.f32.mrf.mxu1 }
 0x5d9   : > { %v5194_v5 = vpop.f32.mrf.mxu0 }
 0x5da   : > { %v5566_v61 = vmax.f32 %v5438_v55, 0.0  ;;  %v5195_v47 = vadd.f32 %v5194_v5, %v12621_v0  ;;  %v5665_v44 = vpack.c.bf16 %v5565_v51, %v5563_v40  ;;  %v5439_v33 = vadd.f32 %v11501_v28, %v5193_v48  ;;  %v12625_v55 = vld [vmem:[#allocation64_spill] sm:$0xff]  ;;  %v11739_v5 = vld [vmem:[#allocation8 + $0x20] sm:$0xff]  }
 0x5db   : > { %v5196_v20 = vpop.f32.mrf.mxu0  ;;  %12626 = vst [vmem:[#allocation23_spill] sm:$0xff] %v11739_v5  ;;  %v12628_v40 = vld [vmem:[#allocation65_spill] sm:$0xff]  ;;  %8728 = vmatpush1.bf16.msra.mxu1 %v11739_v5 }
 0x5dc   : > { %v5197_v59 = vadd.f32 %v5196_v20, %v12623_v57  ;;  %v5666_v15 = vpack.c.bf16 %v5566_v61, %v5564_v10  ;;  %v5440_v14 = vadd.f32 %v11497_v52, %v5195_v47  ;;  %v5567_v10 = vmax.f32 %v5439_v33, 0.0  ;;  %v12627_v61 = vld [vmem:[#allocation63_spill] sm:$0xff]  ;;  %8713 = vmatprep.subr.bf16.mxu1 %v12602_v32 }
 0x5dd   : > { %v5198_v11 = vpop.f32.mrf.mxu0 }
 0x5de   : > { %v5441_v50 = vadd.f32 %v11501_v28, %v5197_v59  ;;  %v5199_v30 = vadd.f32 %v5198_v11, %v12624_v56  ;;  %6069 = vmatprep.mubr.bf16.mxu1 %v5666_v15  ;;  %v5568_v18 = vmax.f32 %v5440_v14, 0.0  ;;  %v11744_v59 = vpop.f32.mrf.mxu1  ;;  %v12629_v11 = vld [vmem:[#allocation66_spill] sm:$0xff] }
 0x5df   : > { %v5202_v29 = vpop.f32.mrf.mxu0  ;;  %6070 = vmatmul.mubr.bf16.gmra.mxu1 %v5665_v44 }
 0x5e0   : > { %v5442_v21 = vadd.f32 %v11497_v52, %v5199_v30  ;;  %v5569_v39 = vmax.f32 %v5441_v50, 0.0  ;;  %v5203_v0 = vadd.f32 %v5202_v29, %v12627_v61 }
 0x5e1   : > { %v5204_v46 = vpop.f32.mrf.mxu0 }
 0x5e2   : > { %v5570_v41 = vmax.f32 %v5442_v21, 0.0  ;;  %v5205_v51 = vadd.f32 %v5204_v46, %v12625_v55  ;;  %v5667_v20 = vpack.c.bf16 %v5569_v39, %v5567_v10  ;;  %v5443_v50 = vadd.f32 %v11501_v28, %v5203_v0  ;;  %v11752_v21 = vpop.f32.mrf.mxu1 }
 0x5e3   : > { %v5206_v47 = vpop.f32.mrf.mxu0 }
 0x5e4   : > { %v5207_v12 = vadd.f32 %v5206_v47, %v12628_v40  ;;  %v5668_v48 = vpack.c.bf16 %v5570_v41, %v5568_v18  ;;  %v5444_v15 = vadd.f32 %v11497_v52, %v5205_v51  ;;  %v12630_v18 = vld [vmem:[#allocation68_spill] sm:$0xff]  ;;  %v5571_v55 = vmax.f32 %v5443_v50, 0.0  ;;  %v12631_v51 = vld [vmem:[#allocation67_spill] sm:$0xff]  ;;  %v12632_v47 = vld [vmem:[#allocation69_spill] sm:$0xff] }
 0x5e5   : > { %v5208_v57 = vpop.f32.mrf.mxu0 }
 0x5e6   : > { %v5445_v44 = vadd.f32 %v11501_v28, %v5207_v12  ;;  %v5209_v14 = vadd.f32 %v5208_v57, %v12629_v11  ;;  %6079 = vmatprep.mubr.bf16.mxu1 %v5668_v48  ;;  %v5572_v39 = vmax.f32 %v5444_v15, 0.0  ;;  %v12633_v11 = vld [vmem:[#allocation70_spill] sm:$0xff] }
 0x5e7   : > { %v5212_v56 = vpop.f32.mrf.mxu0  ;;  %6080 = vmatmul.mubr.bf16.gmra.mxu1 %v5667_v20  ;;  %v11757_v20 = vpop.f32.mrf.mxu1 }
 0x5e8   : > { %v5446_v30 = vadd.f32 %v11497_v52, %v5209_v14  ;;  %v5573_v33 = vmax.f32 %v5445_v44, 0.0  ;;  %v5213_v10 = vadd.f32 %v5212_v56, %v12631_v51 }
 0x5e9   : > { %v5214_v29 = vpop.f32.mrf.mxu0 }
 0x5ea   : > { %v5574_v46 = vmax.f32 %v5446_v30, 0.0  ;;  %v5215_v41 = vadd.f32 %v5214_v29, %v12630_v18  ;;  %v5669_v0 = vpack.c.bf16 %v5573_v33, %v5571_v55  ;;  %v5447_v14 = vadd.f32 %v11501_v28, %v5213_v10  ;;  %v11764_v30 = vld [vmem:[#allocation8 + $0x18] sm:$0xff]  }
 0x5eb   : > { %v5216_v61 = vpop.f32.mrf.mxu0  ;;  %12634 = vst [vmem:[#allocation24_spill] sm:$0xff] %v11764_v30  ;;  %8729 = vmatpush1.bf16.msra.mxu1 %v11764_v30  ;;  %v12641_v30 = vld [vmem:[#allocation75_spill] sm:$0xff] }
 0x5ec   : > { %v5217_v40 = vadd.f32 %v5216_v61, %v12632_v47  ;;  %v5670_v12 = vpack.c.bf16 %v5574_v46, %v5572_v39  ;;  %v5448_v57 = vadd.f32 %v11497_v52, %v5215_v41  ;;  %v11766_v39 = vpop.f32.mrf.mxu1  ;;  %v12635_v41 = vld [vmem:[#allocation72_spill] sm:$0xff]  ;;  %v5575_v51 = vmax.f32 %v5447_v14, 0.0  ;;  %v12636_v61 = vld [vmem:[#allocation71_spill] sm:$0xff]  ;;  %8714 = vmatprep.subr.bf16.mxu1 %v12602_v32 }
 0x5ed   : > { %v5218_v48 = vpop.f32.mrf.mxu0 }
 0x5ee   : > { %v5449_v44 = vadd.f32 %v11501_v28, %v5217_v40  ;;  %v5219_v15 = vadd.f32 %v5218_v48, %v12633_v11  ;;  %6089 = vmatprep.mubr.bf16.mxu1 %v5670_v12  ;;  %v5576_v46 = vmax.f32 %v5448_v57, 0.0  ;;  %v12637_v40 = vld [vmem:[#allocation73_spill] sm:$0xff]  ;;  %v11773_v11 = vpop.f32.mrf.mxu1 }
 0x5ef   : > { %v5222_v50 = vpop.f32.mrf.mxu0  ;;  %6090 = vmatmul.mubr.bf16.gmra.mxu1 %v5669_v0 }
 0x5f0   : > { %v5450_v56 = vadd.f32 %v11497_v52, %v5219_v15  ;;  %v5577_v29 = vmax.f32 %v5449_v44, 0.0  ;;  %v5223_v47 = vadd.f32 %v5222_v50, %v12636_v61 }
 0x5f1   : > { %v5224_v33 = vpop.f32.mrf.mxu0 }
 0x5f2   : > { %v5578_v18 = vmax.f32 %v5450_v56, 0.0  ;;  %v5225_v55 = vadd.f32 %v5224_v33, %v12635_v41  ;;  %v5671_v48 = vpack.c.bf16 %v5577_v29, %v5575_v51  ;;  %v12638_v56 = vld [vmem:[#allocation74_spill] sm:$0xff]  ;;  %v5451_v14 = vadd.f32 %v11501_v28, %v5223_v47  ;;  %v12640_v51 = vld [vmem:[#allocation76_spill] sm:$0xff] }
 0x5f3   : > { %v5226_v10 = vpop.f32.mrf.mxu0 }
 0x5f4   : > { %v5227_v12 = vadd.f32 %v5226_v10, %v12637_v40  ;;  %v5672_v0 = vpack.c.bf16 %v5578_v18, %v5576_v46  ;;  %v5452_v57 = vadd.f32 %v11497_v52, %v5225_v55  ;;  %v11780_v46 = vpop.f32.mrf.mxu1  ;;  %v5579_v55 = vmax.f32 %v5451_v14, 0.0 }
 0x5f5   : > { %v5228_v44 = vpop.f32.mrf.mxu0  ;;  %12639 = vst [vmem:[#allocation26_spill] sm:$0xff] %v11780_v46  ;;  %v12643_v46 = vld [vmem:[#allocation78_spill] sm:$0xff] }
 0x5f6   : > { %v5453_v15 = vadd.f32 %v11501_v28, %v5227_v12  ;;  %v5229_v33 = vadd.f32 %v5228_v44, %v12638_v56  ;;  %6099 = vmatprep.mubr.bf16.mxu1 %v5672_v0  ;;  %v5580_v29 = vmax.f32 %v5452_v57, 0.0  ;;  %v12642_v44 = vld [vmem:[#allocation77_spill] sm:$0xff] }
 0x5f7   : > { %v5232_v50 = vpop.f32.mrf.mxu0  ;;  %6100 = vmatmul.mubr.bf16.gmra.mxu1 %v5671_v48  ;;  %v11785_v48 = vpop.f32.mrf.mxu1 }
 0x5f8   : > { %v5454_v41 = vadd.f32 %v11497_v52, %v5229_v33  ;;  %v5581_v61 = vmax.f32 %v5453_v15, 0.0  ;;  %v5233_v12 = vadd.f32 %v5232_v50, %v12641_v30  ;;  %v11792_v50 = vld [vmem:[#allocation8 + $0x10] sm:$0xff]  }
 0x5f9   : > { %v5234_v10 = vpop.f32.mrf.mxu0  ;;  %8730 = vmatpush1.bf16.msra.mxu1 %v11792_v50 }
 0x5fa   : > { %v5582_v18 = vmax.f32 %v5454_v41, 0.0  ;;  %v5235_v40 = vadd.f32 %v5234_v10, %v12640_v51  ;;  %v5673_v47 = vpack.c.bf16 %v5581_v61, %v5579_v55  ;;  %v5455_v41 = vadd.f32 %v11501_v28, %v5233_v12  ;;  %v11794_v10 = vpop.f32.mrf.mxu1  ;;  %8715 = vmatprep.subr.bf16.mxu1 %v12602_v32 }
 0x5fb   : > { %v5236_v5 = vpop.f32.mrf.mxu0 }
 0x5fc   : > { %v5237_v0 = vadd.f32 %v5236_v5, %v12642_v44  ;;  %v5674_v56 = vpack.c.bf16 %v5582_v18, %v5580_v29  ;;  %v5456_v15 = vadd.f32 %v11497_v52, %v5235_v40 }
 0x5fd   : > { %v5238_v7 = vpop.f32.mrf.mxu0 }
 0x5fe   : > { %v5457_v33 = vadd.f32 %v11501_v28, %v5237_v0  ;;  %v5239_v57 = vadd.f32 %v5238_v7, %v12643_v46  ;;  %6109 = vmatprep.mubr.bf16.mxu1 %v5674_v56  ;;  %v5584_v29 = vmax.f32 %v5456_v15, 0.0  ;;  %v5583_v7 = vmax.f32 %v5455_v41, 0.0  ;;  %v12644_v46 = vld [vmem:[#allocation79_spill] sm:$0xff] }
 0x5ff   : > { %v5242_v14 = vpop.f32.mrf.mxu0  ;;  %6110 = vmatmul.mubr.bf16.gmra.mxu1 %v5673_v47  ;;  %v11801_v47 = vpop.f32.mrf.mxu1 }
 0x600   : > { %v5458_v30 = vadd.f32 %v11497_v52, %v5239_v57  ;;  %v5585_v5 = vmax.f32 %v5457_v33, 0.0  ;;  %v5243_v40 = vadd.f32 %v5242_v14, %v12644_v46 }
 0x601   : > { %v5244_v61 = vpop.f32.mrf.mxu0 }
 0x602   : > { %v5586_v18 = vmax.f32 %v5458_v30, 0.0  ;;  %v5245_v51 = vadd.f32 %v5244_v61, %v11506_v42  ;;  %v5675_v0 = vpack.c.bf16 %v5585_v5, %v5583_v7  ;;  %v5459_v57 = vadd.f32 %v11501_v28, %v5243_v40  ;;  %v11808_v61 = vpop.f32.mrf.mxu1 }
 0x603   : > { %v5246_v55 = vpop.f32.mrf.mxu0 }
 0x604   : > { %v5247_v12 = vadd.f32 %v5246_v55, %v11519_v63  ;;  %v5676_v44 = vpack.c.bf16 %v5586_v18, %v5584_v29  ;;  %v5460_v15 = vadd.f32 %v11497_v52, %v5245_v51  ;;  %v5587_v51 = vmax.f32 %v5459_v57, 0.0 }
 0x605   : > { %v5248_v56 = vpop.f32.mrf.mxu0 }
 0x606   : > { %v5461_v33 = vadd.f32 %v11501_v28, %v5247_v12  ;;  %v5249_v42 = vadd.f32 %v5248_v56, %v11528_v60  ;;  %6119 = vmatprep.mubr.bf16.mxu1 %v5676_v44  ;;  %v5588_v5 = vmax.f32 %v5460_v15, 0.0  ;;  %v11813_v44 = vpop.f32.mrf.mxu1 }
 0x607   : > { %v5252_v41 = vpop.f32.mrf.mxu0  ;;  %6120 = vmatmul.mubr.bf16.gmra.mxu1 %v5675_v0 }
 0x608   : > { %v5462_v14 = vadd.f32 %v11497_v52, %v5249_v42  ;;  %v5589_v30 = vmax.f32 %v5461_v33, 0.0  ;;  %v5253_v7 = vadd.f32 %v5252_v41, %v11539_v25  ;;  %v11820_v42 = vld [vmem:[#allocation8 + $0x8] sm:$0xff]   ;;  %v11822_v41 = vpop.f32.mrf.mxu1 }
 0x609   : > { %v5254_v63 = vpop.f32.mrf.mxu0  ;;  %8731 = vmatpush1.bf16.msra.mxu1 %v11820_v42 }
 0x60a   : > { %v5590_v29 = vmax.f32 %v5462_v14, 0.0  ;;  %v5255_v18 = vadd.f32 %v5254_v63, %v11546_v6  ;;  %v5677_v40 = vpack.c.bf16 %v5589_v30, %v5587_v51  ;;  %v5463_v6 = vadd.f32 %v11501_v28, %v5253_v7  ;;  %8716 = vmatprep.subr.bf16.mxu1 %v12602_v32 }
 0x60b   : > { %v5256_v46 = vpop.f32.mrf.mxu0 }
 0x60c   : > { %v5257_v60 = vadd.f32 %v5256_v46, %v11559_v36  ;;  %v5678_v55 = vpack.c.bf16 %v5590_v29, %v5588_v5  ;;  %v5464_v0 = vadd.f32 %v11497_v52, %v5255_v18 }
 0x60d   : > { %v5258_v12 = vpop.f32.mrf.mxu0 }
 0x60e   : > { %v5465_v56 = vadd.f32 %v11501_v28, %v5257_v60  ;;  %v5259_v15 = vadd.f32 %v5258_v12, %v11568_v13  ;;  %6129 = vmatprep.mubr.bf16.mxu1 %v5678_v55  ;;  %v5592_v14 = vmax.f32 %v5464_v0, 0.0  ;;  %v5591_v13 = vmax.f32 %v5463_v6, 0.0  ;;  %v11829_v60 = vpop.f32.mrf.mxu1 }
 0x60f   : > { %v5262_v33 = vpop.f32.mrf.mxu0  ;;  %6130 = vmatmul.mubr.bf16.gmra.mxu1 %v5677_v40 }
 0x610   : > { %v5466_v25 = vadd.f32 %v11497_v52, %v5259_v15  ;;  %v5593_v36 = vmax.f32 %v5465_v56, 0.0  ;;  %v5263_v5 = vadd.f32 %v5262_v33, %v11579_v49  ;;  %v11836_v15 = vpop.f32.mrf.mxu1 }
 0x611   : > { %v5264_v57 = vpop.f32.mrf.mxu0 }
 0x612   : > { %v5594_v30 = vmax.f32 %v5466_v25, 0.0  ;;  %v5265_v63 = vadd.f32 %v5264_v57, %v11586_v27  ;;  %v5679_v7 = vpack.c.bf16 %v5593_v36, %v5591_v13  ;;  %v5467_v12 = vadd.f32 %v11501_v28, %v5263_v5  ;;  %v11841_v5 = vpop.f32.mrf.mxu1 }
 0x613   : > { %v5266_v29 = vpop.f32.mrf.mxu0 }
 0x614   : > { %v5267_v18 = vadd.f32 %v5266_v29, %v11599_v23  ;;  %v5680_v51 = vpack.c.bf16 %v5594_v30, %v5592_v14  ;;  %v5468_v55 = vadd.f32 %v11497_v52, %v5265_v63  ;;  %v5595_v36 = vmax.f32 %v5467_v12, 0.0 }
 0x615   : > { %v5268_v46 = vpop.f32.mrf.mxu0 }
 0x616   : > { %v5469_v40 = vadd.f32 %v11501_v28, %v5267_v18  ;;  %v5269_v27 = vadd.f32 %v5268_v46, %v11606_v62  ;;  %6139 = vmatprep.mubr.bf16.mxu1 %v5680_v51  ;;  %v5596_v6 = vmax.f32 %v5468_v55, 0.0  ;;  %v11848_v46 = vld [vmem:[#allocation8] sm:$0xff]  }
 0x617   : > { %v5272_v49 = vpop.f32.mrf.mxu0  ;;  %6140 = vmatmul.mubr.bf16.gmra.mxu1 %v5679_v7 }
 0x618   : > { %v5470_v0 = vadd.f32 %v11497_v52, %v5269_v27  ;;  %v5597_v56 = vmax.f32 %v5469_v40, 0.0  ;;  %v5273_v57 = vadd.f32 %v5272_v49, %v11615_v45  ;;  %v11850_v40 = vpop.f32.mrf.mxu1  ;;  %8732 = vmatpush1.bf16.msra.mxu1 %v11848_v46 }
 0x619   : > { %v5274_v23 = vpop.f32.mrf.mxu0  ;;  %8717 = vmatprep.subr.bf16.mxu1 %v12602_v32 }
 0x61a   : > { %v5598_v33 = vmax.f32 %v5470_v0, 0.0  ;;  %v5275_v25 = vadd.f32 %v5274_v23, %v11620_v22  ;;  %v5681_v63 = vpack.c.bf16 %v5597_v56, %v5595_v36  ;;  %v5471_v22 = vadd.f32 %v11501_v28, %v5273_v57  ;;  %v11857_v36 = vpop.f32.mrf.mxu1 }
 0x61b   : > { %v5276_v14 = vpop.f32.mrf.mxu0 }
 0x61c   : > { %v5277_v62 = vadd.f32 %v5276_v14, %v11627_v24  ;;  %v5682_v30 = vpack.c.bf16 %v5598_v33, %v5596_v6  ;;  %v5472_v29 = vadd.f32 %v11497_v52, %v5275_v25 }
 0x61d   : > { %v5278_v13 = vpop.f32.mrf.mxu0 }
 0x61e   : > { %v5473_v18 = vadd.f32 %v11501_v28, %v5277_v62  ;;  %v5279_v51 = vadd.f32 %v5278_v13, %v11632_v38  ;;  %6149 = vmatprep.mubr.bf16.mxu1 %v5682_v30  ;;  %v5600_v27 = vmax.f32 %v5472_v29, 0.0  ;;  %v5599_v38 = vmax.f32 %v5471_v22, 0.0 }
 0x61f   : > { %v5282_v7 = vpop.f32.mrf.mxu0  ;;  %6150 = vmatmul.mubr.bf16.gmra.mxu1 %v5681_v63 }
 0x620   : > { %v5474_v45 = vadd.f32 %v11497_v52, %v5279_v51  ;;  %v5601_v24 = vmax.f32 %v5473_v18, 0.0  ;;  %v5283_v0 = vadd.f32 %v5282_v7, %v11639_v17 }
 0x621   : > { %v5284_v55 = vpop.f32.mrf.mxu0 }
 0x622   : > { %v5602_v12 = vmax.f32 %v5474_v45, 0.0  ;;  %v5285_v49 = vadd.f32 %v5284_v55, %v11644_v4  ;;  %v5683_v33 = vpack.c.bf16 %v5601_v24, %v5599_v38  ;;  %v5475_v62 = vadd.f32 %v11501_v28, %v5283_v0 }
 0x623   : > { %v5286_v56 = vpop.f32.mrf.mxu0 }
 0x624   : > { %v5287_v23 = vadd.f32 %v5286_v56, %v11651_v26  ;;  %v5684_v6 = vpack.c.bf16 %v5602_v12, %v5600_v27  ;;  %v5476_v57 = vadd.f32 %v11497_v52, %v5285_v49  ;;  %v11864_v26 = vpop.f32.mrf.mxu1  ;;  %v5603_v22 = vmax.f32 %v5475_v62, 0.0 }
 0x625   : > { %v5288_v25 = vpop.f32.mrf.mxu0 }
 0x626   : > { %v5477_v14 = vadd.f32 %v11501_v28, %v5287_v23  ;;  %v5289_v4 = vadd.f32 %v5288_v25, %v11659_v43  ;;  %6159 = vmatprep.mubr.bf16.mxu1 %v5684_v6  ;;  %v5604_v29 = vmax.f32 %v5476_v57, 0.0  ;;  %v11869_v27 = vpop.f32.mrf.mxu1  ;;  %v11876_v23 = vld [vmem:[#allocation8 + $0x78] sm:$0xff]  }
 0x627   : > { %v5292_v17 = vpop.f32.mrf.mxu0  ;;  %6160 = vmatmul.mubr.bf16.gmra.mxu1 %v5683_v33 }
 0x628   : > { %v5478_v30 = vadd.f32 %v11497_v52, %v5289_v4  ;;  %v5605_v63 = vmax.f32 %v5477_v14, 0.0  ;;  %v5293_v7 = vadd.f32 %v5292_v17, %v11667_v34  ;;  %v11878_v6 = vpop.f32.mrf.mxu1  ;;  %8733 = vmatpush2.bf16.msra.mxu1 %v11876_v23 }
 0x629   : > { %v5294_v13 = vpop.f32.mrf.mxu0  ;;  %8718 = vmatprep.subr.bf16.mxu1 %v12602_v32 }
 0x62a   : > { %v5606_v18 = vmax.f32 %v5478_v30, 0.0  ;;  %v5295_v51 = vadd.f32 %v5294_v13, %v11672_v16  ;;  %v5685_v55 = vpack.c.bf16 %v5605_v63, %v5603_v22  ;;  %v5479_v16 = vadd.f32 %v11501_v28, %v5293_v7  ;;  %v11885_v13 = vpop.f32.mrf.mxu1  ;;  %v5735_v7 = vld [vmem:[%s12464_s15] sm:$0x3] }
 0x62b   : > { %v5296_v45 = vpop.f32.mrf.mxu0 }
 0x62c   : > { %v5297_v43 = vadd.f32 %v5296_v45, %v11680_v9  ;;  %v5686_v24 = vpack.c.bf16 %v5606_v18, %v5604_v29  ;;  %v5480_v49 = vadd.f32 %v11497_v52, %v5295_v51 }
 0x62d   : > { %v5298_v12 = vpop.f32.mrf.mxu0 }
 0x62e   : > { %v5481_v38 = vadd.f32 %v11501_v28, %v5297_v43  ;;  %v5299_v0 = vadd.f32 %v5298_v12, %v11688_v2  ;;  %6169 = vmatprep.mubr.bf16.mxu1 %v5686_v24  ;;  %v5608_v25 = vmax.f32 %v5480_v49, 0.0  ;;  %v5607_v2 = vmax.f32 %v5479_v16, 0.0 }
 0x62f   : > { %v5302_v56 = vpop.f32.mrf.mxu0  ;;  %6170 = vmatmul.mubr.bf16.gmra.mxu1 %v5685_v55  ;;  %v12645_v55 = vld [vmem:[#allocation21_spill] sm:$0xff] }
 0x630   : > { %v5482_v34 = vadd.f32 %v11497_v52, %v5299_v0  ;;  %v5609_v9 = vmax.f32 %v5481_v38, 0.0  ;;  %v5303_v4 = vadd.f32 %v5302_v56, %v11696_v31  ;;  %v11896_v12 = vrot.slane %v5735_v7, %v12645_v55 }
 0x631   : > { %v5304_v33 = vpop.f32.mrf.mxu0  ;;  %v11899_v0 = vrot.slane %v5735_v7, %v9936_v35  ;;  %v11913_v7 = vld [vmem:[#allocation8 + $0x70] sm:$0xff]  }
 0x632   : > { %v5610_v57 = vmax.f32 %v5482_v34, 0.0  ;;  %v5305_v14 = vadd.f32 %v5304_v33, %v11701_v58  ;;  %v5687_v63 = vpack.c.bf16 %v5609_v9, %v5607_v2  ;;  %v5483_v22 = vadd.f32 %v11501_v28, %v5303_v4  ;;  %8734 = vmatpush2.bf16.msra.mxu1 %v11913_v7 }
 0x633   : > { %v5306_v62 = vpop.f32.mrf.mxu0  ;;  %8719 = vmatprep.subr.bf16.mxu1 %v12602_v32 }
 0x634   : > { %v5307_v17 = vadd.f32 %v5306_v62, %v11708_v53  ;;  %v5688_v30 = vpack.c.bf16 %v5610_v57, %v5608_v25  ;;  %v5484_v18 = vadd.f32 %v11497_v52, %v5305_v14  ;;  %v5611_v16 = vmax.f32 %v5483_v22, 0.0 }
 0x635   : > { %v5308_v29 = vpop.f32.mrf.mxu0 }
 0x636   : > { %v5485_v51 = vadd.f32 %v11501_v28, %v5307_v17  ;;  %v5309_v58 = vadd.f32 %v5308_v29, %v11716_v1  ;;  %6179 = vmatprep.mubr.bf16.mxu1 %v5688_v30  ;;  %v5612_v38 = vmax.f32 %v5484_v18, 0.0 }
 0x637   : > { %v5312_v31 = vpop.f32.mrf.mxu0  ;;  %v5941_v53 = vpop.f32.mrf.mxu1  ;;  %6180 = vmatmul.mubr.bf16.gmra.mxu1 %v5687_v63 }
 0x638   : > { %v5486_v45 = vadd.f32 %v11497_v52, %v5309_v58  ;;  %v5613_v43 = vmax.f32 %v5485_v51, 0.0  ;;  %v5313_v33 = vadd.f32 %v5312_v31, %v11724_v37  ;;  %v5942_v30 = vadd.f32 %v5941_v53, %v11899_v0 }
 0x639   : > { %v5314_v24 = vpop.f32.mrf.mxu0  ;;  %v5943_v49 = vpop.f32.mrf.mxu1 }
 0x63a   : > { %v5614_v1 = vmax.f32 %v5486_v45, 0.0  ;;  %v5315_v56 = vadd.f32 %v5314_v24, %v11729_v19  ;;  %v5689_v2 = vpack.c.bf16 %v5613_v43, %v5611_v16  ;;  %v5944_v4 = vadd.f32 %v5943_v49, %v11896_v12 }
 0x63b   : > { %v5316_v34 = vpop.f32.mrf.mxu0  ;;  %v5945_v9 = vpop.f32.mrf.mxu1  ;;  %v5487_v51 = vadd.f32 %v11501_v28, %v5313_v33 }
 0x63c   : > { %v5317_v25 = vadd.f32 %v5316_v34, %v11736_v54  ;;  %v5946_v57 = vadd.f32 %v5945_v9, %v11899_v0  ;;  %v5690_v14 = vpack.c.bf16 %v5614_v1, %v5612_v38  ;;  %v5488_v37 = vadd.f32 %v11497_v52, %v5315_v56 }
 0x63d   : > { %v5318_v62 = vpop.f32.mrf.mxu0  ;;  %v5947_v17 = vpop.f32.mrf.mxu1  ;;  %v6261_v53 = vmax.f32 %v5944_v4, 0.0  ;;  %v5615_v33 = vmax.f32 %v5487_v51, 0.0 }
 0x63e   : > { %v5489_v63 = vadd.f32 %v11501_v28, %v5317_v25  ;;  %v5319_v19 = vadd.f32 %v5318_v62, %v11744_v59  ;;  %v5948_v29 = vadd.f32 %v5947_v17, %v11896_v12  ;;  %6189 = vmatprep.mubr.bf16.mxu1 %v5690_v14  ;;  %v6262_v58 = vmax.f32 %v5946_v57, 0.0 }
 0x63f   : > { %v5322_v54 = vpop.f32.mrf.mxu0  ;;  %v5951_v18 = vpop.f32.mrf.mxu1  ;;  %6190 = vmatmul.mubr.bf16.gmra.mxu1 %v5689_v2  ;;  %v6260_v59 = vmax.f32 %v5942_v30, 0.0  ;;  %v5616_v38 = vmax.f32 %v5488_v37, 0.0 }
 0x640   : > { %v5490_v22 = vadd.f32 %v11497_v52, %v5319_v19  ;;  %v6263_v31 = vmax.f32 %v5948_v29, 0.0  ;;  %v5617_v24 = vmax.f32 %v5489_v63, 0.0  ;;  %v5323_v1 = vadd.f32 %v5322_v54, %v11752_v21 }
 0x641   : > { %v5324_v45 = vpop.f32.mrf.mxu0  ;;  %v5953_v43 = vpop.f32.mrf.mxu1  ;;  %v6388_v25 = vpack.c.bf16 %v6262_v58, %v6260_v59 }
 0x642   : > { %v5618_v49 = vmax.f32 %v5490_v22, 0.0  ;;  %v5325_v16 = vadd.f32 %v5324_v45, %v11757_v20  ;;  %v6389_v9 = vpack.c.bf16 %v6263_v31, %v6261_v53  ;;  %v5954_v2 = vadd.f32 %v5953_v43, %v11896_v12 }
 0x643   : > { %v5326_v56 = vpop.f32.mrf.mxu0  ;;  %v5955_v34 = vpop.f32.mrf.mxu1  ;;  %v5691_v21 = vpack.c.bf16 %v5617_v24, %v5615_v33  ;;  %v5952_v20 = vadd.f32 %v5951_v18, %v11899_v0  ;;  %v5491_v19 = vadd.f32 %v11501_v28, %v5323_v1 }
 0x644   : > { %v5327_v57 = vadd.f32 %v5326_v56, %v11766_v39  ;;  %v5956_v14 = vadd.f32 %v5955_v34, %v11899_v0  ;;  %6688 = vmatprep.mubr.bf16.mxu0 %v6389_v9  ;;  %v5692_v17 = vpack.c.bf16 %v5618_v49, %v5616_v38  ;;  %v5492_v39 = vadd.f32 %v11497_v52, %v5325_v16  ;;  %v12646_v56 = vld [vmem:[#allocation26_spill] sm:$0xff] }
 0x645   : > { %v5328_v4 = vpop.f32.mrf.mxu0  ;;  %v5957_v62 = vpop.f32.mrf.mxu1  ;;  %6689 = vmatmul.mubr.bf16.vlgmr.msra.gmra.mxu0 %v6388_v25  ;;  %v6265_v18 = vmax.f32 %v5954_v2, 0.0  ;;  %v6264_v53 = vmax.f32 %v5952_v20, 0.0  ;;  %v5619_v59 = vmax.f32 %v5491_v19, 0.0 }
 0x646   : > { %v5493_v30 = vadd.f32 %v11501_v28, %v5327_v57  ;;  %v5329_v63 = vadd.f32 %v5328_v4, %v11773_v11  ;;  %v5958_v29 = vadd.f32 %v5957_v62, %v11896_v12  ;;  %6199 = vmatprep.mubr.bf16.mxu1 %v5692_v17  ;;  %7337 = vmatpush1.bf16.msra.mxu0 %v11654_v3  ;;  %v6266_v51 = vmax.f32 %v5956_v14, 0.0 }
 0x647   : > { %v5332_v37 = vpop.f32.mrf.mxu0  ;;  %v5961_v54 = vpop.f32.mrf.mxu1  ;;  %6200 = vmatmul.mubr.bf16.gmra.mxu1 %v5691_v21  ;;  %7338 = vmatprep.subr.bf16.mxu0 %v12602_v32  ;;  %v5620_v24 = vmax.f32 %v5492_v39, 0.0 }
 0x648   : > { %v5494_v58 = vadd.f32 %v11497_v52, %v5329_v63  ;;  %v6267_v11 = vmax.f32 %v5958_v29, 0.0  ;;  %v5621_v45 = vmax.f32 %v5493_v30, 0.0  ;;  %v6390_v16 = vpack.c.bf16 %v6266_v51, %v6264_v53  ;;  %v12647_v30 = vld [vmem:[#allocation22_spill] sm:$0xff] }
 0x649   : > { %v5334_v22 = vpop.f32.mrf.mxu0  ;;  %v5963_v31 = vpop.f32.mrf.mxu1  ;;  %v5333_v34 = vadd.f32 %v5332_v37, %v12646_v56  ;;  %v5962_v4 = vadd.f32 %v5961_v54, %v11899_v0  ;;  %v11946_v29 = vld [vmem:[#allocation8 + $0x68] sm:$0xff]  }
 0x64a   : > { %v5622_v43 = vmax.f32 %v5494_v58, 0.0  ;;  %v5335_v49 = vadd.f32 %v5334_v22, %v11785_v48  ;;  %v6391_v3 = vpack.c.bf16 %v6267_v11, %v6265_v18  ;;  %7339 = vmatpush1.bf16.msra.mxu0 %v11683_v8  ;;  %v5964_v25 = vadd.f32 %v5963_v31, %v11896_v12  ;;  %8735 = vmatpush2.bf16.msra.mxu1 %v11946_v29 }
 0x64b   : > { %v5336_v38 = vpop.f32.mrf.mxu0  ;;  %v5965_v1 = vpop.f32.mrf.mxu1  ;;  %7340 = vmatprep.subr.bf16.mxu0 %v12602_v32  ;;  %v5693_v2 = vpack.c.bf16 %v5621_v45, %v5619_v59  ;;  %v5495_v63 = vadd.f32 %v11501_v28, %v5333_v34  ;;  %v6268_v58 = vmax.f32 %v5962_v4, 0.0  ;;  %8720 = vmatprep.subr.bf16.mxu1 %v12602_v32  ;;  %v12649_v4 = vld [vmem:[#allocation24_spill] sm:$0xff] }
 0x64c   : > { %v5337_v9 = vadd.f32 %v5336_v38, %v11794_v10  ;;  %v5966_v33 = vadd.f32 %v5965_v1, %v11899_v0  ;;  %6698 = vmatprep.mubr.bf16.mxu0 %v6391_v3  ;;  %v5694_v48 = vpack.c.bf16 %v5622_v43, %v5620_v24  ;;  %v5496_v10 = vadd.f32 %v11497_v52, %v5335_v49  ;;  %v12648_v24 = vld [vmem:[#allocation23_spill] sm:$0xff] }
 0x64d   : > { %v5338_v57 = vpop.f32.mrf.mxu0  ;;  %v5967_v14 = vpop.f32.mrf.mxu1  ;;  %6699 = vmatmul.mubr.bf16.gmra.mxu0 %v6390_v16  ;;  %v5623_v49 = vmax.f32 %v5495_v63, 0.0 }
 0x64e   : > { %v5497_v8 = vadd.f32 %v11501_v28, %v5337_v9  ;;  %v5339_v62 = vadd.f32 %v5338_v57, %v11801_v47  ;;  %v5968_v17 = vadd.f32 %v5967_v14, %v11896_v12  ;;  %6209 = vmatprep.mubr.bf16.mxu1 %v5694_v48  ;;  %7341 = vmatpush1.bf16.msra.mxu0 %v12647_v30  ;;  %v6270_v19 = vmax.f32 %v5966_v33, 0.0 }
 0x64f   : > { %v5342_v21 = vpop.f32.mrf.mxu0  ;;  %v5971_v20 = vpop.f32.mrf.mxu1  ;;  %6210 = vmatmul.mubr.bf16.gmra.mxu1 %v5693_v2  ;;  %7342 = vmatprep.subr.bf16.mxu0 %v12602_v32  ;;  %v6269_v47 = vmax.f32 %v5964_v25, 0.0  ;;  %v5624_v22 = vmax.f32 %v5496_v10, 0.0 }
 0x650   : > { %v5498_v39 = vadd.f32 %v11497_v52, %v5339_v62  ;;  %v6271_v37 = vmax.f32 %v5968_v17, 0.0  ;;  %v5625_v18 = vmax.f32 %v5497_v8, 0.0  ;;  %v5343_v31 = vadd.f32 %v5342_v21, %v11808_v61 }
 0x651   : > { %v5344_v54 = vpop.f32.mrf.mxu0  ;;  %v5973_v51 = vpop.f32.mrf.mxu1  ;;  %v6392_v38 = vpack.c.bf16 %v6270_v19, %v6268_v58  ;;  %v5972_v9 = vadd.f32 %v5971_v20, %v11899_v0 }
 0x652   : > { %v5626_v11 = vmax.f32 %v5498_v39, 0.0  ;;  %v5345_v53 = vadd.f32 %v5344_v54, %v11813_v44  ;;  %v6393_v59 = vpack.c.bf16 %v6271_v37, %v6269_v47  ;;  %7343 = vmatpush1.bf16.msra.mxu0 %v12648_v24  ;;  %v5974_v16 = vadd.f32 %v5973_v51, %v11896_v12 }
 0x653   : > { %v5346_v45 = vpop.f32.mrf.mxu0  ;;  %v5975_v43 = vpop.f32.mrf.mxu1  ;;  %7344 = vmatprep.subr.bf16.mxu0 %v12602_v32  ;;  %v5695_v34 = vpack.c.bf16 %v5625_v18, %v5623_v49  ;;  %v6272_v20 = vmax.f32 %v5972_v9, 0.0 }
 0x654   : > { %v5347_v1 = vadd.f32 %v5346_v45, %v11822_v41  ;;  %v5976_v3 = vadd.f32 %v5975_v43, %v11899_v0  ;;  %6708 = vmatprep.mubr.bf16.mxu0 %v6393_v59  ;;  %v5696_v56 = vpack.c.bf16 %v5626_v11, %v5624_v22  ;;  %v5499_v41 = vadd.f32 %v11501_v28, %v5343_v31 }
 0x655   : > { %v5348_v61 = vpop.f32.mrf.mxu0  ;;  %v5977_v44 = vpop.f32.mrf.mxu1  ;;  %6709 = vmatmul.mubr.bf16.gmra.mxu0 %v6392_v38  ;;  %v5500_v57 = vadd.f32 %v11497_v52, %v5345_v53  ;;  %v6273_v10 = vmax.f32 %v5974_v16, 0.0 }
 0x656   : > { %v5501_v33 = vadd.f32 %v11501_v28, %v5347_v1  ;;  %v5349_v25 = vadd.f32 %v5348_v61, %v11829_v60  ;;  %v5978_v14 = vadd.f32 %v5977_v44, %v11896_v12  ;;  %6219 = vmatprep.mubr.bf16.mxu1 %v5696_v56  ;;  %7345 = vmatpush1.bf16.msra.mxu0 %v12649_v4  ;;  %v6274_v8 = vmax.f32 %v5976_v3, 0.0  ;;  %v11982_v61 = vld [vmem:[#allocation8 + $0x60] sm:$0xff]  }
 0x657   : > { %v5352_v48 = vpop.f32.mrf.mxu0  ;;  %v5981_v2 = vpop.f32.mrf.mxu1  ;;  %6220 = vmatmul.mubr.bf16.gmra.mxu1 %v5695_v34  ;;  %7346 = vmatprep.subr.bf16.mxu0 %v12602_v32  ;;  %v5627_v19 = vmax.f32 %v5499_v41, 0.0  ;;  %v5628_v39 = vmax.f32 %v5500_v57, 0.0 }
 0x658   : > { %v5502_v62 = vadd.f32 %v11497_v52, %v5349_v25  ;;  %v6275_v60 = vmax.f32 %v5978_v14, 0.0  ;;  %v5629_v30 = vmax.f32 %v5501_v33, 0.0  ;;  %v6394_v58 = vpack.c.bf16 %v6274_v8, %v6272_v20  ;;  %8736 = vmatpush2.bf16.msra.mxu1 %v11982_v61 }
 0x659   : > { %v5354_v17 = vpop.f32.mrf.mxu0  ;;  %v5983_v21 = vpop.f32.mrf.mxu1  ;;  %v5353_v18 = vadd.f32 %v5352_v48, %v11836_v15  ;;  %v5982_v59 = vadd.f32 %v5981_v2, %v11899_v0  ;;  %8721 = vmatprep.subr.bf16.mxu1 %v12602_v32 }
 0x65a   : > { %v5630_v63 = vmax.f32 %v5502_v62, 0.0  ;;  %v5355_v47 = vadd.f32 %v5354_v17, %v11841_v5  ;;  %v6395_v51 = vpack.c.bf16 %v6275_v60, %v6273_v10  ;;  %7347 = vmatpush1.bf16.msra.mxu0 %v11792_v50  ;;  %v5984_v31 = vadd.f32 %v5983_v21, %v11896_v12 }
 0x65b   : > { %v5356_v37 = vpop.f32.mrf.mxu0  ;;  %v5985_v54 = vpop.f32.mrf.mxu1  ;;  %7348 = vmatprep.subr.bf16.mxu0 %v12602_v32  ;;  %v5697_v43 = vpack.c.bf16 %v5629_v30, %v5627_v19  ;;  %v5503_v1 = vadd.f32 %v11501_v28, %v5353_v18  ;;  %v6276_v9 = vmax.f32 %v5982_v59, 0.0 }
 0x65c   : > { %v5357_v11 = vadd.f32 %v5356_v37, %v11850_v40  ;;  %v5986_v22 = vadd.f32 %v5985_v54, %v11899_v0  ;;  %6718 = vmatprep.mubr.bf16.mxu0 %v6395_v51  ;;  %v5698_v5 = vpack.c.bf16 %v5630_v63, %v5628_v39  ;;  %v5504_v15 = vadd.f32 %v11497_v52, %v5355_v47 }
 0x65d   : > { %v5358_v53 = vpop.f32.mrf.mxu0  ;;  %v5987_v45 = vpop.f32.mrf.mxu1  ;;  %6719 = vmatmul.mubr.bf16.gmra.mxu0 %v6394_v58  ;;  %v5631_v4 = vmax.f32 %v5503_v1, 0.0 }
 0x65e   : > { %v5505_v50 = vadd.f32 %v11501_v28, %v5357_v11  ;;  %v5359_v24 = vadd.f32 %v5358_v53, %v11857_v36  ;;  %v5988_v40 = vadd.f32 %v5987_v45, %v11896_v12  ;;  %6229 = vmatprep.mubr.bf16.mxu1 %v5698_v5  ;;  %7349 = vmatpush1.bf16.msra.mxu0 %v11820_v42  ;;  %v6278_v3 = vmax.f32 %v5986_v22, 0.0 }
 0x65f   : > { %v5362_v49 = vpop.f32.mrf.mxu0  ;;  %v5991_v38 = vpop.f32.mrf.mxu1  ;;  %6230 = vmatmul.mubr.bf16.gmra.mxu1 %v5697_v43  ;;  %7350 = vmatprep.subr.bf16.mxu0 %v12602_v32  ;;  %v6277_v36 = vmax.f32 %v5984_v31, 0.0  ;;  %v5632_v42 = vmax.f32 %v5504_v15, 0.0 }
 0x660   : > { %v5506_v16 = vadd.f32 %v11497_v52, %v5359_v24  ;;  %v6279_v44 = vmax.f32 %v5988_v40, 0.0  ;;  %v5633_v33 = vmax.f32 %v5505_v50, 0.0  ;;  %v5363_v57 = vadd.f32 %v5362_v49, %v11864_v26 }
 0x661   : > { %v5364_v56 = vpop.f32.mrf.mxu0  ;;  %v5993_v34 = vpop.f32.mrf.mxu1  ;;  %v6396_v8 = vpack.c.bf16 %v6278_v3, %v6276_v9 }
 0x662   : > { %v5634_v25 = vmax.f32 %v5506_v16, 0.0  ;;  %v5365_v41 = vadd.f32 %v5364_v56, %v11869_v27  ;;  %v6397_v2 = vpack.c.bf16 %v6279_v44, %v6277_v36  ;;  %7351 = vmatpush1.bf16.msra.mxu0 %v11848_v46  ;;  %v5992_v27 = vadd.f32 %v5991_v38, %v11899_v0  ;;  %v9177_v38 = vld [vmem:[#allocation8 + $0x58] sm:$0xff]  }
 0x663   : > { %v5366_v14 = vpop.f32.mrf.mxu0  ;;  %v5995_v48 = vpop.f32.mrf.mxu1  ;;  %7352 = vmatprep.subr.bf16.mxu0 %v12602_v32  ;;  %v5994_v60 = vadd.f32 %v5993_v34, %v11896_v12  ;;  %v5699_v20 = vpack.c.bf16 %v5633_v33, %v5631_v4  ;;  %8737 = vmatpush2.bf16.msra.mxu1 %v9177_v38 }
 0x664   : > { %v5367_v62 = vadd.f32 %v5366_v14, %v11878_v6  ;;  %v5996_v10 = vadd.f32 %v5995_v48, %v11899_v0  ;;  %6728 = vmatprep.mubr.bf16.mxu0 %v6397_v2  ;;  %v5700_v21 = vpack.c.bf16 %v5634_v25, %v5632_v42  ;;  %v5508_v30 = vadd.f32 %v11497_v52, %v5365_v41 }
 0x665   : > { %v5368_v26 = vpop.f32.mrf.mxu0  ;;  %v5997_v17 = vpop.f32.mrf.mxu1  ;;  %6729 = vmatmul.mubr.bf16.gmra.mxu0 %v6396_v8  ;;  %v5507_v6 = vadd.f32 %v11501_v28, %v5363_v57  ;;  %v6281_v54 = vmax.f32 %v5994_v60, 0.0  ;;  %v6280_v18 = vmax.f32 %v5992_v27, 0.0  ;;  %8722 = vmatprep.subr.bf16.mxu1 %v12602_v32 }
 0x666   : > { %v5509_v46 = vadd.f32 %v11501_v28, %v5367_v62  ;;  %v5369_v63 = vadd.f32 %v5368_v26, %v11885_v13  ;;  %v5998_v19 = vadd.f32 %v5997_v17, %v11896_v12  ;;  %6239 = vmatprep.mubr.bf16.mxu1 %v5700_v21  ;;  %7353 = vmatpush2.bf16.msra.mxu0 %v11876_v23  ;;  %v6282_v47 = vmax.f32 %v5996_v10, 0.0 }
 0x667   : > { %v6001_v39 = vpop.f32.mrf.mxu1  ;;  %6240 = vmatmul.mubr.bf16.gmra.mxu1 %v5699_v20  ;;  %7354 = vmatprep.subr.bf16.mxu0 %v12602_v32  ;;  %v5636_v13 = vmax.f32 %v5508_v30, 0.0  ;;  %v5635_v28 = vmax.f32 %v5507_v6, 0.0  ;;  %v9178_v30 = vld [vmem:[#allocation8 + $0x50] sm:$0xff]  }
 0x668   : > { %v5510_v37 = vadd.f32 %v11497_v52, %v5369_v63  ;;  %v6283_v51 = vmax.f32 %v5998_v19, 0.0  ;;  %v5637_v11 = vmax.f32 %v5509_v46, 0.0  ;;  %v6398_v45 = vpack.c.bf16 %v6282_v47, %v6280_v18  ;;  %8738 = vmatpush2.bf16.msra.mxu1 %v9178_v30 }
 0x669   : > { %v6003_v58 = vpop.f32.mrf.mxu1  ;;  %v6002_v50 = vadd.f32 %v6001_v39, %v11899_v0  ;;  %8723 = vmatprep.subr.bf16.mxu1 %v12602_v32 }
 0x66a   : > { %v5638_v22 = vmax.f32 %v5510_v37, 0.0  ;;  %v6399_v53 = vpack.c.bf16 %v6283_v51, %v6281_v54  ;;  %7355 = vmatpush2.bf16.msra.mxu0 %v11913_v7  ;;  %v6004_v23 = vadd.f32 %v6003_v58, %v11896_v12  ;;  %v5701_v59 = vpack.c.bf16 %v5637_v11, %v5635_v28 }
 0x66b   : > { %v6005_v31 = vpop.f32.mrf.mxu1  ;;  %7356 = vmatprep.subr.bf16.mxu0 %v12602_v32  ;;  %v6284_v3 = vmax.f32 %v6002_v50, 0.0 }
 0x66c   : > { %v6006_v52 = vadd.f32 %v6005_v31, %v11899_v0  ;;  %v5702_v5 = vpack.c.bf16 %v5638_v22, %v5636_v13  ;;  %6738 = vmatprep.mubr.bf16.mxu0 %v6399_v53  ;;  %v6285_v7 = vmax.f32 %v6004_v23, 0.0 }
 0x66d   : > { %v6007_v43 = vpop.f32.mrf.mxu1  ;;  %6739 = vmatmul.mubr.bf16.gmra.mxu0 %v6398_v45 }
 0x66e   : > { %v6008_v24 = vadd.f32 %v6007_v43, %v11896_v12  ;;  %6249 = vmatprep.mubr.bf16.mxu1 %v5702_v5  ;;  %7357 = vmatpush2.bf16.msra.mxu0 %v11946_v29  ;;  %v6286_v40 = vmax.f32 %v6006_v52, 0.0 }
 0x66f   : > { %v6011_v15 = vpop.f32.mrf.mxu1  ;;  %6250 = vmatmul.mubr.bf16.gmra.mxu1 %v5701_v59  ;;  %7358 = vmatprep.subr.bf16.mxu0 %v12602_v32 }
 0x670   : > { %v6287_v49 = vmax.f32 %v6008_v24, 0.0  ;;  %v6400_v44 = vpack.c.bf16 %v6286_v40, %v6284_v3  ;;  %v6012_v9 = vadd.f32 %v6011_v15, %v11899_v0 }
 0x671   : > { %v6013_v1 = vpop.f32.mrf.mxu1 }
 0x672   : > { %v6401_v16 = vpack.c.bf16 %v6287_v49, %v6285_v7  ;;  %7359 = vmatpush2.bf16.msra.mxu0 %v11982_v61  ;;  %v6014_v56 = vadd.f32 %v6013_v1, %v11896_v12  ;;  %v6288_v14 = vmax.f32 %v6012_v9, 0.0 }
 0x673   : > { %v6015_v36 = vpop.f32.mrf.mxu1  ;;  %7360 = vmatprep.subr.bf16.mxu0 %v12602_v32 }
 0x674   : > { %v6016_v29 = vadd.f32 %v6015_v36, %v11899_v0  ;;  %6748 = vmatprep.mubr.bf16.mxu0 %v6401_v16  ;;  %v6289_v41 = vmax.f32 %v6014_v56, 0.0 }
 0x675   : > { %v6017_v34 = vpop.f32.mrf.mxu1  ;;  %6749 = vmatmul.mubr.bf16.gmra.mxu0 %v6400_v44 }
 0x676   : > { %v6018_v33 = vadd.f32 %v6017_v34, %v11896_v12  ;;  %7361 = vmatpush2.bf16.msra.mxu0 %v9177_v38  ;;  %v6290_v42 = vmax.f32 %v6016_v29, 0.0  ;;  %v9179_v38 = vld [vmem:[#allocation8 + $0x48] sm:$0xff]  }
 0x677   : > { %v6021_v25 = vpop.f32.mrf.mxu1  ;;  %7362 = vmatprep.subr.bf16.mxu0 %v12602_v32  ;;  %8739 = vmatpush2.bf16.msra.mxu1 %v9179_v38 }
 0x678   : > { %v6291_v57 = vmax.f32 %v6018_v33, 0.0  ;;  %v6402_v4 = vpack.c.bf16 %v6290_v42, %v6288_v14  ;;  %v6022_v27 = vadd.f32 %v6021_v25, %v11899_v0  ;;  %8724 = vmatprep.subr.bf16.mxu1 %v12602_v32 }
 0x679   : > { %v6023_v61 = vpop.f32.mrf.mxu1 }
 0x67a   : > { %v6403_v48 = vpack.c.bf16 %v6291_v57, %v6289_v41  ;;  %v6024_v8 = vadd.f32 %v6023_v61, %v11896_v12  ;;  %v6292_v63 = vmax.f32 %v6022_v27, 0.0  ;;  %7363 = vmatpush2.bf16.msra.mxu0 %v9178_v30 }
 0x67b   : > { %v6025_v2 = vpop.f32.mrf.mxu1  ;;  %7364 = vmatprep.subr.bf16.mxu0 %v12602_v32 }
 0x67c   : > { %v6026_v62 = vadd.f32 %v6025_v2, %v11899_v0  ;;  %6758 = vmatprep.mubr.bf16.mxu0 %v6403_v48  ;;  %v6293_v17 = vmax.f32 %v6024_v8, 0.0 }
 0x67d   : > { %v6027_v10 = vpop.f32.mrf.mxu1  ;;  %6759 = vmatmul.mubr.bf16.gmra.mxu0 %v6402_v4 }
 0x67e   : > { %v6028_v60 = vadd.f32 %v6027_v10, %v11896_v12  ;;  %v6294_v21 = vmax.f32 %v6026_v62, 0.0  ;;  %7365 = vmatpush2.bf16.msra.mxu0 %v9179_v38 }
 0x67f   : > { %v6031_v26 = vpop.f32.mrf.mxu1  ;;  %7366 = vmatprep.subr.bf16.mxu0 %v12602_v32 }
 0x680   : > { %v6295_v20 = vmax.f32 %v6028_v60, 0.0  ;;  %v6404_v39 = vpack.c.bf16 %v6294_v21, %v6292_v63  ;;  %v6032_v51 = vadd.f32 %v6031_v26, %v11899_v0 }
 0x681   : > { %v6033_v46 = vpop.f32.mrf.mxu1 }
 0x682   : > { %v6405_v6 = vpack.c.bf16 %v6295_v20, %v6293_v17  ;;  %v6034_v47 = vadd.f32 %v6033_v46, %v11896_v12  ;;  %v6296_v31 = vmax.f32 %v6032_v51, 0.0  ;;  %v9180_v20 = vld [vmem:[#allocation8 + $0x40] sm:$0xff]  }
 0x683   : > { %v6035_v19 = vpop.f32.mrf.mxu1  ;;  %8740 = vmatpush2.bf16.msra.mxu1 %v9180_v20  ;;  %7367 = vmatpush2.bf16.msra.mxu0 %v9180_v20 }
 0x684   : > { %v6036_v37 = vadd.f32 %v6035_v19, %v11899_v0  ;;  %6768 = vmatprep.mubr.bf16.mxu0 %v6405_v6  ;;  %v6297_v13 = vmax.f32 %v6034_v47, 0.0 }
 0x685   : > { %v6037_v54 = vpop.f32.mrf.mxu1  ;;  %6769 = vmatmul.mubr.bf16.gmra.mxu0 %v6404_v39 }
 0x686   : > { %v6038_v58 = vadd.f32 %v6037_v54, %v11896_v12  ;;  %v6298_v11 = vmax.f32 %v6036_v37, 0.0 }
 0x687   : > { %v6041_v18 = vpop.f32.mrf.mxu1 }
 0x688   : > { %v6299_v22 = vmax.f32 %v6038_v58, 0.0  ;;  %v6406_v23 = vpack.c.bf16 %v6298_v11, %v6296_v31  ;;  %v6042_v59 = vadd.f32 %v6041_v18, %v11899_v0 }
 0x689   : > { %v6043_v28 = vpop.f32.mrf.mxu1 }
 0x68a   : > { %v6407_v53 = vpack.c.bf16 %v6299_v22, %v6297_v13  ;;  %v6044_v52 = vadd.f32 %v6043_v28, %v11896_v12  ;;  %v6300_v1 = vmax.f32 %v6042_v59, 0.0 }
 0x68b   : > { %v6045_v45 = vpop.f32.mrf.mxu1 }
 0x68c   : > { %v6046_v5 = vadd.f32 %v6045_v45, %v11899_v0  ;;  %6778 = vmatprep.mubr.bf16.mxu0 %v6407_v53  ;;  %v6301_v15 = vmax.f32 %v6044_v52, 0.0 }
 0x68d   : > { %v6047_v43 = vpop.f32.mrf.mxu1  ;;  %6779 = vmatmul.mubr.bf16.gmra.mxu0 %v6406_v23 }
 0x68e   : > { %v6048_v50 = vadd.f32 %v6047_v43, %v11896_v12  ;;  %v6302_v7 = vmax.f32 %v6046_v5, 0.0 }
 0x68f   : > { %v6051_v24 = vpop.f32.mrf.mxu1 }
 0x690   : > { %v6303_v40 = vmax.f32 %v6048_v50, 0.0  ;;  %v6408_v36 = vpack.c.bf16 %v6302_v7, %v6300_v1  ;;  %v6052_v34 = vadd.f32 %v6051_v24, %v11899_v0 }
 0x691   : > { %v6053_v49 = vpop.f32.mrf.mxu1 }
 0x692   : > { %v6409_v3 = vpack.c.bf16 %v6303_v40, %v6301_v15  ;;  %v6054_v44 = vadd.f32 %v6053_v49, %v11896_v12  ;;  %v6304_v61 = vmax.f32 %v6052_v34, 0.0 }
 0x693   : > { %v6055_v16 = vpop.f32.mrf.mxu1 }
 0x694   : > { %v6056_v56 = vadd.f32 %v6055_v16, %v11899_v0  ;;  %6788 = vmatprep.mubr.bf16.mxu0 %v6409_v3  ;;  %v6305_v25 = vmax.f32 %v6054_v44, 0.0 }
 0x695   : > { %v6057_v29 = vpop.f32.mrf.mxu1  ;;  %6789 = vmatmul.mubr.bf16.gmra.mxu0 %v6408_v36 }
 0x696   : > { %v6058_v9 = vadd.f32 %v6057_v29, %v11896_v12  ;;  %v6306_v41 = vmax.f32 %v6056_v56, 0.0 }
 0x697   : > { %v6061_v33 = vpop.f32.mrf.mxu1 }
 0x698   : > { %v6307_v42 = vmax.f32 %v6058_v9, 0.0  ;;  %v6410_v2 = vpack.c.bf16 %v6306_v41, %v6304_v61  ;;  %v6062_v62 = vadd.f32 %v6061_v33, %v11899_v0 }
 0x699   : > { %v6063_v57 = vpop.f32.mrf.mxu1 }
 0x69a   : > { %v6411_v14 = vpack.c.bf16 %v6307_v42, %v6305_v25  ;;  %v6064_v4 = vadd.f32 %v6063_v57, %v11896_v12  ;;  %v6308_v30 = vmax.f32 %v6062_v62, 0.0 }
 0x69b   : > { %v6065_v48 = vpop.f32.mrf.mxu1 }
 0x69c   : > { %v6066_v8 = vadd.f32 %v6065_v48, %v11899_v0  ;;  %6798 = vmatprep.mubr.bf16.mxu0 %v6411_v14  ;;  %v6309_v60 = vmax.f32 %v6064_v4, 0.0 }
 0x69d   : > { %v6067_v32 = vpop.f32.mrf.mxu1  ;;  %6799 = vmatmul.mubr.bf16.gmra.mxu0 %v6410_v2 }
 0x69e   : > { %v6068_v10 = vadd.f32 %v6067_v32, %v11896_v12  ;;  %v6310_v26 = vmax.f32 %v6066_v8, 0.0 }
 0x69f   : > { %v6071_v27 = vpop.f32.mrf.mxu1 }
 0x6a0   : > { %v6311_v17 = vmax.f32 %v6068_v10, 0.0  ;;  %v6412_v6 = vpack.c.bf16 %v6310_v26, %v6308_v30  ;;  %v6072_v37 = vadd.f32 %v6071_v27, %v11899_v0 }
 0x6a1   : > { %v6073_v21 = vpop.f32.mrf.mxu1 }
 0x6a2   : > { %v6413_v46 = vpack.c.bf16 %v6311_v17, %v6309_v60  ;;  %v6074_v19 = vadd.f32 %v6073_v21, %v11896_v12  ;;  %v6312_v22 = vmax.f32 %v6072_v37, 0.0 }
 0x6a3   : > { %v6075_v63 = vpop.f32.mrf.mxu1 }
 0x6a4   : > { %v6076_v39 = vadd.f32 %v6075_v63, %v11899_v0  ;;  %6808 = vmatprep.mubr.bf16.mxu0 %v6413_v46  ;;  %v6313_v58 = vmax.f32 %v6074_v19, 0.0 }
 0x6a5   : > { %v6077_v47 = vpop.f32.mrf.mxu1  ;;  %6809 = vmatmul.mubr.bf16.gmra.mxu0 %v6412_v6 }
 0x6a6   : > { %v6078_v54 = vadd.f32 %v6077_v47, %v11896_v12  ;;  %v6314_v18 = vmax.f32 %v6076_v39, 0.0 }
 0x6a7   : > { %v6081_v51 = vpop.f32.mrf.mxu1 }
 0x6a8   : > { %v6315_v13 = vmax.f32 %v6078_v54, 0.0  ;;  %v6414_v53 = vpack.c.bf16 %v6314_v18, %v6312_v22  ;;  %v6082_v5 = vadd.f32 %v6081_v51, %v11899_v0 }
 0x6a9   : > { %v6083_v11 = vpop.f32.mrf.mxu1 }
 0x6aa   : > { %v6415_v28 = vpack.c.bf16 %v6315_v13, %v6313_v58  ;;  %v6084_v45 = vadd.f32 %v6083_v11, %v11896_v12  ;;  %v6316_v40 = vmax.f32 %v6082_v5, 0.0 }
 0x6ab   : > { %v6085_v31 = vpop.f32.mrf.mxu1 }
 0x6ac   : > { %v6086_v23 = vadd.f32 %v6085_v31, %v11899_v0  ;;  %6818 = vmatprep.mubr.bf16.mxu0 %v6415_v28  ;;  %v6317_v50 = vmax.f32 %v6084_v45, 0.0 }
 0x6ad   : > { %v6087_v52 = vpop.f32.mrf.mxu1  ;;  %6819 = vmatmul.mubr.bf16.gmra.mxu0 %v6414_v53 }
 0x6ae   : > { %v6088_v43 = vadd.f32 %v6087_v52, %v11896_v12  ;;  %v6318_v24 = vmax.f32 %v6086_v23, 0.0 }
 0x6af   : > { %v6091_v59 = vpop.f32.mrf.mxu1 }
 0x6b0   : > { %v6319_v15 = vmax.f32 %v6088_v43, 0.0  ;;  %v6416_v1 = vpack.c.bf16 %v6318_v24, %v6316_v40  ;;  %v6092_v44 = vadd.f32 %v6091_v59, %v11899_v0 }
 0x6b1   : > { %v6093_v7 = vpop.f32.mrf.mxu1 }
 0x6b2   : > { %v6417_v49 = vpack.c.bf16 %v6319_v15, %v6317_v50  ;;  %v6094_v3 = vadd.f32 %v6093_v7, %v11896_v12  ;;  %v6320_v41 = vmax.f32 %v6092_v44, 0.0 }
 0x6b3   : > { %v6095_v38 = vpop.f32.mrf.mxu1 }
 0x6b4   : > { %v6096_v16 = vadd.f32 %v6095_v38, %v11899_v0  ;;  %6828 = vmatprep.mubr.bf16.mxu0 %v6417_v49  ;;  %v6321_v34 = vmax.f32 %v6094_v3, 0.0 }
 0x6b5   : > { %v6097_v36 = vpop.f32.mrf.mxu1  ;;  %6829 = vmatmul.mubr.bf16.gmra.mxu0 %v6416_v1 }
 0x6b6   : > { %v6098_v56 = vadd.f32 %v6097_v36, %v11896_v12  ;;  %v6322_v9 = vmax.f32 %v6096_v16, 0.0 }
 0x6b7   : > { %v6101_v29 = vpop.f32.mrf.mxu1 }
 0x6b8   : > { %v6323_v33 = vmax.f32 %v6098_v56, 0.0  ;;  %v6418_v61 = vpack.c.bf16 %v6322_v9, %v6320_v41  ;;  %v6102_v4 = vadd.f32 %v6101_v29, %v11899_v0 }
 0x6b9   : > { %v6103_v25 = vpop.f32.mrf.mxu1 }
 0x6ba   : > { %v6419_v42 = vpack.c.bf16 %v6323_v33, %v6321_v34  ;;  %v6104_v14 = vadd.f32 %v6103_v25, %v11896_v12  ;;  %v6324_v26 = vmax.f32 %v6102_v4, 0.0 }
 0x6bb   : > { %v6105_v57 = vpop.f32.mrf.mxu1 }
 0x6bc   : > { %v6106_v48 = vadd.f32 %v6105_v57, %v11899_v0  ;;  %6838 = vmatprep.mubr.bf16.mxu0 %v6419_v42  ;;  %v6325_v62 = vmax.f32 %v6104_v14, 0.0 }
 0x6bd   : > { %v6107_v2 = vpop.f32.mrf.mxu1  ;;  %6839 = vmatmul.mubr.bf16.gmra.mxu0 %v6418_v61 }
 0x6be   : > { %v6108_v8 = vadd.f32 %v6107_v2, %v11896_v12  ;;  %v6326_v10 = vmax.f32 %v6106_v48, 0.0 }
 0x6bf   : > { %v6111_v32 = vpop.f32.mrf.mxu1 }
 0x6c0   : > { %v6327_v27 = vmax.f32 %v6108_v8, 0.0  ;;  %v6420_v20 = vpack.c.bf16 %v6326_v10, %v6324_v26  ;;  %v6112_v6 = vadd.f32 %v6111_v32, %v11899_v0 }
 0x6c1   : > { %v6113_v60 = vpop.f32.mrf.mxu1 }
 0x6c2   : > { %v6421_v17 = vpack.c.bf16 %v6327_v27, %v6325_v62  ;;  %v6114_v30 = vadd.f32 %v6113_v60, %v11896_v12  ;;  %v6328_v58 = vmax.f32 %v6112_v6, 0.0 }
 0x6c3   : > { %v6115_v21 = vpop.f32.mrf.mxu1 }
 0x6c4   : > { %v6116_v46 = vadd.f32 %v6115_v21, %v11899_v0  ;;  %6848 = vmatprep.mubr.bf16.mxu0 %v6421_v17  ;;  %v6329_v47 = vmax.f32 %v6114_v30, 0.0 }
 0x6c5   : > { %v6117_v63 = vpop.f32.mrf.mxu1  ;;  %6849 = vmatmul.mubr.bf16.gmra.mxu0 %v6420_v20 }
 0x6c6   : > { %v6118_v19 = vadd.f32 %v6117_v63, %v11896_v12  ;;  %v6330_v37 = vmax.f32 %v6116_v46, 0.0 }
 0x6c7   : > { %v6121_v39 = vpop.f32.mrf.mxu1 }
 0x6c8   : > { %v6331_v54 = vmax.f32 %v6118_v19, 0.0  ;;  %v6422_v11 = vpack.c.bf16 %v6330_v37, %v6328_v58  ;;  %v6122_v53 = vadd.f32 %v6121_v39, %v11899_v0 }
 0x6c9   : > { %v6123_v51 = vpop.f32.mrf.mxu1 }
 0x6ca   : > { %v6423_v18 = vpack.c.bf16 %v6331_v54, %v6329_v47  ;;  %v6124_v22 = vadd.f32 %v6123_v51, %v11896_v12  ;;  %v6332_v50 = vmax.f32 %v6122_v53, 0.0 }
 0x6cb   : > { %v6125_v13 = vpop.f32.mrf.mxu1 }
 0x6cc   : > { %v6126_v28 = vadd.f32 %v6125_v13, %v11899_v0  ;;  %6858 = vmatprep.mubr.bf16.mxu0 %v6423_v18  ;;  %v6333_v52 = vmax.f32 %v6124_v22, 0.0 }
 0x6cd   : > { %v6127_v31 = vpop.f32.mrf.mxu1  ;;  %6859 = vmatmul.mubr.bf16.gmra.mxu0 %v6422_v11 }
 0x6ce   : > { %v6128_v45 = vadd.f32 %v6127_v31, %v11896_v12  ;;  %v6334_v5 = vmax.f32 %v6126_v28, 0.0 }
 0x6cf   : > { %v6131_v23 = vpop.f32.mrf.mxu1 }
 0x6d0   : > { %v6335_v43 = vmax.f32 %v6128_v45, 0.0  ;;  %v6424_v7 = vpack.c.bf16 %v6334_v5, %v6332_v50  ;;  %v6132_v1 = vadd.f32 %v6131_v23, %v11899_v0 }
 0x6d1   : > { %v6133_v59 = vpop.f32.mrf.mxu1 }
 0x6d2   : > { %v6425_v24 = vpack.c.bf16 %v6335_v43, %v6333_v52  ;;  %v6134_v40 = vadd.f32 %v6133_v59, %v11896_v12  ;;  %v6336_v34 = vmax.f32 %v6132_v1, 0.0 }
 0x6d3   : > { %v6135_v15 = vpop.f32.mrf.mxu1 }
 0x6d4   : > { %v6136_v49 = vadd.f32 %v6135_v15, %v11899_v0  ;;  %6868 = vmatprep.mubr.bf16.mxu0 %v6425_v24  ;;  %v6337_v36 = vmax.f32 %v6134_v40, 0.0 }
 0x6d5   : > { %v6137_v38 = vpop.f32.mrf.mxu1  ;;  %6869 = vmatmul.mubr.bf16.gmra.mxu0 %v6424_v7 }
 0x6d6   : > { %v6138_v3 = vadd.f32 %v6137_v38, %v11896_v12  ;;  %v6338_v44 = vmax.f32 %v6136_v49, 0.0 }
 0x6d7   : > { %v6141_v16 = vpop.f32.mrf.mxu1 }
 0x6d8   : > { %v6339_v56 = vmax.f32 %v6138_v3, 0.0  ;;  %v6426_v25 = vpack.c.bf16 %v6338_v44, %v6336_v34  ;;  %v6142_v61 = vadd.f32 %v6141_v16, %v11899_v0 }
 0x6d9   : > { %v6143_v29 = vpop.f32.mrf.mxu1 }
 0x6da   : > { %v6427_v9 = vpack.c.bf16 %v6339_v56, %v6337_v36  ;;  %v6144_v41 = vadd.f32 %v6143_v29, %v11896_v12  ;;  %v6340_v62 = vmax.f32 %v6142_v61, 0.0 }
 0x6db   : > { %v6145_v33 = vpop.f32.mrf.mxu1 }
 0x6dc   : > { %v6146_v42 = vadd.f32 %v6145_v33, %v11899_v0  ;;  %6878 = vmatprep.mubr.bf16.mxu0 %v6427_v9  ;;  %v6341_v2 = vmax.f32 %v6144_v41, 0.0 }
 0x6dd   : > { %v6147_v57 = vpop.f32.mrf.mxu1  ;;  %6879 = vmatmul.mubr.bf16.gmra.mxu0 %v6426_v25 }
 0x6de   : > { %v6148_v14 = vadd.f32 %v6147_v57, %v11896_v12  ;;  %v6342_v4 = vmax.f32 %v6146_v42, 0.0 }
 0x6df   : > { %v6151_v48 = vpop.f32.mrf.mxu1 }
 0x6e0   : > { %v6343_v8 = vmax.f32 %v6148_v14, 0.0  ;;  %v6428_v60 = vpack.c.bf16 %v6342_v4, %v6340_v62  ;;  %v6152_v20 = vadd.f32 %v6151_v48, %v11899_v0 }
 0x6e1   : > { %v6153_v32 = vpop.f32.mrf.mxu1 }
 0x6e2   : > { %v6429_v10 = vpack.c.bf16 %v6343_v8, %v6341_v2  ;;  %v6154_v26 = vadd.f32 %v6153_v32, %v11896_v12  ;;  %v6344_v47 = vmax.f32 %v6152_v20, 0.0 }
 0x6e3   : > { %v6155_v27 = vpop.f32.mrf.mxu1 }
 0x6e4   : > { %v6156_v17 = vadd.f32 %v6155_v27, %v11899_v0  ;;  %6888 = vmatprep.mubr.bf16.mxu0 %v6429_v10  ;;  %v6345_v63 = vmax.f32 %v6154_v26, 0.0 }
 0x6e5   : > { %v6157_v21 = vpop.f32.mrf.mxu1  ;;  %6889 = vmatmul.mubr.bf16.gmra.mxu0 %v6428_v60 }
 0x6e6   : > { %v6158_v30 = vadd.f32 %v6157_v21, %v11896_v12  ;;  %v6346_v6 = vmax.f32 %v6156_v17, 0.0 }
 0x6e7   : > { %v6161_v46 = vpop.f32.mrf.mxu1 }
 0x6e8   : > { %v6347_v19 = vmax.f32 %v6158_v30, 0.0  ;;  %v6430_v51 = vpack.c.bf16 %v6346_v6, %v6344_v47  ;;  %v6162_v11 = vadd.f32 %v6161_v46, %v11899_v0 }
 0x6e9   : > { %v6163_v39 = vpop.f32.mrf.mxu1 }
 0x6ea   : > { %v6431_v37 = vpack.c.bf16 %v6347_v19, %v6345_v63  ;;  %v6164_v58 = vadd.f32 %v6163_v39, %v11896_v12  ;;  %v6348_v52 = vmax.f32 %v6162_v11, 0.0 }
 0x6eb   : > { %v6165_v54 = vpop.f32.mrf.mxu1 }
 0x6ec   : > { %v6166_v18 = vadd.f32 %v6165_v54, %v11899_v0  ;;  %6898 = vmatprep.mubr.bf16.mxu0 %v6431_v37  ;;  %v6349_v31 = vmax.f32 %v6164_v58, 0.0 }
 0x6ed   : > { %v6167_v13 = vpop.f32.mrf.mxu1  ;;  %6899 = vmatmul.mubr.bf16.gmra.mxu0 %v6430_v51 }
 0x6ee   : > { %v6168_v22 = vadd.f32 %v6167_v13, %v11896_v12  ;;  %v6350_v53 = vmax.f32 %v6166_v18, 0.0 }
 0x6ef   : > { %v6171_v28 = vpop.f32.mrf.mxu1 }
 0x6f0   : > { %v6351_v45 = vmax.f32 %v6168_v22, 0.0  ;;  %v6432_v59 = vpack.c.bf16 %v6350_v53, %v6348_v52  ;;  %v6172_v7 = vadd.f32 %v6171_v28, %v11899_v0 }
 0x6f1   : > { %v6173_v23 = vpop.f32.mrf.mxu1 }
 0x6f2   : > { %v6433_v5 = vpack.c.bf16 %v6351_v45, %v6349_v31  ;;  %v6174_v50 = vadd.f32 %v6173_v23, %v11896_v12  ;;  %v6352_v36 = vmax.f32 %v6172_v7, 0.0 }
 0x6f3   : > { %v6175_v43 = vpop.f32.mrf.mxu1 }
 0x6f4   : > { %v6176_v24 = vadd.f32 %v6175_v43, %v11899_v0  ;;  %6908 = vmatprep.mubr.bf16.mxu0 %v6433_v5  ;;  %v6353_v38 = vmax.f32 %v6174_v50, 0.0 }
 0x6f5   : > { %v6177_v15 = vpop.f32.mrf.mxu1  ;;  %6909 = vmatmul.mubr.bf16.gmra.mxu0 %v6432_v59 }
 0x6f6   : > { %v6178_v40 = vadd.f32 %v6177_v15, %v11896_v12  ;;  %v6354_v1 = vmax.f32 %v6176_v24, 0.0 }
 0x6f7   : > { %v6181_v49 = vpop.f32.mrf.mxu1 }
 0x6f8   : > { %v6355_v3 = vmax.f32 %v6178_v40, 0.0  ;;  %v6434_v29 = vpack.c.bf16 %v6354_v1, %v6352_v36  ;;  %v6182_v25 = vadd.f32 %v6181_v49, %v11899_v0 }
 0x6f9   : > { %v6183_v16 = vpop.f32.mrf.mxu1 }
 0x6fa   : > { %v6435_v44 = vpack.c.bf16 %v6355_v3, %v6353_v38  ;;  %v6184_v34 = vadd.f32 %v6183_v16, %v11896_v12  ;;  %v6356_v2 = vmax.f32 %v6182_v25, 0.0 }
 0x6fb   : > { %v6185_v56 = vpop.f32.mrf.mxu1 }
 0x6fc   : > { %v6186_v9 = vadd.f32 %v6185_v56, %v11899_v0  ;;  %6918 = vmatprep.mubr.bf16.mxu0 %v6435_v44  ;;  %v6357_v57 = vmax.f32 %v6184_v34, 0.0 }
 0x6fd   : > { %v6187_v33 = vpop.f32.mrf.mxu1  ;;  %6919 = vmatmul.mubr.bf16.gmra.mxu0 %v6434_v29 }
 0x6fe   : > { %v6188_v41 = vadd.f32 %v6187_v33, %v11896_v12  ;;  %v6358_v61 = vmax.f32 %v6186_v9, 0.0 }
 0x6ff   : > { %v6191_v42 = vpop.f32.mrf.mxu1 }
 0x700   : > { %v6359_v14 = vmax.f32 %v6188_v41, 0.0  ;;  %v6436_v32 = vpack.c.bf16 %v6358_v61, %v6356_v2  ;;  %v6192_v60 = vadd.f32 %v6191_v42, %v11899_v0 }
 0x701   : > { %v6193_v48 = vpop.f32.mrf.mxu1 }
 0x702   : > { %v6437_v4 = vpack.c.bf16 %v6359_v14, %v6357_v57  ;;  %v6194_v62 = vadd.f32 %v6193_v48, %v11896_v12  ;;  %v6360_v6 = vmax.f32 %v6192_v60, 0.0  ;;  %v6484_v48 = vld [vmem:[%s12466_s17] sm:$0x3] }
 0x703   : > { %v6195_v8 = vpop.f32.mrf.mxu1  ;;  %v12135_v60 = vrot.slane %v6484_v48, %v9936_v35 }
 0x704   : > { %v6196_v10 = vadd.f32 %v6195_v8, %v11899_v0  ;;  %6928 = vmatprep.mubr.bf16.mxu0 %v6437_v4  ;;  %v6361_v21 = vmax.f32 %v6194_v62, 0.0 }
 0x705   : > { %v6197_v27 = vpop.f32.mrf.mxu1  ;;  %v12095_v17 = vpop.f32.mrf.mxu0  ;;  %6929 = vmatmul.mubr.bf16.gmra.mxu0 %v6436_v32 }
 0x706   : > { %v6198_v26 = vadd.f32 %v6197_v27, %v11896_v12  ;;  %v6362_v20 = vmax.f32 %v6196_v10, 0.0 }
 0x707   : > { %v6201_v46 = vpop.f32.mrf.mxu1  ;;  %v12097_v63 = vpop.f32.mrf.mxu0 }
 0x708   : > { %v6363_v30 = vmax.f32 %v6198_v26, 0.0  ;;  %v6438_v37 = vpack.c.bf16 %v6362_v20, %v6360_v6  ;;  %v6202_v22 = vadd.f32 %v6201_v46, %v11899_v0  ;;  %v12138_v20 = vrot.slane %v6484_v48, %v12645_v55 }
 0x709   : > { %v6203_v19 = vpop.f32.mrf.mxu1  ;;  %v12099_v39 = vpop.f32.mrf.mxu0 }
 0x70a   : > { %v6439_v47 = vpack.c.bf16 %v6363_v30, %v6361_v21  ;;  %v6204_v18 = vadd.f32 %v6203_v19, %v11896_v12  ;;  %v6364_v59 = vmax.f32 %v6202_v22, 0.0 }
 0x70b   : > { %v6205_v54 = vpop.f32.mrf.mxu1  ;;  %v12101_v51 = vpop.f32.mrf.mxu0 }
 0x70c   : > { %6938 = vmatprep.mubr.bf16.mxu0 %v6439_v47  ;;  %v6206_v58 = vadd.f32 %v6205_v54, %v11899_v0  ;;  %v6365_v52 = vmax.f32 %v6204_v18, 0.0 }
 0x70d   : > { %v6207_v13 = vpop.f32.mrf.mxu1  ;;  %v12105_v11 = vpop.f32.mrf.mxu0  ;;  %6939 = vmatmul.mubr.bf16.gmra.mxu0 %v6438_v37 }
 0x70e   : > { %v6208_v28 = vadd.f32 %v6207_v13, %v11896_v12  ;;  %v6366_v45 = vmax.f32 %v6206_v58, 0.0 }
 0x70f   : > { %v6211_v31 = vpop.f32.mrf.mxu1  ;;  %v12109_v53 = vpop.f32.mrf.mxu0 }
 0x710   : > { %v6367_v23 = vmax.f32 %v6208_v28, 0.0  ;;  %v6440_v7 = vpack.c.bf16 %v6366_v45, %v6364_v59  ;;  %v6212_v3 = vadd.f32 %v6211_v31, %v11899_v0 }
 0x711   : > { %v6213_v5 = vpop.f32.mrf.mxu1  ;;  %v12111_v43 = vpop.f32.mrf.mxu0 }
 0x712   : > { %v6441_v15 = vpack.c.bf16 %v6367_v23, %v6365_v52  ;;  %v6214_v49 = vadd.f32 %v6213_v5, %v11896_v12  ;;  %v6368_v25 = vmax.f32 %v6212_v3, 0.0 }
 0x713   : > { %v6215_v50 = vpop.f32.mrf.mxu1  ;;  %v12113_v24 = vpop.f32.mrf.mxu0 }
 0x714   : > { %v6216_v40 = vadd.f32 %v6215_v50, %v11899_v0  ;;  %6948 = vmatprep.mubr.bf16.mxu0 %v6441_v15  ;;  %v6369_v34 = vmax.f32 %v6214_v49, 0.0 }
 0x715   : > { %v6217_v38 = vpop.f32.mrf.mxu1  ;;  %v12117_v1 = vpop.f32.mrf.mxu0  ;;  %6949 = vmatmul.mubr.bf16.gmra.mxu0 %v6440_v7 }
 0x716   : > { %v6218_v16 = vadd.f32 %v6217_v38, %v11896_v12  ;;  %v6370_v56 = vmax.f32 %v6216_v40, 0.0 }
 0x717   : > { %v6221_v36 = vpop.f32.mrf.mxu1  ;;  %v12121_v44 = vpop.f32.mrf.mxu0 }
 0x718   : > { %v6371_v29 = vmax.f32 %v6218_v16, 0.0  ;;  %v6442_v61 = vpack.c.bf16 %v6370_v56, %v6368_v25  ;;  %v6222_v32 = vadd.f32 %v6221_v36, %v11899_v0 }
 0x719   : > { %v6223_v9 = vpop.f32.mrf.mxu1  ;;  %v12123_v33 = vpop.f32.mrf.mxu0 }
 0x71a   : > { %v6443_v57 = vpack.c.bf16 %v6371_v29, %v6369_v34  ;;  %v6224_v2 = vadd.f32 %v6223_v9, %v11896_v12  ;;  %v6372_v19 = vmax.f32 %v6222_v32, 0.0 }
 0x71b   : > { %v6225_v41 = vpop.f32.mrf.mxu1  ;;  %v12125_v42 = vpop.f32.mrf.mxu0 }
 0x71c   : > { %v6226_v14 = vadd.f32 %v6225_v41, %v11899_v0  ;;  %6958 = vmatprep.mubr.bf16.mxu0 %v6443_v57  ;;  %v6373_v30 = vmax.f32 %v6224_v2, 0.0 }
 0x71d   : > { %v6227_v4 = vpop.f32.mrf.mxu1  ;;  %v6720_v8 = vpop.f32.mrf.mxu0  ;;  %6959 = vmatmul.mubr.bf16.gmra.mxu0 %v6442_v61 }
 0x71e   : > { %v6228_v62 = vadd.f32 %v6227_v4, %v11896_v12  ;;  %v6374_v26 = vmax.f32 %v6226_v14, 0.0  ;;  %v6721_v35 = vadd.f32 %v6720_v8, %v12135_v60 }
 0x71f   : > { %v6231_v10 = vpop.f32.mrf.mxu1  ;;  %v6722_v27 = vpop.f32.mrf.mxu0 }
 0x720   : > { %v6375_v21 = vmax.f32 %v6228_v62, 0.0  ;;  %v6723_v37 = vadd.f32 %v6722_v27, %v12138_v20  ;;  %v6444_v13 = vpack.c.bf16 %v6374_v26, %v6372_v19  ;;  %v6232_v23 = vadd.f32 %v6231_v10, %v11899_v0 }
 0x721   : > { %v6233_v46 = vpop.f32.mrf.mxu1  ;;  %v6724_v6 = vpop.f32.mrf.mxu0  ;;  %v7021_v40 = vmax.f32 %v6721_v35, 0.0 }
 0x722   : > { %v6725_v47 = vadd.f32 %v6724_v6, %v12135_v60  ;;  %v6445_v18 = vpack.c.bf16 %v6375_v21, %v6373_v30  ;;  %v6234_v55 = vadd.f32 %v6233_v46, %v11896_v12  ;;  %v7022_v50 = vmax.f32 %v6723_v37, 0.0 }
 0x723   : > { %v6235_v54 = vpop.f32.mrf.mxu1  ;;  %v6726_v58 = vpop.f32.mrf.mxu0  ;;  %v6376_v29 = vmax.f32 %v6232_v23, 0.0 }
 0x724   : > { %v6236_v22 = vadd.f32 %v6235_v54, %v11899_v0  ;;  %v6727_v28 = vadd.f32 %v6726_v58, %v12138_v20  ;;  %6968 = vmatprep.mubr.bf16.mxu0 %v6445_v18  ;;  %v7023_v52 = vmax.f32 %v6725_v47, 0.0  ;;  %v6377_v3 = vmax.f32 %v6234_v55, 0.0 }
 0x725   : > { %v6237_v31 = vpop.f32.mrf.mxu1  ;;  %v6730_v45 = vpop.f32.mrf.mxu0  ;;  %6969 = vmatmul.mubr.bf16.gmra.mxu0 %v6444_v13 }
 0x726   : > { %v7024_v5 = vmax.f32 %v6727_v28, 0.0  ;;  %v6238_v59 = vadd.f32 %v6237_v31, %v11896_v12  ;;  %v6378_v49 = vmax.f32 %v6236_v22, 0.0  ;;  %v7143_v34 = vpack.c.bf16 %v7023_v52, %v7021_v40 }
 0x727   : > { %v6241_v15 = vpop.f32.mrf.mxu1  ;;  %v6732_v7 = vpop.f32.mrf.mxu0  ;;  %v6731_v48 = vadd.f32 %v6730_v45, %v12135_v60 }
 0x728   : > { %v6379_v38 = vmax.f32 %v6238_v59, 0.0  ;;  %v7144_v56 = vpack.c.bf16 %v7024_v5, %v7022_v50  ;;  %v6733_v25 = vadd.f32 %v6732_v7, %v12138_v20  ;;  %v6446_v14 = vpack.c.bf16 %v6378_v49, %v6376_v29 }
 0x729   : > { %v6243_v16 = vpop.f32.mrf.mxu1  ;;  %v6734_v36 = vpop.f32.mrf.mxu0  ;;  %v6242_v10 = vadd.f32 %v6241_v15, %v11899_v0  ;;  %v7025_v19 = vmax.f32 %v6731_v48, 0.0  ;;  %v6697_v7 = vadd.f32 %v12101_v51, %v12138_v20  ;;  %v6693_v29 = vadd.f32 %v12097_v63, %v12138_v20 }
 0x72a   : > { %v6735_v9 = vadd.f32 %v6734_v36, %v12135_v60  ;;  %7392 = vmatprep.mubr.bf16.mxu1 %v7144_v56  ;;  %v6447_v61 = vpack.c.bf16 %v6379_v38, %v6377_v3  ;;  %v6244_v8 = vadd.f32 %v6243_v16, %v11896_v12  ;;  %v7026_v30 = vmax.f32 %v6733_v25, 0.0 }
 0x72b   : > { %v6245_v41 = vpop.f32.mrf.mxu1  ;;  %v6736_v57 = vpop.f32.mrf.mxu0  ;;  %7393 = vmatmul.mubr.bf16.vlgmr.msra.gmra.mxu1 %v7143_v34  ;;  %v6380_v35 = vmax.f32 %v6242_v10, 0.0  ;;  %v6695_v63 = vadd.f32 %v12099_v39, %v12135_v60  ;;  %v6703_v39 = vadd.f32 %v12109_v53, %v12138_v20  ;;  %v6705_v53 = vadd.f32 %v12111_v43, %v12135_v60 }
 0x72c   : > { %v6246_v2 = vadd.f32 %v6245_v41, %v11899_v0  ;;  %v6737_v4 = vadd.f32 %v6736_v57, %v12138_v20  ;;  %6978 = vmatprep.mubr.bf16.mxu0 %v6447_v61  ;;  %v7027_v27 = vmax.f32 %v6735_v9, 0.0  ;;  %v6381_v54 = vmax.f32 %v6244_v8, 0.0 }
 0x72d   : > { %v6247_v32 = vpop.f32.mrf.mxu1  ;;  %v6740_v62 = vpop.f32.mrf.mxu0  ;;  %6979 = vmatmul.mubr.bf16.gmra.mxu0 %v6446_v14  ;;  %v7012_v61 = vmax.f32 %v6697_v7, 0.0  ;;  %v7010_v8 = vmax.f32 %v6693_v29, 0.0  ;;  %v6713_v43 = vadd.f32 %v12121_v44, %v12138_v20  ;;  %v6715_v44 = vadd.f32 %v12123_v33, %v12135_v60 }
 0x72e   : > { %v7028_v26 = vmax.f32 %v6737_v4, 0.0  ;;  %v6248_v21 = vadd.f32 %v6247_v32, %v11896_v12  ;;  %v6382_v47 = vmax.f32 %v6246_v2, 0.0  ;;  %v7145_v22 = vpack.c.bf16 %v7027_v27, %v7025_v19 }
 0x72f   : > { %v6251_v46 = vpop.f32.mrf.mxu1  ;;  %v6742_v6 = vpop.f32.mrf.mxu0  ;;  %v6741_v31 = vadd.f32 %v6740_v62, %v12135_v60 }
 0x730   : > { %v6383_v37 = vmax.f32 %v6248_v21, 0.0  ;;  %v7146_v13 = vpack.c.bf16 %v7028_v26, %v7026_v30  ;;  %v6743_v28 = vadd.f32 %v6742_v6, %v12138_v20  ;;  %v6448_v5 = vpack.c.bf16 %v6382_v47, %v6380_v35 }
 0x731   : > { %v6253_v58 = vpop.f32.mrf.mxu1  ;;  %v6744_v18 = vpop.f32.mrf.mxu0  ;;  %v6252_v40 = vadd.f32 %v6251_v46, %v11899_v0  ;;  %v7029_v34 = vmax.f32 %v6741_v31, 0.0  ;;  %v6707_v26 = vadd.f32 %v12113_v24, %v12138_v20  ;;  %v7138_v30 = vpack.c.bf16 %v7012_v61, %v7010_v8 }
 0x732   : > { %v6745_v55 = vadd.f32 %v6744_v18, %v12135_v60  ;;  %7400 = vmatprep.mubr.bf16.mxu1 %v7146_v13  ;;  %v6449_v52 = vpack.c.bf16 %v6383_v37, %v6381_v54  ;;  %v6254_v59 = vadd.f32 %v6253_v58, %v11896_v12  ;;  %v7030_v3 = vmax.f32 %v6743_v28, 0.0 }
 0x733   : > { %v6255_v45 = vpop.f32.mrf.mxu1  ;;  %v6746_v23 = vpop.f32.mrf.mxu0  ;;  %7401 = vmatmul.mubr.bf16.gmra.mxu1 %v7145_v22  ;;  %v6691_v46 = vadd.f32 %v12095_v17, %v12135_v60  ;;  %v7011_v54 = vmax.f32 %v6695_v63, 0.0  ;;  %v7016_v13 = vmax.f32 %v6707_v26, 0.0  ;;  %v7019_v63 = vmax.f32 %v6715_v44, 0.0 }
 0x734   : > { %v6256_v50 = vadd.f32 %v6255_v45, %v11899_v0  ;;  %v6747_v15 = vadd.f32 %v6746_v23, %v12138_v20  ;;  %6988 = vmatprep.mubr.bf16.mxu0 %v6449_v52  ;;  %v7031_v16 = vmax.f32 %v6745_v55, 0.0  ;;  %v6385_v25 = vmax.f32 %v6254_v59, 0.0 }
 0x735   : > { %v6257_v49 = vpop.f32.mrf.mxu1  ;;  %v6750_v38 = vpop.f32.mrf.mxu0  ;;  %6989 = vmatmul.mubr.bf16.gmra.mxu0 %v6448_v5  ;;  %v6384_v0 = vmax.f32 %v6252_v40, 0.0  ;;  %v7009_v24 = vmax.f32 %v6691_v46, 0.0  ;;  %v7014_v55 = vmax.f32 %v6703_v39, 0.0  ;;  %v6717_v5 = vadd.f32 %v12125_v42, %v12138_v20 }
 0x736   : > { %v7032_v36 = vmax.f32 %v6747_v15, 0.0  ;;  %v6258_v56 = vadd.f32 %v6257_v49, %v11896_v12  ;;  %v6386_v41 = vmax.f32 %v6256_v50, 0.0  ;;  %v7147_v48 = vpack.c.bf16 %v7031_v16, %v7029_v34 }
 0x737   : > { %v6752_v9 = vpop.f32.mrf.mxu0  ;;  %v6751_v10 = vadd.f32 %v6750_v38, %v12135_v60  ;;  %v7137_v45 = vpack.c.bf16 %v7011_v54, %v7009_v24  ;;  %v7140_v50 = vpack.c.bf16 %v7016_v13, %v7014_v55  ;;  %v6701_v15 = vadd.f32 %v12105_v11, %v12135_v60 }
 0x738   : > { %v6387_v57 = vmax.f32 %v6258_v56, 0.0  ;;  %v7148_v51 = vpack.c.bf16 %v7032_v36, %v7030_v3  ;;  %v6753_v2 = vadd.f32 %v6752_v9, %v12138_v20  ;;  %v6450_v62 = vpack.c.bf16 %v6386_v41, %v6384_v0 }
 0x739   : > { %v6754_v14 = vpop.f32.mrf.mxu0  ;;  %v7033_v58 = vmax.f32 %v6751_v10, 0.0  ;;  %v7015_v3 = vmax.f32 %v6705_v53, 0.0  ;;  %v7020_v56 = vmax.f32 %v6717_v5, 0.0  ;;  %v7013_v42 = vmax.f32 %v6701_v15, 0.0 }
 0x73a   : > { %v6755_v4 = vadd.f32 %v6754_v14, %v12135_v60  ;;  %7408 = vmatprep.mubr.bf16.mxu1 %v7148_v51  ;;  %v6451_v12 = vpack.c.bf16 %v6387_v57, %v6385_v25  ;;  %v7034_v6 = vmax.f32 %v6753_v2, 0.0  ;;  %v7018_v25 = vmax.f32 %v6713_v43, 0.0 }
 0x73b   : > { %v6756_v32 = vpop.f32.mrf.mxu0  ;;  %7409 = vmatmul.mubr.bf16.gmra.mxu1 %v7147_v48  ;;  %v7139_v57 = vpack.c.bf16 %v7015_v3, %v7013_v42  ;;  %v6711_v48 = vadd.f32 %v12117_v1, %v12135_v60 }
 0x73c   : > { %v6757_v27 = vadd.f32 %v6756_v32, %v12138_v20  ;;  %6998 = vmatprep.mubr.bf16.mxu0 %v6451_v12  ;;  %v7035_v19 = vmax.f32 %v6755_v4, 0.0  ;;  %v7142_v14 = vpack.c.bf16 %v7020_v56, %v7018_v25 }
 0x73d   : > { %v6760_v21 = vpop.f32.mrf.mxu0  ;;  %6999 = vmatmul.mubr.bf16.gmra.mxu0 %v6450_v62  ;;  %v7017_v10 = vmax.f32 %v6711_v48, 0.0 }
 0x73e   : > { %v7036_v47 = vmax.f32 %v6757_v27, 0.0  ;;  %7368 = vmatprep.mubr.bf16.mxu0 %v7138_v30  ;;  %v7149_v22 = vpack.c.bf16 %v7035_v19, %v7033_v58  ;;  %v6761_v23 = vadd.f32 %v6760_v21, %v12135_v60 }
 0x73f   : > { %v6762_v37 = vpop.f32.mrf.mxu0  ;;  %v7141_v46 = vpack.c.bf16 %v7019_v63, %v7017_v10 }
 0x740   : > { %v7150_v18 = vpack.c.bf16 %v7036_v47, %v7034_v6  ;;  %v6763_v28 = vadd.f32 %v6762_v37, %v12138_v20  ;;  %v7037_v16 = vmax.f32 %v6761_v23, 0.0 }
 0x741   : > { %v6764_v35 = vpop.f32.mrf.mxu0 }
 0x742   : > { %v6765_v17 = vadd.f32 %v6764_v35, %v12135_v60  ;;  %7416 = vmatprep.mubr.bf16.mxu1 %v7150_v18  ;;  %v7038_v7 = vmax.f32 %v6763_v28, 0.0 }
 0x743   : > { %v6766_v31 = vpop.f32.mrf.mxu0  ;;  %7417 = vmatmul.mubr.bf16.gmra.mxu1 %v7149_v22 }
 0x744   : > { %v6767_v52 = vadd.f32 %v6766_v31, %v12138_v20  ;;  %v7039_v40 = vmax.f32 %v6765_v17, 0.0 }
 0x745   : > { %v6770_v59 = vpop.f32.mrf.mxu0  ;;  %7369 = vmatmul.mubr.bf16.vlgmr.msra.gmra.mxu0 %v7137_v45 }
 0x746   : > { %v7040_v49 = vmax.f32 %v6767_v52, 0.0  ;;  %7376 = vmatprep.mubr.bf16.mxu0 %v7140_v50  ;;  %v7151_v34 = vpack.c.bf16 %v7039_v40, %v7037_v16  ;;  %v6771_v51 = vadd.f32 %v6770_v59, %v12135_v60 }
 0x747   : > { %v6772_v38 = vpop.f32.mrf.mxu0 }
 0x748   : > { %v7152_v36 = vpack.c.bf16 %v7040_v49, %v7038_v7  ;;  %v6773_v9 = vadd.f32 %v6772_v38, %v12138_v20  ;;  %v7041_v32 = vmax.f32 %v6771_v51, 0.0 }
 0x749   : > { %v6774_v29 = vpop.f32.mrf.mxu0 }
 0x74a   : > { %v6775_v11 = vadd.f32 %v6774_v29, %v12135_v60  ;;  %7424 = vmatprep.mubr.bf16.mxu1 %v7152_v36  ;;  %v7042_v2 = vmax.f32 %v6773_v9, 0.0 }
 0x74b   : > { %v6776_v41 = vpop.f32.mrf.mxu0  ;;  %7425 = vmatmul.mubr.bf16.gmra.mxu1 %v7151_v34 }
 0x74c   : > { %v6777_v61 = vadd.f32 %v6776_v41, %v12138_v20  ;;  %v7043_v4 = vmax.f32 %v6775_v11, 0.0 }
 0x74d   : > { %v6780_v0 = vpop.f32.mrf.mxu0  ;;  %7377 = vmatmul.mubr.bf16.gmra.mxu0 %v7139_v57 }
 0x74e   : > { %v7044_v12 = vmax.f32 %v6777_v61, 0.0  ;;  %7384 = vmatprep.mubr.bf16.mxu0 %v7142_v14  ;;  %v7153_v27 = vpack.c.bf16 %v7043_v4, %v7041_v32  ;;  %v6781_v1 = vadd.f32 %v6780_v0, %v12135_v60 }
 0x74f   : > { %v6782_v8 = vpop.f32.mrf.mxu0 }
 0x750   : > { %v7154_v62 = vpack.c.bf16 %v7044_v12, %v7042_v2  ;;  %v6783_v26 = vadd.f32 %v6782_v8, %v12138_v20  ;;  %v7045_v58 = vmax.f32 %v6781_v1, 0.0 }
 0x751   : > { %v6784_v33 = vpop.f32.mrf.mxu0 }
 0x752   : > { %v6785_v21 = vadd.f32 %v6784_v33, %v12135_v60  ;;  %7432 = vmatprep.mubr.bf16.mxu1 %v7154_v62  ;;  %v7046_v47 = vmax.f32 %v6783_v26, 0.0 }
 0x753   : > { %v6786_v30 = vpop.f32.mrf.mxu0  ;;  %7433 = vmatmul.mubr.bf16.gmra.mxu1 %v7153_v27 }
 0x754   : > { %v6787_v6 = vadd.f32 %v6786_v30, %v12138_v20  ;;  %v7047_v39 = vmax.f32 %v6785_v21, 0.0 }
 0x755   : > { %v6790_v19 = vpop.f32.mrf.mxu0  ;;  %7385 = vmatmul.mubr.bf16.gmra.mxu0 %v7141_v46 }
 0x756   : > { %v7048_v37 = vmax.f32 %v6787_v6, 0.0  ;;  %v7155_v35 = vpack.c.bf16 %v7047_v39, %v7045_v58  ;;  %v6791_v17 = vadd.f32 %v6790_v19, %v12135_v60 }
 0x757   : > { %v6792_v54 = vpop.f32.mrf.mxu0 }
 0x758   : > { %v7156_v18 = vpack.c.bf16 %v7048_v37, %v7046_v47  ;;  %v6793_v24 = vadd.f32 %v6792_v54, %v12138_v20  ;;  %v7049_v5 = vmax.f32 %v6791_v17, 0.0 }
 0x759   : > { %v6794_v13 = vpop.f32.mrf.mxu0 }
 0x75a   : > { %v6795_v22 = vadd.f32 %v6794_v13, %v12135_v60  ;;  %7440 = vmatprep.mubr.bf16.mxu1 %v7156_v18  ;;  %v7050_v45 = vmax.f32 %v6793_v24, 0.0 }
 0x75b   : > { %v6796_v28 = vpop.f32.mrf.mxu0  ;;  %7441 = vmatmul.mubr.bf16.gmra.mxu1 %v7155_v35 }
 0x75c   : > { %v6797_v55 = vadd.f32 %v6796_v28, %v12138_v20  ;;  %v7051_v53 = vmax.f32 %v6795_v22, 0.0 }
 0x75d   : > { %v6800_v31 = vpop.f32.mrf.mxu0 }
 0x75e   : > { %v7052_v23 = vmax.f32 %v6797_v55, 0.0  ;;  %v7157_v15 = vpack.c.bf16 %v7051_v53, %v7049_v5  ;;  %v6801_v43 = vadd.f32 %v6800_v31, %v12135_v60 }
 0x75f   : > { %v6802_v52 = vpop.f32.mrf.mxu0 }
 0x760   : > { %v7158_v59 = vpack.c.bf16 %v7052_v23, %v7050_v45  ;;  %v6803_v7 = vadd.f32 %v6802_v52, %v12138_v20  ;;  %v7053_v42 = vmax.f32 %v6801_v43, 0.0 }
 0x761   : > { %v6804_v50 = vpop.f32.mrf.mxu0 }
 0x762   : > { %v6805_v40 = vadd.f32 %v6804_v50, %v12135_v60  ;;  %7448 = vmatprep.mubr.bf16.mxu1 %v7158_v59  ;;  %v7054_v16 = vmax.f32 %v6803_v7, 0.0 }
 0x763   : > { %v6806_v49 = vpop.f32.mrf.mxu0  ;;  %7449 = vmatmul.mubr.bf16.gmra.mxu1 %v7157_v15 }
 0x764   : > { %v6807_v38 = vadd.f32 %v6806_v49, %v12138_v20  ;;  %v7055_v36 = vmax.f32 %v6805_v40, 0.0 }
 0x765   : > { %v6810_v3 = vpop.f32.mrf.mxu0 }
 0x766   : > { %v7056_v56 = vmax.f32 %v6807_v38, 0.0  ;;  %v7159_v11 = vpack.c.bf16 %v7055_v36, %v7053_v42  ;;  %v6811_v44 = vadd.f32 %v6810_v3, %v12135_v60 }
 0x767   : > { %v6812_v29 = vpop.f32.mrf.mxu0 }
 0x768   : > { %v7160_v34 = vpack.c.bf16 %v7056_v56, %v7054_v16  ;;  %v6813_v25 = vadd.f32 %v6812_v29, %v12138_v20  ;;  %v7057_v4 = vmax.f32 %v6811_v44, 0.0 }
 0x769   : > { %v6814_v9 = vpop.f32.mrf.mxu0 }
 0x76a   : > { %v6815_v41 = vadd.f32 %v6814_v9, %v12135_v60  ;;  %7456 = vmatprep.mubr.bf16.mxu1 %v7160_v34  ;;  %v7058_v0 = vmax.f32 %v6813_v25, 0.0 }
 0x76b   : > { %v6816_v57 = vpop.f32.mrf.mxu0  ;;  %7457 = vmatmul.mubr.bf16.gmra.mxu1 %v7159_v11 }
 0x76c   : > { %v6817_v51 = vadd.f32 %v6816_v57, %v12138_v20  ;;  %v7059_v14 = vmax.f32 %v6815_v41, 0.0 }
 0x76d   : > { %v6820_v61 = vpop.f32.mrf.mxu0 }
 0x76e   : > { %v7060_v48 = vmax.f32 %v6817_v51, 0.0  ;;  %v7161_v63 = vpack.c.bf16 %v7059_v14, %v7057_v4  ;;  %v6821_v10 = vadd.f32 %v6820_v61, %v12135_v60 }
 0x76f   : > { %v6822_v2 = vpop.f32.mrf.mxu0 }
 0x770   : > { %v7162_v12 = vpack.c.bf16 %v7060_v48, %v7058_v0  ;;  %v6823_v32 = vadd.f32 %v6822_v2, %v12138_v20  ;;  %v7061_v6 = vmax.f32 %v6821_v10, 0.0 }
 0x771   : > { %v6824_v8 = vpop.f32.mrf.mxu0 }
 0x772   : > { %v6825_v62 = vadd.f32 %v6824_v8, %v12135_v60  ;;  %7464 = vmatprep.mubr.bf16.mxu1 %v7162_v12  ;;  %v7062_v21 = vmax.f32 %v6823_v32, 0.0 }
 0x773   : > { %v6826_v33 = vpop.f32.mrf.mxu0  ;;  %7465 = vmatmul.mubr.bf16.gmra.mxu1 %v7161_v63 }
 0x774   : > { %v6827_v27 = vadd.f32 %v6826_v33, %v12138_v20  ;;  %v7063_v30 = vmax.f32 %v6825_v62, 0.0 }
 0x775   : > { %v6830_v26 = vpop.f32.mrf.mxu0 }
 0x776   : > { %v7064_v46 = vmax.f32 %v6827_v27, 0.0  ;;  %v7163_v39 = vpack.c.bf16 %v7063_v30, %v7061_v6  ;;  %v6831_v18 = vadd.f32 %v6830_v26, %v12135_v60 }
 0x777   : > { %v6832_v1 = vpop.f32.mrf.mxu0 }
 0x778   : > { %v7164_v19 = vpack.c.bf16 %v7064_v46, %v7062_v21  ;;  %v6833_v37 = vadd.f32 %v6832_v1, %v12138_v20  ;;  %v7065_v55 = vmax.f32 %v6831_v18, 0.0 }
 0x779   : > { %v6834_v47 = vpop.f32.mrf.mxu0 }
 0x77a   : > { %v6835_v54 = vadd.f32 %v6834_v47, %v12135_v60  ;;  %7472 = vmatprep.mubr.bf16.mxu1 %v7164_v19  ;;  %v7066_v24 = vmax.f32 %v6833_v37, 0.0 }
 0x77b   : > { %v6836_v58 = vpop.f32.mrf.mxu0  ;;  %7473 = vmatmul.mubr.bf16.gmra.mxu1 %v7163_v39 }
 0x77c   : > { %v6837_v13 = vadd.f32 %v6836_v58, %v12138_v20  ;;  %v7067_v22 = vmax.f32 %v6835_v54, 0.0 }
 0x77d   : > { %v6840_v35 = vpop.f32.mrf.mxu0 }
 0x77e   : > { %v7068_v28 = vmax.f32 %v6837_v13, 0.0  ;;  %v7165_v53 = vpack.c.bf16 %v7067_v22, %v7065_v55  ;;  %v6841_v59 = vadd.f32 %v6840_v35, %v12135_v60 }
 0x77f   : > { %v6842_v17 = vpop.f32.mrf.mxu0 }
 0x780   : > { %v7166_v31 = vpack.c.bf16 %v7068_v28, %v7066_v24  ;;  %v6843_v23 = vadd.f32 %v6842_v17, %v12138_v20  ;;  %v7069_v38 = vmax.f32 %v6841_v59, 0.0 }
 0x781   : > { %v6844_v45 = vpop.f32.mrf.mxu0 }
 0x782   : > { %v6845_v52 = vadd.f32 %v6844_v45, %v12135_v60  ;;  %7480 = vmatprep.mubr.bf16.mxu1 %v7166_v31  ;;  %v7070_v7 = vmax.f32 %v6843_v23, 0.0 }
 0x783   : > { %v6846_v5 = vpop.f32.mrf.mxu0  ;;  %7481 = vmatmul.mubr.bf16.gmra.mxu1 %v7165_v53 }
 0x784   : > { %v6847_v50 = vadd.f32 %v6846_v5, %v12138_v20  ;;  %v7071_v40 = vmax.f32 %v6845_v52, 0.0 }
 0x785   : > { %v6850_v15 = vpop.f32.mrf.mxu0 }
 0x786   : > { %v7072_v49 = vmax.f32 %v6847_v50, 0.0  ;;  %v7167_v36 = vpack.c.bf16 %v7071_v40, %v7069_v38  ;;  %v6851_v34 = vadd.f32 %v6850_v15, %v12135_v60 }
 0x787   : > { %v6852_v43 = vpop.f32.mrf.mxu0 }
 0x788   : > { %v7168_v3 = vpack.c.bf16 %v7072_v49, %v7070_v7  ;;  %v6853_v56 = vadd.f32 %v6852_v43, %v12138_v20  ;;  %v7073_v51 = vmax.f32 %v6851_v34, 0.0 }
 0x789   : > { %v6854_v16 = vpop.f32.mrf.mxu0 }
 0x78a   : > { %v6855_v29 = vadd.f32 %v6854_v16, %v12135_v60  ;;  %7488 = vmatprep.mubr.bf16.mxu1 %v7168_v3  ;;  %v7074_v25 = vmax.f32 %v6853_v56, 0.0 }
 0x78b   : > { %v6856_v42 = vpop.f32.mrf.mxu0  ;;  %7489 = vmatmul.mubr.bf16.gmra.mxu1 %v7167_v36 }
 0x78c   : > { %v6857_v9 = vadd.f32 %v6856_v42, %v12138_v20  ;;  %v7075_v41 = vmax.f32 %v6855_v29, 0.0 }
 0x78d   : > { %v6860_v11 = vpop.f32.mrf.mxu0 }
 0x78e   : > { %v7076_v57 = vmax.f32 %v6857_v9, 0.0  ;;  %v7169_v14 = vpack.c.bf16 %v7075_v41, %v7073_v51  ;;  %v6861_v12 = vadd.f32 %v6860_v11, %v12135_v60 }
 0x78f   : > { %v6862_v44 = vpop.f32.mrf.mxu0 }
 0x790   : > { %v7170_v61 = vpack.c.bf16 %v7076_v57, %v7074_v25  ;;  %v6863_v48 = vadd.f32 %v6862_v44, %v12138_v20  ;;  %v7077_v27 = vmax.f32 %v6861_v12, 0.0 }
 0x791   : > { %v6864_v0 = vpop.f32.mrf.mxu0 }
 0x792   : > { %v6865_v2 = vadd.f32 %v6864_v0, %v12135_v60  ;;  %7496 = vmatprep.mubr.bf16.mxu1 %v7170_v61  ;;  %v7078_v32 = vmax.f32 %v6863_v48, 0.0 }
 0x793   : > { %v6866_v4 = vpop.f32.mrf.mxu0  ;;  %7497 = vmatmul.mubr.bf16.gmra.mxu1 %v7169_v14 }
 0x794   : > { %v6867_v8 = vadd.f32 %v6866_v4, %v12138_v20  ;;  %v7079_v62 = vmax.f32 %v6865_v2, 0.0 }
 0x795   : > { %v6870_v63 = vpop.f32.mrf.mxu0 }
 0x796   : > { %v7080_v33 = vmax.f32 %v6867_v8, 0.0  ;;  %v7171_v30 = vpack.c.bf16 %v7079_v62, %v7077_v27  ;;  %v6871_v19 = vadd.f32 %v6870_v63, %v12135_v60 }
 0x797   : > { %v6872_v10 = vpop.f32.mrf.mxu0 }
 0x798   : > { %v7172_v26 = vpack.c.bf16 %v7080_v33, %v7078_v32  ;;  %v6873_v46 = vadd.f32 %v6872_v10, %v12138_v20  ;;  %v7081_v13 = vmax.f32 %v6871_v19, 0.0 }
 0x799   : > { %v6874_v21 = vpop.f32.mrf.mxu0 }
 0x79a   : > { %v6875_v1 = vadd.f32 %v6874_v21, %v12135_v60  ;;  %7504 = vmatprep.mubr.bf16.mxu1 %v7172_v26  ;;  %v7082_v37 = vmax.f32 %v6873_v46, 0.0 }
 0x79b   : > { %v6876_v6 = vpop.f32.mrf.mxu0  ;;  %7505 = vmatmul.mubr.bf16.gmra.mxu1 %v7171_v30 }
 0x79c   : > { %v6877_v47 = vadd.f32 %v6876_v6, %v12138_v20  ;;  %v7083_v54 = vmax.f32 %v6875_v1, 0.0 }
 0x79d   : > { %v6880_v39 = vpop.f32.mrf.mxu0 }
 0x79e   : > { %v7084_v58 = vmax.f32 %v6877_v47, 0.0  ;;  %v7173_v22 = vpack.c.bf16 %v7083_v54, %v7081_v13  ;;  %v6881_v31 = vadd.f32 %v6880_v39, %v12135_v60 }
 0x79f   : > { %v6882_v18 = vpop.f32.mrf.mxu0 }
 0x7a0   : > { %v7174_v35 = vpack.c.bf16 %v7084_v58, %v7082_v37  ;;  %v6883_v28 = vadd.f32 %v6882_v18, %v12138_v20  ;;  %v7085_v50 = vmax.f32 %v6881_v31, 0.0 }
 0x7a1   : > { %v6884_v24 = vpop.f32.mrf.mxu0 }
 0x7a2   : > { %v6885_v17 = vadd.f32 %v6884_v24, %v12135_v60  ;;  %7512 = vmatprep.mubr.bf16.mxu1 %v7174_v35  ;;  %v7086_v23 = vmax.f32 %v6883_v28, 0.0 }
 0x7a3   : > { %v6886_v55 = vpop.f32.mrf.mxu0  ;;  %7513 = vmatmul.mubr.bf16.gmra.mxu1 %v7173_v22 }
 0x7a4   : > { %v6887_v45 = vadd.f32 %v6886_v55, %v12138_v20  ;;  %v7087_v52 = vmax.f32 %v6885_v17, 0.0 }
 0x7a5   : > { %v6890_v53 = vpop.f32.mrf.mxu0 }
 0x7a6   : > { %v7088_v5 = vmax.f32 %v6887_v45, 0.0  ;;  %v7175_v40 = vpack.c.bf16 %v7087_v52, %v7085_v50  ;;  %v6891_v3 = vadd.f32 %v6890_v53, %v12135_v60 }
 0x7a7   : > { %v6892_v59 = vpop.f32.mrf.mxu0 }
 0x7a8   : > { %v7176_v15 = vpack.c.bf16 %v7088_v5, %v7086_v23  ;;  %v6893_v49 = vadd.f32 %v6892_v59, %v12138_v20  ;;  %v7089_v9 = vmax.f32 %v6891_v3, 0.0 }
 0x7a9   : > { %v6894_v7 = vpop.f32.mrf.mxu0 }
 0x7aa   : > { %v6895_v43 = vadd.f32 %v6894_v7, %v12135_v60  ;;  %7520 = vmatprep.mubr.bf16.mxu1 %v7176_v15  ;;  %v7090_v56 = vmax.f32 %v6893_v49, 0.0 }
 0x7ab   : > { %v6896_v38 = vpop.f32.mrf.mxu0  ;;  %7521 = vmatmul.mubr.bf16.gmra.mxu1 %v7175_v40 }
 0x7ac   : > { %v6897_v16 = vadd.f32 %v6896_v38, %v12138_v20  ;;  %v7091_v29 = vmax.f32 %v6895_v43, 0.0 }
 0x7ad   : > { %v6900_v36 = vpop.f32.mrf.mxu0 }
 0x7ae   : > { %v7092_v42 = vmax.f32 %v6897_v16, 0.0  ;;  %v7177_v41 = vpack.c.bf16 %v7091_v29, %v7089_v9  ;;  %v6901_v61 = vadd.f32 %v6900_v36, %v12135_v60 }
 0x7af   : > { %v6902_v34 = vpop.f32.mrf.mxu0 }
 0x7b0   : > { %v7178_v11 = vpack.c.bf16 %v7092_v42, %v7090_v56  ;;  %v6903_v57 = vadd.f32 %v6902_v34, %v12138_v20  ;;  %v7093_v8 = vmax.f32 %v6901_v61, 0.0 }
 0x7b1   : > { %v6904_v25 = vpop.f32.mrf.mxu0 }
 0x7b2   : > { %v6905_v44 = vadd.f32 %v6904_v25, %v12135_v60  ;;  %7528 = vmatprep.mubr.bf16.mxu1 %v7178_v11  ;;  %v7094_v48 = vmax.f32 %v6903_v57, 0.0 }
 0x7b3   : > { %v6906_v51 = vpop.f32.mrf.mxu0  ;;  %7529 = vmatmul.mubr.bf16.gmra.mxu1 %v7177_v41 }
 0x7b4   : > { %v6907_v0 = vadd.f32 %v6906_v51, %v12138_v20  ;;  %v7095_v2 = vmax.f32 %v6905_v44, 0.0 }
 0x7b5   : > { %v6910_v14 = vpop.f32.mrf.mxu0 }
 0x7b6   : > { %v7096_v4 = vmax.f32 %v6907_v0, 0.0  ;;  %v7179_v62 = vpack.c.bf16 %v7095_v2, %v7093_v8  ;;  %v6911_v26 = vadd.f32 %v6910_v14, %v12135_v60 }
 0x7b7   : > { %v6912_v12 = vpop.f32.mrf.mxu0 }
 0x7b8   : > { %v7180_v63 = vpack.c.bf16 %v7096_v4, %v7094_v48  ;;  %v6913_v33 = vadd.f32 %v6912_v12, %v12138_v20  ;;  %v7097_v47 = vmax.f32 %v6911_v26, 0.0 }
 0x7b9   : > { %v6914_v32 = vpop.f32.mrf.mxu0 }
 0x7ba   : > { %v6915_v10 = vadd.f32 %v6914_v32, %v12135_v60  ;;  %7536 = vmatprep.mubr.bf16.mxu1 %v7180_v63  ;;  %v7098_v46 = vmax.f32 %v6913_v33, 0.0 }
 0x7bb   : > { %v6916_v27 = vpop.f32.mrf.mxu0  ;;  %7537 = vmatmul.mubr.bf16.gmra.mxu1 %v7179_v62 }
 0x7bc   : > { %v6917_v21 = vadd.f32 %v6916_v27, %v12138_v20  ;;  %v7099_v1 = vmax.f32 %v6915_v10, 0.0 }
 0x7bd   : > { %v6920_v30 = vpop.f32.mrf.mxu0 }
 0x7be   : > { %v7100_v6 = vmax.f32 %v6917_v21, 0.0  ;;  %v7181_v54 = vpack.c.bf16 %v7099_v1, %v7097_v47  ;;  %v6921_v35 = vadd.f32 %v6920_v30, %v12135_v60 }
 0x7bf   : > { %v6922_v19 = vpop.f32.mrf.mxu0 }
 0x7c0   : > { %v7182_v39 = vpack.c.bf16 %v7100_v6, %v7098_v46  ;;  %v6923_v58 = vadd.f32 %v6922_v19, %v12138_v20  ;;  %v7101_v45 = vmax.f32 %v6921_v35, 0.0 }
 0x7c1   : > { %v6924_v37 = vpop.f32.mrf.mxu0 }
 0x7c2   : > { %v6925_v18 = vadd.f32 %v6924_v37, %v12135_v60  ;;  %7544 = vmatprep.mubr.bf16.mxu1 %v7182_v39  ;;  %v7102_v28 = vmax.f32 %v6923_v58, 0.0 }
 0x7c3   : > { %v6926_v13 = vpop.f32.mrf.mxu0  ;;  %7545 = vmatmul.mubr.bf16.gmra.mxu1 %v7181_v54 }
 0x7c4   : > { %v6927_v24 = vadd.f32 %v6926_v13, %v12138_v20  ;;  %v7103_v17 = vmax.f32 %v6925_v18, 0.0 }
 0x7c5   : > { %v6930_v22 = vpop.f32.mrf.mxu0 }
 0x7c6   : > { %v7104_v55 = vmax.f32 %v6927_v24, 0.0  ;;  %v7183_v52 = vpack.c.bf16 %v7103_v17, %v7101_v45  ;;  %v6931_v15 = vadd.f32 %v6930_v22, %v12135_v60 }
 0x7c7   : > { %v6932_v31 = vpop.f32.mrf.mxu0 }
 0x7c8   : > { %v7184_v53 = vpack.c.bf16 %v7104_v55, %v7102_v28  ;;  %v6933_v5 = vadd.f32 %v6932_v31, %v12138_v20  ;;  %v7105_v16 = vmax.f32 %v6931_v15, 0.0 }
 0x7c9   : > { %v6934_v23 = vpop.f32.mrf.mxu0 }
 0x7ca   : > { %v6935_v59 = vadd.f32 %v6934_v23, %v12135_v60  ;;  %7552 = vmatprep.mubr.bf16.mxu1 %v7184_v53  ;;  %v7106_v49 = vmax.f32 %v6933_v5, 0.0 }
 0x7cb   : > { %v6936_v50 = vpop.f32.mrf.mxu0  ;;  %7553 = vmatmul.mubr.bf16.gmra.mxu1 %v7183_v52 }
 0x7cc   : > { %v6937_v7 = vadd.f32 %v6936_v50, %v12138_v20  ;;  %v7107_v43 = vmax.f32 %v6935_v59, 0.0  ;;  %v12284_v59 = vld [vmem:[%s12468_s19] ss:$0 sm:$0xff] }
 0x7cd   : > { %v6940_v40 = vpop.f32.mrf.mxu0 }
 0x7ce   : > { %v7108_v38 = vmax.f32 %v6937_v7, 0.0  ;;  %v7185_v29 = vpack.c.bf16 %v7107_v43, %v7105_v16  ;;  %v6941_v11 = vadd.f32 %v6940_v40, %v12135_v60 }
 0x7cf   : > { %v6942_v3 = vpop.f32.mrf.mxu0 }
 0x7d0   : > { %v7186_v36 = vpack.c.bf16 %v7108_v38, %v7106_v49  ;;  %v6943_v42 = vadd.f32 %v6942_v3, %v12138_v20  ;;  %v7109_v61 = vmax.f32 %v6941_v11, 0.0 }
 0x7d1   : > { %v6944_v56 = vpop.f32.mrf.mxu0 }
 0x7d2   : > { %v6945_v34 = vadd.f32 %v6944_v56, %v12135_v60  ;;  %7560 = vmatprep.mubr.bf16.mxu1 %v7186_v36  ;;  %v7110_v41 = vmax.f32 %v6943_v42, 0.0 }
 0x7d3   : > { %v6946_v9 = vpop.f32.mrf.mxu0  ;;  %7561 = vmatmul.mubr.bf16.gmra.mxu1 %v7185_v29 }
 0x7d4   : > { %v6947_v25 = vadd.f32 %v6946_v9, %v12138_v20  ;;  %v7111_v57 = vmax.f32 %v6945_v34, 0.0 }
 0x7d5   : > { %v6950_v51 = vpop.f32.mrf.mxu0 }
 0x7d6   : > { %v7112_v44 = vmax.f32 %v6947_v25, 0.0  ;;  %v7187_v48 = vpack.c.bf16 %v7111_v57, %v7109_v61  ;;  %v6951_v8 = vadd.f32 %v6950_v51, %v12135_v60 }
 0x7d7   : > { %v6952_v14 = vpop.f32.mrf.mxu0 }
 0x7d8   : > { %v7188_v0 = vpack.c.bf16 %v7112_v44, %v7110_v41  ;;  %v6953_v4 = vadd.f32 %v6952_v14, %v12138_v20  ;;  %v7113_v26 = vmax.f32 %v6951_v8, 0.0 }
 0x7d9   : > { %v6954_v2 = vpop.f32.mrf.mxu0 }
 0x7da   : > { %7568 = vmatprep.mubr.bf16.mxu1 %v7188_v0  ;;  %v6955_v12 = vadd.f32 %v6954_v2, %v12135_v60  ;;  %v7114_v10 = vmax.f32 %v6953_v4, 0.0 }
 0x7db   : > { %v6956_v63 = vpop.f32.mrf.mxu0  ;;  %7569 = vmatmul.mubr.bf16.gmra.mxu1 %v7187_v48 }
 0x7dc   : > { %v6957_v32 = vadd.f32 %v6956_v63, %v12138_v20  ;;  %v7115_v62 = vmax.f32 %v6955_v12, 0.0 }
 0x7dd   : > { %v6960_v33 = vpop.f32.mrf.mxu0 }
 0x7de   : > { %v7116_v27 = vmax.f32 %v6957_v32, 0.0  ;;  %v7189_v46 = vpack.c.bf16 %v7115_v62, %v7113_v26  ;;  %v6961_v47 = vadd.f32 %v6960_v33, %v12135_v60 }
 0x7df   : > { %v6962_v21 = vpop.f32.mrf.mxu0 }
 0x7e0   : > { %v7190_v30 = vpack.c.bf16 %v7116_v27, %v7114_v10  ;;  %v6963_v6 = vadd.f32 %v6962_v21, %v12138_v20  ;;  %v7117_v35 = vmax.f32 %v6961_v47, 0.0 }
 0x7e1   : > { %v6964_v1 = vpop.f32.mrf.mxu0 }
 0x7e2   : > { %v6965_v19 = vadd.f32 %v6964_v1, %v12135_v60  ;;  %7576 = vmatprep.mubr.bf16.mxu1 %v7190_v30  ;;  %v7118_v18 = vmax.f32 %v6963_v6, 0.0 }
 0x7e3   : > { %v6966_v39 = vpop.f32.mrf.mxu0  ;;  %7577 = vmatmul.mubr.bf16.gmra.mxu1 %v7189_v46 }
 0x7e4   : > { %v6967_v37 = vadd.f32 %v6966_v39, %v12138_v20  ;;  %v7119_v54 = vmax.f32 %v6965_v19, 0.0 }
 0x7e5   : > { %v6970_v58 = vpop.f32.mrf.mxu0 }
 0x7e6   : > { %v7120_v13 = vmax.f32 %v6967_v37, 0.0  ;;  %v7191_v28 = vpack.c.bf16 %v7119_v54, %v7117_v35  ;;  %v6971_v45 = vadd.f32 %v6970_v58, %v12135_v60 }
 0x7e7   : > { %v6972_v24 = vpop.f32.mrf.mxu0 }
 0x7e8   : > { %v7192_v22 = vpack.c.bf16 %v7120_v13, %v7118_v18  ;;  %v6973_v55 = vadd.f32 %v6972_v24, %v12138_v20  ;;  %v7121_v49 = vmax.f32 %v6971_v45, 0.0 }
 0x7e9   : > { %v6974_v17 = vpop.f32.mrf.mxu0 }
 0x7ea   : > { %v6975_v31 = vadd.f32 %v6974_v17, %v12135_v60  ;;  %7584 = vmatprep.mubr.bf16.mxu1 %v7192_v22  ;;  %v7122_v7 = vmax.f32 %v6973_v55, 0.0 }
 0x7eb   : > { %v6976_v53 = vpop.f32.mrf.mxu0  ;;  %v7394_v23 = vpop.f32.mrf.mxu1  ;;  %7585 = vmatmul.mubr.bf16.gmra.mxu1 %v7191_v28 }
 0x7ec   : > { %v6977_v52 = vadd.f32 %v6976_v53, %v12138_v20  ;;  %v7123_v5 = vmax.f32 %v6975_v31, 0.0  ;;  %v7395_v16 = vadd.f32 %v12284_v59, %v7394_v23 }
 0x7ed   : > { %v6980_v50 = vpop.f32.mrf.mxu0  ;;  %v7396_v15 = vpop.f32.mrf.mxu1 }
 0x7ee   : > { %v7124_v40 = vmax.f32 %v6977_v52, 0.0  ;;  %v7193_v56 = vpack.c.bf16 %v7123_v5, %v7121_v49  ;;  %v6981_v25 = vadd.f32 %v6980_v50, %v12135_v60 }
 0x7ef   : > { %v6982_v43 = vpop.f32.mrf.mxu0  ;;  %v7397_v38 = vpop.f32.mrf.mxu1 }
 0x7f0   : > { %v7194_v3 = vpack.c.bf16 %v7124_v40, %v7122_v7  ;;  %v7398_v36 = vadd.f32 %v12284_v59, %v7397_v38  ;;  %v6983_v34 = vadd.f32 %v6982_v43, %v12138_v20  ;;  %v7125_v2 = vmax.f32 %v6981_v25, 0.0 }
 0x7f1   : > { %v6984_v29 = vpop.f32.mrf.mxu0  ;;  %v7399_v42 = vpop.f32.mrf.mxu1 }
 0x7f2   : > { %v8536_v9 = vpack.c.bf16 %v7398_v36, %v7395_v16  ;;  %v6985_v11 = vadd.f32 %v6984_v29, %v12135_v60  ;;  %7592 = vmatprep.mubr.bf16.mxu1 %v7194_v3  ;;  %v7126_v14 = vmax.f32 %v6983_v34, 0.0 }
 0x7f3   : > { %v6986_v41 = vpop.f32.mrf.mxu0  ;;  %v7402_v57 = vpop.f32.mrf.mxu1  ;;  %7593 = vmatmul.mubr.bf16.gmra.mxu1 %v7193_v56 }
 0x7f4   : > { %8680 = vst [vmem:[%s12293_s24 + $0x18] sm:$0xff] %v8536_v9   ;;  %v6987_v44 = vadd.f32 %v6986_v41, %v12138_v20  ;;  %v7127_v51 = vmax.f32 %v6985_v11, 0.0  ;;  %v7403_v63 = vadd.f32 %v12284_v59, %v7402_v57 }
 0x7f5   : > { %v6990_v61 = vpop.f32.mrf.mxu0  ;;  %v7404_v0 = vpop.f32.mrf.mxu1 }
 0x7f6   : > { %v7128_v48 = vmax.f32 %v6987_v44, 0.0  ;;  %v7195_v62 = vpack.c.bf16 %v7127_v51, %v7125_v2  ;;  %v6991_v30 = vadd.f32 %v6990_v61, %v12135_v60 }
 0x7f7   : > { %v6992_v4 = vpop.f32.mrf.mxu0  ;;  %v7405_v12 = vpop.f32.mrf.mxu1 }
 0x7f8   : > { %v7196_v8 = vpack.c.bf16 %v7128_v48, %v7126_v14  ;;  %v7406_v32 = vadd.f32 %v12284_v59, %v7405_v12  ;;  %v6993_v27 = vadd.f32 %v6992_v4, %v12138_v20  ;;  %v7129_v58 = vmax.f32 %v6991_v30, 0.0 }
 0x7f9   : > { %v6994_v33 = vpop.f32.mrf.mxu0  ;;  %v7407_v10 = vpop.f32.mrf.mxu1 }
 0x7fa   : > { %v8541_v26 = vpack.c.bf16 %v7406_v32, %v7403_v63  ;;  %v6995_v21 = vadd.f32 %v6994_v33, %v12135_v60  ;;  %7600 = vmatprep.mubr.bf16.mxu1 %v7196_v8  ;;  %v7130_v37 = vmax.f32 %v6993_v27, 0.0 }
 0x7fb   : > { %v6996_v46 = vpop.f32.mrf.mxu0  ;;  %v7410_v1 = vpop.f32.mrf.mxu1  ;;  %7601 = vmatmul.mubr.bf16.gmra.mxu1 %v7195_v62 }
 0x7fc   : > { %8681 = vst [vmem:[%s12293_s24 + $0x20] sm:$0xff] %v8541_v26   ;;  %v6997_v6 = vadd.f32 %v6996_v46, %v12138_v20  ;;  %v7131_v19 = vmax.f32 %v6995_v21, 0.0  ;;  %v7411_v24 = vadd.f32 %v12284_v59, %v7410_v1 }
 0x7fd   : > { %v7000_v47 = vpop.f32.mrf.mxu0  ;;  %v7412_v39 = vpop.f32.mrf.mxu1 }
 0x7fe   : > { %v7132_v54 = vmax.f32 %v6997_v6, 0.0  ;;  %v7197_v28 = vpack.c.bf16 %v7131_v19, %v7129_v58  ;;  %v7001_v23 = vadd.f32 %v7000_v47, %v12135_v60 }
 0x7ff   : > { %v7002_v18 = vpop.f32.mrf.mxu0  ;;  %v7413_v13 = vpop.f32.mrf.mxu1 }
 0x800   : > { %v7198_v35 = vpack.c.bf16 %v7132_v54, %v7130_v37  ;;  %v7414_v22 = vadd.f32 %v12284_v59, %v7413_v13  ;;  %v7003_v31 = vadd.f32 %v7002_v18, %v12138_v20  ;;  %v7133_v38 = vmax.f32 %v7001_v23, 0.0 }
 0x801   : > { %v7004_v17 = vpop.f32.mrf.mxu0  ;;  %v7415_v55 = vpop.f32.mrf.mxu1 }
 0x802   : > { %v8546_v45 = vpack.c.bf16 %v7414_v22, %v7411_v24  ;;  %v7005_v53 = vadd.f32 %v7004_v17, %v12135_v60  ;;  %7608 = vmatprep.mubr.bf16.mxu1 %v7198_v35  ;;  %v7134_v49 = vmax.f32 %v7003_v31, 0.0 }
 0x803   : > { %v7006_v52 = vpop.f32.mrf.mxu0  ;;  %v7418_v5 = vpop.f32.mrf.mxu1  ;;  %7609 = vmatmul.mubr.bf16.gmra.mxu1 %v7197_v28 }
 0x804   : > { %8682 = vst [vmem:[%s12293_s24 + $0x28] sm:$0xff] %v8546_v45   ;;  %v7007_v50 = vadd.f32 %v7006_v52, %v12138_v20  ;;  %v7135_v15 = vmax.f32 %v7005_v53, 0.0  ;;  %v7419_v56 = vadd.f32 %v12284_v59, %v7418_v5 }
 0x805   : > { %v7370_v7 = vpop.f32.mrf.mxu0  ;;  %v7420_v40 = vpop.f32.mrf.mxu1 }
 0x806   : > { %v7136_v43 = vmax.f32 %v7007_v50, 0.0  ;;  %v7199_v29 = vpack.c.bf16 %v7135_v15, %v7133_v38  ;;  %v7371_v20 = vadd.f32 %v12284_v59, %v7370_v7 }
 0x807   : > { %v7372_v3 = vpop.f32.mrf.mxu0  ;;  %v7421_v16 = vpop.f32.mrf.mxu1 }
 0x808   : > { %v7200_v36 = vpack.c.bf16 %v7136_v43, %v7134_v49  ;;  %v7422_v60 = vadd.f32 %v12284_v59, %v7421_v16 }
 0x809   : > { %v7373_v42 = vpop.f32.mrf.mxu0  ;;  %v7423_v34 = vpop.f32.mrf.mxu1 }
 0x80a   : > { %v8551_v9 = vpack.c.bf16 %v7422_v60, %v7419_v56  ;;  %v7374_v11 = vadd.f32 %v12284_v59, %v7373_v42  ;;  %7616 = vmatprep.mubr.bf16.mxu1 %v7200_v36 }
 0x80b   : > { %v7375_v25 = vpop.f32.mrf.mxu0  ;;  %v7426_v41 = vpop.f32.mrf.mxu1  ;;  %7617 = vmatmul.mubr.bf16.gmra.mxu1 %v7199_v29 }
 0x80c   : > { %8683 = vst [vmem:[%s12293_s24 + $0x30] sm:$0xff] %v8551_v9   ;;  %v8521_v57 = vpack.c.bf16 %v7374_v11, %v7371_v20  ;;  %v7427_v14 = vadd.f32 %v12284_v59, %v7426_v41 }
 0x80d   : > { %v7378_v44 = vpop.f32.mrf.mxu0  ;;  %v7428_v51 = vpop.f32.mrf.mxu1 }
 0x80e   : > { %8522 = vst [vmem:[%s12293_s24] sm:$0xff] %v8521_v57   ;;  %v7379_v12 = vadd.f32 %v12284_v59, %v7378_v44 }
 0x80f   : > { %v7380_v61 = vpop.f32.mrf.mxu0  ;;  %v7429_v0 = vpop.f32.mrf.mxu1 }
 0x810   : > { %v7430_v48 = vadd.f32 %v12284_v59, %v7429_v0 }
 0x811   : > { %v7381_v2 = vpop.f32.mrf.mxu0  ;;  %v7431_v4 = vpop.f32.mrf.mxu1 }
 0x812   : > { %v8556_v8 = vpack.c.bf16 %v7430_v48, %v7427_v14  ;;  %v7382_v63 = vadd.f32 %v12284_v59, %v7381_v2 }
 0x813   : > { %v7383_v32 = vpop.f32.mrf.mxu0  ;;  %v7434_v62 = vpop.f32.mrf.mxu1 }
 0x814   : > { %8684 = vst [vmem:[%s12293_s24 + $0x38] sm:$0xff] %v8556_v8   ;;  %v8526_v33 = vpack.c.bf16 %v7382_v63, %v7379_v12  ;;  %v7435_v30 = vadd.f32 %v12284_v59, %v7434_v62 }
 0x815   : > { %v7386_v10 = vpop.f32.mrf.mxu0  ;;  %v7436_v27 = vpop.f32.mrf.mxu1 }
 0x816   : > { %8678 = vst [vmem:[%s12293_s24 + $0x8] sm:$0xff] %v8526_v33   ;;  %v7387_v19 = vadd.f32 %v12284_v59, %v7386_v10 }
 0x817   : > { %v7388_v26 = vpop.f32.mrf.mxu0  ;;  %v7437_v21 = vpop.f32.mrf.mxu1 }
 0x818   : > { %v7438_v46 = vadd.f32 %v12284_v59, %v7437_v21 }
 0x819   : > { %v7389_v1 = vpop.f32.mrf.mxu0  ;;  %v7439_v6 = vpop.f32.mrf.mxu1 }
 0x81a   : > { %v8561_v47 = vpack.c.bf16 %v7438_v46, %v7435_v30  ;;  %v7390_v39 = vadd.f32 %v12284_v59, %v7389_v1 }
 0x81b   : > { %v7391_v37 = vpop.f32.mrf.mxu0  ;;  %v7442_v54 = vpop.f32.mrf.mxu1 }
 0x81c   : > { %8685 = vst [vmem:[%s12293_s24 + $0x40] sm:$0xff] %v8561_v47   ;;  %v8531_v58 = vpack.c.bf16 %v7390_v39, %v7387_v19  ;;  %v7443_v35 = vadd.f32 %v12284_v59, %v7442_v54 }
 0x81d   : > { %v7444_v18 = vpop.f32.mrf.mxu1 }
 0x81e   : > { %8679 = vst [vmem:[%s12293_s24 + $0x10] sm:$0xff] %v8531_v58  }
 0x81f   : > { %v7445_v13 = vpop.f32.mrf.mxu1 }
 0x820   : > { %v7446_v24 = vadd.f32 %v12284_v59, %v7445_v13 }
 0x821   : > { %v7447_v22 = vpop.f32.mrf.mxu1 }
 0x822   : > { %v8566_v28 = vpack.c.bf16 %v7446_v24, %v7443_v35 }
 0x823   : > { %v7450_v17 = vpop.f32.mrf.mxu1 }
 0x824   : > { %8686 = vst [vmem:[%s12293_s24 + $0x48] sm:$0xff] %v8566_v28   ;;  %v7451_v45 = vadd.f32 %v12284_v59, %v7450_v17 }
 0x825   : > { %v7452_v55 = vpop.f32.mrf.mxu1 }
 0x827   : > { %v7453_v31 = vpop.f32.mrf.mxu1 }
 0x828   : > { %v7454_v53 = vadd.f32 %v12284_v59, %v7453_v31 }
 0x829   : > { %v7455_v23 = vpop.f32.mrf.mxu1 }
 0x82a   : > { %v8571_v52 = vpack.c.bf16 %v7454_v53, %v7451_v45 }
 0x82b   : > { %v7458_v5 = vpop.f32.mrf.mxu1 }
 0x82c   : > { %8687 = vst [vmem:[%s12293_s24 + $0x50] sm:$0xff] %v8571_v52   ;;  %v7459_v7 = vadd.f32 %v12284_v59, %v7458_v5 }
 0x82d   : > { %v7460_v50 = vpop.f32.mrf.mxu1 }
 0x82f   : > { %v7461_v15 = vpop.f32.mrf.mxu1 }
 0x830   : > { %v7462_v40 = vadd.f32 %v12284_v59, %v7461_v15 }
 0x831   : > { %v7463_v49 = vpop.f32.mrf.mxu1 }
 0x832   : > { %v8576_v43 = vpack.c.bf16 %v7462_v40, %v7459_v7 }
 0x833   : > { %v7466_v38 = vpop.f32.mrf.mxu1 }
 0x834   : > { %8688 = vst [vmem:[%s12293_s24 + $0x58] sm:$0xff] %v8576_v43   ;;  %v7467_v36 = vadd.f32 %v12284_v59, %v7466_v38 }
 0x835   : > { %v7468_v3 = vpop.f32.mrf.mxu1 }
 0x837   : > { %v7469_v16 = vpop.f32.mrf.mxu1 }
 0x838   : > { %v7470_v56 = vadd.f32 %v12284_v59, %v7469_v16 }
 0x839   : > { %v7471_v60 = vpop.f32.mrf.mxu1 }
 0x83a   : > { %v8581_v29 = vpack.c.bf16 %v7470_v56, %v7467_v36 }
 0x83b   : > { %v7474_v42 = vpop.f32.mrf.mxu1 }
 0x83c   : > { %8689 = vst [vmem:[%s12293_s24 + $0x60] sm:$0xff] %v8581_v29   ;;  %v7475_v9 = vadd.f32 %v12284_v59, %v7474_v42 }
 0x83d   : > { %v7476_v34 = vpop.f32.mrf.mxu1 }
 0x83f   : > { %v7477_v20 = vpop.f32.mrf.mxu1 }
 0x840   : > { %v7478_v11 = vadd.f32 %v12284_v59, %v7477_v20 }
 0x841   : > { %v7479_v25 = vpop.f32.mrf.mxu1 }
 0x842   : > { %v8586_v41 = vpack.c.bf16 %v7478_v11, %v7475_v9 }
 0x843   : > { %v7482_v57 = vpop.f32.mrf.mxu1 }
 0x844   : > { %8690 = vst [vmem:[%s12293_s24 + $0x68] sm:$0xff] %v8586_v41   ;;  %v7483_v61 = vadd.f32 %v12284_v59, %v7482_v57 }
 0x845   : > { %v7484_v44 = vpop.f32.mrf.mxu1 }
 0x847   : > { %v7485_v51 = vpop.f32.mrf.mxu1 }
 0x848   : > { %v7486_v0 = vadd.f32 %v12284_v59, %v7485_v51 }
 0x849   : > { %v7487_v14 = vpop.f32.mrf.mxu1 }
 0x84a   : > { %v8591_v48 = vpack.c.bf16 %v7486_v0, %v7483_v61 }
 0x84b   : > { %v7490_v2 = vpop.f32.mrf.mxu1 }
 0x84c   : > { %8691 = vst [vmem:[%s12293_s24 + $0x70] sm:$0xff] %v8591_v48   ;;  %v7491_v8 = vadd.f32 %v12284_v59, %v7490_v2 }
 0x84d   : > { %v7492_v4 = vpop.f32.mrf.mxu1 }
 0x84f   : > { %v7493_v12 = vpop.f32.mrf.mxu1 }
 0x850   : > { %v7494_v63 = vadd.f32 %v12284_v59, %v7493_v12 }
 0x851   : > { %v7495_v32 = vpop.f32.mrf.mxu1 }
 0x852   : > { %v8596_v62 = vpack.c.bf16 %v7494_v63, %v7491_v8 }
 0x853   : > { %v7498_v33 = vpop.f32.mrf.mxu1 }
 0x854   : > { %8692 = vst [vmem:[%s12293_s24 + $0x78] sm:$0xff] %v8596_v62   ;;  %v7499_v26 = vadd.f32 %v12284_v59, %v7498_v33 }
 0x855   : > { %v7500_v10 = vpop.f32.mrf.mxu1 }
 0x857   : > { %v7501_v27 = vpop.f32.mrf.mxu1 }
 0x858   : > { %v7502_v21 = vadd.f32 %v12284_v59, %v7501_v27 }
 0x859   : > { %v7503_v30 = vpop.f32.mrf.mxu1 }
 0x85a   : > { %v8601_v46 = vpack.c.bf16 %v7502_v21, %v7499_v26 }
 0x85b   : > { %v7506_v1 = vpop.f32.mrf.mxu1 }
 0x85c   : > { %8693 = vst [vmem:[%s12293_s24 + $0x80] sm:$0xff] %v8601_v46   ;;  %v7507_v47 = vadd.f32 %v12284_v59, %v7506_v1 }
 0x85d   : > { %v7508_v6 = vpop.f32.mrf.mxu1 }
 0x85f   : > { %v7509_v19 = vpop.f32.mrf.mxu1 }
 0x860   : > { %v7510_v39 = vadd.f32 %v12284_v59, %v7509_v19 }
 0x861   : > { %v7511_v37 = vpop.f32.mrf.mxu1 }
 0x862   : > { %v8606_v54 = vpack.c.bf16 %v7510_v39, %v7507_v47 }
 0x863   : > { %v7514_v58 = vpop.f32.mrf.mxu1 }
 0x864   : > { %8694 = vst [vmem:[%s12293_s24 + $0x88] sm:$0xff] %v8606_v54   ;;  %v7515_v35 = vadd.f32 %v12284_v59, %v7514_v58 }
 0x865   : > { %v7516_v18 = vpop.f32.mrf.mxu1 }
 0x867   : > { %v7517_v13 = vpop.f32.mrf.mxu1 }
 0x868   : > { %v7518_v24 = vadd.f32 %v12284_v59, %v7517_v13 }
 0x869   : > { %v7519_v22 = vpop.f32.mrf.mxu1 }
 0x86a   : > { %v8611_v28 = vpack.c.bf16 %v7518_v24, %v7515_v35 }
 0x86b   : > { %v7522_v17 = vpop.f32.mrf.mxu1 }
 0x86c   : > { %8695 = vst [vmem:[%s12293_s24 + $0x90] sm:$0xff] %v8611_v28   ;;  %v7523_v45 = vadd.f32 %v12284_v59, %v7522_v17 }
 0x86d   : > { %v7524_v55 = vpop.f32.mrf.mxu1 }
 0x86f   : > { %v7525_v31 = vpop.f32.mrf.mxu1 }
 0x870   : > { %v7526_v53 = vadd.f32 %v12284_v59, %v7525_v31 }
 0x871   : > { %v7527_v23 = vpop.f32.mrf.mxu1 }
 0x872   : > { %v8616_v52 = vpack.c.bf16 %v7526_v53, %v7523_v45 }
 0x873   : > { %v7530_v5 = vpop.f32.mrf.mxu1 }
 0x874   : > { %8696 = vst [vmem:[%s12293_s24 + $0x98] sm:$0xff] %v8616_v52   ;;  %v7531_v7 = vadd.f32 %v12284_v59, %v7530_v5 }
 0x875   : > { %v7532_v50 = vpop.f32.mrf.mxu1 }
 0x877   : > { %v7533_v15 = vpop.f32.mrf.mxu1 }
 0x878   : > { %v7534_v40 = vadd.f32 %v12284_v59, %v7533_v15 }
 0x879   : > { %v7535_v49 = vpop.f32.mrf.mxu1 }
 0x87a   : > { %v8621_v43 = vpack.c.bf16 %v7534_v40, %v7531_v7 }
 0x87b   : > { %v7538_v38 = vpop.f32.mrf.mxu1 }
 0x87c   : > { %8697 = vst [vmem:[%s12293_s24 + $0xa0] sm:$0xff] %v8621_v43   ;;  %v7539_v36 = vadd.f32 %v12284_v59, %v7538_v38 }
 0x87d   : > { %v7540_v3 = vpop.f32.mrf.mxu1 }
 0x87f   : > { %v7541_v16 = vpop.f32.mrf.mxu1 }
 0x880   : > { %v7542_v56 = vadd.f32 %v12284_v59, %v7541_v16 }
 0x881   : > { %v7543_v60 = vpop.f32.mrf.mxu1 }
 0x882   : > { %v8626_v29 = vpack.c.bf16 %v7542_v56, %v7539_v36 }
 0x883   : > { %v7546_v42 = vpop.f32.mrf.mxu1 }
 0x884   : > { %8698 = vst [vmem:[%s12293_s24 + $0xa8] sm:$0xff] %v8626_v29   ;;  %v7547_v9 = vadd.f32 %v12284_v59, %v7546_v42 }
 0x885   : > { %v7548_v34 = vpop.f32.mrf.mxu1 }
 0x887   : > { %v7549_v20 = vpop.f32.mrf.mxu1 }
 0x888   : > { %v7550_v11 = vadd.f32 %v12284_v59, %v7549_v20 }
 0x889   : > { %v7551_v25 = vpop.f32.mrf.mxu1 }
 0x88a   : > { %v8631_v41 = vpack.c.bf16 %v7550_v11, %v7547_v9 }
 0x88b   : > { %v7554_v57 = vpop.f32.mrf.mxu1 }
 0x88c   : > { %8699 = vst [vmem:[%s12293_s24 + $0xb0] sm:$0xff] %v8631_v41   ;;  %v7555_v61 = vadd.f32 %v12284_v59, %v7554_v57 }
 0x88d   : > { %v7556_v44 = vpop.f32.mrf.mxu1 }
 0x88f   : > { %v7557_v51 = vpop.f32.mrf.mxu1 }
 0x890   : > { %v7558_v0 = vadd.f32 %v12284_v59, %v7557_v51 }
 0x891   : > { %v7559_v14 = vpop.f32.mrf.mxu1 }
 0x892   : > { %v8636_v48 = vpack.c.bf16 %v7558_v0, %v7555_v61 }
 0x893   : > { %v7562_v2 = vpop.f32.mrf.mxu1 }
 0x894   : > { %8700 = vst [vmem:[%s12293_s24 + $0xb8] sm:$0xff] %v8636_v48   ;;  %v7563_v8 = vadd.f32 %v12284_v59, %v7562_v2 }
 0x895   : > { %v7564_v4 = vpop.f32.mrf.mxu1 }
 0x897   : > { %v7565_v12 = vpop.f32.mrf.mxu1 }
 0x898   : > { %v7566_v63 = vadd.f32 %v12284_v59, %v7565_v12 }
 0x899   : > { %v7567_v32 = vpop.f32.mrf.mxu1 }
 0x89a   : > { %v8641_v62 = vpack.c.bf16 %v7566_v63, %v7563_v8 }
 0x89b   : > { %v7570_v33 = vpop.f32.mrf.mxu1 }
 0x89c   : > { %8701 = vst [vmem:[%s12293_s24 + $0xc0] sm:$0xff] %v8641_v62   ;;  %v7571_v26 = vadd.f32 %v12284_v59, %v7570_v33 }
 0x89d   : > { %v7572_v10 = vpop.f32.mrf.mxu1 }
 0x89f   : > { %v7573_v27 = vpop.f32.mrf.mxu1 }
 0x8a0   : > { %v7574_v21 = vadd.f32 %v12284_v59, %v7573_v27 }
 0x8a1   : > { %v7575_v30 = vpop.f32.mrf.mxu1 }
 0x8a2   : > { %v8646_v46 = vpack.c.bf16 %v7574_v21, %v7571_v26 }
 0x8a3   : > { %v7578_v1 = vpop.f32.mrf.mxu1 }
 0x8a4   : > { %8702 = vst [vmem:[%s12293_s24 + $0xc8] sm:$0xff] %v8646_v46   ;;  %v7579_v47 = vadd.f32 %v12284_v59, %v7578_v1 }
 0x8a5   : > { %v7580_v6 = vpop.f32.mrf.mxu1 }
 0x8a7   : > { %v7581_v19 = vpop.f32.mrf.mxu1 }
 0x8a8   : > { %v7582_v39 = vadd.f32 %v12284_v59, %v7581_v19 }
 0x8a9   : > { %v7583_v37 = vpop.f32.mrf.mxu1 }
 0x8aa   : > { %v8651_v54 = vpack.c.bf16 %v7582_v39, %v7579_v47 }
 0x8ab   : > { %v7586_v58 = vpop.f32.mrf.mxu1 }
 0x8ac   : > { %8703 = vst [vmem:[%s12293_s24 + $0xd0] sm:$0xff] %v8651_v54   ;;  %v7587_v35 = vadd.f32 %v12284_v59, %v7586_v58 }
 0x8ad   : > { %v7588_v18 = vpop.f32.mrf.mxu1 }
 0x8af   : > { %v7589_v13 = vpop.f32.mrf.mxu1 }
 0x8b0   : > { %v7590_v24 = vadd.f32 %v12284_v59, %v7589_v13 }
 0x8b1   : > { %v7591_v22 = vpop.f32.mrf.mxu1 }
 0x8b2   : > { %v8656_v28 = vpack.c.bf16 %v7590_v24, %v7587_v35 }
 0x8b3   : > { %v7594_v17 = vpop.f32.mrf.mxu1 }
 0x8b4   : > { %8704 = vst [vmem:[%s12293_s24 + $0xd8] sm:$0xff] %v8656_v28   ;;  %v7595_v45 = vadd.f32 %v12284_v59, %v7594_v17 }
 0x8b5   : > { %v7596_v55 = vpop.f32.mrf.mxu1 }
 0x8b7   : > { %v7597_v31 = vpop.f32.mrf.mxu1 }
 0x8b8   : > { %v7598_v53 = vadd.f32 %v12284_v59, %v7597_v31 }
 0x8b9   : > { %v7599_v23 = vpop.f32.mrf.mxu1 }
 0x8ba   : > { %v8661_v52 = vpack.c.bf16 %v7598_v53, %v7595_v45 }
 0x8bb   : > { %v7602_v5 = vpop.f32.mrf.mxu1 }
 0x8bc   : > { %8705 = vst [vmem:[%s12293_s24 + $0xe0] sm:$0xff] %v8661_v52   ;;  %v7603_v7 = vadd.f32 %v12284_v59, %v7602_v5 }
 0x8bd   : > { %v7604_v50 = vpop.f32.mrf.mxu1 }
 0x8bf   : > { %v7605_v15 = vpop.f32.mrf.mxu1 }
 0x8c0   : > { %v7606_v40 = vadd.f32 %v12284_v59, %v7605_v15 }
 0x8c1   : > { %v7607_v49 = vpop.f32.mrf.mxu1 }
 0x8c2   : > { %v8666_v43 = vpack.c.bf16 %v7606_v40, %v7603_v7 }
 0x8c3   : > { %v7610_v38 = vpop.f32.mrf.mxu1 }
 0x8c4   : > { %8706 = vst [vmem:[%s12293_s24 + $0xe8] sm:$0xff] %v8666_v43   ;;  %v7611_v36 = vadd.f32 %v12284_v59, %v7610_v38 }
 0x8c5   : > { %v7612_v3 = vpop.f32.mrf.mxu1 }
 0x8c7   : > { %v7613_v16 = vpop.f32.mrf.mxu1 }
 0x8c8   : > { %v7614_v56 = vadd.f32 %v12284_v59, %v7613_v16 }
 0x8c9   : > { %v7615_v60 = vpop.f32.mrf.mxu1 }
 0x8ca   : > { %v8671_v29 = vpack.c.bf16 %v7614_v56, %v7611_v36 }
 0x8cb   : > { %v7618_v42 = vpop.f32.mrf.mxu1 }
 0x8cc   : > { %8707 = vst [vmem:[%s12293_s24 + $0xf0] sm:$0xff] %v8671_v29   ;;  %v7619_v9 = vadd.f32 %v12284_v59, %v7618_v42 }
 0x8cd   : > { %v7620_v34 = vpop.f32.mrf.mxu1 }
 0x8cf   : > { %v7621_v20 = vpop.f32.mrf.mxu1 }
 0x8d0   : > { %v7622_v11 = vadd.f32 %v12284_v59, %v7621_v20 }
 0x8d1   : > { %v7623_v25 = vpop.f32.mrf.mxu1 }
 0x8d2   : > { %v8676_v41 = vpack.c.bf16 %v7622_v11, %v7619_v9 }
 0x8d4   : > { %8708 = vst [vmem:[%s12293_s24 + $0xf8] sm:$0xff] %v8676_v41  }
 0x8d5   : > { %9298 = shalt.err (!%p9295_p8)
}
 0x8d6   : > { %s9299_s25 = scalar_lea.hbm %s12402_s1, 4096  ;;  %s9303_s28 = scalar_lea.hbm %s12469_s20, 8192 }
 0x8d7   : > { %p9300_p13 = scmp.ne.s32.totalorder %s12402_s1, %s9299_s25  ;;  %p9304_p6 = scmp.lt.s32.totalorder %s12402_s1, %s12469_s20 }
 0x8d8   : > { %p9305_p12 = scmp.lt.s32.totalorder %s9303_s28, %s9299_s25 }
 0x8d9   : > { %p9301_p11 = pnand %p9300_p13, %p12650_p1 }
 0x8da   : > { %p9306_p10 = por %p9305_p12, %p9304_p6 }
 0x8db   : > { %p9302_p0 = pneg %p9301_p11 }
 0x8dd   : > { %p9307_p9 = pnand %p9306_p10, %p9302_p0 }
 0x8df   : > { %9310 = shalt.err (!%p9307_p9)
}
 0x8e0   : > { %s9370_s23 = smov 64   ;;  %s9371_s26 = smov 4  }
 0x8e1   : > { %8757 = dma.vmem_to_hbm [thread:$0]  (%p12650_p1), %s12404_s27, 4096, %s12402_s1, %s12409_s2, %s9370_s23, %s9370_s23, %s9371_s26  }
 0x8e2 PF: > { %s12651_s21 = sld [smem:[#allocation17_spill]] }
 0x8e3   : > { %s12652_s24 = sld [smem:[#allocation15_spill]] }
 0x8e4   : > { %s12653_s3 = sld [smem:[#allocation20_spill]] }
 0x8e8   : > { %p8784_p3 = scmp.ge.s32.totalorder %s12651_s21, 2 }
 0x8e9   : > { %s7974_s5 = sand.u32 1, %s12652_s24  }
 0x8ea   : > { %p12654_p2 = scmp.ne.s32.totalorder %s12653_s3, 0  ;;  %s7975_s25 = scalar_lea.sflag [#allocation4], %s7974_s5 }
 0x8ec   : > { %p8773_p4 = pnand %p8784_p3, %p12654_p2 }
 0x8ee   : > { %p8774_p5 = pneg %p8773_p4 }
 0x8f0   : > { %9340 = dma.done.wait (%p8774_p5), %s7975_s25, 4096  }
 0x8f1   : > { %9342 = vsyncadd (%p8774_p5), %s7975_s25, 4294963200  ;;  %s12655_s24 = sld [smem:[#allocation18_spill]]  ;;  %s12658_s1 = smov %s9349_s22 }
 0x8f2   : > { %s12656_s28 = sld [smem:[#allocation16_spill]] }
 0x8f3   : > { %s12657_s23 = sld [smem:[#allocation19_spill]] }
 0x8f7   : > { %p33_p7 = scmp.ge.s32.totalorder %s12655_s24, 4  }
 0x8f8   : > { %s12659_s22 = smov %s12656_s28 }
 0x8f9   :  { %35 = sbr.rel (!%p33_p7) target bundleno = 13 (0xd), region = 152 }
 0x8fe   :  { %7980 = vsyncpa [#allocation3], 1 }
 0x8ff   :  { %7982 = vsyncpa [#allocation3 + $0x1], 1 }
 0x900   :  { %7983 = vsyncpa [#allocation6], 1 }
 0x901   :  { %7984 = vsyncpa [#allocation9], 1 }
 0x902   :  { %7985 = vsyncpa [#allocation4], 1 }
 0x903   :  { %7987 = vsyncpa [#allocation4 + $0x1], 1 }

</bundles_post_ra>
